<compile_context>
chip_gen: v7x
topology: tpu7x:2x2x1
jax: 0.10.0
libtpu: 0.0.40
codegen_flags: <defaults>
</compile_context>

<pallas_src>
import jax
import jax.numpy as jnp
import numpy as np
from jax.experimental import pallas as pl
from jax.experimental.pallas import tpu as pltpu


# Fused layer dims after (a) merging the two layer-0 projections and
# (b) padding the tiny output heads to 8 columns (no 128-wide zero streaming):
#   layer 0: [48, 3072]   = concat(policy_net_0 [48,1024], value_net_0 [48,2048])
#   layer 1: [1024, 512]  policy_net_2
#   layer 2: [512, 256]   policy_net_4
#   layer 3: [256, 8]     action_net (padded from 5 cols)
#   layer 4: [2048, 1024] value_net_2
#   layer 5: [1024, 512]  value_net_4
#   layer 6: [512, 8]     value_net (padded from 1 col)
_HEAD_W = 8
_N_LAYERS = 7
_P_WIDTH = 1024      # policy-branch width out of the merged layer 0

_FUSED_DIMS = (
    (48, 3072),
    (1024, 512),
    (512, 256),
    (256, _HEAD_W),
    (2048, 1024),
    (1024, 512),
    (512, _HEAD_W),
)

# All biases packed in ONE f32 row vector; each segment starts on a
# 128-lane-aligned offset (tiny head segments occupy a 128-wide slot).
_BIAS_OFFS = []
_off = 0
for _, _n in _FUSED_DIMS:
    _BIAS_OFFS.append(_off)
    _off += max(_n, 128)
_BIAS_TOTAL = _off            # = 5632

_LAYER_DIMS = {
    "policy_net_0": (48, 1024),
    "policy_net_2": (1024, 512),
    "policy_net_4": (512, 256),
    "action_net": (256, 5),
    "value_net_0": (48, 2048),
    "value_net_2": (2048, 1024),
    "value_net_4": (1024, 512),
    "value_net": (512, 1),
}


def _policy_fused_kernel(
    x_ref, bias_ref,
    w0_hbm, w1_hbm, w2_hbm, w3_hbm, w4_hbm, w5_hbm, w6_hbm,
    act_ref, val_ref,
    w0_v, w1_v, w2_v, w3_v, w4_v, w5_v, w6_v,
    sems,
):
    w_hbm = (w0_hbm, w1_hbm, w2_hbm, w3_hbm, w4_hbm, w5_hbm, w6_hbm)
    w_vmem = (w0_v, w1_v, w2_v, w3_v, w4_v, w5_v, w6_v)

    # Kick off ALL weight DMAs immediately: the HBM stream then runs
    # back-to-back and overlaps with the matmuls of earlier layers.
    copies = []
    for i in range(_N_LAYERS):
        cp = pltpu.make_async_copy(w_hbm[i], w_vmem[i], sems.at[i])
        cp.start()
        copies.append(cp)

    def dense(h, i, relu):
        copies[i].wait()
        n = _FUSED_DIMS[i][1]
        off = _BIAS_OFFS[i]
        b = bias_ref[:, off:off + n]                    # static, aligned view
        y = jnp.dot(h.astype(jnp.bfloat16), w_vmem[i][...],
                    preferred_element_type=jnp.float32)
        y = y + b
        if relu:
            y = jnp.maximum(y, 0.0)
        return y

    x = x_ref[...]                       # [B, 48] f32

    h0 = dense(x, 0, relu=True)          # [B, 3072]
    hp = h0[:, :_P_WIDTH]                # [B, 1024] policy branch
    hv = h0[:, _P_WIDTH:]                # [B, 2048] value branch

    # Policy head
    p = dense(hp, 1, relu=True)          # [B, 512]
    p = dense(p, 2, relu=True)           # [B, 256]
    act_ref[...] = dense(p, 3, relu=False).astype(act_ref.dtype)   # [B, 8]

    # Value head
    v = dense(hv, 4, relu=True)          # [B, 1024]
    v = dense(v, 5, relu=True)           # [B, 512]
    val_ref[...] = dense(v, 6, relu=False).astype(val_ref.dtype)   # [B, 8]


def policy_forward_fused(fused, x):
    """Full Policy forward in one pallas_call. Returns (action [B,5], value [B,1])."""
    B = x.shape[0]
    ws = fused["weights"]      # 7 bf16 [K, N] weight matrices (streamed from HBM)
    bias = fused["bias"]       # f32 [1, 5632] packed biases (one prologue DMA)

    # Pin weights explicitly to HBM so the manual-DMA streaming contract is
    # deterministic; fall back to pl.ANY on versions without the enum member.
    hbm_space = getattr(pltpu.MemorySpace, "HBM", pl.ANY)

    in_specs = (
        [pl.BlockSpec(x.shape, lambda: (0, 0)),
         pl.BlockSpec(bias.shape, lambda: (0, 0))]
        + [pl.BlockSpec(memory_space=hbm_space)] * _N_LAYERS
    )
    out_specs = (
        pl.BlockSpec((B, _HEAD_W), lambda: (0, 0)),
        pl.BlockSpec((B, _HEAD_W), lambda: (0, 0)),
    )
    out_shape = (
        jax.ShapeDtypeStruct((B, _HEAD_W), jnp.float32),
        jax.ShapeDtypeStruct((B, _HEAD_W), jnp.float32),
    )
    scratch_shapes = (
        [pltpu.VMEM(w.shape, jnp.bfloat16) for w in ws]     # ~6.8 MiB total
        + [pltpu.SemaphoreType.DMA((_N_LAYERS,))]
    )

    weight_elems = sum(k * n for k, n in _FUSED_DIMS)
    cost = pl.CostEstimate(
        flops=2 * B * weight_elems,
        transcendentals=0,
        bytes_accessed=(weight_elems * 2                 # bf16 weights
                        + bias.size * 4                  # biases
                        + x.size * 4                     # activations in
                        + 2 * B * _HEAD_W * 4),          # outputs
    )

    act_pad, val_pad = pl.pallas_call(
        _policy_fused_kernel,
        out_shape=out_shape,
        in_specs=in_specs,
        out_specs=out_specs,
        scratch_shapes=scratch_shapes,
        compiler_params=pltpu.CompilerParams(vmem_limit_bytes=16 << 20),
        cost_estimate=cost,
    )(x, bias, *ws)

    return act_pad[:, :5], val_pad[:, :1]


policy_forward = jax.jit(policy_forward_fused)


# ---------------------------------------------------------------------------
# Parameter construction (deterministic, nn.Linear-like shapes; weight stored
# pre-transposed as [in_features, out_features]).
# ---------------------------------------------------------------------------
def init_linear(key, in_f, out_f):
    kw, kb = jax.random.split(key)
    bound = 1.0 / np.sqrt(in_f)
    w = jax.random.uniform(kw, (in_f, out_f), jnp.float32, -bound, bound)
    b = jax.random.uniform(kb, (out_f,), jnp.float32, -bound, bound)
    return w, b


def init_policy_params(key):
    keys = jax.random.split(key, len(_LAYER_DIMS))
    return {name: init_linear(k, fi, fo)
            for k, (name, (fi, fo)) in zip(keys, _LAYER_DIMS.items())}


def pack_fused_params(params):
    """Merge layer-0 of both heads, pad the tiny heads to 8 lanes, pack all
    biases into one aligned f32 row, and cast weights to bf16 (the kernel is
    HBM-bandwidth bound on weight bytes)."""
    def pad_cols(w, b, n_to):
        k, n = w.shape
        wp = jnp.zeros((k, n_to), w.dtype).at[:, :n].set(w)
        bp = jnp.zeros((n_to,), b.dtype).at[:n].set(b)
        return wp, bp

    w_p0, b_p0 = params["policy_net_0"]
    w_v0, b_v0 = params["value_net_0"]
    w0 = jnp.concatenate([w_p0, w_v0], axis=1)            # [48, 3072]
    b0 = jnp.concatenate([b_p0, b_v0], axis=0)            # [3072]

    w3, b3 = pad_cols(*params["action_net"], _HEAD_W)     # [256, 8]
    w6, b6 = pad_cols(*params["value_net"], _HEAD_W)      # [512, 8]

    weights = (w0, params["policy_net_2"][0], params["policy_net_4"][0], w3,
               params["value_net_2"][0], params["value_net_4"][0], w6)
    biases = (b0, params["policy_net_2"][1], params["policy_net_4"][1], b3,
              params["value_net_2"][1], params["value_net_4"][1], b6)

    # Single packed bias row; each layer's segment starts 128-lane aligned.
    bias_vec = jnp.zeros((1, _BIAS_TOTAL), jnp.float32)
    for b, off in zip(biases, _BIAS_OFFS):
        bias_vec = bias_vec.at[0, off:off + b.shape[0]].set(b.astype(jnp.float32))

    weights = tuple(w.astype(jnp.bfloat16) for w in weights)
    return {"weights": weights, "bias": bias_vec}


def reference_forward(params, x):
    """Pure-JAX reference with the same bf16 weight/activation rounding."""
    def lin(h, name, relu):
        w, b = params[name]
        w = w.astype(jnp.bfloat16).astype(jnp.float32)
        h = h.astype(jnp.bfloat16).astype(jnp.float32)
        y = h @ w + b
        return jnp.maximum(y, 0.0) if relu else y

    h = lin(x, "policy_net_0", True)
    h = lin(h, "policy_net_2", True)
    h = lin(h, "policy_net_4", True)
    action = lin(h, "action_net", False)
    v = lin(x, "value_net_0", True)
    v = lin(v, "value_net_2", True)
    v = lin(v, "value_net_4", True)
    value = lin(v, "value_net", False)
    return action, value


if __name__ == "__main__":
    key = jax.random.PRNGKey(0)
    k_params, k_x = jax.random.split(key)
    params = init_policy_params(k_params)
    fused = pack_fused_params(params)

    batch = 2
    x = jax.random.normal(k_x, (batch, 48), dtype=jnp.float32)

    action, value = policy_forward(fused, x)
    jax.block_until_ready((action, value))

    assert action.shape == (batch, 5)
    assert value.shape == (batch, 1)

    ref_action, ref_value = reference_forward(params, x)
    np.testing.assert_allclose(np.asarray(action), np.asarray(ref_action),
                               rtol=2e-2, atol=2e-2)
    np.testing.assert_allclose(np.asarray(value), np.asarray(ref_value),
                               rtol=2e-2, atol=2e-2)

    print("KERNEL_OK")
</pallas_src>

<mosaic_0001>
module attributes {stable_mosaic.version = 11 : i64} {
  func.func @_policy_fused_kernel(%arg0: memref<2x48xf32, #tpu.memory_space<vmem>>, %arg1: memref<1x5632xf32, #tpu.memory_space<vmem>>, %arg2: memref<48x3072xbf16, #tpu.memory_space<hbm>>, %arg3: memref<1024x512xbf16, #tpu.memory_space<hbm>>, %arg4: memref<512x256xbf16, #tpu.memory_space<hbm>>, %arg5: memref<256x8xbf16, #tpu.memory_space<hbm>>, %arg6: memref<2048x1024xbf16, #tpu.memory_space<hbm>>, %arg7: memref<1024x512xbf16, #tpu.memory_space<hbm>>, %arg8: memref<512x8xbf16, #tpu.memory_space<hbm>>, %arg9: memref<2x8xf32, #tpu.memory_space<vmem>>, %arg10: memref<2x8xf32, #tpu.memory_space<vmem>>, %arg11: memref<48x3072xbf16, #tpu.memory_space<vmem>>, %arg12: memref<1024x512xbf16, #tpu.memory_space<vmem>>, %arg13: memref<512x256xbf16, #tpu.memory_space<vmem>>, %arg14: memref<256x8xbf16, #tpu.memory_space<vmem>>, %arg15: memref<2048x1024xbf16, #tpu.memory_space<vmem>>, %arg16: memref<1024x512xbf16, #tpu.memory_space<vmem>>, %arg17: memref<512x8xbf16, #tpu.memory_space<vmem>>, %arg18: memref<7x!tpu.dma_semaphore, #tpu.memory_space<semaphore_mem>>) attributes {dimension_semantics = [], scalar_prefetch = 0 : i64, scratch_operands = 8 : i64, tpu.core_type = #tpu.core_type<tc>} {
    %c0_i32 = arith.constant 0 : i32
    %0 = tpu.memref_slice %arg18[%c0_i32] : memref<7x!tpu.dma_semaphore, #tpu.memory_space<semaphore_mem>> -> memref<1x!tpu.dma_semaphore, #tpu.memory_space<semaphore_mem>>
    %1 = tpu.memref_squeeze %0 : memref<1x!tpu.dma_semaphore, #tpu.memory_space<semaphore_mem>> -> memref<!tpu.dma_semaphore, #tpu.memory_space<semaphore_mem>>
    tpu.enqueue_dma source(%arg2 : memref<48x3072xbf16, #tpu.memory_space<hbm>>) target(%arg11 : memref<48x3072xbf16, #tpu.memory_space<vmem>>) target_semaphore(%1 : memref<!tpu.dma_semaphore, #tpu.memory_space<semaphore_mem>>)
    %c1_i32 = arith.constant 1 : i32
    %2 = tpu.memref_slice %arg18[%c1_i32] : memref<7x!tpu.dma_semaphore, #tpu.memory_space<semaphore_mem>> -> memref<1x!tpu.dma_semaphore, #tpu.memory_space<semaphore_mem>>
    %3 = tpu.memref_squeeze %2 : memref<1x!tpu.dma_semaphore, #tpu.memory_space<semaphore_mem>> -> memref<!tpu.dma_semaphore, #tpu.memory_space<semaphore_mem>>
    tpu.enqueue_dma source(%arg3 : memref<1024x512xbf16, #tpu.memory_space<hbm>>) target(%arg12 : memref<1024x512xbf16, #tpu.memory_space<vmem>>) target_semaphore(%3 : memref<!tpu.dma_semaphore, #tpu.memory_space<semaphore_mem>>)
    %c2_i32 = arith.constant 2 : i32
    %4 = tpu.memref_slice %arg18[%c2_i32] : memref<7x!tpu.dma_semaphore, #tpu.memory_space<semaphore_mem>> -> memref<1x!tpu.dma_semaphore, #tpu.memory_space<semaphore_mem>>
    %5 = tpu.memref_squeeze %4 : memref<1x!tpu.dma_semaphore, #tpu.memory_space<semaphore_mem>> -> memref<!tpu.dma_semaphore, #tpu.memory_space<semaphore_mem>>
    tpu.enqueue_dma source(%arg4 : memref<512x256xbf16, #tpu.memory_space<hbm>>) target(%arg13 : memref<512x256xbf16, #tpu.memory_space<vmem>>) target_semaphore(%5 : memref<!tpu.dma_semaphore, #tpu.memory_space<semaphore_mem>>)
    %c3_i32 = arith.constant 3 : i32
    %6 = tpu.memref_slice %arg18[%c3_i32] : memref<7x!tpu.dma_semaphore, #tpu.memory_space<semaphore_mem>> -> memref<1x!tpu.dma_semaphore, #tpu.memory_space<semaphore_mem>>
    %7 = tpu.memref_squeeze %6 : memref<1x!tpu.dma_semaphore, #tpu.memory_space<semaphore_mem>> -> memref<!tpu.dma_semaphore, #tpu.memory_space<semaphore_mem>>
    tpu.enqueue_dma source(%arg5 : memref<256x8xbf16, #tpu.memory_space<hbm>>) target(%arg14 : memref<256x8xbf16, #tpu.memory_space<vmem>>) target_semaphore(%7 : memref<!tpu.dma_semaphore, #tpu.memory_space<semaphore_mem>>)
    %c4_i32 = arith.constant 4 : i32
    %8 = tpu.memref_slice %arg18[%c4_i32] : memref<7x!tpu.dma_semaphore, #tpu.memory_space<semaphore_mem>> -> memref<1x!tpu.dma_semaphore, #tpu.memory_space<semaphore_mem>>
    %9 = tpu.memref_squeeze %8 : memref<1x!tpu.dma_semaphore, #tpu.memory_space<semaphore_mem>> -> memref<!tpu.dma_semaphore, #tpu.memory_space<semaphore_mem>>
    tpu.enqueue_dma source(%arg6 : memref<2048x1024xbf16, #tpu.memory_space<hbm>>) target(%arg15 : memref<2048x1024xbf16, #tpu.memory_space<vmem>>) target_semaphore(%9 : memref<!tpu.dma_semaphore, #tpu.memory_space<semaphore_mem>>)
    %c5_i32 = arith.constant 5 : i32
    %10 = tpu.memref_slice %arg18[%c5_i32] : memref<7x!tpu.dma_semaphore, #tpu.memory_space<semaphore_mem>> -> memref<1x!tpu.dma_semaphore, #tpu.memory_space<semaphore_mem>>
    %11 = tpu.memref_squeeze %10 : memref<1x!tpu.dma_semaphore, #tpu.memory_space<semaphore_mem>> -> memref<!tpu.dma_semaphore, #tpu.memory_space<semaphore_mem>>
    tpu.enqueue_dma source(%arg7 : memref<1024x512xbf16, #tpu.memory_space<hbm>>) target(%arg16 : memref<1024x512xbf16, #tpu.memory_space<vmem>>) target_semaphore(%11 : memref<!tpu.dma_semaphore, #tpu.memory_space<semaphore_mem>>)
    %c6_i32 = arith.constant 6 : i32
    %12 = tpu.memref_slice %arg18[%c6_i32] : memref<7x!tpu.dma_semaphore, #tpu.memory_space<semaphore_mem>> -> memref<1x!tpu.dma_semaphore, #tpu.memory_space<semaphore_mem>>
    %13 = tpu.memref_squeeze %12 : memref<1x!tpu.dma_semaphore, #tpu.memory_space<semaphore_mem>> -> memref<!tpu.dma_semaphore, #tpu.memory_space<semaphore_mem>>
    tpu.enqueue_dma source(%arg8 : memref<512x8xbf16, #tpu.memory_space<hbm>>) target(%arg17 : memref<512x8xbf16, #tpu.memory_space<vmem>>) target_semaphore(%13 : memref<!tpu.dma_semaphore, #tpu.memory_space<semaphore_mem>>)
    %c0 = arith.constant 0 : index
    %c0_0 = arith.constant 0 : index
    %14 = vector.load %arg0[%c0, %c0_0] : memref<2x48xf32, #tpu.memory_space<vmem>>, vector<2x48xf32>
    %c0_i32_1 = arith.constant 0 : i32
    %15 = tpu.memref_slice %arg18[%c0_i32_1] : memref<7x!tpu.dma_semaphore, #tpu.memory_space<semaphore_mem>> -> memref<1x!tpu.dma_semaphore, #tpu.memory_space<semaphore_mem>>
    %16 = tpu.memref_squeeze %15 : memref<1x!tpu.dma_semaphore, #tpu.memory_space<semaphore_mem>> -> memref<!tpu.dma_semaphore, #tpu.memory_space<semaphore_mem>>
    tpu.wait_dma2 semaphore(%16 : memref<!tpu.dma_semaphore, #tpu.memory_space<semaphore_mem>>) src(%arg2 : memref<48x3072xbf16, #tpu.memory_space<hbm>>) dst(%arg11 : memref<48x3072xbf16, #tpu.memory_space<vmem>>)
    %c0_2 = arith.constant 0 : index
    %c0_3 = arith.constant 0 : index
    %17 = vector.load %arg1[%c0_2, %c0_3] : memref<1x5632xf32, #tpu.memory_space<vmem>>, vector<1x3072xf32>
    %18 = arith.truncf %14 : vector<2x48xf32> to vector<2x48xbf16>
    %c0_4 = arith.constant 0 : index
    %c0_5 = arith.constant 0 : index
    %19 = vector.load %arg11[%c0_4, %c0_5] : memref<48x3072xbf16, #tpu.memory_space<vmem>>, vector<48x3072xbf16>
    %cst = arith.constant dense<0.000000e+00> : vector<2x3072xf32>
    %20 = tpu.matmul %18, %19, %cst {dimension_numbers = #tpu.dot_dimension_numbers<[1], [0], [0], [1], [0, 0, 1, 1], [], []>} : vector<2x48xbf16>, vector<48x3072xbf16>, vector<2x3072xf32> -> vector<2x3072xf32>
    %21 = vector.broadcast %17 : vector<1x3072xf32> to vector<2x3072xf32>
    %22 = arith.addf %20, %21 : vector<2x3072xf32>
    %cst_6 = arith.constant 0.000000e+00 : f32
    %23 = vector.broadcast %cst_6 : f32 to vector<2x3072xf32>
    %24 = arith.maximumf %22, %23 : vector<2x3072xf32>
    %25 = vector.extract_strided_slice %24 {offsets = [0, 0], sizes = [2, 1024], strides = [1, 1]} : vector<2x3072xf32> to vector<2x1024xf32>
    %26 = vector.extract_strided_slice %24 {offsets = [0, 1024], sizes = [2, 2048], strides = [1, 1]} : vector<2x3072xf32> to vector<2x2048xf32>
    %c1_i32_7 = arith.constant 1 : i32
    %27 = tpu.memref_slice %arg18[%c1_i32_7] : memref<7x!tpu.dma_semaphore, #tpu.memory_space<semaphore_mem>> -> memref<1x!tpu.dma_semaphore, #tpu.memory_space<semaphore_mem>>
    %28 = tpu.memref_squeeze %27 : memref<1x!tpu.dma_semaphore, #tpu.memory_space<semaphore_mem>> -> memref<!tpu.dma_semaphore, #tpu.memory_space<semaphore_mem>>
    tpu.wait_dma2 semaphore(%28 : memref<!tpu.dma_semaphore, #tpu.memory_space<semaphore_mem>>) src(%arg3 : memref<1024x512xbf16, #tpu.memory_space<hbm>>) dst(%arg12 : memref<1024x512xbf16, #tpu.memory_space<vmem>>)
    %c0_8 = arith.constant 0 : index
    %c3072 = arith.constant 3072 : index
    %29 = vector.load %arg1[%c0_8, %c3072] : memref<1x5632xf32, #tpu.memory_space<vmem>>, vector<1x512xf32>
    %30 = arith.truncf %25 : vector<2x1024xf32> to vector<2x1024xbf16>
    %c0_9 = arith.constant 0 : index
    %c0_10 = arith.constant 0 : index
    %31 = vector.load %arg12[%c0_9, %c0_10] : memref<1024x512xbf16, #tpu.memory_space<vmem>>, vector<1024x512xbf16>
    %cst_11 = arith.constant dense<0.000000e+00> : vector<2x512xf32>
    %32 = tpu.matmul %30, %31, %cst_11 {dimension_numbers = #tpu.dot_dimension_numbers<[1], [0], [0], [1], [0, 0, 1, 1], [], []>} : vector<2x1024xbf16>, vector<1024x512xbf16>, vector<2x512xf32> -> vector<2x512xf32>
    %33 = vector.broadcast %29 : vector<1x512xf32> to vector<2x512xf32>
    %34 = arith.addf %32, %33 : vector<2x512xf32>
    %cst_12 = arith.constant 0.000000e+00 : f32
    %35 = vector.broadcast %cst_12 : f32 to vector<2x512xf32>
    %36 = arith.maximumf %34, %35 : vector<2x512xf32>
    %c2_i32_13 = arith.constant 2 : i32
    %37 = tpu.memref_slice %arg18[%c2_i32_13] : memref<7x!tpu.dma_semaphore, #tpu.memory_space<semaphore_mem>> -> memref<1x!tpu.dma_semaphore, #tpu.memory_space<semaphore_mem>>
    %38 = tpu.memref_squeeze %37 : memref<1x!tpu.dma_semaphore, #tpu.memory_space<semaphore_mem>> -> memref<!tpu.dma_semaphore, #tpu.memory_space<semaphore_mem>>
    tpu.wait_dma2 semaphore(%38 : memref<!tpu.dma_semaphore, #tpu.memory_space<semaphore_mem>>) src(%arg4 : memref<512x256xbf16, #tpu.memory_space<hbm>>) dst(%arg13 : memref<512x256xbf16, #tpu.memory_space<vmem>>)
    %c0_14 = arith.constant 0 : index
    %c3584 = arith.constant 3584 : index
    %39 = vector.load %arg1[%c0_14, %c3584] : memref<1x5632xf32, #tpu.memory_space<vmem>>, vector<1x256xf32>
    %40 = arith.truncf %36 : vector<2x512xf32> to vector<2x512xbf16>
    %c0_15 = arith.constant 0 : index
    %c0_16 = arith.constant 0 : index
    %41 = vector.load %arg13[%c0_15, %c0_16] : memref<512x256xbf16, #tpu.memory_space<vmem>>, vector<512x256xbf16>
    %cst_17 = arith.constant dense<0.000000e+00> : vector<2x256xf32>
    %42 = tpu.matmul %40, %41, %cst_17 {dimension_numbers = #tpu.dot_dimension_numbers<[1], [0], [0], [1], [0, 0, 1, 1], [], []>} : vector<2x512xbf16>, vector<512x256xbf16>, vector<2x256xf32> -> vector<2x256xf32>
    %43 = vector.broadcast %39 : vector<1x256xf32> to vector<2x256xf32>
    %44 = arith.addf %42, %43 : vector<2x256xf32>
    %cst_18 = arith.constant 0.000000e+00 : f32
    %45 = vector.broadcast %cst_18 : f32 to vector<2x256xf32>
    %46 = arith.maximumf %44, %45 : vector<2x256xf32>
    %c3_i32_19 = arith.constant 3 : i32
    %47 = tpu.memref_slice %arg18[%c3_i32_19] : memref<7x!tpu.dma_semaphore, #tpu.memory_space<semaphore_mem>> -> memref<1x!tpu.dma_semaphore, #tpu.memory_space<semaphore_mem>>
    %48 = tpu.memref_squeeze %47 : memref<1x!tpu.dma_semaphore, #tpu.memory_space<semaphore_mem>> -> memref<!tpu.dma_semaphore, #tpu.memory_space<semaphore_mem>>
    tpu.wait_dma2 semaphore(%48 : memref<!tpu.dma_semaphore, #tpu.memory_space<semaphore_mem>>) src(%arg5 : memref<256x8xbf16, #tpu.memory_space<hbm>>) dst(%arg14 : memref<256x8xbf16, #tpu.memory_space<vmem>>)
    %c0_20 = arith.constant 0 : index
    %c3840 = arith.constant 3840 : index
    %49 = vector.load %arg1[%c0_20, %c3840] : memref<1x5632xf32, #tpu.memory_space<vmem>>, vector<1x8xf32>
    %50 = arith.truncf %46 : vector<2x256xf32> to vector<2x256xbf16>
    %c0_21 = arith.constant 0 : index
    %c0_22 = arith.constant 0 : index
    %51 = vector.load %arg14[%c0_21, %c0_22] : memref<256x8xbf16, #tpu.memory_space<vmem>>, vector<256x8xbf16>
    %cst_23 = arith.constant dense<0.000000e+00> : vector<2x8xf32>
    %52 = tpu.matmul %50, %51, %cst_23 {dimension_numbers = #tpu.dot_dimension_numbers<[1], [0], [0], [1], [0, 0, 1, 1], [], []>} : vector<2x256xbf16>, vector<256x8xbf16>, vector<2x8xf32> -> vector<2x8xf32>
    %53 = vector.broadcast %49 : vector<1x8xf32> to vector<2x8xf32>
    %54 = arith.addf %52, %53 : vector<2x8xf32>
    %c0_24 = arith.constant 0 : index
    %c0_25 = arith.constant 0 : index
    %55 = vector.load %arg9[%c0_24, %c0_25] : memref<2x8xf32, #tpu.memory_space<vmem>>, vector<2x8xf32>
    tpu.vector_store %arg9[%c0_24, %c0_25], %54 {strides = array<i32>} : memref<2x8xf32, #tpu.memory_space<vmem>>, vector<2x8xf32>,
    %c4_i32_26 = arith.constant 4 : i32
    %56 = tpu.memref_slice %arg18[%c4_i32_26] : memref<7x!tpu.dma_semaphore, #tpu.memory_space<semaphore_mem>> -> memref<1x!tpu.dma_semaphore, #tpu.memory_space<semaphore_mem>>
    %57 = tpu.memref_squeeze %56 : memref<1x!tpu.dma_semaphore, #tpu.memory_space<semaphore_mem>> -> memref<!tpu.dma_semaphore, #tpu.memory_space<semaphore_mem>>
    tpu.wait_dma2 semaphore(%57 : memref<!tpu.dma_semaphore, #tpu.memory_space<semaphore_mem>>) src(%arg6 : memref<2048x1024xbf16, #tpu.memory_space<hbm>>) dst(%arg15 : memref<2048x1024xbf16, #tpu.memory_space<vmem>>)
    %c0_27 = arith.constant 0 : index
    %c3968 = arith.constant 3968 : index
    %58 = vector.load %arg1[%c0_27, %c3968] : memref<1x5632xf32, #tpu.memory_space<vmem>>, vector<1x1024xf32>
    %59 = arith.truncf %26 : vector<2x2048xf32> to vector<2x2048xbf16>
    %c0_28 = arith.constant 0 : index
    %c0_29 = arith.constant 0 : index
    %60 = vector.load %arg15[%c0_28, %c0_29] : memref<2048x1024xbf16, #tpu.memory_space<vmem>>, vector<2048x1024xbf16>
    %cst_30 = arith.constant dense<0.000000e+00> : vector<2x1024xf32>
    %61 = tpu.matmul %59, %60, %cst_30 {dimension_numbers = #tpu.dot_dimension_numbers<[1], [0], [0], [1], [0, 0, 1, 1], [], []>} : vector<2x2048xbf16>, vector<2048x1024xbf16>, vector<2x1024xf32> -> vector<2x1024xf32>
    %62 = vector.broadcast %58 : vector<1x1024xf32> to vector<2x1024xf32>
    %63 = arith.addf %61, %62 : vector<2x1024xf32>
    %cst_31 = arith.constant 0.000000e+00 : f32
    %64 = vector.broadcast %cst_31 : f32 to vector<2x1024xf32>
    %65 = arith.maximumf %63, %64 : vector<2x1024xf32>
    %c5_i32_32 = arith.constant 5 : i32
    %66 = tpu.memref_slice %arg18[%c5_i32_32] : memref<7x!tpu.dma_semaphore, #tpu.memory_space<semaphore_mem>> -> memref<1x!tpu.dma_semaphore, #tpu.memory_space<semaphore_mem>>
    %67 = tpu.memref_squeeze %66 : memref<1x!tpu.dma_semaphore, #tpu.memory_space<semaphore_mem>> -> memref<!tpu.dma_semaphore, #tpu.memory_space<semaphore_mem>>
    tpu.wait_dma2 semaphore(%67 : memref<!tpu.dma_semaphore, #tpu.memory_space<semaphore_mem>>) src(%arg7 : memref<1024x512xbf16, #tpu.memory_space<hbm>>) dst(%arg16 : memref<1024x512xbf16, #tpu.memory_space<vmem>>)
    %c0_33 = arith.constant 0 : index
    %c4992 = arith.constant 4992 : index
    %68 = vector.load %arg1[%c0_33, %c4992] : memref<1x5632xf32, #tpu.memory_space<vmem>>, vector<1x512xf32>
    %69 = arith.truncf %65 : vector<2x1024xf32> to vector<2x1024xbf16>
    %c0_34 = arith.constant 0 : index
    %c0_35 = arith.constant 0 : index
    %70 = vector.load %arg16[%c0_34, %c0_35] : memref<1024x512xbf16, #tpu.memory_space<vmem>>, vector<1024x512xbf16>
    %cst_36 = arith.constant dense<0.000000e+00> : vector<2x512xf32>
    %71 = tpu.matmul %69, %70, %cst_36 {dimension_numbers = #tpu.dot_dimension_numbers<[1], [0], [0], [1], [0, 0, 1, 1], [], []>} : vector<2x1024xbf16>, vector<1024x512xbf16>, vector<2x512xf32> -> vector<2x512xf32>
    %72 = vector.broadcast %68 : vector<1x512xf32> to vector<2x512xf32>
    %73 = arith.addf %71, %72 : vector<2x512xf32>
    %cst_37 = arith.constant 0.000000e+00 : f32
    %74 = vector.broadcast %cst_37 : f32 to vector<2x512xf32>
    %75 = arith.maximumf %73, %74 : vector<2x512xf32>
    %c6_i32_38 = arith.constant 6 : i32
    %76 = tpu.memref_slice %arg18[%c6_i32_38] : memref<7x!tpu.dma_semaphore, #tpu.memory_space<semaphore_mem>> -> memref<1x!tpu.dma_semaphore, #tpu.memory_space<semaphore_mem>>
    %77 = tpu.memref_squeeze %76 : memref<1x!tpu.dma_semaphore, #tpu.memory_space<semaphore_mem>> -> memref<!tpu.dma_semaphore, #tpu.memory_space<semaphore_mem>>
    tpu.wait_dma2 semaphore(%77 : memref<!tpu.dma_semaphore, #tpu.memory_space<semaphore_mem>>) src(%arg8 : memref<512x8xbf16, #tpu.memory_space<hbm>>) dst(%arg17 : memref<512x8xbf16, #tpu.memory_space<vmem>>)
    %c0_39 = arith.constant 0 : index
    %c5504 = arith.constant 5504 : index
    %78 = vector.load %arg1[%c0_39, %c5504] : memref<1x5632xf32, #tpu.memory_space<vmem>>, vector<1x8xf32>
    %79 = arith.truncf %75 : vector<2x512xf32> to vector<2x512xbf16>
    %c0_40 = arith.constant 0 : index
    %c0_41 = arith.constant 0 : index
    %80 = vector.load %arg17[%c0_40, %c0_41] : memref<512x8xbf16, #tpu.memory_space<vmem>>, vector<512x8xbf16>
    %cst_42 = arith.constant dense<0.000000e+00> : vector<2x8xf32>
    %81 = tpu.matmul %79, %80, %cst_42 {dimension_numbers = #tpu.dot_dimension_numbers<[1], [0], [0], [1], [0, 0, 1, 1], [], []>} : vector<2x512xbf16>, vector<512x8xbf16>, vector<2x8xf32> -> vector<2x8xf32>
    %82 = vector.broadcast %78 : vector<1x8xf32> to vector<2x8xf32>
    %83 = arith.addf %81, %82 : vector<2x8xf32>
    %c0_43 = arith.constant 0 : index
    %c0_44 = arith.constant 0 : index
    %84 = vector.load %arg10[%c0_43, %c0_44] : memref<2x8xf32, #tpu.memory_space<vmem>>, vector<2x8xf32>
    tpu.vector_store %arg10[%c0_43, %c0_44], %83 {strides = array<i32>} : memref<2x8xf32, #tpu.memory_space<vmem>>, vector<2x8xf32>,
    return
  }
}

</mosaic_0001>

<bundles_post_ra>
// kernel: policy_forward_fused.1
= control target key start
LH: loop header
LB: loop body
LE: loop exit
PB: predicated region body
PF: predicated region fallthrough
CT: control target
= control target key end

     0   :  { %16 = vsyncpa [#allocation11], 0  ;;  %s6503_s0 = inlined_call_operand.hbm [shape: f32[2,48], index: 0, kind: input, shape index: {}]   ;;  %s6504_s1 = inlined_call_operand.hbm [shape: f32[1,5632], index: 1, kind: input, shape index: {}]   ;;  %s6505_s2 = inlined_call_operand.hbm [shape: bf16[48,3072], index: 2, kind: input, shape index: {}]   ;;  %s6506_s3 = inlined_call_operand.hbm [shape: bf16[1024,512], index: 3, kind: input, shape index: {}]   ;;  %s6507_s4 = inlined_call_operand.hbm [shape: bf16[512,256], index: 4, kind: input, shape index: {}]   ;;  %s6508_s5 = inlined_call_operand.vmem [shape: bf16[256,8], index: 5, kind: input, shape index: {}]   ;;  %s6509_s6 = inlined_call_operand.hbm [shape: bf16[2048,1024], index: 6, kind: input, shape index: {}]   ;;  %s6510_s7 = inlined_call_operand.hbm [shape: bf16[1024,512], index: 7, kind: input, shape index: {}]   ;;  %s6511_s8 = inlined_call_operand.vmem [shape: bf16[512,8], index: 8, kind: input, shape index: {}]   ;;  %s6512_s9 = inlined_call_operand.hbm [shape: f32[2,8], index: 9, kind: output, shape index: {0}]   ;;  %s6513_s10 = inlined_call_operand.vmem [shape: f32[2,8], index: 10, kind: output, shape index: {1}]  }
   0x1   :  { %17 = vsyncpa [#allocation14], 0 }
   0x2   :  { %18 = vsyncpa [#allocation12], 0  ;;  %s5617_s13 = smov [#allocation10]   ;;  %s5618_s15 = smov [#allocation13]  }
   0x3   :  { %s25_s14 = sshll.u32 %s5617_s13, 4  ;;  %s35_s16 = sshll.u32 %s5618_s15, 4  ;;  %s26_s14 = int_to_ptr.vmem [resolvable:$true] %s25_s14  ;;  %s36_s16 = int_to_ptr.vmem [resolvable:$true] %s35_s16 }
   0x4   :  { %s5531_s19 = scalar_lea.hbm %s6503_s0, 32 }
   0x5   :  { %p5532_p0 = scmp.ne.s32.totalorder %s6503_s0, %s5531_s19  ;;  %p5535_p1 = scmp.lt.u32.totalorder %s5531_s19, %s6503_s0 }
   0x7   :  { %p5537_p2 = pnand %p5535_p1, %p5532_p0 }
   0x9   :  { %5540 = shalt.err (!%p5537_p2)
}
   0xa   :  { %s5541_s24 = scalar_lea.vmem %s26_s14, 32  ;;  %p5546_p4 = scmp.lt.s32.totalorder %s26_s14, %s26_s14 }
   0xb   :  { %p5542_p3 = scmp.ne.s32.totalorder %s26_s14, %s5541_s24  ;;  %p5547_p5 = scmp.lt.s32.totalorder %s5541_s24, %s5541_s24 }
   0xd   :  { %p5548_p6 = por %p5547_p5, %p5546_p4 }
   0xf   :  { %p5549_p7 = pnand %p5548_p6, %p5542_p3 }
  0x11   :  { %5552 = shalt.err (!%p5549_p7)
}
  0x12   :  { %28 = dma.hbm_to_vmem [thread:$0]  %s6503_s0, 32, %s26_s14, [#allocation11]  }
  0x13   :  { %s5553_s29 = scalar_lea.hbm %s6504_s1, 704 }
  0x14   :  { %p5554_p8 = scmp.ne.s32.totalorder %s6504_s1, %s5553_s29  ;;  %p5557_p9 = scmp.lt.u32.totalorder %s5553_s29, %s6504_s1 }
  0x16   :  { %p5559_p10 = pnand %p5557_p9, %p5554_p8 }
  0x18   :  { %5562 = shalt.err (!%p5559_p10)
}
  0x19   :  { %s5563_s15 = scalar_lea.vmem %s36_s16, 704  ;;  %p5568_p12 = scmp.lt.s32.totalorder %s36_s16, %s36_s16 }
  0x1a   :  { %p5564_p11 = scmp.ne.s32.totalorder %s36_s16, %s5563_s15  ;;  %p5569_p13 = scmp.lt.s32.totalorder %s5563_s15, %s5563_s15 }
  0x1c   :  { %p5570_p0 = por %p5569_p13, %p5568_p12 }
  0x1e   :  { %p5571_p1 = pnand %p5570_p0, %p5564_p11 }
  0x20   :  { %5574 = shalt.err (!%p5571_p1)
}
  0x21   :  { %38 = dma.hbm_to_vmem [thread:$0]  %s6504_s1, 704, %s36_s16, [#allocation14]  }
  0x22   :  { %5597 = dma.done.wait [#allocation11], 32  }
  0x23   :  { %5598 = vsyncadd [#allocation11], 4294967264 }
  0x24   :  { %5599 = dma.done.wait [#allocation14], 704  }
  0x25   :  { %5600 = vsyncadd [#allocation14], 4294966592  ;;  %s50_s17 = sld [smem:[#allocation0]]   ;;  %s5619_s18 = smov 3072  }
  0x26   :  { %62 = sst [smem:[#allocation17]] %s5619_s18  ;;  %s5620_s19 = smov 24  }
  0x27   :  { %64 = sst [smem:[#allocation17 + $0x1]] %s5619_s18  ;;  %s5621_s20 = smov 64  }
  0x28   :  { %66 = sst [smem:[#allocation17 + $0x2]] %s5620_s19  ;;  %s5622_s21 = smov 1536  }
  0x29   :  { %68 = sst [smem:[#allocation17 + $0x3]] %s5621_s20  ;;  %s5623_s22 = smov [#allocation2]  }
  0x2a   :  { %74 = sst [smem:[#allocation17 + $0x6]] %s5622_s21  ;;  %s58_s23 = sshll.u32 %s5623_s22, 4  ;;  %s59_s23 = int_to_ptr.vmem [resolvable:$true] %s58_s23 }
  0x2b   :  { %76 = sst [smem:[#allocation17 + $0x7]] %s5621_s20  ;;  %s5221_s1 = sshll.u32 %s50_s17, 26 }
  0x2c   :  { %s5728_s16 = sadd.s32 134217728, %s5221_s1  ;;  %s5624_s24 = smov 128  }
  0x2d   :  { %70 = sst [smem:[#allocation17 + $0x4]] %s5624_s24  ;;  %s5625_s25 = smov 2  }
  0x2e   :  { %72 = sst [smem:[#allocation17 + $0x5]] %s5625_s25  ;;  %s5626_s26 = smov 4  }
  0x2f   :  { %78 = sst [smem:[#allocation17 + $0x8]] %s5626_s26  ;;  %s5627_s27 = smov [#allocation9]  }
  0x30   :  { %s5628_s28 = smov [#allocation16]   ;;  %s5629_s11 = smov 512  }
  0x31   :  { %80 = dma.general %s6505_s2, 9216, %s59_s23, %s5627_s27, %s5628_s28, [#allocation17], %s5728_s16, 0  }
  0x32   :  { %101 = sst [smem:[#allocation19 + $0x2]] %s5626_s26  ;;  %s5630_s12 = smov [#allocation3]  }
  0x33   :  { %97 = sst [smem:[#allocation19]] %s5629_s11  ;;  %s93_s13 = sshll.u32 %s5630_s12, 4  ;;  %s94_s13 = int_to_ptr.vmem [resolvable:$true] %s93_s13 }
  0x34   :  { %99 = sst [smem:[#allocation19 + $0x1]] %s5629_s11  ;;  %s5631_s15 = smov 256  }
  0x35   :  { %103 = sst [smem:[#allocation19 + $0x3]] %s5621_s20  ;;  %s5632_s2 = smov [#allocation9 + $0x1]  }
  0x36   :  { %105 = sst [smem:[#allocation19 + $0x4]] %s5624_s24  ;;  %s5633_s0 = smov [#allocation18]  }
  0x37   :  { %107 = sst [smem:[#allocation19 + $0x5]] %s5625_s25  ;;  %s5634_s18 = smov [#allocation4]  }
  0x38   :  { %109 = sst [smem:[#allocation19 + $0x6]] %s5631_s15  ;;  %s128_s19 = sshll.u32 %s5634_s18, 4  ;;  %s129_s19 = int_to_ptr.vmem [resolvable:$true] %s128_s19 }
  0x39   :  { %111 = sst [smem:[#allocation19 + $0x7]] %s5621_s20  ;;  %s5636_s21 = smov [#allocation20]  }
  0x3a   :  { %113 = sst [smem:[#allocation19 + $0x8]] %s5626_s26 }
  0x3b   :  { %115 = dma.general %s6506_s3, 32768, %s94_s13, %s5632_s2, %s5633_s0, [#allocation19], %s5728_s16, 0  }
  0x3c   :  { %132 = sst [smem:[#allocation21]] %s5631_s15  ;;  %s5635_s3 = smov [#allocation9 + $0x2]  }
  0x3d   :  { %134 = sst [smem:[#allocation21 + $0x1]] %s5631_s15 }
  0x3e   :  { %136 = sst [smem:[#allocation21 + $0x2]] %s5625_s25 }
  0x3f   :  { %138 = sst [smem:[#allocation21 + $0x3]] %s5621_s20 }
  0x40   :  { %140 = sst [smem:[#allocation21 + $0x4]] %s5624_s24 }
  0x41   :  { %142 = sst [smem:[#allocation21 + $0x5]] %s5625_s25 }
  0x42   :  { %144 = sst [smem:[#allocation21 + $0x6]] %s5624_s24 }
  0x43   :  { %146 = sst [smem:[#allocation21 + $0x7]] %s5621_s20 }
  0x44   :  { %148 = sst [smem:[#allocation21 + $0x8]] %s5626_s26 }
  0x45   :  { %150 = dma.general %s6507_s4, 8192, %s129_s19, %s5635_s3, %s5636_s21, [#allocation21], %s5728_s16, 0  }
  0x46   :  { %v5766_v0 = vld [vmem:[%s6508_s5] sm:$0xff]  ;;  %v5771_v1 = vld [vmem:[%s6508_s5 + $0x8] sm:$0xff]  ;;  %v5776_v2 = vld [vmem:[%s6508_s5 + $0x10] sm:$0xff] }
  0x47   :  { %v5781_v3 = vld [vmem:[%s6508_s5 + $0x18] sm:$0xff]  ;;  %v5786_v4 = vld [vmem:[%s6508_s5 + $0x20] sm:$0xff]  ;;  %v5791_v5 = vld [vmem:[%s6508_s5 + $0x28] sm:$0xff] }
  0x48   :  { %v5796_v6 = vld [vmem:[%s6508_s5 + $0x30] sm:$0xff]  ;;  %v5801_v7 = vld [vmem:[%s6508_s5 + $0x38] sm:$0xff]  ;;  %v5806_v8 = vld [vmem:[%s6508_s5 + $0x40] sm:$0xff] }
  0x49   :  { %v5811_v9 = vld [vmem:[%s6508_s5 + $0x48] sm:$0xff]  ;;  %v5816_v10 = vld [vmem:[%s6508_s5 + $0x50] sm:$0xff]  ;;  %v5821_v11 = vld [vmem:[%s6508_s5 + $0x58] sm:$0xff] }
  0x4a   :  { %v5826_v12 = vld [vmem:[%s6508_s5 + $0x60] sm:$0xff]  ;;  %v5831_v13 = vld [vmem:[%s6508_s5 + $0x68] sm:$0xff]  ;;  %v5836_v14 = vld [vmem:[%s6508_s5 + $0x70] sm:$0xff] }
  0x4b   :  { %v5841_v15 = vld [vmem:[%s6508_s5 + $0x78] sm:$0xff] }
  0x4c   :  { %223 = vsyncadd [#allocation9 + $0x3], 2048  ;;  %s5637_s3 = smov 1024   ;;  %s5638_s21 = smov [#allocation6]  }
  0x4d   :  { %240 = sst [smem:[#allocation24]] %s5637_s3  ;;  %s236_s22 = sshll.u32 %s5638_s21, 4  ;;  %s237_s22 = int_to_ptr.vmem [resolvable:$true] %s236_s22 }
  0x4e   :  { %242 = sst [smem:[#allocation24 + $0x1]] %s5637_s3  ;;  %s5639_s23 = smov 8  }
  0x4f   :  { %246 = sst [smem:[#allocation24 + $0x3]] %s5621_s20  ;;  %s5640_s5 = smov [#allocation9 + $0x4]  }
  0x50   :  { %244 = sst [smem:[#allocation24 + $0x2]] %s5639_s23  ;;  %s5641_s1 = smov [#allocation23]  }
  0x51   :  { %248 = sst [smem:[#allocation24 + $0x4]] %s5624_s24  ;;  %s5642_s29 = smov [#allocation7]  }
  0x52   :  { %250 = sst [smem:[#allocation24 + $0x5]] %s5625_s25  ;;  %s271_s30 = sshll.u32 %s5642_s29, 4  ;;  %s272_s30 = int_to_ptr.vmem [resolvable:$true] %s271_s30 }
  0x53   :  { %252 = sst [smem:[#allocation24 + $0x6]] %s5629_s11  ;;  %s5644_s12 = smov [#allocation25]  }
  0x54   :  { %254 = sst [smem:[#allocation24 + $0x7]] %s5621_s20 }
  0x55   :  { %256 = sst [smem:[#allocation24 + $0x8]] %s5626_s26 }
  0x56   :  { %258 = dma.general %s6509_s6, 131072, %s237_s22, %s5640_s5, %s5641_s1, [#allocation24], %s5728_s16, 0  }
  0x57   :  { %275 = sst [smem:[#allocation26]] %s5629_s11  ;;  %s5643_s6 = smov [#allocation9 + $0x5]  }
  0x58   :  { %277 = sst [smem:[#allocation26 + $0x1]] %s5629_s11 }
  0x59   :  { %279 = sst [smem:[#allocation26 + $0x2]] %s5626_s26 }
  0x5a   :  { %281 = sst [smem:[#allocation26 + $0x3]] %s5621_s20 }
  0x5b   :  { %283 = sst [smem:[#allocation26 + $0x4]] %s5624_s24 }
  0x5c   :  { %285 = sst [smem:[#allocation26 + $0x5]] %s5625_s25 }
  0x5d   :  { %287 = sst [smem:[#allocation26 + $0x6]] %s5631_s15 }
  0x5e   :  { %289 = sst [smem:[#allocation26 + $0x7]] %s5621_s20 }
  0x5f   :  { %291 = sst [smem:[#allocation26 + $0x8]] %s5626_s26 }
  0x60   :  { %293 = dma.general %s6510_s7, 32768, %s272_s30, %s5643_s6, %s5644_s12, [#allocation26], %s5728_s16, 0  }
  0x61   :  { %v5869_v16 = vld [vmem:[%s6511_s8] sm:$0xff]  ;;  %v5874_v17 = vld [vmem:[%s6511_s8 + $0x8] sm:$0xff]  ;;  %v5879_v18 = vld [vmem:[%s6511_s8 + $0x10] sm:$0xff] }
  0x62   :  { %6514 = vst [vmem:[#allocation38_spill] sm:$0xff] %v5874_v17  ;;  %6515 = vst [vmem:[#allocation39_spill] sm:$0xff] %v5879_v18  ;;  %v5884_v19 = vld [vmem:[%s6511_s8 + $0x18] sm:$0xff]  ;;  %v5889_v20 = vld [vmem:[%s6511_s8 + $0x20] sm:$0xff] }
  0x63   :  { %6516 = vst [vmem:[#allocation40_spill] sm:$0xff] %v5884_v19  ;;  %6517 = vst [vmem:[#allocation41_spill] sm:$0xff] %v5889_v20  ;;  %v5894_v21 = vld [vmem:[%s6511_s8 + $0x28] sm:$0xff]  ;;  %v5899_v22 = vld [vmem:[%s6511_s8 + $0x30] sm:$0xff] }
  0x64   :  { %6518 = vst [vmem:[#allocation42_spill] sm:$0xff] %v5894_v21  ;;  %6519 = vst [vmem:[#allocation43_spill] sm:$0xff] %v5899_v22  ;;  %v5904_v23 = vld [vmem:[%s6511_s8 + $0x38] sm:$0xff]  ;;  %v5909_v24 = vld [vmem:[%s6511_s8 + $0x40] sm:$0xff] }
  0x65   :  { %6520 = vst [vmem:[#allocation44_spill] sm:$0xff] %v5904_v23  ;;  %v5914_v25 = vld [vmem:[%s6511_s8 + $0x48] sm:$0xff]  ;;  %v5919_v26 = vld [vmem:[%s6511_s8 + $0x50] sm:$0xff]  ;;  %v5924_v27 = vld [vmem:[%s6511_s8 + $0x58] sm:$0xff] }
  0x66   :  { %6521 = vst [vmem:[#allocation45_spill] sm:$0xff] %v5919_v26  ;;  %6522 = vst [vmem:[#allocation46_spill] sm:$0xff] %v5924_v27  ;;  %v5929_v28 = vld [vmem:[%s6511_s8 + $0x60] sm:$0xff]  ;;  %v5934_v29 = vld [vmem:[%s6511_s8 + $0x68] sm:$0xff] }
  0x67   :  { %6523 = vst [vmem:[#allocation47_spill] sm:$0xff] %v5929_v28  ;;  %6524 = vst [vmem:[#allocation48_spill] sm:$0xff] %v5934_v29  ;;  %v5939_v30 = vld [vmem:[%s6511_s8 + $0x70] sm:$0xff]  ;;  %v5944_v31 = vld [vmem:[%s6511_s8 + $0x78] sm:$0xff] }
  0x68   :  { %6525 = vst [vmem:[#allocation49_spill] sm:$0xff] %v5939_v30  ;;  %6526 = vst [vmem:[#allocation50_spill] sm:$0xff] %v5944_v31  ;;  %v5949_v32 = vld [vmem:[%s6511_s8 + $0x80] sm:$0xff]  ;;  %v5954_v33 = vld [vmem:[%s6511_s8 + $0x88] sm:$0xff] }
  0x69   :  { %6527 = vst [vmem:[#allocation51_spill] sm:$0xff] %v5949_v32  ;;  %6528 = vst [vmem:[#allocation52_spill] sm:$0xff] %v5954_v33  ;;  %v5959_v34 = vld [vmem:[%s6511_s8 + $0x90] sm:$0xff]  ;;  %v5964_v35 = vld [vmem:[%s6511_s8 + $0x98] sm:$0xff] }
  0x6a   :  { %6529 = vst [vmem:[#allocation53_spill] sm:$0xff] %v5959_v34  ;;  %6530 = vst [vmem:[#allocation54_spill] sm:$0xff] %v5964_v35  ;;  %v5969_v36 = vld [vmem:[%s6511_s8 + $0xa0] sm:$0xff]  ;;  %v5974_v37 = vld [vmem:[%s6511_s8 + $0xa8] sm:$0xff] }
  0x6b   :  { %6531 = vst [vmem:[#allocation55_spill] sm:$0xff] %v5969_v36  ;;  %6532 = vst [vmem:[#allocation56_spill] sm:$0xff] %v5974_v37  ;;  %v5979_v38 = vld [vmem:[%s6511_s8 + $0xb0] sm:$0xff]  ;;  %v5984_v39 = vld [vmem:[%s6511_s8 + $0xb8] sm:$0xff] }
  0x6c   :  { %6533 = vst [vmem:[#allocation57_spill] sm:$0xff] %v5979_v38  ;;  %6534 = vst [vmem:[#allocation58_spill] sm:$0xff] %v5984_v39  ;;  %v5989_v40 = vld [vmem:[%s6511_s8 + $0xc0] sm:$0xff]  ;;  %v5994_v41 = vld [vmem:[%s6511_s8 + $0xc8] sm:$0xff] }
  0x6d   :  { %6535 = vst [vmem:[#allocation59_spill] sm:$0xff] %v5989_v40  ;;  %6536 = vst [vmem:[#allocation60_spill] sm:$0xff] %v5994_v41  ;;  %v5999_v42 = vld [vmem:[%s6511_s8 + $0xd0] sm:$0xff]  ;;  %v6004_v43 = vld [vmem:[%s6511_s8 + $0xd8] sm:$0xff] }
  0x6e   :  { %6537 = vst [vmem:[#allocation61_spill] sm:$0xff] %v5999_v42  ;;  %6538 = vst [vmem:[#allocation62_spill] sm:$0xff] %v6004_v43  ;;  %v6009_v44 = vld [vmem:[%s6511_s8 + $0xe0] sm:$0xff]  ;;  %v6014_v45 = vld [vmem:[%s6511_s8 + $0xe8] sm:$0xff] }
  0x6f   :  { %6539 = vst [vmem:[#allocation63_spill] sm:$0xff] %v6009_v44  ;;  %6540 = vst [vmem:[#allocation64_spill] sm:$0xff] %v6014_v45  ;;  %v6019_v46 = vld [vmem:[%s6511_s8 + $0xf0] sm:$0xff]  ;;  %v6024_v47 = vld [vmem:[%s6511_s8 + $0xf8] sm:$0xff] }
  0x70   :  { %6541 = vst [vmem:[#allocation65_spill] sm:$0xff] %v6019_v46  ;;  %6542 = vst [vmem:[#allocation66_spill] sm:$0xff] %v6024_v47 }
  0x71   :  { %398 = vsyncadd [#allocation9 + $0x6], 4096  ;;  %v399_v48 = vld [vmem:[#allocation10] sm:$0x3] }
  0x72   :  { %5601 = dma.done.wait [#allocation9], 9216 }
  0x73   :  { %5602 = vsyncadd [#allocation9], 4294958080  ;;  %v5645_v49 = vmov 0   ;;  %v409_v50 = vld [vmem:[#allocation2 + $0x8] sm:$0xff]  ;;  %v408_v51 = vld [vmem:[#allocation2] sm:$0xff]  ;;  %v6028_v62 = vpack.c.bf16 %v399_v48, %v399_v48  ;;  %vm603_vm0 = vcmask 392192  }
  0x74   :  { %639 = vmatprep.mubr.bf16.mxu1 %v5645_v49  ;;  %721 = vmatprep.mubr.bf16.mxu0 %v5645_v49  ;;  %v433_v52 = vld [vmem:[#allocation2 + $0xc8] sm:$0xff]  ;;  %v432_v53 = vld [vmem:[#allocation2 + $0xc0] sm:$0xff]  ;;  %v411_v60 = vld [vmem:[#allocation2 + $0x18] sm:$0xff] }
  0x75   :  { %607 = vmatprep.subr.bf16.mxu1 %v409_v50  ;;  %v457_v54 = vld [vmem:[#allocation2 + $0x188] sm:$0xff]  ;;  %v412_v56 = vld [vmem:[#allocation2 + $0x20] sm:$0xff]  ;;  %v410_v63 = vld [vmem:[#allocation2 + $0x10] sm:$0xff] }
  0x76   :  { %608 = vmatpush1.bf16.msra.mxu1 %v408_v51  ;;  %v413_v55 = vld [vmem:[#allocation2 + $0x28] sm:$0xff]  ;;  %v456_v58 = vld [vmem:[#allocation2 + $0x180] sm:$0xff]  ;;  %v435_v50 = vld [vmem:[#allocation2 + $0xd8] sm:$0xff] }
  0x77   :  { %609 = vmatprep.subr.bf16.mxu1 %v433_v52  ;;  %689 = vmatprep.subr.bf16.mxu0 %v413_v55  ;;  %v437_v57 = vld [vmem:[#allocation2 + $0xe8] sm:$0xff]  ;;  %v436_v59 = vld [vmem:[#allocation2 + $0xe0] sm:$0xff]  ;;  %v459_v48 = vld [vmem:[#allocation2 + $0x198] sm:$0xff] }
  0x78   :  { %690 = vmatpush1.bf16.msra.mxu0 %v412_v56  ;;  %v461_v61 = vld [vmem:[#allocation2 + $0x1a8] sm:$0xff]  ;;  %v460_v51 = vld [vmem:[#allocation2 + $0x1a0] sm:$0xff]  ;;  %v458_v56 = vld [vmem:[#allocation2 + $0x190] sm:$0xff] }
  0x79   :  { %691 = vmatprep.subr.bf16.mxu0 %v437_v57  ;;  %v417_v52 = vld [vmem:[#allocation2 + $0x48] sm:$0xff]  ;;  %v415_v57 = vld [vmem:[#allocation2 + $0x38] sm:$0xff] }
  0x7a   :  { %610 = vmatpush1.bf16.msra.mxu1 %v432_v53  ;;  %v434_v53 = vld [vmem:[#allocation2 + $0xd0] sm:$0xff]  ;;  %v441_v55 = vld [vmem:[#allocation2 + $0x108] sm:$0xff] }
  0x7b   :  { %611 = vmatprep.subr.bf16.mxu1 %v457_v54  ;;  %v416_v54 = vld [vmem:[#allocation2 + $0x40] sm:$0xff]  ;;  %v6094_v36 = vld [vmem:[#allocation13 + $0x8] sm:$0xff]  ;;  %v406_v23 = vld [vmem:[#allocation13 + $0x10] sm:$0xff] }
  0x7c   :  { %692 = vmatpush1.bf16.msra.mxu0 %v436_v59  ;;  %v465_v59 = vld [vmem:[#allocation2 + $0x1c8] sm:$0xff] }
  0x7d   :  { %693 = vmatprep.subr.bf16.mxu0 %v461_v61  ;;  %v439_v61 = vld [vmem:[#allocation2 + $0xf8] sm:$0xff] }
  0x7e   :  { %612 = vmatpush1.bf16.msra.mxu1 %v456_v58  ;;  %v440_v58 = vld [vmem:[#allocation2 + $0x100] sm:$0xff] }
  0x7f   :  { %648 = vmatprep.subr.bf16.mxu1 %v411_v60  ;;  %v414_v60 = vld [vmem:[#allocation2 + $0x30] sm:$0xff] }
  0x80   :  { %694 = vmatpush1.bf16.msra.mxu0 %v460_v51  ;;  %v438_v51 = vld [vmem:[#allocation2 + $0xf0] sm:$0xff] }
  0x81   :  { %5231 = vmatmul.mubr.msk.bf16.vlgmr.msra.gmra.mrb[0].mxu1 %vm603_vm0, %v6028_v62  ;;  %771 = vmatprep.subr.bf16.mxu0 %v417_v52  ;;  %v463_v52 = vld [vmem:[#allocation2 + $0x1b8] sm:$0xff] }
  0x82   :  { %649 = vmatpush1.bf16.msra.mxu1 %v410_v63  ;;  %680 = vmatprep.mubr.bf16.mxu1 %v5645_v49  ;;  %v464_v63 = vld [vmem:[#allocation2 + $0x1c0] sm:$0xff] }
  0x83   :  { %650 = vmatprep.subr.bf16.mxu1 %v435_v50  ;;  %5233 = vmatmul.mubr.msk.bf16.vlgmr.msra.gmra.mrb[0].mxu0 %vm603_vm0, %v6028_v62  ;;  %v421_v50 = vld [vmem:[#allocation2 + $0x68] sm:$0xff] }
  0x84   :  { %772 = vmatpush1.bf16.msra.mxu0 %v416_v54  ;;  %803 = vmatprep.mubr.bf16.mxu0 %v5645_v49  ;;  %v462_v54 = vld [vmem:[#allocation2 + $0x1b0] sm:$0xff] }
  0x85   :  { %773 = vmatprep.subr.bf16.mxu0 %v441_v55  ;;  %v419_v55 = vld [vmem:[#allocation2 + $0x58] sm:$0xff] }
  0x86   :  { %651 = vmatpush1.bf16.msra.mxu1 %v434_v53  ;;  %v420_v53 = vld [vmem:[#allocation2 + $0x60] sm:$0xff] }
  0x87   :  { %652 = vmatprep.subr.bf16.mxu1 %v459_v48  ;;  %v445_v48 = vld [vmem:[#allocation2 + $0x128] sm:$0xff] }
  0x88   :  { %774 = vmatpush1.bf16.msra.mxu0 %v440_v58  ;;  %v418_v58 = vld [vmem:[#allocation2 + $0x50] sm:$0xff] }
  0x89   :  { %775 = vmatprep.subr.bf16.mxu0 %v465_v59  ;;  %v443_v59 = vld [vmem:[#allocation2 + $0x118] sm:$0xff] }
  0x8a   :  { %653 = vmatpush1.bf16.msra.mxu1 %v458_v56  ;;  %v444_v56 = vld [vmem:[#allocation2 + $0x120] sm:$0xff] }
  0x8b   :  { %730 = vmatprep.subr.bf16.mxu1 %v415_v57  ;;  %v469_v57 = vld [vmem:[#allocation2 + $0x1e8] sm:$0xff] }
  0x8c   :  { %776 = vmatpush1.bf16.msra.mxu0 %v464_v63  ;;  %v442_v63 = vld [vmem:[#allocation2 + $0x110] sm:$0xff] }
  0x8d   :  { %5232 = vmatmul.mubr.msk.bf16.vlgmr.msra.gmra.mrb[4].mxu1 %vm603_vm0, %v6028_v62  ;;  %853 = vmatprep.subr.bf16.mxu0 %v421_v50  ;;  %v467_v50 = vld [vmem:[#allocation2 + $0x1d8] sm:$0xff] }
  0x8e   :  { %731 = vmatpush1.bf16.msra.mxu1 %v414_v60  ;;  %762 = vmatprep.mubr.bf16.mxu1 %v5645_v49  ;;  %v468_v60 = vld [vmem:[#allocation2 + $0x1e0] sm:$0xff] }
  0x8f   :  { %732 = vmatprep.subr.bf16.mxu1 %v439_v61  ;;  %5235 = vmatmul.mubr.msk.bf16.vlgmr.msra.gmra.mrb[4].mxu0 %vm603_vm0, %v6028_v62  ;;  %v425_v61 = vld [vmem:[#allocation2 + $0x88] sm:$0xff] }
  0x90   :  { %854 = vmatpush1.bf16.msra.mxu0 %v420_v53  ;;  %885 = vmatprep.mubr.bf16.mxu0 %v5645_v49  ;;  %v466_v53 = vld [vmem:[#allocation2 + $0x1d0] sm:$0xff] }
  0x91   :  { %855 = vmatprep.subr.bf16.mxu0 %v445_v48  ;;  %v423_v48 = vld [vmem:[#allocation2 + $0x78] sm:$0xff] }
  0x92   :  { %733 = vmatpush1.bf16.msra.mxu1 %v438_v51  ;;  %v424_v51 = vld [vmem:[#allocation2 + $0x80] sm:$0xff] }
  0x93   :  { %734 = vmatprep.subr.bf16.mxu1 %v463_v52  ;;  %v449_v52 = vld [vmem:[#allocation2 + $0x148] sm:$0xff] }
  0x94   :  { %856 = vmatpush1.bf16.msra.mxu0 %v444_v56  ;;  %v422_v56 = vld [vmem:[#allocation2 + $0x70] sm:$0xff] }
  0x95   :  { %857 = vmatprep.subr.bf16.mxu0 %v469_v57  ;;  %v447_v57 = vld [vmem:[#allocation2 + $0x138] sm:$0xff] }
  0x96   :  { %735 = vmatpush1.bf16.msra.mxu1 %v462_v54  ;;  %v448_v54 = vld [vmem:[#allocation2 + $0x140] sm:$0xff] }
  0x97   :  { %812 = vmatprep.subr.bf16.mxu1 %v419_v55  ;;  %v473_v55 = vld [vmem:[#allocation2 + $0x208] sm:$0xff] }
  0x98   :  { %858 = vmatpush1.bf16.msra.mxu0 %v468_v60  ;;  %v446_v60 = vld [vmem:[#allocation2 + $0x130] sm:$0xff] }
  0x99   :  { %5234 = vmatmul.mubr.msk.bf16.vlgmr.msra.gmra.mrb[8].mxu1 %vm603_vm0, %v6028_v62  ;;  %935 = vmatprep.subr.bf16.mxu0 %v425_v61  ;;  %v471_v61 = vld [vmem:[#allocation2 + $0x1f8] sm:$0xff] }
  0x9a   :  { %813 = vmatpush1.bf16.msra.mxu1 %v418_v58  ;;  %844 = vmatprep.mubr.bf16.mxu1 %v5645_v49  ;;  %v472_v58 = vld [vmem:[#allocation2 + $0x200] sm:$0xff] }
  0x9b   :  { %814 = vmatprep.subr.bf16.mxu1 %v443_v59  ;;  %5237 = vmatmul.mubr.msk.bf16.vlgmr.msra.gmra.mrb[8].mxu0 %vm603_vm0, %v6028_v62  ;;  %v429_v59 = vld [vmem:[#allocation2 + $0xa8] sm:$0xff] }
  0x9c   :  { %936 = vmatpush1.bf16.msra.mxu0 %v424_v51  ;;  %967 = vmatprep.mubr.bf16.mxu0 %v5645_v49  ;;  %v470_v51 = vld [vmem:[#allocation2 + $0x1f0] sm:$0xff] }
  0x9d   :  { %937 = vmatprep.subr.bf16.mxu0 %v449_v52  ;;  %v427_v52 = vld [vmem:[#allocation2 + $0x98] sm:$0xff] }
  0x9e   :  { %815 = vmatpush1.bf16.msra.mxu1 %v442_v63  ;;  %v428_v63 = vld [vmem:[#allocation2 + $0xa0] sm:$0xff] }
  0x9f   :  { %816 = vmatprep.subr.bf16.mxu1 %v467_v50  ;;  %v453_v50 = vld [vmem:[#allocation2 + $0x168] sm:$0xff] }
  0xa0   :  { %938 = vmatpush1.bf16.msra.mxu0 %v448_v54  ;;  %v426_v54 = vld [vmem:[#allocation2 + $0x90] sm:$0xff] }
  0xa1   :  { %939 = vmatprep.subr.bf16.mxu0 %v473_v55  ;;  %v451_v55 = vld [vmem:[#allocation2 + $0x158] sm:$0xff] }
  0xa2   :  { %817 = vmatpush1.bf16.msra.mxu1 %v466_v53  ;;  %v452_v53 = vld [vmem:[#allocation2 + $0x160] sm:$0xff] }
  0xa3   :  { %894 = vmatprep.subr.bf16.mxu1 %v423_v48  ;;  %v477_v48 = vld [vmem:[#allocation2 + $0x228] sm:$0xff] }
  0xa4   :  { %940 = vmatpush1.bf16.msra.mxu0 %v472_v58  ;;  %v475_v58 = vld [vmem:[#allocation2 + $0x218] sm:$0xff] }
  0xa5   :  { %5236 = vmatmul.mubr.msk.bf16.vlgmr.msra.gmra.mrb[12].mxu1 %vm603_vm0, %v6028_v62  ;;  %1017 = vmatprep.subr.bf16.mxu0 %v429_v59  ;;  %v474_v59 = vld [vmem:[#allocation2 + $0x210] sm:$0xff] }
  0xa6   :  { %895 = vmatpush1.bf16.msra.mxu1 %v422_v56  ;;  %926 = vmatprep.mubr.bf16.mxu1 %v5645_v49  ;;  %v476_v56 = vld [vmem:[#allocation2 + $0x220] sm:$0xff] }
  0xa7   :  { %896 = vmatprep.subr.bf16.mxu1 %v447_v57  ;;  %5239 = vmatmul.mubr.msk.bf16.vlgmr.msra.gmra.mrb[12].mxu0 %vm603_vm0, %v6028_v62  ;;  %v450_v57 = vld [vmem:[#allocation2 + $0x150] sm:$0xff] }
  0xa8   :  { %1018 = vmatpush1.bf16.msra.mxu0 %v428_v63  ;;  %1049 = vmatprep.mubr.bf16.mxu0 %v5645_v49  ;;  %v455_v63 = vld [vmem:[#allocation2 + $0x178] sm:$0xff] }
  0xa9   :  { %1019 = vmatprep.subr.bf16.mxu0 %v453_v50  ;;  %v454_v50 = vld [vmem:[#allocation2 + $0x170] sm:$0xff] }
  0xaa   :  { %897 = vmatpush1.bf16.msra.mxu1 %v446_v60  ;;  %v431_v60 = vld [vmem:[#allocation2 + $0xb8] sm:$0xff] }
  0xab   :  { %898 = vmatprep.subr.bf16.mxu1 %v471_v61  ;;  %v430_v61 = vld [vmem:[#allocation2 + $0xb0] sm:$0xff] }
  0xac   :  { %1020 = vmatpush1.bf16.msra.mxu0 %v452_v53  ;;  %v483_v53 = vlaneseq }
  0xad   :  { %1021 = vmatprep.subr.bf16.mxu0 %v477_v48 }
  0xae   :  { %899 = vmatpush1.bf16.msra.mxu1 %v470_v51  ;;  %v479_v51 = vld [vmem:[#allocation2 + $0x238] sm:$0xff]  ;;  %v484_v48 = vshrl.u32 %v483_v53, 7 }
  0xaf   :  { %976 = vmatprep.subr.bf16.mxu1 %v427_v52  ;;  %v478_v52 = vld [vmem:[#allocation2 + $0x230] sm:$0xff] }
  0xb0   :  { %1022 = vmatpush1.bf16.msra.mxu0 %v476_v56  ;;  %v6066_v56 = vsub.s32 1, %v484_v48  ;;  %v6082_v38 = vsub.s32 2, %v484_v48  ;;  %v6084_v37 = vsub.s32 3, %v484_v48  ;;  %v6106_v43 = vsub.s32 6, %v484_v48 }
  0xb1   :  { %5238 = vmatmul.mubr.msk.bf16.vlgmr.msra.gmra.mrb[16].mxu1 %vm603_vm0, %v6028_v62 }
  0xb2   :  { %977 = vmatpush1.bf16.msra.mxu1 %v426_v54  ;;  %1008 = vmatprep.mubr.bf16.mxu1 %v5645_v49  ;;  %v6064_v54 = vsub.s32 0, %v484_v48  ;;  %v526_v33 = vrot.slane %v6094_v36, %v6082_v38 }
  0xb3   :  { %978 = vmatprep.subr.bf16.mxu1 %v451_v55  ;;  %5241 = vmatmul.mubr.msk.bf16.vlgmr.msra.gmra.mrb[16].mxu0 %vm603_vm0, %v6028_v62  ;;  %v404_v55 = vld [vmem:[#allocation13] sm:$0xff] }
  0xb4   :  { %v498_v47 = vrot.slane %v404_v55, %v6084_v37 }
  0xb6   :  { %979 = vmatpush1.bf16.msra.mxu1 %v450_v57  ;;  %v486_v57 = vrot.slane %v404_v55, %v6064_v54 }
  0xb7   :  { %980 = vmatprep.subr.bf16.mxu1 %v475_v58  ;;  %v6070_v58 = vsub.s32 4, %v484_v48 }
  0xba   :  { %981 = vmatpush1.bf16.msra.mxu1 %v474_v59  ;;  %v6072_v59 = vsub.s32 5, %v484_v48 }
  0xbb   :  { %1058 = vmatprep.subr.bf16.mxu1 %v431_v60 }
  0xbc   :  { %v506_v39 = vrot.slane %v404_v55, %v6072_v59 }
  0xbd   :  { %5240 = vmatmul.mubr.msk.bf16.vlgmr.msra.gmra.mrb[20].mxu1 %vm603_vm0, %v6028_v62 }
  0xbe   :  { %1059 = vmatpush1.bf16.msra.mxu1 %v430_v61  ;;  %1090 = vmatprep.mubr.bf16.mxu1 %v5645_v49  ;;  %v490_v49 = vrot.slane %v404_v55, %v6066_v56 }
  0xbf   :  { %1060 = vmatprep.subr.bf16.mxu1 %v455_v63 }
  0xc2   :  { %1061 = vmatpush1.bf16.msra.mxu1 %v454_v50 }
  0xc3   :  { %1062 = vmatprep.subr.bf16.mxu1 %v479_v51  ;;  %v502_v51 = vrot.slane %v404_v55, %v6070_v58 }
  0xc6   :  { %1063 = vmatpush1.bf16.msra.mxu1 %v478_v52 }
  0xc9   :  { %5242 = vmatmul.mubr.msk.bf16.vlgmr.msra.gmra.mrb[24].mxu1 %vm603_vm0, %v6028_v62 }
 0x154   :  { %v641_v60 = vpop.f32.mrb[0].mxu1 }
 0x155   :  { %v6074_v61 = vadd.f32 %v641_v60, %v486_v57  ;;  %v643_v63 = vpop.f32.mrb[1].mxu1 }
 0x156   :  { %v6076_v62 = vadd.f32 %v643_v63, %v490_v49  ;;  %v645_v50 = vpop.f32.mrb[2].mxu1  ;;  %v723_v46 = vpop.f32.mrb[0].mxu0 }
 0x157   :  { %v646_v53 = vpop.f32.mrb[3].mxu1  ;;  %v6086_v57 = vadd.f32 %v723_v46, %v502_v51  ;;  %v725_v60 = vpop.f32.mrb[1].mxu0  ;;  %v522_v50 = vrot.slane %v6094_v36, %v6066_v56 }
 0x158   :  { %v6088_v49 = vadd.f32 %v725_v60, %v506_v39  ;;  %v727_v63 = vpop.f32.mrb[2].mxu0  ;;  %v494_v53 = vrot.slane %v404_v55, %v6082_v38  ;;  %v518_v60 = vrot.slane %v6094_v36, %v6064_v54 }
 0x159   :  { %v728_v45 = vpop.f32.mrb[3].mxu0 }
 0x160   :  { %v682_v44 = vpop.f32.mrb[4].mxu1 }
 0x161   :  { %v6096_v35 = vadd.f32 %v682_v44, %v494_v53  ;;  %v684_v46 = vpop.f32.mrb[5].mxu1  ;;  %v6108_v44 = vsub.s32 7, %v484_v48 }
 0x162   :  { %v6098_v51 = vadd.f32 %v684_v46, %v498_v47  ;;  %v686_v39 = vpop.f32.mrb[6].mxu1  ;;  %v805_v34 = vpop.f32.mrb[4].mxu0 }
 0x163   :  { %v687_v63 = vpop.f32.mrb[7].mxu1  ;;  %v6110_v53 = vadd.f32 %v805_v34, %v518_v60  ;;  %v807_v47 = vpop.f32.mrb[5].mxu0  ;;  %v514_v52 = vrot.slane %v404_v55, %v6108_v44  ;;  %v530_v60 = vrot.slane %v6094_v36, %v6084_v37 }
 0x164   :  { %v6112_v46 = vadd.f32 %v807_v47, %v522_v50  ;;  %v809_v39 = vpop.f32.mrb[6].mxu0  ;;  %v510_v63 = vrot.slane %v404_v55, %v6106_v43  ;;  %v534_v50 = vrot.slane %v6094_v36, %v6070_v58 }
 0x165   :  { %v810_v45 = vpop.f32.mrb[7].mxu0 }
 0x166   :  { %v538_v45 = vrot.slane %v6094_v36, %v6072_v59 }
 0x16c   :  { %v764_v41 = vpop.f32.mrb[8].mxu1 }
 0x16d   :  { %v6118_v32 = vadd.f32 %v764_v41, %v510_v63  ;;  %v766_v48 = vpop.f32.mrb[9].mxu1 }
 0x16e   :  { %v6120_v40 = vadd.f32 %v766_v48, %v514_v52  ;;  %v768_v34 = vpop.f32.mrb[10].mxu1  ;;  %v887_v42 = vpop.f32.mrb[8].mxu0  ;;  %v554_v48 = vrot.slane %v406_v23, %v6066_v56 }
 0x16f   :  { %v769_v47 = vpop.f32.mrb[11].mxu1  ;;  %v6128_v55 = vadd.f32 %v887_v42, %v534_v50  ;;  %v889_v41 = vpop.f32.mrb[9].mxu0 }
 0x170   :  { %v6130_v63 = vadd.f32 %v889_v41, %v538_v45  ;;  %v891_v52 = vpop.f32.mrb[10].mxu0  ;;  %v550_v41 = vrot.slane %v406_v23, %v6064_v54 }
 0x171   :  { %v892_v34 = vpop.f32.mrb[11].mxu0 }
 0x178   :  { %v846_v39 = vpop.f32.mrb[12].mxu1 }
 0x179   :  { %v6138_v31 = vadd.f32 %v846_v39, %v526_v33  ;;  %v848_v42 = vpop.f32.mrb[13].mxu1 }
 0x17a   :  { %v6140_v50 = vadd.f32 %v848_v42, %v530_v60  ;;  %v850_v45 = vpop.f32.mrb[14].mxu1  ;;  %v969_v22 = vpop.f32.mrb[12].mxu0  ;;  %v542_v42 = vrot.slane %v6094_v36, %v6106_v43  ;;  %v570_v60 = vrot.slane %v406_v23, %v6072_v59 }
 0x17b   :  { %v851_v34 = vpop.f32.mrb[15].mxu1  ;;  %v6146_v30 = vadd.f32 %v969_v22, %v550_v41  ;;  %v971_v21 = vpop.f32.mrb[13].mxu0 }
 0x17c   :  { %v6148_v29 = vadd.f32 %v971_v21, %v554_v48  ;;  %v973_v33 = vpop.f32.mrb[14].mxu0  ;;  %v546_v34 = vrot.slane %v6094_v36, %v6108_v44  ;;  %v566_v48 = vrot.slane %v406_v23, %v6070_v58 }
 0x17d   :  { %v974_v39 = vpop.f32.mrb[15].mxu0 }
 0x184   :  { %v928_v52 = vpop.f32.mrb[16].mxu1 }
 0x185   :  { %v6156_v47 = vadd.f32 %v928_v52, %v542_v42  ;;  %v930_v22 = vpop.f32.mrb[17].mxu1 }
 0x186   :  { %v6158_v41 = vadd.f32 %v930_v22, %v546_v34  ;;  %v932_v21 = vpop.f32.mrb[18].mxu1  ;;  %v1051_v45 = vpop.f32.mrb[16].mxu0  ;;  %v558_v22 = vrot.slane %v406_v23, %v6082_v38 }
 0x187   :  { %v933_v39 = vpop.f32.mrb[19].mxu1  ;;  %v6164_v28 = vadd.f32 %v1051_v45, %v566_v48  ;;  %v1053_v36 = vpop.f32.mrb[17].mxu0 }
 0x188   :  { %v6166_v19 = vadd.f32 %v1053_v36, %v570_v60  ;;  %v1055_v52 = vpop.f32.mrb[18].mxu0  ;;  %v562_v39 = vrot.slane %v406_v23, %v6084_v37 }
 0x189   :  { %v1056_v34 = vpop.f32.mrb[19].mxu0  ;;  %v574_v52 = vrot.slane %v406_v23, %v6106_v43 }
 0x18a   :  { %v578_v34 = vrot.slane %v406_v23, %v6108_v44 }
 0x190   :  { %v1010_v33 = vpop.f32.mrb[20].mxu1 }
 0x191   :  { %v6172_v27 = vadd.f32 %v1010_v33, %v558_v22  ;;  %v1012_v20 = vpop.f32.mrb[21].mxu1 }
 0x192   :  { %v6174_v18 = vadd.f32 %v1012_v20, %v562_v39  ;;  %v1014_v45 = vpop.f32.mrb[22].mxu1 }
 0x193   :  { %v1015_v48 = vpop.f32.mrb[23].mxu1 }
 0x19c   :  { %v1092_v42 = vpop.f32.mrb[24].mxu1 }
 0x19d   :  { %v6180_v21 = vadd.f32 %v1092_v42, %v574_v52  ;;  %v1094_v26 = vpop.f32.mrb[25].mxu1 }
 0x19e   :  { %v6182_v17 = vadd.f32 %v1094_v26, %v578_v34  ;;  %v1096_v33 = vpop.f32.mrb[26].mxu1 }
 0x19f   :  { %v1097_v22 = vpop.f32.mrb[27].mxu1 }
 0x1a0   :  { %5603 = dma.done.wait [#allocation9 + $0x1], 32768 }
 0x1a1   :  { %5604 = vsyncadd [#allocation9 + $0x1], 4294934528  ;;  %v6543_v45 = vmax.f32 %v6076_v62, 0.0  ;;  %v1137_v23 = vld [vmem:[#allocation3 + $0x8] sm:$0xff]  ;;  %v1139_v42 = vld [vmem:[#allocation3 + $0x18] sm:$0xff] }
 0x1a2   :  { %v1136_v52 = vld [vmem:[#allocation3] sm:$0xff]  ;;  %1413 = vmatprep.subr.bf16.mxu0 %v1137_v23  ;;  %1577 = vmatprep.subr.bf16.mxu1 %v1139_v42  ;;  %v1138_v26 = vld [vmem:[#allocation3 + $0x10] sm:$0xff]  ;;  %v1141_v34 = vld [vmem:[#allocation3 + $0x28] sm:$0xff] }
 0x1a3   :  { %v1129_v48 = vpack.c.bf16 %v6543_v45, %v6543_v45  ;;  %v1143_v33 = vld [vmem:[#allocation3 + $0x38] sm:$0xff]  ;;  %1414 = vmatpush1.bf16.msra.mxu0 %v1136_v52  ;;  %1578 = vmatpush1.bf16.msra.mxu1 %v1138_v26  ;;  %v1140_v22 = vld [vmem:[#allocation3 + $0x20] sm:$0xff]  ;;  %v1142_v20 = vld [vmem:[#allocation3 + $0x30] sm:$0xff] }
 0x1a4   :  { %1415 = vmatprep.subr.bf16.mxu0 %v1141_v34  ;;  %1579 = vmatprep.subr.bf16.mxu1 %v1143_v33  ;;  %v1145_v39 = vld [vmem:[#allocation3 + $0x48] sm:$0xff]  ;;  %v1147_v62 = vld [vmem:[#allocation3 + $0x58] sm:$0xff]  ;;  %v1144_v45 = vld [vmem:[#allocation3 + $0x40] sm:$0xff] }
 0x1a5   :  { %1445 = vmatprep.mubr.bf16.mxu0 %v1129_v48  ;;  %1609 = vmatprep.mubr.bf16.mxu1 %v1129_v48  ;;  %v1146_v48 = vld [vmem:[#allocation3 + $0x50] sm:$0xff]  ;;  %v1149_v60 = vld [vmem:[#allocation3 + $0x68] sm:$0xff]  ;;  %v1151_v23 = vld [vmem:[#allocation3 + $0x78] sm:$0xff] }
 0x1a6   :  { %v1148_v42 = vld [vmem:[#allocation3 + $0x60] sm:$0xff]  ;;  %v1150_v52 = vld [vmem:[#allocation3 + $0x70] sm:$0xff]  ;;  %v1153_v26 = vld [vmem:[#allocation3 + $0x88] sm:$0xff] }
 0x1a7   :  { %1416 = vmatpush1.bf16.msra.mxu0 %v1140_v22  ;;  %1580 = vmatpush1.bf16.msra.mxu1 %v1142_v20  ;;  %v1155_v34 = vld [vmem:[#allocation3 + $0x98] sm:$0xff]  ;;  %v1152_v33 = vld [vmem:[#allocation3 + $0x80] sm:$0xff]  ;;  %v1154_v20 = vld [vmem:[#allocation3 + $0x90] sm:$0xff] }
 0x1a8   :  { %1417 = vmatprep.subr.bf16.mxu0 %v1145_v39  ;;  %1581 = vmatprep.subr.bf16.mxu1 %v1147_v62  ;;  %v1157_v39 = vld [vmem:[#allocation3 + $0xa8] sm:$0xff]  ;;  %v1159_v22 = vld [vmem:[#allocation3 + $0xb8] sm:$0xff]  ;;  %v1156_v62 = vld [vmem:[#allocation3 + $0xa0] sm:$0xff] }
 0x1ab   :  { %1418 = vmatpush1.bf16.msra.mxu0 %v1144_v45  ;;  %1582 = vmatpush1.bf16.msra.mxu1 %v1146_v48  ;;  %v1158_v45 = vld [vmem:[#allocation3 + $0xb0] sm:$0xff]  ;;  %v1163_v48 = vld [vmem:[#allocation3 + $0xd8] sm:$0xff] }
 0x1ac   :  { %1419 = vmatprep.subr.bf16.mxu0 %v1149_v60  ;;  %1583 = vmatprep.subr.bf16.mxu1 %v1151_v23  ;;  %v1161_v60 = vld [vmem:[#allocation3 + $0xc8] sm:$0xff]  ;;  %v1160_v23 = vld [vmem:[#allocation3 + $0xc0] sm:$0xff] }
 0x1af   :  { %1420 = vmatpush1.bf16.msra.mxu0 %v1148_v42  ;;  %1584 = vmatpush1.bf16.msra.mxu1 %v1150_v52  ;;  %v1162_v42 = vld [vmem:[#allocation3 + $0xd0] sm:$0xff]  ;;  %v1165_v52 = vld [vmem:[#allocation3 + $0xe8] sm:$0xff] }
 0x1b0   :  { %1421 = vmatprep.subr.bf16.mxu0 %v1153_v26  ;;  %1585 = vmatprep.subr.bf16.mxu1 %v1155_v34  ;;  %v1167_v26 = vld [vmem:[#allocation3 + $0xf8] sm:$0xff]  ;;  %v1164_v34 = vld [vmem:[#allocation3 + $0xe0] sm:$0xff] }
 0x1b3   :  { %1422 = vmatpush1.bf16.msra.mxu0 %v1152_v33  ;;  %1586 = vmatpush1.bf16.msra.mxu1 %v1154_v20  ;;  %v1166_v33 = vld [vmem:[#allocation3 + $0xf0] sm:$0xff]  ;;  %v1169_v20 = vld [vmem:[#allocation3 + $0x108] sm:$0xff] }
 0x1b4   :  { %1423 = vmatprep.subr.bf16.mxu0 %v1157_v39  ;;  %1587 = vmatprep.subr.bf16.mxu1 %v1159_v22  ;;  %v1171_v39 = vld [vmem:[#allocation3 + $0x118] sm:$0xff]  ;;  %v1168_v22 = vld [vmem:[#allocation3 + $0x100] sm:$0xff] }
 0x1b7   :  { %1424 = vmatpush1.bf16.msra.mxu0 %v1156_v62  ;;  %1588 = vmatpush1.bf16.msra.mxu1 %v1158_v45  ;;  %v1170_v62 = vld [vmem:[#allocation3 + $0x110] sm:$0xff]  ;;  %v1173_v45 = vld [vmem:[#allocation3 + $0x128] sm:$0xff] }
 0x1b8   :  { %1425 = vmatprep.subr.bf16.mxu0 %v1161_v60  ;;  %1589 = vmatprep.subr.bf16.mxu1 %v1163_v48  ;;  %v1175_v60 = vld [vmem:[#allocation3 + $0x138] sm:$0xff]  ;;  %v1172_v48 = vld [vmem:[#allocation3 + $0x120] sm:$0xff] }
 0x1bb   :  { %1426 = vmatpush1.bf16.msra.mxu0 %v1160_v23  ;;  %1590 = vmatpush1.bf16.msra.mxu1 %v1162_v42  ;;  %v1174_v23 = vld [vmem:[#allocation3 + $0x130] sm:$0xff]  ;;  %v1177_v42 = vld [vmem:[#allocation3 + $0x148] sm:$0xff] }
 0x1bc   :  { %1427 = vmatprep.subr.bf16.mxu0 %v1165_v52  ;;  %1591 = vmatprep.subr.bf16.mxu1 %v1167_v26  ;;  %v1179_v52 = vld [vmem:[#allocation3 + $0x158] sm:$0xff]  ;;  %v1176_v26 = vld [vmem:[#allocation3 + $0x140] sm:$0xff] }
 0x1bf   :  { %1428 = vmatpush1.bf16.msra.mxu0 %v1164_v34  ;;  %1592 = vmatpush1.bf16.msra.mxu1 %v1166_v33  ;;  %v1178_v34 = vld [vmem:[#allocation3 + $0x150] sm:$0xff]  ;;  %v1181_v33 = vld [vmem:[#allocation3 + $0x168] sm:$0xff] }
 0x1c0   :  { %1429 = vmatprep.subr.bf16.mxu0 %v1169_v20  ;;  %1593 = vmatprep.subr.bf16.mxu1 %v1171_v39  ;;  %v1183_v20 = vld [vmem:[#allocation3 + $0x178] sm:$0xff]  ;;  %v1180_v39 = vld [vmem:[#allocation3 + $0x160] sm:$0xff] }
 0x1c3   :  { %1430 = vmatpush1.bf16.msra.mxu0 %v1168_v22  ;;  %1594 = vmatpush1.bf16.msra.mxu1 %v1170_v62  ;;  %v1182_v22 = vld [vmem:[#allocation3 + $0x170] sm:$0xff]  ;;  %v1185_v62 = vld [vmem:[#allocation3 + $0x188] sm:$0xff] }
 0x1c4   :  { %1431 = vmatprep.subr.bf16.mxu0 %v1173_v45  ;;  %1595 = vmatprep.subr.bf16.mxu1 %v1175_v60  ;;  %v1187_v45 = vld [vmem:[#allocation3 + $0x198] sm:$0xff]  ;;  %v1184_v60 = vld [vmem:[#allocation3 + $0x180] sm:$0xff] }
 0x1c7   :  { %1432 = vmatpush1.bf16.msra.mxu0 %v1172_v48  ;;  %1596 = vmatpush1.bf16.msra.mxu1 %v1174_v23  ;;  %v1186_v48 = vld [vmem:[#allocation3 + $0x190] sm:$0xff]  ;;  %v1189_v23 = vld [vmem:[#allocation3 + $0x1a8] sm:$0xff] }
 0x1c8   :  { %1433 = vmatprep.subr.bf16.mxu0 %v1177_v42  ;;  %1597 = vmatprep.subr.bf16.mxu1 %v1179_v52  ;;  %v1191_v42 = vld [vmem:[#allocation3 + $0x1b8] sm:$0xff]  ;;  %v1188_v52 = vld [vmem:[#allocation3 + $0x1a0] sm:$0xff] }
 0x1cb   :  { %1434 = vmatpush1.bf16.msra.mxu0 %v1176_v26  ;;  %1598 = vmatpush1.bf16.msra.mxu1 %v1178_v34  ;;  %v1190_v26 = vld [vmem:[#allocation3 + $0x1b0] sm:$0xff]  ;;  %v1193_v34 = vld [vmem:[#allocation3 + $0x1c8] sm:$0xff] }
 0x1cc   :  { %1435 = vmatprep.subr.bf16.mxu0 %v1181_v33  ;;  %1599 = vmatprep.subr.bf16.mxu1 %v1183_v20  ;;  %v1195_v33 = vld [vmem:[#allocation3 + $0x1d8] sm:$0xff]  ;;  %v1192_v20 = vld [vmem:[#allocation3 + $0x1c0] sm:$0xff] }
 0x1cf   :  { %1436 = vmatpush1.bf16.msra.mxu0 %v1180_v39  ;;  %1600 = vmatpush1.bf16.msra.mxu1 %v1182_v22  ;;  %v1194_v39 = vld [vmem:[#allocation3 + $0x1d0] sm:$0xff]  ;;  %v1197_v22 = vld [vmem:[#allocation3 + $0x1e8] sm:$0xff] }
 0x1d0   :  { %1437 = vmatprep.subr.bf16.mxu0 %v1185_v62  ;;  %1601 = vmatprep.subr.bf16.mxu1 %v1187_v45  ;;  %v1199_v62 = vld [vmem:[#allocation3 + $0x1f8] sm:$0xff]  ;;  %v1196_v45 = vld [vmem:[#allocation3 + $0x1e0] sm:$0xff] }
 0x1d3   :  { %1438 = vmatpush1.bf16.msra.mxu0 %v1184_v60  ;;  %1602 = vmatpush1.bf16.msra.mxu1 %v1186_v48  ;;  %v1198_v60 = vld [vmem:[#allocation3 + $0x1f0] sm:$0xff]  ;;  %v1201_v48 = vld [vmem:[#allocation3 + $0x208] sm:$0xff] }
 0x1d4   :  { %1439 = vmatprep.subr.bf16.mxu0 %v1189_v23  ;;  %1603 = vmatprep.subr.bf16.mxu1 %v1191_v42  ;;  %v1203_v23 = vld [vmem:[#allocation3 + $0x218] sm:$0xff]  ;;  %v6544_v42 = vmax.f32 %v6074_v61, 0.0  ;;  %v1204_v61 = vld [vmem:[#allocation3 + $0x220] sm:$0xff] }
 0x1d6   :  { %v1128_v36 = vpack.c.bf16 %v6544_v42, %v6544_v42  ;;  %v1214_v42 = vld [vmem:[#allocation3 + $0x270] sm:$0xff] }
 0x1d7   :  { %1440 = vmatpush1.bf16.msra.mxu0 %v1188_v52  ;;  %1604 = vmatpush1.bf16.msra.mxu1 %v1190_v26  ;;  %v1200_v52 = vld [vmem:[#allocation3 + $0x200] sm:$0xff]  ;;  %v1202_v26 = vld [vmem:[#allocation3 + $0x210] sm:$0xff] }
 0x1d8   :  { %1441 = vmatprep.subr.bf16.mxu0 %v1193_v34  ;;  %1605 = vmatprep.subr.bf16.mxu1 %v1195_v33  ;;  %v1205_v34 = vld [vmem:[#allocation3 + $0x228] sm:$0xff]  ;;  %v1207_v33 = vld [vmem:[#allocation3 + $0x238] sm:$0xff] }
 0x1db   :  { %1442 = vmatpush1.bf16.msra.mxu0 %v1192_v20  ;;  %1606 = vmatpush1.bf16.msra.mxu1 %v1194_v39  ;;  %v6545_v20 = vmax.f32 %v6098_v51, 0.0  ;;  %v1210_v51 = vld [vmem:[#allocation3 + $0x250] sm:$0xff] }
 0x1dc   :  { %1443 = vmatprep.subr.bf16.mxu0 %v1197_v22  ;;  %1607 = vmatprep.subr.bf16.mxu1 %v1199_v62  ;;  %v1206_v22 = vld [vmem:[#allocation3 + $0x230] sm:$0xff]  ;;  %v1209_v62 = vld [vmem:[#allocation3 + $0x248] sm:$0xff] }
 0x1dd   :  { %v1131_v39 = vpack.c.bf16 %v6545_v20, %v6545_v20  ;;  %v1221_v20 = vld [vmem:[#allocation3 + $0x2a8] sm:$0xff] }
 0x1df   :  { %1444 = vmatpush1.bf16.msra.mxu0 %v1196_v45  ;;  %1608 = vmatpush1.bf16.msra.mxu1 %v1198_v60  ;;  %v1211_v45 = vld [vmem:[#allocation3 + $0x258] sm:$0xff]  ;;  %v1208_v60 = vld [vmem:[#allocation3 + $0x240] sm:$0xff] }
 0x1e0   :  { %1454 = vmatprep.subr.bf16.mxu0 %v1201_v48  ;;  %1618 = vmatprep.subr.bf16.mxu1 %v1203_v23  ;;  %v1213_v48 = vld [vmem:[#allocation3 + $0x268] sm:$0xff]  ;;  %v1215_v23 = vld [vmem:[#allocation3 + $0x278] sm:$0xff] }
 0x1e2   :  { %1446 = vmatmul.mubr.bf16.vlgmr.msra.gmra.mrb[20].mxu0 %v1128_v36  ;;  %1610 = vmatmul.mubr.bf16.vlgmr.msra.gmra.mrb[28].mxu1 %v1128_v36  ;;  %v1212_v36 = vld [vmem:[#allocation3 + $0x260] sm:$0xff] }
 0x1e3   :  { %1455 = vmatpush1.bf16.msra.mxu0 %v1200_v52  ;;  %1619 = vmatpush1.bf16.msra.mxu1 %v1202_v26  ;;  %v1217_v52 = vld [vmem:[#allocation3 + $0x288] sm:$0xff]  ;;  %v1219_v26 = vld [vmem:[#allocation3 + $0x298] sm:$0xff] }
 0x1e4   :  { %1456 = vmatprep.subr.bf16.mxu0 %v1205_v34  ;;  %1620 = vmatprep.subr.bf16.mxu1 %v1207_v33  ;;  %v1216_v34 = vld [vmem:[#allocation3 + $0x280] sm:$0xff]  ;;  %v1218_v33 = vld [vmem:[#allocation3 + $0x290] sm:$0xff] }
 0x1e5   :  { %1486 = vmatprep.mubr.bf16.mxu0 %v1131_v39  ;;  %1650 = vmatprep.mubr.bf16.mxu1 %v1131_v39  ;;  %v1223_v39 = vld [vmem:[#allocation3 + $0x2b8] sm:$0xff] }
 0x1e7   :  { %1457 = vmatpush1.bf16.msra.mxu0 %v1204_v61  ;;  %1621 = vmatpush1.bf16.msra.mxu1 %v1206_v22  ;;  %v1220_v61 = vld [vmem:[#allocation3 + $0x2a0] sm:$0xff]  ;;  %v1222_v22 = vld [vmem:[#allocation3 + $0x2b0] sm:$0xff] }
 0x1e8   :  { %1458 = vmatprep.subr.bf16.mxu0 %v1209_v62  ;;  %1622 = vmatprep.subr.bf16.mxu1 %v1211_v45  ;;  %v1225_v62 = vld [vmem:[#allocation3 + $0x2c8] sm:$0xff]  ;;  %v1227_v45 = vld [vmem:[#allocation3 + $0x2d8] sm:$0xff] }
 0x1eb   :  { %1459 = vmatpush1.bf16.msra.mxu0 %v1208_v60  ;;  %1623 = vmatpush1.bf16.msra.mxu1 %v1210_v51  ;;  %v1224_v60 = vld [vmem:[#allocation3 + $0x2c0] sm:$0xff]  ;;  %v1226_v51 = vld [vmem:[#allocation3 + $0x2d0] sm:$0xff] }
 0x1ec   :  { %1460 = vmatprep.subr.bf16.mxu0 %v1213_v48  ;;  %1624 = vmatprep.subr.bf16.mxu1 %v1215_v23  ;;  %v1229_v48 = vld [vmem:[#allocation3 + $0x2e8] sm:$0xff]  ;;  %v1231_v23 = vld [vmem:[#allocation3 + $0x2f8] sm:$0xff] }
 0x1ef   :  { %1461 = vmatpush1.bf16.msra.mxu0 %v1212_v36  ;;  %1625 = vmatpush1.bf16.msra.mxu1 %v1214_v42  ;;  %v1228_v36 = vld [vmem:[#allocation3 + $0x2e0] sm:$0xff]  ;;  %v1230_v42 = vld [vmem:[#allocation3 + $0x2f0] sm:$0xff] }
 0x1f0   :  { %1462 = vmatprep.subr.bf16.mxu0 %v1217_v52  ;;  %1626 = vmatprep.subr.bf16.mxu1 %v1219_v26  ;;  %v1233_v52 = vld [vmem:[#allocation3 + $0x308] sm:$0xff]  ;;  %v1235_v26 = vld [vmem:[#allocation3 + $0x318] sm:$0xff] }
 0x1f3   :  { %1463 = vmatpush1.bf16.msra.mxu0 %v1216_v34  ;;  %1627 = vmatpush1.bf16.msra.mxu1 %v1218_v33  ;;  %v1232_v34 = vld [vmem:[#allocation3 + $0x300] sm:$0xff]  ;;  %v1234_v33 = vld [vmem:[#allocation3 + $0x310] sm:$0xff] }
 0x1f4   :  { %1464 = vmatprep.subr.bf16.mxu0 %v1221_v20  ;;  %1628 = vmatprep.subr.bf16.mxu1 %v1223_v39  ;;  %v1237_v20 = vld [vmem:[#allocation3 + $0x328] sm:$0xff]  ;;  %v1239_v39 = vld [vmem:[#allocation3 + $0x338] sm:$0xff] }
 0x1f7   :  { %1465 = vmatpush1.bf16.msra.mxu0 %v1220_v61  ;;  %1629 = vmatpush1.bf16.msra.mxu1 %v1222_v22  ;;  %v1236_v61 = vld [vmem:[#allocation3 + $0x320] sm:$0xff]  ;;  %v1238_v22 = vld [vmem:[#allocation3 + $0x330] sm:$0xff] }
 0x1f8   :  { %1466 = vmatprep.subr.bf16.mxu0 %v1225_v62  ;;  %1630 = vmatprep.subr.bf16.mxu1 %v1227_v45  ;;  %v1241_v62 = vld [vmem:[#allocation3 + $0x348] sm:$0xff]  ;;  %v1243_v45 = vld [vmem:[#allocation3 + $0x358] sm:$0xff] }
 0x1fb   :  { %1467 = vmatpush1.bf16.msra.mxu0 %v1224_v60  ;;  %1631 = vmatpush1.bf16.msra.mxu1 %v1226_v51  ;;  %v1240_v60 = vld [vmem:[#allocation3 + $0x340] sm:$0xff]  ;;  %v1242_v51 = vld [vmem:[#allocation3 + $0x350] sm:$0xff] }
 0x1fc   :  { %1468 = vmatprep.subr.bf16.mxu0 %v1229_v48  ;;  %1632 = vmatprep.subr.bf16.mxu1 %v1231_v23  ;;  %v1245_v48 = vld [vmem:[#allocation3 + $0x368] sm:$0xff]  ;;  %v1247_v23 = vld [vmem:[#allocation3 + $0x378] sm:$0xff] }
 0x1ff   :  { %1469 = vmatpush1.bf16.msra.mxu0 %v1228_v36  ;;  %1633 = vmatpush1.bf16.msra.mxu1 %v1230_v42  ;;  %v1244_v36 = vld [vmem:[#allocation3 + $0x360] sm:$0xff]  ;;  %v1246_v42 = vld [vmem:[#allocation3 + $0x370] sm:$0xff] }
 0x200   :  { %1470 = vmatprep.subr.bf16.mxu0 %v1233_v52  ;;  %1634 = vmatprep.subr.bf16.mxu1 %v1235_v26  ;;  %v1249_v52 = vld [vmem:[#allocation3 + $0x388] sm:$0xff]  ;;  %v1251_v26 = vld [vmem:[#allocation3 + $0x398] sm:$0xff] }
 0x203   :  { %1471 = vmatpush1.bf16.msra.mxu0 %v1232_v34  ;;  %1635 = vmatpush1.bf16.msra.mxu1 %v1234_v33  ;;  %v1248_v34 = vld [vmem:[#allocation3 + $0x380] sm:$0xff]  ;;  %v1250_v33 = vld [vmem:[#allocation3 + $0x390] sm:$0xff] }
 0x204   :  { %1472 = vmatprep.subr.bf16.mxu0 %v1237_v20  ;;  %1636 = vmatprep.subr.bf16.mxu1 %v1239_v39  ;;  %v1253_v20 = vld [vmem:[#allocation3 + $0x3a8] sm:$0xff]  ;;  %v1255_v39 = vld [vmem:[#allocation3 + $0x3b8] sm:$0xff] }
 0x207   :  { %1473 = vmatpush1.bf16.msra.mxu0 %v1236_v61  ;;  %1637 = vmatpush1.bf16.msra.mxu1 %v1238_v22  ;;  %v1252_v61 = vld [vmem:[#allocation3 + $0x3a0] sm:$0xff]  ;;  %v1254_v22 = vld [vmem:[#allocation3 + $0x3b0] sm:$0xff] }
 0x208   :  { %1474 = vmatprep.subr.bf16.mxu0 %v1241_v62  ;;  %1638 = vmatprep.subr.bf16.mxu1 %v1243_v45  ;;  %v1257_v62 = vld [vmem:[#allocation3 + $0x3c8] sm:$0xff]  ;;  %v1259_v45 = vld [vmem:[#allocation3 + $0x3d8] sm:$0xff] }
 0x20b   :  { %1475 = vmatpush1.bf16.msra.mxu0 %v1240_v60  ;;  %1639 = vmatpush1.bf16.msra.mxu1 %v1242_v51  ;;  %v1256_v60 = vld [vmem:[#allocation3 + $0x3c0] sm:$0xff]  ;;  %v1258_v51 = vld [vmem:[#allocation3 + $0x3d0] sm:$0xff] }
 0x20c   :  { %1476 = vmatprep.subr.bf16.mxu0 %v1245_v48  ;;  %1640 = vmatprep.subr.bf16.mxu1 %v1247_v23  ;;  %v1261_v48 = vld [vmem:[#allocation3 + $0x3e8] sm:$0xff]  ;;  %v1263_v23 = vld [vmem:[#allocation3 + $0x3f8] sm:$0xff] }
 0x20f   :  { %1477 = vmatpush1.bf16.msra.mxu0 %v1244_v36  ;;  %1641 = vmatpush1.bf16.msra.mxu1 %v1246_v42  ;;  %v1260_v36 = vld [vmem:[#allocation3 + $0x3e0] sm:$0xff]  ;;  %v1262_v42 = vld [vmem:[#allocation3 + $0x3f0] sm:$0xff] }
 0x210   :  { %1478 = vmatprep.subr.bf16.mxu0 %v1249_v52  ;;  %1642 = vmatprep.subr.bf16.mxu1 %v1251_v26  ;;  %v1265_v52 = vld [vmem:[#allocation3 + $0x408] sm:$0xff]  ;;  %v1267_v26 = vld [vmem:[#allocation3 + $0x418] sm:$0xff] }
 0x213   :  { %1479 = vmatpush1.bf16.msra.mxu0 %v1248_v34  ;;  %1643 = vmatpush1.bf16.msra.mxu1 %v1250_v33  ;;  %v6546_v34 = vmax.f32 %v6096_v35, 0.0  ;;  %v1268_v35 = vld [vmem:[#allocation3 + $0x420] sm:$0xff] }
 0x214   :  { %1480 = vmatprep.subr.bf16.mxu0 %v1253_v20  ;;  %1644 = vmatprep.subr.bf16.mxu1 %v1255_v39  ;;  %v1264_v20 = vld [vmem:[#allocation3 + $0x400] sm:$0xff]  ;;  %v1266_v39 = vld [vmem:[#allocation3 + $0x410] sm:$0xff] }
 0x215   :  { %v1130_v33 = vpack.c.bf16 %v6546_v34, %v6546_v34  ;;  %v1281_v34 = vld [vmem:[#allocation3 + $0x488] sm:$0xff] }
 0x217   :  { %1481 = vmatpush1.bf16.msra.mxu0 %v1252_v61  ;;  %1645 = vmatpush1.bf16.msra.mxu1 %v1254_v22  ;;  %v1269_v61 = vld [vmem:[#allocation3 + $0x428] sm:$0xff]  ;;  %v1271_v22 = vld [vmem:[#allocation3 + $0x438] sm:$0xff] }
 0x218   :  { %1482 = vmatprep.subr.bf16.mxu0 %v1257_v62  ;;  %1646 = vmatprep.subr.bf16.mxu1 %v1259_v45  ;;  %v6547_v62 = vmax.f32 %v6088_v49, 0.0  ;;  %v1274_v49 = vld [vmem:[#allocation3 + $0x450] sm:$0xff] }
 0x21a   :  { %v1133_v45 = vpack.c.bf16 %v6547_v62, %v6547_v62  ;;  %v1284_v62 = vld [vmem:[#allocation3 + $0x4a0] sm:$0xff] }
 0x21b   :  { %1483 = vmatpush1.bf16.msra.mxu0 %v1256_v60  ;;  %1647 = vmatpush1.bf16.msra.mxu1 %v1258_v51  ;;  %v1270_v60 = vld [vmem:[#allocation3 + $0x430] sm:$0xff]  ;;  %v1273_v51 = vld [vmem:[#allocation3 + $0x448] sm:$0xff] }
 0x21c   :  { %1484 = vmatprep.subr.bf16.mxu0 %v1261_v48  ;;  %1648 = vmatprep.subr.bf16.mxu1 %v1263_v23  ;;  %v1275_v48 = vld [vmem:[#allocation3 + $0x458] sm:$0xff]  ;;  %v1272_v23 = vld [vmem:[#allocation3 + $0x440] sm:$0xff] }
 0x21f   :  { %1485 = vmatpush1.bf16.msra.mxu0 %v1260_v36  ;;  %1649 = vmatpush1.bf16.msra.mxu1 %v1262_v42  ;;  %v1277_v36 = vld [vmem:[#allocation3 + $0x468] sm:$0xff]  ;;  %v1279_v42 = vld [vmem:[#allocation3 + $0x478] sm:$0xff] }
 0x220   :  { %1495 = vmatprep.subr.bf16.mxu0 %v1265_v52  ;;  %1659 = vmatprep.subr.bf16.mxu1 %v1267_v26  ;;  %v1276_v52 = vld [vmem:[#allocation3 + $0x460] sm:$0xff]  ;;  %v1278_v26 = vld [vmem:[#allocation3 + $0x470] sm:$0xff] }
 0x222   :  { %1487 = vmatmul.mubr.bf16.vlgmr.msra.gmra.mrb[20].mxu0 %v1130_v33  ;;  %1651 = vmatmul.mubr.bf16.vlgmr.msra.gmra.mrb[28].mxu1 %v1130_v33  ;;  %v1283_v33 = vld [vmem:[#allocation3 + $0x498] sm:$0xff] }
 0x223   :  { %1496 = vmatpush1.bf16.msra.mxu0 %v1264_v20  ;;  %1660 = vmatpush1.bf16.msra.mxu1 %v1266_v39  ;;  %v1280_v20 = vld [vmem:[#allocation3 + $0x480] sm:$0xff]  ;;  %v1282_v39 = vld [vmem:[#allocation3 + $0x490] sm:$0xff] }
 0x224   :  { %1497 = vmatprep.subr.bf16.mxu0 %v1269_v61  ;;  %1661 = vmatprep.subr.bf16.mxu1 %v1271_v22  ;;  %v1285_v61 = vld [vmem:[#allocation3 + $0x4a8] sm:$0xff]  ;;  %v1287_v22 = vld [vmem:[#allocation3 + $0x4b8] sm:$0xff] }
 0x225   :  { %1527 = vmatprep.mubr.bf16.mxu0 %v1133_v45  ;;  %1691 = vmatprep.mubr.bf16.mxu1 %v1133_v45  ;;  %v1286_v45 = vld [vmem:[#allocation3 + $0x4b0] sm:$0xff] }
 0x227   :  { %1498 = vmatpush1.bf16.msra.mxu0 %v1268_v35  ;;  %1662 = vmatpush1.bf16.msra.mxu1 %v1270_v60  ;;  %v1289_v35 = vld [vmem:[#allocation3 + $0x4c8] sm:$0xff]  ;;  %v1291_v60 = vld [vmem:[#allocation3 + $0x4d8] sm:$0xff] }
 0x228   :  { %1499 = vmatprep.subr.bf16.mxu0 %v1273_v51  ;;  %1663 = vmatprep.subr.bf16.mxu1 %v1275_v48  ;;  %v1288_v51 = vld [vmem:[#allocation3 + $0x4c0] sm:$0xff]  ;;  %v1290_v48 = vld [vmem:[#allocation3 + $0x4d0] sm:$0xff] }
 0x22b   :  { %1500 = vmatpush1.bf16.msra.mxu0 %v1272_v23  ;;  %1664 = vmatpush1.bf16.msra.mxu1 %v1274_v49  ;;  %v1293_v23 = vld [vmem:[#allocation3 + $0x4e8] sm:$0xff]  ;;  %v1295_v49 = vld [vmem:[#allocation3 + $0x4f8] sm:$0xff] }
 0x22c   :  { %1501 = vmatprep.subr.bf16.mxu0 %v1277_v36  ;;  %1665 = vmatprep.subr.bf16.mxu1 %v1279_v42  ;;  %v1292_v36 = vld [vmem:[#allocation3 + $0x4e0] sm:$0xff]  ;;  %v1294_v42 = vld [vmem:[#allocation3 + $0x4f0] sm:$0xff] }
 0x22f   :  { %1502 = vmatpush1.bf16.msra.mxu0 %v1276_v52  ;;  %1666 = vmatpush1.bf16.msra.mxu1 %v1278_v26  ;;  %v1297_v52 = vld [vmem:[#allocation3 + $0x508] sm:$0xff]  ;;  %v1299_v26 = vld [vmem:[#allocation3 + $0x518] sm:$0xff] }
 0x230   :  { %1503 = vmatprep.subr.bf16.mxu0 %v1281_v34  ;;  %1667 = vmatprep.subr.bf16.mxu1 %v1283_v33  ;;  %v1296_v34 = vld [vmem:[#allocation3 + $0x500] sm:$0xff]  ;;  %v1298_v33 = vld [vmem:[#allocation3 + $0x510] sm:$0xff] }
 0x233   :  { %1504 = vmatpush1.bf16.msra.mxu0 %v1280_v20  ;;  %1668 = vmatpush1.bf16.msra.mxu1 %v1282_v39  ;;  %v1301_v20 = vld [vmem:[#allocation3 + $0x528] sm:$0xff]  ;;  %v1303_v39 = vld [vmem:[#allocation3 + $0x538] sm:$0xff] }
 0x234   :  { %1505 = vmatprep.subr.bf16.mxu0 %v1285_v61  ;;  %1669 = vmatprep.subr.bf16.mxu1 %v1287_v22  ;;  %v1300_v61 = vld [vmem:[#allocation3 + $0x520] sm:$0xff]  ;;  %v1302_v22 = vld [vmem:[#allocation3 + $0x530] sm:$0xff] }
 0x237   :  { %1506 = vmatpush1.bf16.msra.mxu0 %v1284_v62  ;;  %1670 = vmatpush1.bf16.msra.mxu1 %v1286_v45  ;;  %v1305_v62 = vld [vmem:[#allocation3 + $0x548] sm:$0xff]  ;;  %v1307_v45 = vld [vmem:[#allocation3 + $0x558] sm:$0xff] }
 0x238   :  { %1507 = vmatprep.subr.bf16.mxu0 %v1289_v35  ;;  %1671 = vmatprep.subr.bf16.mxu1 %v1291_v60  ;;  %v1304_v35 = vld [vmem:[#allocation3 + $0x540] sm:$0xff]  ;;  %v1306_v60 = vld [vmem:[#allocation3 + $0x550] sm:$0xff] }
 0x23b   :  { %1508 = vmatpush1.bf16.msra.mxu0 %v1288_v51  ;;  %1672 = vmatpush1.bf16.msra.mxu1 %v1290_v48  ;;  %v1309_v51 = vld [vmem:[#allocation3 + $0x568] sm:$0xff]  ;;  %v1311_v48 = vld [vmem:[#allocation3 + $0x578] sm:$0xff] }
 0x23c   :  { %1509 = vmatprep.subr.bf16.mxu0 %v1293_v23  ;;  %1673 = vmatprep.subr.bf16.mxu1 %v1295_v49  ;;  %v1308_v23 = vld [vmem:[#allocation3 + $0x560] sm:$0xff]  ;;  %v1310_v49 = vld [vmem:[#allocation3 + $0x570] sm:$0xff] }
 0x23f   :  { %1510 = vmatpush1.bf16.msra.mxu0 %v1292_v36  ;;  %1674 = vmatpush1.bf16.msra.mxu1 %v1294_v42  ;;  %v1313_v36 = vld [vmem:[#allocation3 + $0x588] sm:$0xff]  ;;  %v1315_v42 = vld [vmem:[#allocation3 + $0x598] sm:$0xff] }
 0x240   :  { %1511 = vmatprep.subr.bf16.mxu0 %v1297_v52  ;;  %1675 = vmatprep.subr.bf16.mxu1 %v1299_v26  ;;  %v1312_v52 = vld [vmem:[#allocation3 + $0x580] sm:$0xff]  ;;  %v1314_v26 = vld [vmem:[#allocation3 + $0x590] sm:$0xff] }
 0x243   :  { %1512 = vmatpush1.bf16.msra.mxu0 %v1296_v34  ;;  %1676 = vmatpush1.bf16.msra.mxu1 %v1298_v33  ;;  %v1317_v34 = vld [vmem:[#allocation3 + $0x5a8] sm:$0xff]  ;;  %v1319_v33 = vld [vmem:[#allocation3 + $0x5b8] sm:$0xff] }
 0x244   :  { %1513 = vmatprep.subr.bf16.mxu0 %v1301_v20  ;;  %1677 = vmatprep.subr.bf16.mxu1 %v1303_v39  ;;  %v1316_v20 = vld [vmem:[#allocation3 + $0x5a0] sm:$0xff]  ;;  %v1318_v39 = vld [vmem:[#allocation3 + $0x5b0] sm:$0xff] }
 0x247   :  { %1514 = vmatpush1.bf16.msra.mxu0 %v1300_v61  ;;  %1678 = vmatpush1.bf16.msra.mxu1 %v1302_v22  ;;  %v1321_v61 = vld [vmem:[#allocation3 + $0x5c8] sm:$0xff]  ;;  %v1323_v22 = vld [vmem:[#allocation3 + $0x5d8] sm:$0xff] }
 0x248   :  { %1515 = vmatprep.subr.bf16.mxu0 %v1305_v62  ;;  %1679 = vmatprep.subr.bf16.mxu1 %v1307_v45  ;;  %v1320_v62 = vld [vmem:[#allocation3 + $0x5c0] sm:$0xff]  ;;  %v1322_v45 = vld [vmem:[#allocation3 + $0x5d0] sm:$0xff] }
 0x24b   :  { %1516 = vmatpush1.bf16.msra.mxu0 %v1304_v35  ;;  %1680 = vmatpush1.bf16.msra.mxu1 %v1306_v60  ;;  %v1325_v35 = vld [vmem:[#allocation3 + $0x5e8] sm:$0xff]  ;;  %v1327_v60 = vld [vmem:[#allocation3 + $0x5f8] sm:$0xff] }
 0x24c   :  { %1517 = vmatprep.subr.bf16.mxu0 %v1309_v51  ;;  %1681 = vmatprep.subr.bf16.mxu1 %v1311_v48  ;;  %v1324_v51 = vld [vmem:[#allocation3 + $0x5e0] sm:$0xff]  ;;  %v1326_v48 = vld [vmem:[#allocation3 + $0x5f0] sm:$0xff] }
 0x24f   :  { %1518 = vmatpush1.bf16.msra.mxu0 %v1308_v23  ;;  %1682 = vmatpush1.bf16.msra.mxu1 %v1310_v49  ;;  %v1329_v23 = vld [vmem:[#allocation3 + $0x608] sm:$0xff]  ;;  %v1331_v49 = vld [vmem:[#allocation3 + $0x618] sm:$0xff] }
 0x250   :  { %1519 = vmatprep.subr.bf16.mxu0 %v1313_v36  ;;  %1683 = vmatprep.subr.bf16.mxu1 %v1315_v42  ;;  %v6548_v36 = vmax.f32 %v6086_v57, 0.0  ;;  %v1332_v57 = vld [vmem:[#allocation3 + $0x620] sm:$0xff] }
 0x252   :  { %v1132_v42 = vpack.c.bf16 %v6548_v36, %v6548_v36  ;;  %v1344_v36 = vld [vmem:[#allocation3 + $0x680] sm:$0xff] }
 0x253   :  { %1520 = vmatpush1.bf16.msra.mxu0 %v1312_v52  ;;  %1684 = vmatpush1.bf16.msra.mxu1 %v1314_v26  ;;  %v1328_v52 = vld [vmem:[#allocation3 + $0x600] sm:$0xff]  ;;  %v1330_v26 = vld [vmem:[#allocation3 + $0x610] sm:$0xff] }
 0x254   :  { %1521 = vmatprep.subr.bf16.mxu0 %v1317_v34  ;;  %1685 = vmatprep.subr.bf16.mxu1 %v1319_v33  ;;  %v1333_v34 = vld [vmem:[#allocation3 + $0x628] sm:$0xff]  ;;  %v1335_v33 = vld [vmem:[#allocation3 + $0x638] sm:$0xff] }
 0x257   :  { %1522 = vmatpush1.bf16.msra.mxu0 %v1316_v20  ;;  %1686 = vmatpush1.bf16.msra.mxu1 %v1318_v39  ;;  %v6549_v20 = vmax.f32 %v6120_v40, 0.0  ;;  %v1338_v40 = vld [vmem:[#allocation3 + $0x650] sm:$0xff] }
 0x258   :  { %1523 = vmatprep.subr.bf16.mxu0 %v1321_v61  ;;  %1687 = vmatprep.subr.bf16.mxu1 %v1323_v22  ;;  %v1334_v61 = vld [vmem:[#allocation3 + $0x630] sm:$0xff]  ;;  %v1337_v22 = vld [vmem:[#allocation3 + $0x648] sm:$0xff] }
 0x259   :  { %v1135_v39 = vpack.c.bf16 %v6549_v20, %v6549_v20  ;;  %v1353_v20 = vld [vmem:[#allocation3 + $0x6c8] sm:$0xff] }
 0x25b   :  { %1524 = vmatpush1.bf16.msra.mxu0 %v1320_v62  ;;  %1688 = vmatpush1.bf16.msra.mxu1 %v1322_v45  ;;  %v1339_v62 = vld [vmem:[#allocation3 + $0x658] sm:$0xff]  ;;  %v1336_v45 = vld [vmem:[#allocation3 + $0x640] sm:$0xff] }
 0x25c   :  { %1525 = vmatprep.subr.bf16.mxu0 %v1325_v35  ;;  %1689 = vmatprep.subr.bf16.mxu1 %v1327_v60  ;;  %v1341_v35 = vld [vmem:[#allocation3 + $0x668] sm:$0xff]  ;;  %v1343_v60 = vld [vmem:[#allocation3 + $0x678] sm:$0xff] }
 0x25f   :  { %1526 = vmatpush1.bf16.msra.mxu0 %v1324_v51  ;;  %1690 = vmatpush1.bf16.msra.mxu1 %v1326_v48  ;;  %v1340_v51 = vld [vmem:[#allocation3 + $0x660] sm:$0xff]  ;;  %v1342_v48 = vld [vmem:[#allocation3 + $0x670] sm:$0xff] }
 0x260   :  { %1536 = vmatprep.subr.bf16.mxu0 %v1329_v23  ;;  %1700 = vmatprep.subr.bf16.mxu1 %v1331_v49  ;;  %v1345_v23 = vld [vmem:[#allocation3 + $0x688] sm:$0xff]  ;;  %v1347_v49 = vld [vmem:[#allocation3 + $0x698] sm:$0xff] }
 0x262   :  { %1528 = vmatmul.mubr.bf16.vlgmr.msra.gmra.mrb[20].mxu0 %v1132_v42  ;;  %1692 = vmatmul.mubr.bf16.vlgmr.msra.gmra.mrb[28].mxu1 %v1132_v42  ;;  %v1346_v42 = vld [vmem:[#allocation3 + $0x690] sm:$0xff] }
 0x263   :  { %1537 = vmatpush1.bf16.msra.mxu0 %v1328_v52  ;;  %1701 = vmatpush1.bf16.msra.mxu1 %v1330_v26  ;;  %v1349_v52 = vld [vmem:[#allocation3 + $0x6a8] sm:$0xff]  ;;  %v1351_v26 = vld [vmem:[#allocation3 + $0x6b8] sm:$0xff] }
 0x264   :  { %1538 = vmatprep.subr.bf16.mxu0 %v1333_v34  ;;  %1702 = vmatprep.subr.bf16.mxu1 %v1335_v33  ;;  %v1348_v34 = vld [vmem:[#allocation3 + $0x6a0] sm:$0xff]  ;;  %v1350_v33 = vld [vmem:[#allocation3 + $0x6b0] sm:$0xff] }
 0x265   :  { %1568 = vmatprep.mubr.bf16.mxu0 %v1135_v39  ;;  %1732 = vmatprep.mubr.bf16.mxu1 %v1135_v39  ;;  %v1355_v39 = vld [vmem:[#allocation3 + $0x6d8] sm:$0xff] }
 0x267   :  { %1539 = vmatpush1.bf16.msra.mxu0 %v1332_v57  ;;  %1703 = vmatpush1.bf16.msra.mxu1 %v1334_v61  ;;  %v1352_v57 = vld [vmem:[#allocation3 + $0x6c0] sm:$0xff]  ;;  %v1354_v61 = vld [vmem:[#allocation3 + $0x6d0] sm:$0xff] }
 0x268   :  { %1540 = vmatprep.subr.bf16.mxu0 %v1337_v22  ;;  %1704 = vmatprep.subr.bf16.mxu1 %v1339_v62  ;;  %v1357_v22 = vld [vmem:[#allocation3 + $0x6e8] sm:$0xff]  ;;  %v1359_v62 = vld [vmem:[#allocation3 + $0x6f8] sm:$0xff] }
 0x26b   :  { %1541 = vmatpush1.bf16.msra.mxu0 %v1336_v45  ;;  %1705 = vmatpush1.bf16.msra.mxu1 %v1338_v40  ;;  %v1356_v45 = vld [vmem:[#allocation3 + $0x6e0] sm:$0xff]  ;;  %v1358_v40 = vld [vmem:[#allocation3 + $0x6f0] sm:$0xff] }
 0x26c   :  { %1542 = vmatprep.subr.bf16.mxu0 %v1341_v35  ;;  %1706 = vmatprep.subr.bf16.mxu1 %v1343_v60  ;;  %v1361_v35 = vld [vmem:[#allocation3 + $0x708] sm:$0xff]  ;;  %v1363_v60 = vld [vmem:[#allocation3 + $0x718] sm:$0xff] }
 0x26f   :  { %1543 = vmatpush1.bf16.msra.mxu0 %v1340_v51  ;;  %1707 = vmatpush1.bf16.msra.mxu1 %v1342_v48  ;;  %v1360_v51 = vld [vmem:[#allocation3 + $0x700] sm:$0xff]  ;;  %v1362_v48 = vld [vmem:[#allocation3 + $0x710] sm:$0xff] }
 0x270   :  { %1544 = vmatprep.subr.bf16.mxu0 %v1345_v23  ;;  %1708 = vmatprep.subr.bf16.mxu1 %v1347_v49  ;;  %v1365_v23 = vld [vmem:[#allocation3 + $0x728] sm:$0xff]  ;;  %v1367_v49 = vld [vmem:[#allocation3 + $0x738] sm:$0xff] }
 0x273   :  { %1545 = vmatpush1.bf16.msra.mxu0 %v1344_v36  ;;  %1709 = vmatpush1.bf16.msra.mxu1 %v1346_v42  ;;  %v1364_v36 = vld [vmem:[#allocation3 + $0x720] sm:$0xff]  ;;  %v1366_v42 = vld [vmem:[#allocation3 + $0x730] sm:$0xff] }
 0x274   :  { %1546 = vmatprep.subr.bf16.mxu0 %v1349_v52  ;;  %1710 = vmatprep.subr.bf16.mxu1 %v1351_v26  ;;  %v1369_v52 = vld [vmem:[#allocation3 + $0x748] sm:$0xff]  ;;  %v1371_v26 = vld [vmem:[#allocation3 + $0x758] sm:$0xff] }
 0x277   :  { %1547 = vmatpush1.bf16.msra.mxu0 %v1348_v34  ;;  %1711 = vmatpush1.bf16.msra.mxu1 %v1350_v33  ;;  %v1368_v34 = vld [vmem:[#allocation3 + $0x740] sm:$0xff]  ;;  %v1370_v33 = vld [vmem:[#allocation3 + $0x750] sm:$0xff] }
 0x278   :  { %1548 = vmatprep.subr.bf16.mxu0 %v1353_v20  ;;  %1712 = vmatprep.subr.bf16.mxu1 %v1355_v39  ;;  %v1373_v20 = vld [vmem:[#allocation3 + $0x768] sm:$0xff]  ;;  %v1375_v39 = vld [vmem:[#allocation3 + $0x778] sm:$0xff] }
 0x27b   :  { %1549 = vmatpush1.bf16.msra.mxu0 %v1352_v57  ;;  %1713 = vmatpush1.bf16.msra.mxu1 %v1354_v61  ;;  %v1372_v57 = vld [vmem:[#allocation3 + $0x760] sm:$0xff]  ;;  %v1374_v61 = vld [vmem:[#allocation3 + $0x770] sm:$0xff] }
 0x27c   :  { %1550 = vmatprep.subr.bf16.mxu0 %v1357_v22  ;;  %1714 = vmatprep.subr.bf16.mxu1 %v1359_v62  ;;  %v1377_v22 = vld [vmem:[#allocation3 + $0x788] sm:$0xff]  ;;  %v1379_v62 = vld [vmem:[#allocation3 + $0x798] sm:$0xff] }
 0x27f   :  { %1551 = vmatpush1.bf16.msra.mxu0 %v1356_v45  ;;  %1715 = vmatpush1.bf16.msra.mxu1 %v1358_v40  ;;  %v1376_v45 = vld [vmem:[#allocation3 + $0x780] sm:$0xff]  ;;  %v1378_v40 = vld [vmem:[#allocation3 + $0x790] sm:$0xff] }
 0x280   :  { %1552 = vmatprep.subr.bf16.mxu0 %v1361_v35  ;;  %1716 = vmatprep.subr.bf16.mxu1 %v1363_v60  ;;  %v1381_v35 = vld [vmem:[#allocation3 + $0x7a8] sm:$0xff]  ;;  %v1383_v60 = vld [vmem:[#allocation3 + $0x7b8] sm:$0xff] }
 0x283   :  { %1553 = vmatpush1.bf16.msra.mxu0 %v1360_v51  ;;  %1717 = vmatpush1.bf16.msra.mxu1 %v1362_v48  ;;  %v1380_v51 = vld [vmem:[#allocation3 + $0x7a0] sm:$0xff]  ;;  %v1382_v48 = vld [vmem:[#allocation3 + $0x7b0] sm:$0xff] }
 0x284   :  { %1554 = vmatprep.subr.bf16.mxu0 %v1365_v23  ;;  %1718 = vmatprep.subr.bf16.mxu1 %v1367_v49  ;;  %v1385_v23 = vld [vmem:[#allocation3 + $0x7c8] sm:$0xff]  ;;  %v1387_v49 = vld [vmem:[#allocation3 + $0x7d8] sm:$0xff] }
 0x287   :  { %1555 = vmatpush1.bf16.msra.mxu0 %v1364_v36  ;;  %1719 = vmatpush1.bf16.msra.mxu1 %v1366_v42  ;;  %v1384_v36 = vld [vmem:[#allocation3 + $0x7c0] sm:$0xff]  ;;  %v1386_v42 = vld [vmem:[#allocation3 + $0x7d0] sm:$0xff] }
 0x288   :  { %1556 = vmatprep.subr.bf16.mxu0 %v1369_v52  ;;  %1720 = vmatprep.subr.bf16.mxu1 %v1371_v26  ;;  %v1389_v52 = vld [vmem:[#allocation3 + $0x7e8] sm:$0xff]  ;;  %v1391_v26 = vld [vmem:[#allocation3 + $0x7f8] sm:$0xff] }
 0x28b   :  { %1557 = vmatpush1.bf16.msra.mxu0 %v1368_v34  ;;  %1721 = vmatpush1.bf16.msra.mxu1 %v1370_v33  ;;  %v1388_v34 = vld [vmem:[#allocation3 + $0x7e0] sm:$0xff]  ;;  %v1390_v33 = vld [vmem:[#allocation3 + $0x7f0] sm:$0xff] }
 0x28c   :  { %1558 = vmatprep.subr.bf16.mxu0 %v1373_v20  ;;  %1722 = vmatprep.subr.bf16.mxu1 %v1375_v39  ;;  %v6550_v20 = vmax.f32 %v6118_v32, 0.0 }
 0x28e   :  { %v1134_v39 = vpack.c.bf16 %v6550_v20, %v6550_v20 }
 0x28f   :  { %1559 = vmatpush1.bf16.msra.mxu0 %v1372_v57  ;;  %1723 = vmatpush1.bf16.msra.mxu1 %v1374_v61  ;;  %v1127_v57 = vld [vmem:[#allocation13 + $0x18] sm:$0xf] }
 0x290   :  { %1560 = vmatprep.subr.bf16.mxu0 %v1377_v22  ;;  %1724 = vmatprep.subr.bf16.mxu1 %v1379_v62  ;;  %v1396_v61 = vrot.slane %v1127_v57, %v6064_v54  ;;  %v1404_v22 = vrot.slane %v1127_v57, %v6082_v38  ;;  %v1400_v62 = vrot.slane %v1127_v57, %v6066_v56 }
 0x293   :  { %1561 = vmatpush1.bf16.msra.mxu0 %v1376_v45  ;;  %1725 = vmatpush1.bf16.msra.mxu1 %v1378_v40  ;;  %v1408_v45 = vrot.slane %v1127_v57, %v6084_v37 }
 0x294   :  { %1562 = vmatprep.subr.bf16.mxu0 %v1381_v35  ;;  %1726 = vmatprep.subr.bf16.mxu1 %v1383_v60 }
 0x297   :  { %1563 = vmatpush1.bf16.msra.mxu0 %v1380_v51  ;;  %1727 = vmatpush1.bf16.msra.mxu1 %v1382_v48 }
 0x298   :  { %1564 = vmatprep.subr.bf16.mxu0 %v1385_v23  ;;  %1728 = vmatprep.subr.bf16.mxu1 %v1387_v49 }
 0x29b   :  { %1565 = vmatpush1.bf16.msra.mxu0 %v1384_v36  ;;  %1729 = vmatpush1.bf16.msra.mxu1 %v1386_v42 }
 0x29c   :  { %1566 = vmatprep.subr.bf16.mxu0 %v1389_v52  ;;  %1730 = vmatprep.subr.bf16.mxu1 %v1391_v26 }
 0x29f   :  { %1567 = vmatpush1.bf16.msra.mxu0 %v1388_v34  ;;  %1731 = vmatpush1.bf16.msra.mxu1 %v1390_v33 }
 0x2a2   :  { %1569 = vmatmul.mubr.bf16.vlgmr.msra.gmra.mrb[20].mxu0 %v1134_v39  ;;  %1733 = vmatmul.mubr.bf16.vlgmr.msra.gmra.mrb[28].mxu1 %v1134_v39 }
 0x375   :  { %v1570_v40 = vpop.f32.mrb[20].mxu0  ;;  %v1734_v35 = vpop.f32.mrb[28].mxu1 }
 0x376   :  { %v6214_v60 = vadd.f32 %v1570_v40, %v1396_v61  ;;  %v6216_v32 = vadd.f32 %v1734_v35, %v1404_v22  ;;  %v1572_v51 = vpop.f32.mrb[21].mxu0  ;;  %v1736_v48 = vpop.f32.mrb[29].mxu1 }
 0x377   :  { %v5319_v23 = vadd.f32 %v1572_v51, %v1400_v62  ;;  %v6218_v49 = vadd.f32 %v1736_v48, %v1408_v45  ;;  %v1574_v36 = vpop.f32.mrb[22].mxu0  ;;  %v1738_v42 = vpop.f32.mrb[30].mxu1 }
 0x378   :  { %v1741_v52 = vmax.f32 %v6214_v60, 0.0  ;;  %v1743_v26 = vmax.f32 %v6216_v32, 0.0  ;;  %v1575_v34 = vpop.f32.mrb[23].mxu0  ;;  %v1739_v33 = vpop.f32.mrb[31].mxu1 }
 0x379   :  { %v1742_v20 = vmax.f32 %v5319_v23, 0.0  ;;  %v1744_v39 = vmax.f32 %v6218_v49, 0.0 }
 0x37a   :  { %5605 = dma.done.wait [#allocation9 + $0x2], 8192 }
 0x37b   :  { %5606 = vsyncadd [#allocation9 + $0x2], 4294959104  ;;  %v1751_v57 = vpack.c.bf16 %v1742_v20, %v1742_v20  ;;  %v1755_v61 = vld [vmem:[#allocation4 + $0x8] sm:$0xff]  ;;  %v1754_v22 = vld [vmem:[#allocation4] sm:$0xff]  ;;  %5252 = vmatprep.subr.bf16.mxu1 %v5806_v8 }
 0x37c   :  { %v1757_v62 = vld [vmem:[#allocation4 + $0x18] sm:$0xff]  ;;  %1829 = vmatprep.subr.bf16.mxu0 %v1755_v61  ;;  %v1756_v45 = vld [vmem:[#allocation4 + $0x10] sm:$0xff]  ;;  %v1759_v40 = vld [vmem:[#allocation4 + $0x28] sm:$0xff] }
 0x37d   :  { %1861 = vmatprep.mubr.bf16.mxu0 %v1751_v57  ;;  %1830 = vmatpush1.bf16.msra.mxu0 %v1754_v22  ;;  %v1758_v35 = vld [vmem:[#allocation4 + $0x20] sm:$0xff]  ;;  %v1761_v51 = vld [vmem:[#allocation4 + $0x38] sm:$0xff]  ;;  %v1760_v48 = vld [vmem:[#allocation4 + $0x30] sm:$0xff] }
 0x37e   :  { %1831 = vmatprep.subr.bf16.mxu0 %v1757_v62  ;;  %v1763_v23 = vld [vmem:[#allocation4 + $0x48] sm:$0xff]  ;;  %v1762_v36 = vld [vmem:[#allocation4 + $0x40] sm:$0xff]  ;;  %v1765_v42 = vld [vmem:[#allocation4 + $0x58] sm:$0xff] }
 0x37f   :  { %v1764_v34 = vld [vmem:[#allocation4 + $0x50] sm:$0xff]  ;;  %v1767_v33 = vld [vmem:[#allocation4 + $0x68] sm:$0xff]  ;;  %v1766_v20 = vld [vmem:[#allocation4 + $0x60] sm:$0xff] }
 0x380   :  { %v1769_v57 = vld [vmem:[#allocation4 + $0x78] sm:$0xff]  ;;  %v1768_v61 = vld [vmem:[#allocation4 + $0x70] sm:$0xff]  ;;  %v1771_v22 = vld [vmem:[#allocation4 + $0x88] sm:$0xff] }
 0x381   :  { %1832 = vmatpush1.bf16.msra.mxu0 %v1756_v45  ;;  %v1770_v62 = vld [vmem:[#allocation4 + $0x80] sm:$0xff]  ;;  %v1773_v45 = vld [vmem:[#allocation4 + $0x98] sm:$0xff] }
 0x382   :  { %1833 = vmatprep.subr.bf16.mxu0 %v1759_v40  ;;  %v1772_v40 = vld [vmem:[#allocation4 + $0x90] sm:$0xff]  ;;  %v1793_v60 = vld [vmem:[#allocation4 + $0x138] sm:$0xff]  ;;  %v1794_v49 = vld [vmem:[#allocation4 + $0x140] sm:$0xff] }
 0x385   :  { %1834 = vmatpush1.bf16.msra.mxu0 %v1758_v35  ;;  %v1775_v35 = vld [vmem:[#allocation4 + $0xa8] sm:$0xff] }
 0x386   :  { %1835 = vmatprep.subr.bf16.mxu0 %v1761_v51  ;;  %v1774_v51 = vld [vmem:[#allocation4 + $0xa0] sm:$0xff] }
 0x389   :  { %1836 = vmatpush1.bf16.msra.mxu0 %v1760_v48  ;;  %v1777_v48 = vld [vmem:[#allocation4 + $0xb8] sm:$0xff] }
 0x38a   :  { %1837 = vmatprep.subr.bf16.mxu0 %v1763_v23  ;;  %v1776_v23 = vld [vmem:[#allocation4 + $0xb0] sm:$0xff] }
 0x38d   :  { %1838 = vmatpush1.bf16.msra.mxu0 %v1762_v36  ;;  %v1779_v36 = vld [vmem:[#allocation4 + $0xc8] sm:$0xff] }
 0x38e   :  { %1839 = vmatprep.subr.bf16.mxu0 %v1765_v42  ;;  %v1778_v42 = vld [vmem:[#allocation4 + $0xc0] sm:$0xff] }
 0x391   :  { %1840 = vmatpush1.bf16.msra.mxu0 %v1764_v34  ;;  %v1781_v34 = vld [vmem:[#allocation4 + $0xd8] sm:$0xff] }
 0x392   :  { %1841 = vmatprep.subr.bf16.mxu0 %v1767_v33  ;;  %v1780_v33 = vld [vmem:[#allocation4 + $0xd0] sm:$0xff] }
 0x395   :  { %1842 = vmatpush1.bf16.msra.mxu0 %v1766_v20  ;;  %v1783_v20 = vld [vmem:[#allocation4 + $0xe8] sm:$0xff] }
 0x396   :  { %1843 = vmatprep.subr.bf16.mxu0 %v1769_v57  ;;  %v1782_v57 = vld [vmem:[#allocation4 + $0xe0] sm:$0xff] }
 0x399   :  { %1844 = vmatpush1.bf16.msra.mxu0 %v1768_v61  ;;  %v1785_v61 = vld [vmem:[#allocation4 + $0xf8] sm:$0xff] }
 0x39a   :  { %1845 = vmatprep.subr.bf16.mxu0 %v1771_v22  ;;  %v1784_v22 = vld [vmem:[#allocation4 + $0xf0] sm:$0xff] }
 0x39d   :  { %1846 = vmatpush1.bf16.msra.mxu0 %v1770_v62  ;;  %v1787_v62 = vld [vmem:[#allocation4 + $0x108] sm:$0xff] }
 0x39e   :  { %1847 = vmatprep.subr.bf16.mxu0 %v1773_v45  ;;  %v1750_v45 = vpack.c.bf16 %v1741_v52, %v1741_v52  ;;  %v1792_v52 = vld [vmem:[#allocation4 + $0x130] sm:$0xff] }
 0x3a1   :  { %1848 = vmatpush1.bf16.msra.mxu0 %v1772_v40  ;;  %v1753_v40 = vpack.c.bf16 %v1744_v39, %v1744_v39  ;;  %v1797_v39 = vld [vmem:[#allocation4 + $0x158] sm:$0xff] }
 0x3a2   :  { %1849 = vmatprep.subr.bf16.mxu0 %v1775_v35  ;;  %v1786_v35 = vld [vmem:[#allocation4 + $0x100] sm:$0xff] }
 0x3a5   :  { %1850 = vmatpush1.bf16.msra.mxu0 %v1774_v51  ;;  %v1789_v51 = vld [vmem:[#allocation4 + $0x118] sm:$0xff] }
 0x3a6   :  { %1851 = vmatprep.subr.bf16.mxu0 %v1777_v48  ;;  %v1788_v48 = vld [vmem:[#allocation4 + $0x110] sm:$0xff] }
 0x3a9   :  { %1852 = vmatpush1.bf16.msra.mxu0 %v1776_v23  ;;  %v1791_v23 = vld [vmem:[#allocation4 + $0x128] sm:$0xff] }
 0x3aa   :  { %1853 = vmatprep.subr.bf16.mxu0 %v1779_v36  ;;  %v1790_v36 = vld [vmem:[#allocation4 + $0x120] sm:$0xff] }
 0x3ad   :  { %1854 = vmatpush1.bf16.msra.mxu0 %v1778_v42  ;;  %v1795_v42 = vld [vmem:[#allocation4 + $0x148] sm:$0xff] }
 0x3ae   :  { %1855 = vmatprep.subr.bf16.mxu0 %v1781_v34  ;;  %v1796_v34 = vld [vmem:[#allocation4 + $0x150] sm:$0xff] }
 0x3b1   :  { %1856 = vmatpush1.bf16.msra.mxu0 %v1780_v33  ;;  %v1799_v33 = vld [vmem:[#allocation4 + $0x168] sm:$0xff] }
 0x3b2   :  { %1857 = vmatprep.subr.bf16.mxu0 %v1783_v20  ;;  %v1798_v20 = vld [vmem:[#allocation4 + $0x160] sm:$0xff] }
 0x3b5   :  { %1858 = vmatpush1.bf16.msra.mxu0 %v1782_v57  ;;  %v1801_v57 = vld [vmem:[#allocation4 + $0x178] sm:$0xff] }
 0x3b6   :  { %1859 = vmatprep.subr.bf16.mxu0 %v1785_v61  ;;  %v1800_v61 = vld [vmem:[#allocation4 + $0x170] sm:$0xff] }
 0x3b9   :  { %1860 = vmatpush1.bf16.msra.mxu0 %v1784_v22  ;;  %v1803_v22 = vld [vmem:[#allocation4 + $0x188] sm:$0xff] }
 0x3ba   :  { %1870 = vmatprep.subr.bf16.mxu0 %v1787_v62  ;;  %v1802_v62 = vld [vmem:[#allocation4 + $0x180] sm:$0xff] }
 0x3bc   :  { %1862 = vmatmul.mubr.bf16.vlgmr.msra.gmra.mrb[24].mxu0 %v1750_v45  ;;  %v1805_v45 = vld [vmem:[#allocation4 + $0x198] sm:$0xff] }
 0x3bd   :  { %1871 = vmatpush1.bf16.msra.mxu0 %v1786_v35  ;;  %1902 = vmatprep.mubr.bf16.mxu0 %v1753_v40  ;;  %v1804_v40 = vld [vmem:[#allocation4 + $0x190] sm:$0xff]  ;;  %v1807_v35 = vld [vmem:[#allocation4 + $0x1a8] sm:$0xff] }
 0x3be   :  { %1872 = vmatprep.subr.bf16.mxu0 %v1789_v51  ;;  %v1806_v51 = vld [vmem:[#allocation4 + $0x1a0] sm:$0xff] }
 0x3c1   :  { %1873 = vmatpush1.bf16.msra.mxu0 %v1788_v48  ;;  %v1809_v48 = vld [vmem:[#allocation4 + $0x1b8] sm:$0xff] }
 0x3c2   :  { %1874 = vmatprep.subr.bf16.mxu0 %v1791_v23  ;;  %v1808_v23 = vld [vmem:[#allocation4 + $0x1b0] sm:$0xff] }
 0x3c5   :  { %1875 = vmatpush1.bf16.msra.mxu0 %v1790_v36  ;;  %v1811_v36 = vld [vmem:[#allocation4 + $0x1c8] sm:$0xff] }
 0x3c6   :  { %1876 = vmatprep.subr.bf16.mxu0 %v1793_v60  ;;  %v1810_v60 = vld [vmem:[#allocation4 + $0x1c0] sm:$0xff] }
 0x3c9   :  { %1877 = vmatpush1.bf16.msra.mxu0 %v1792_v52  ;;  %v1813_v52 = vld [vmem:[#allocation4 + $0x1d8] sm:$0xff] }
 0x3ca   :  { %1878 = vmatprep.subr.bf16.mxu0 %v1795_v42  ;;  %v1812_v42 = vld [vmem:[#allocation4 + $0x1d0] sm:$0xff] }
 0x3cd   :  { %1879 = vmatpush1.bf16.msra.mxu0 %v1794_v49  ;;  %v1815_v49 = vld [vmem:[#allocation4 + $0x1e8] sm:$0xff] }
 0x3ce   :  { %1880 = vmatprep.subr.bf16.mxu0 %v1797_v39  ;;  %v1814_v39 = vld [vmem:[#allocation4 + $0x1e0] sm:$0xff] }
 0x3d1   :  { %1881 = vmatpush1.bf16.msra.mxu0 %v1796_v34  ;;  %v1817_v34 = vld [vmem:[#allocation4 + $0x1f8] sm:$0xff] }
 0x3d2   :  { %1882 = vmatprep.subr.bf16.mxu0 %v1799_v33  ;;  %v1816_v33 = vld [vmem:[#allocation4 + $0x1f0] sm:$0xff] }
 0x3d5   :  { %1883 = vmatpush1.bf16.msra.mxu0 %v1798_v20  ;;  %v1752_v20 = vpack.c.bf16 %v1743_v26, %v1743_v26 }
 0x3d6   :  { %1884 = vmatprep.subr.bf16.mxu0 %v1801_v57  ;;  %v1749_v57 = vld [vmem:[#allocation13 + $0x1c] sm:$0x3] }
 0x3d9   :  { %1885 = vmatpush1.bf16.msra.mxu0 %v1800_v61  ;;  %v1822_v61 = vrot.slane %v1749_v57, %v6064_v54 }
 0x3da   :  { %1886 = vmatprep.subr.bf16.mxu0 %v1803_v22  ;;  %v1826_v22 = vrot.slane %v1749_v57, %v6066_v56 }
 0x3dd   :  { %1887 = vmatpush1.bf16.msra.mxu0 %v1802_v62 }
 0x3de   :  { %1888 = vmatprep.subr.bf16.mxu0 %v1805_v45 }
 0x3e1   :  { %1889 = vmatpush1.bf16.msra.mxu0 %v1804_v40 }
 0x3e2   :  { %1890 = vmatprep.subr.bf16.mxu0 %v1807_v35 }
 0x3e5   :  { %1891 = vmatpush1.bf16.msra.mxu0 %v1806_v51 }
 0x3e6   :  { %1892 = vmatprep.subr.bf16.mxu0 %v1809_v48 }
 0x3e9   :  { %1893 = vmatpush1.bf16.msra.mxu0 %v1808_v23 }
 0x3ea   :  { %1894 = vmatprep.subr.bf16.mxu0 %v1811_v36 }
 0x3ed   :  { %1895 = vmatpush1.bf16.msra.mxu0 %v1810_v60 }
 0x3ee   :  { %1896 = vmatprep.subr.bf16.mxu0 %v1813_v52 }
 0x3f1   :  { %1897 = vmatpush1.bf16.msra.mxu0 %v1812_v42 }
 0x3f2   :  { %1898 = vmatprep.subr.bf16.mxu0 %v1815_v49 }
 0x3f5   :  { %1899 = vmatpush1.bf16.msra.mxu0 %v1814_v39 }
 0x3f6   :  { %1900 = vmatprep.subr.bf16.mxu0 %v1817_v34 }
 0x3f9   :  { %1901 = vmatpush1.bf16.msra.mxu0 %v1816_v33 }
 0x3fc   :  { %1903 = vmatmul.mubr.bf16.vlgmr.msra.gmra.mrb[24].mxu0 %v1752_v20 }
 0x4cf   :  { %v1904_v62 = vpop.f32.mrb[24].mxu0 }
 0x4d0   :  { %v5322_v45 = vadd.f32 %v1904_v62, %v1822_v61  ;;  %v1906_v40 = vpop.f32.mrb[25].mxu0 }
 0x4d1   :  { %v5323_v35 = vadd.f32 %v1906_v40, %v1826_v22  ;;  %v1908_v51 = vpop.f32.mrb[26].mxu0 }
 0x4d2   :  { %v1911_v48 = vmax.f32 %v5322_v45, 0.0  ;;  %v1909_v23 = vpop.f32.mrb[27].mxu0 }
 0x4d3   :  { %v1912_v36 = vmax.f32 %v5323_v35, 0.0 }
 0x4d5   :  { %v1919_v32 = vpack.c.bf16 %v1912_v36, %v1912_v36 }
 0x4d6   :  { %5607 = dma.done.wait [#allocation9 + $0x3], 2048 }
 0x4d7   :  { %5608 = vsyncadd [#allocation9 + $0x3], 4294965248  ;;  %5253 = vmatpush3.bf16.msra.mxu1 %v5766_v0  ;;  %1974 = vmatprep.mubr.bf16.mxu1 %v1919_v32  ;;  %v1918_v0 = vpack.c.bf16 %v1911_v48, %v1911_v48  ;;  %vm1982_vm1 = vcmask 58368  }
 0x4d8   :  { %5254 = vmatprep.subr.bf16.mxu1 %v5811_v9 }
 0x4db   :  { %5255 = vmatpush3.bf16.msra.mxu1 %v5771_v1 }
 0x4dc   :  { %5256 = vmatprep.subr.bf16.mxu1 %v5816_v10 }
 0x4df   :  { %5257 = vmatpush3.bf16.msra.mxu1 %v5776_v2  ;;  %v5243_v2 = vld [vmem:[#allocation13 + $0x1e] ss:$0 sm:$0xff] }
 0x4e0   :  { %5258 = vmatprep.subr.bf16.mxu1 %v5821_v11 }
 0x4e3   :  { %5259 = vmatpush3.bf16.msra.mxu1 %v5781_v3 }
 0x4e4   :  { %5260 = vmatprep.subr.bf16.mxu1 %v5826_v12 }
 0x4e7   :  { %5261 = vmatpush3.bf16.msra.mxu1 %v5786_v4 }
 0x4e8   :  { %5262 = vmatprep.subr.bf16.mxu1 %v5831_v13 }
 0x4eb   :  { %5263 = vmatpush3.bf16.msra.mxu1 %v5791_v5 }
 0x4ec   :  { %5264 = vmatprep.subr.bf16.mxu1 %v5836_v14 }
 0x4ef   :  { %5265 = vmatpush3.bf16.msra.mxu1 %v5796_v6 }
 0x4f0   :  { %5266 = vmatprep.subr.bf16.mxu1 %v5841_v15 }
 0x4f3   :  { %5267 = vmatpush3.bf16.msra.mxu1 %v5801_v7 }
 0x4f6   :  { %1975 = vmatmul.mubr.bf16.vlgmr.msra.gmra.mrb[32].mxu1 %v1918_v0 }
 0x5c9   :  { %v5268_v1 = vpop.f32.mrb[32].mxu1 }
 0x5ca   :  { %v5269_v3 = vpop.f32.mrb[33].mxu1 }
 0x5cb   :  { %v5270_v8 = vadd.f32 %v5269_v3, %v5268_v1  ;;  %v5271_v9 = vpop.f32.mrb[34].mxu1 }
 0x5cc   :  { %v5272_v4 = vpop.f32.mrb[35].mxu1 }
 0x5cd   :  { %v1977_v10 = vadd.f32 %v5270_v8, %v5243_v2 }
 0x5cf   :  { %1983 = vst.msk [vmem:[#allocation15] sm:$0x3] %vm1982_vm1, %v1977_v10 }
 0x5d0   :  { %5609 = dma.done.wait [#allocation9 + $0x4], 131072 }
 0x5d1   :  { %5610 = vsyncadd [#allocation9 + $0x4], 4294836224  ;;  %v6551_v5 = vmax.f32 %v6112_v46, 0.0  ;;  %v2006_v7 = vld [vmem:[#allocation6 + $0x8] sm:$0xff]  ;;  %v2008_v11 = vld [vmem:[#allocation6 + $0x18] sm:$0xff] }
 0x5d2   :  { %v2005_v12 = vld [vmem:[#allocation6] sm:$0xff]  ;;  %3070 = vmatprep.subr.bf16.mxu1 %v2006_v7  ;;  %3398 = vmatprep.subr.bf16.mxu0 %v2008_v11  ;;  %v2007_v13 = vld [vmem:[#allocation6 + $0x10] sm:$0xff]  ;;  %v2014_v14 = vld [vmem:[#allocation6 + $0x48] sm:$0xff] }
 0x5d3   :  { %v6254_v6 = vpack.c.bf16 %v6551_v5, %v6551_v5  ;;  %v2016_v15 = vld [vmem:[#allocation6 + $0x58] sm:$0xff]  ;;  %3071 = vmatpush1.bf16.msra.mxu1 %v2005_v12  ;;  %3399 = vmatpush1.bf16.msra.mxu0 %v2007_v13  ;;  %v2013_v46 = vld [vmem:[#allocation6 + $0x40] sm:$0xff]  ;;  %v2015_v26 = vld [vmem:[#allocation6 + $0x50] sm:$0xff] }
 0x5d4   :  { %3072 = vmatprep.subr.bf16.mxu1 %v2014_v14  ;;  %3400 = vmatprep.subr.bf16.mxu0 %v2016_v15  ;;  %v2022_v60 = vld [vmem:[#allocation6 + $0x88] sm:$0xff]  ;;  %v2024_v52 = vld [vmem:[#allocation6 + $0x98] sm:$0xff]  ;;  %v2021_v42 = vld [vmem:[#allocation6 + $0x80] sm:$0xff] }
 0x5d5   :  { %3102 = vmatprep.mubr.bf16.mxu1 %v6254_v6  ;;  %3430 = vmatprep.mubr.bf16.mxu0 %v6254_v6  ;;  %v2023_v49 = vld [vmem:[#allocation6 + $0x90] sm:$0xff]  ;;  %v2030_v39 = vld [vmem:[#allocation6 + $0xc8] sm:$0xff]  ;;  %v2032_v34 = vld [vmem:[#allocation6 + $0xd8] sm:$0xff] }
 0x5d6   :  { %v2029_v33 = vld [vmem:[#allocation6 + $0xc0] sm:$0xff]  ;;  %v2031_v20 = vld [vmem:[#allocation6 + $0xd0] sm:$0xff]  ;;  %v2038_v57 = vld [vmem:[#allocation6 + $0x108] sm:$0xff] }
 0x5d7   :  { %3073 = vmatpush1.bf16.msra.mxu1 %v2013_v46  ;;  %3401 = vmatpush1.bf16.msra.mxu0 %v2015_v26  ;;  %v2040_v61 = vld [vmem:[#allocation6 + $0x118] sm:$0xff]  ;;  %v2037_v22 = vld [vmem:[#allocation6 + $0x100] sm:$0xff]  ;;  %v2039_v62 = vld [vmem:[#allocation6 + $0x110] sm:$0xff] }
 0x5d8   :  { %3074 = vmatprep.subr.bf16.mxu1 %v2022_v60  ;;  %3402 = vmatprep.subr.bf16.mxu0 %v2024_v52  ;;  %v2046_v45 = vld [vmem:[#allocation6 + $0x148] sm:$0xff]  ;;  %v2048_v40 = vld [vmem:[#allocation6 + $0x158] sm:$0xff]  ;;  %v2045_v35 = vld [vmem:[#allocation6 + $0x140] sm:$0xff] }
 0x5d9   :  { %v2047_v51 = vld [vmem:[#allocation6 + $0x150] sm:$0xff]  ;;  %v2054_v48 = vld [vmem:[#allocation6 + $0x188] sm:$0xff]  ;;  %v2056_v23 = vld [vmem:[#allocation6 + $0x198] sm:$0xff] }
 0x5da   :  { %v2053_v36 = vld [vmem:[#allocation6 + $0x180] sm:$0xff]  ;;  %v2055_v32 = vld [vmem:[#allocation6 + $0x190] sm:$0xff]  ;;  %v2062_v0 = vld [vmem:[#allocation6 + $0x1c8] sm:$0xff] }
 0x5db   :  { %3075 = vmatpush1.bf16.msra.mxu1 %v2021_v42  ;;  %3403 = vmatpush1.bf16.msra.mxu0 %v2023_v49  ;;  %v2064_v1 = vld [vmem:[#allocation6 + $0x1d8] sm:$0xff]  ;;  %v2061_v2 = vld [vmem:[#allocation6 + $0x1c0] sm:$0xff]  ;;  %v2063_v3 = vld [vmem:[#allocation6 + $0x1d0] sm:$0xff] }
 0x5dc   :  { %3076 = vmatprep.subr.bf16.mxu1 %v2030_v39  ;;  %3404 = vmatprep.subr.bf16.mxu0 %v2032_v34  ;;  %v2070_v8 = vld [vmem:[#allocation6 + $0x208] sm:$0xff]  ;;  %v2072_v9 = vld [vmem:[#allocation6 + $0x218] sm:$0xff]  ;;  %v2069_v4 = vld [vmem:[#allocation6 + $0x200] sm:$0xff] }
 0x5dd   :  { %v2071_v10 = vld [vmem:[#allocation6 + $0x210] sm:$0xff]  ;;  %v2078_v5 = vld [vmem:[#allocation6 + $0x248] sm:$0xff]  ;;  %v2080_v7 = vld [vmem:[#allocation6 + $0x258] sm:$0xff] }
 0x5de   :  { %v2077_v11 = vld [vmem:[#allocation6 + $0x240] sm:$0xff]  ;;  %v2079_v12 = vld [vmem:[#allocation6 + $0x250] sm:$0xff]  ;;  %v2086_v13 = vld [vmem:[#allocation6 + $0x288] sm:$0xff] }
 0x5df   :  { %3077 = vmatpush1.bf16.msra.mxu1 %v2029_v33  ;;  %3405 = vmatpush1.bf16.msra.mxu0 %v2031_v20  ;;  %v2088_v14 = vld [vmem:[#allocation6 + $0x298] sm:$0xff]  ;;  %v2085_v15 = vld [vmem:[#allocation6 + $0x280] sm:$0xff]  ;;  %v2087_v46 = vld [vmem:[#allocation6 + $0x290] sm:$0xff] }
 0x5e0   :  { %3078 = vmatprep.subr.bf16.mxu1 %v2038_v57  ;;  %3406 = vmatprep.subr.bf16.mxu0 %v2040_v61  ;;  %v2094_v26 = vld [vmem:[#allocation6 + $0x2c8] sm:$0xff]  ;;  %v2096_v60 = vld [vmem:[#allocation6 + $0x2d8] sm:$0xff]  ;;  %v2093_v52 = vld [vmem:[#allocation6 + $0x2c0] sm:$0xff] }
 0x5e1   :  { %v2095_v42 = vld [vmem:[#allocation6 + $0x2d0] sm:$0xff]  ;;  %v2102_v49 = vld [vmem:[#allocation6 + $0x308] sm:$0xff]  ;;  %v2104_v39 = vld [vmem:[#allocation6 + $0x318] sm:$0xff] }
 0x5e2   :  { %v2101_v34 = vld [vmem:[#allocation6 + $0x300] sm:$0xff]  ;;  %v2103_v33 = vld [vmem:[#allocation6 + $0x310] sm:$0xff]  ;;  %v2110_v20 = vld [vmem:[#allocation6 + $0x348] sm:$0xff] }
 0x5e3   :  { %3079 = vmatpush1.bf16.msra.mxu1 %v2037_v22  ;;  %3407 = vmatpush1.bf16.msra.mxu0 %v2039_v62  ;;  %v2112_v57 = vld [vmem:[#allocation6 + $0x358] sm:$0xff]  ;;  %v2109_v61 = vld [vmem:[#allocation6 + $0x340] sm:$0xff]  ;;  %v2111_v22 = vld [vmem:[#allocation6 + $0x350] sm:$0xff] }
 0x5e4   :  { %3080 = vmatprep.subr.bf16.mxu1 %v2046_v45  ;;  %3408 = vmatprep.subr.bf16.mxu0 %v2048_v40  ;;  %v2118_v62 = vld [vmem:[#allocation6 + $0x388] sm:$0xff]  ;;  %v2120_v45 = vld [vmem:[#allocation6 + $0x398] sm:$0xff]  ;;  %v2117_v40 = vld [vmem:[#allocation6 + $0x380] sm:$0xff] }
 0x5e7   :  { %3081 = vmatpush1.bf16.msra.mxu1 %v2045_v35  ;;  %3409 = vmatpush1.bf16.msra.mxu0 %v2047_v51  ;;  %v2119_v35 = vld [vmem:[#allocation6 + $0x390] sm:$0xff]  ;;  %v2126_v51 = vld [vmem:[#allocation6 + $0x3c8] sm:$0xff] }
 0x5e8   :  { %3082 = vmatprep.subr.bf16.mxu1 %v2054_v48  ;;  %3410 = vmatprep.subr.bf16.mxu0 %v2056_v23  ;;  %v2128_v48 = vld [vmem:[#allocation6 + $0x3d8] sm:$0xff]  ;;  %v2125_v23 = vld [vmem:[#allocation6 + $0x3c0] sm:$0xff] }
 0x5eb   :  { %3083 = vmatpush1.bf16.msra.mxu1 %v2053_v36  ;;  %3411 = vmatpush1.bf16.msra.mxu0 %v2055_v32  ;;  %v2127_v36 = vld [vmem:[#allocation6 + $0x3d0] sm:$0xff]  ;;  %v2134_v32 = vld [vmem:[#allocation6 + $0x408] sm:$0xff] }
 0x5ec   :  { %3084 = vmatprep.subr.bf16.mxu1 %v2062_v0  ;;  %3412 = vmatprep.subr.bf16.mxu0 %v2064_v1  ;;  %v2136_v0 = vld [vmem:[#allocation6 + $0x418] sm:$0xff]  ;;  %v6552_v1 = vmax.f32 %v6110_v53, 0.0  ;;  %v2141_v53 = vld [vmem:[#allocation6 + $0x440] sm:$0xff] }
 0x5ef   :  { %3085 = vmatpush1.bf16.msra.mxu1 %v2061_v2  ;;  %3413 = vmatpush1.bf16.msra.mxu0 %v2063_v3  ;;  %v6261_v2 = vpack.c.bf16 %v6552_v1, %v6552_v1  ;;  %v2133_v3 = vld [vmem:[#allocation6 + $0x400] sm:$0xff]  ;;  %v2208_v1 = vld [vmem:[#allocation6 + $0x658] sm:$0xff] }
 0x5f0   :  { %3086 = vmatprep.subr.bf16.mxu1 %v2070_v8  ;;  %3414 = vmatprep.subr.bf16.mxu0 %v2072_v9  ;;  %v2135_v8 = vld [vmem:[#allocation6 + $0x410] sm:$0xff]  ;;  %v2142_v9 = vld [vmem:[#allocation6 + $0x448] sm:$0xff] }
 0x5f3   :  { %3087 = vmatpush1.bf16.msra.mxu1 %v2069_v4  ;;  %3415 = vmatpush1.bf16.msra.mxu0 %v2071_v10  ;;  %v2144_v4 = vld [vmem:[#allocation6 + $0x458] sm:$0xff]  ;;  %v6553_v10 = vmax.f32 %v6140_v50, 0.0  ;;  %v2149_v50 = vld [vmem:[#allocation6 + $0x480] sm:$0xff] }
 0x5f4   :  { %3088 = vmatprep.subr.bf16.mxu1 %v2078_v5  ;;  %3416 = vmatprep.subr.bf16.mxu0 %v2080_v7  ;;  %v2143_v7 = vld [vmem:[#allocation6 + $0x450] sm:$0xff] }
 0x5f5   :  { %v6266_v5 = vpack.c.bf16 %v6553_v10, %v6553_v10  ;;  %v2213_v10 = vld [vmem:[#allocation6 + $0x680] sm:$0xff] }
 0x5f7   :  { %3089 = vmatpush1.bf16.msra.mxu1 %v2077_v11  ;;  %3417 = vmatpush1.bf16.msra.mxu0 %v2079_v12  ;;  %v2150_v11 = vld [vmem:[#allocation6 + $0x488] sm:$0xff]  ;;  %v2152_v12 = vld [vmem:[#allocation6 + $0x498] sm:$0xff] }
 0x5f8   :  { %3090 = vmatprep.subr.bf16.mxu1 %v2086_v13  ;;  %3418 = vmatprep.subr.bf16.mxu0 %v2088_v14  ;;  %v2151_v13 = vld [vmem:[#allocation6 + $0x490] sm:$0xff]  ;;  %v2158_v14 = vld [vmem:[#allocation6 + $0x4c8] sm:$0xff] }
 0x5fb   :  { %3091 = vmatpush1.bf16.msra.mxu1 %v2085_v15  ;;  %3419 = vmatpush1.bf16.msra.mxu0 %v2087_v46  ;;  %v2160_v15 = vld [vmem:[#allocation6 + $0x4d8] sm:$0xff]  ;;  %v2157_v46 = vld [vmem:[#allocation6 + $0x4c0] sm:$0xff] }
 0x5fc   :  { %3092 = vmatprep.subr.bf16.mxu1 %v2094_v26  ;;  %3420 = vmatprep.subr.bf16.mxu0 %v2096_v60  ;;  %v2159_v26 = vld [vmem:[#allocation6 + $0x4d0] sm:$0xff]  ;;  %v2166_v60 = vld [vmem:[#allocation6 + $0x508] sm:$0xff] }
 0x5ff   :  { %3093 = vmatpush1.bf16.msra.mxu1 %v2093_v52  ;;  %3421 = vmatpush1.bf16.msra.mxu0 %v2095_v42  ;;  %v2168_v52 = vld [vmem:[#allocation6 + $0x518] sm:$0xff]  ;;  %v2165_v42 = vld [vmem:[#allocation6 + $0x500] sm:$0xff] }
 0x600   :  { %3094 = vmatprep.subr.bf16.mxu1 %v2102_v49  ;;  %3422 = vmatprep.subr.bf16.mxu0 %v2104_v39  ;;  %v2167_v49 = vld [vmem:[#allocation6 + $0x510] sm:$0xff]  ;;  %v2174_v39 = vld [vmem:[#allocation6 + $0x548] sm:$0xff] }
 0x603   :  { %3095 = vmatpush1.bf16.msra.mxu1 %v2101_v34  ;;  %3423 = vmatpush1.bf16.msra.mxu0 %v2103_v33  ;;  %v2176_v34 = vld [vmem:[#allocation6 + $0x558] sm:$0xff]  ;;  %v2173_v33 = vld [vmem:[#allocation6 + $0x540] sm:$0xff] }
 0x604   :  { %3096 = vmatprep.subr.bf16.mxu1 %v2110_v20  ;;  %3424 = vmatprep.subr.bf16.mxu0 %v2112_v57  ;;  %v2175_v20 = vld [vmem:[#allocation6 + $0x550] sm:$0xff]  ;;  %v2182_v57 = vld [vmem:[#allocation6 + $0x588] sm:$0xff] }
 0x607   :  { %3097 = vmatpush1.bf16.msra.mxu1 %v2109_v61  ;;  %3425 = vmatpush1.bf16.msra.mxu0 %v2111_v22  ;;  %v2184_v61 = vld [vmem:[#allocation6 + $0x598] sm:$0xff]  ;;  %v2181_v22 = vld [vmem:[#allocation6 + $0x580] sm:$0xff] }
 0x608   :  { %3098 = vmatprep.subr.bf16.mxu1 %v2118_v62  ;;  %3426 = vmatprep.subr.bf16.mxu0 %v2120_v45  ;;  %v2183_v62 = vld [vmem:[#allocation6 + $0x590] sm:$0xff]  ;;  %v2190_v45 = vld [vmem:[#allocation6 + $0x5c8] sm:$0xff] }
 0x60b   :  { %3099 = vmatpush1.bf16.msra.mxu1 %v2117_v40  ;;  %3427 = vmatpush1.bf16.msra.mxu0 %v2119_v35  ;;  %v2192_v40 = vld [vmem:[#allocation6 + $0x5d8] sm:$0xff]  ;;  %v2189_v35 = vld [vmem:[#allocation6 + $0x5c0] sm:$0xff] }
 0x60c   :  { %3100 = vmatprep.subr.bf16.mxu1 %v2126_v51  ;;  %3428 = vmatprep.subr.bf16.mxu0 %v2128_v48  ;;  %v2191_v51 = vld [vmem:[#allocation6 + $0x5d0] sm:$0xff]  ;;  %v2198_v48 = vld [vmem:[#allocation6 + $0x608] sm:$0xff] }
 0x60f   :  { %3101 = vmatpush1.bf16.msra.mxu1 %v2125_v23  ;;  %3429 = vmatpush1.bf16.msra.mxu0 %v2127_v36  ;;  %v2200_v23 = vld [vmem:[#allocation6 + $0x618] sm:$0xff]  ;;  %v2197_v36 = vld [vmem:[#allocation6 + $0x600] sm:$0xff] }
 0x610   :  { %3111 = vmatprep.subr.bf16.mxu1 %v2134_v32  ;;  %3439 = vmatprep.subr.bf16.mxu0 %v2136_v0  ;;  %v2199_v32 = vld [vmem:[#allocation6 + $0x610] sm:$0xff]  ;;  %v2206_v0 = vld [vmem:[#allocation6 + $0x648] sm:$0xff] }
 0x612   :  { %3103 = vmatmul.mubr.bf16.vlgmr.msra.gmra.mrb[36].mxu1 %v6261_v2  ;;  %3431 = vmatmul.mubr.bf16.vlgmr.msra.gmra.mrb[28].mxu0 %v6261_v2 }
 0x613   :  { %3112 = vmatpush1.bf16.msra.mxu1 %v2133_v3  ;;  %3440 = vmatpush1.bf16.msra.mxu0 %v2135_v8  ;;  %v2205_v3 = vld [vmem:[#allocation6 + $0x640] sm:$0xff]  ;;  %v2207_v8 = vld [vmem:[#allocation6 + $0x650] sm:$0xff] }
 0x614   :  { %3113 = vmatprep.subr.bf16.mxu1 %v2142_v9  ;;  %3441 = vmatprep.subr.bf16.mxu0 %v2144_v4  ;;  %v2214_v9 = vld [vmem:[#allocation6 + $0x688] sm:$0xff]  ;;  %v2216_v4 = vld [vmem:[#allocation6 + $0x698] sm:$0xff] }
 0x615   :  { %3143 = vmatprep.mubr.bf16.mxu1 %v6266_v5  ;;  %3471 = vmatprep.mubr.bf16.mxu0 %v6266_v5 }
 0x617   :  { %3114 = vmatpush1.bf16.msra.mxu1 %v2141_v53  ;;  %3442 = vmatpush1.bf16.msra.mxu0 %v2143_v7  ;;  %v2215_v53 = vld [vmem:[#allocation6 + $0x690] sm:$0xff]  ;;  %v2222_v7 = vld [vmem:[#allocation6 + $0x6c8] sm:$0xff] }
 0x618   :  { %3115 = vmatprep.subr.bf16.mxu1 %v2150_v11  ;;  %3443 = vmatprep.subr.bf16.mxu0 %v2152_v12  ;;  %v2224_v11 = vld [vmem:[#allocation6 + $0x6d8] sm:$0xff]  ;;  %v2221_v12 = vld [vmem:[#allocation6 + $0x6c0] sm:$0xff] }
 0x61b   :  { %3116 = vmatpush1.bf16.msra.mxu1 %v2149_v50  ;;  %3444 = vmatpush1.bf16.msra.mxu0 %v2151_v13  ;;  %v2223_v50 = vld [vmem:[#allocation6 + $0x6d0] sm:$0xff]  ;;  %v2230_v13 = vld [vmem:[#allocation6 + $0x708] sm:$0xff] }
 0x61c   :  { %3117 = vmatprep.subr.bf16.mxu1 %v2158_v14  ;;  %3445 = vmatprep.subr.bf16.mxu0 %v2160_v15  ;;  %v2232_v14 = vld [vmem:[#allocation6 + $0x718] sm:$0xff]  ;;  %v2229_v15 = vld [vmem:[#allocation6 + $0x700] sm:$0xff] }
 0x61f   :  { %3118 = vmatpush1.bf16.msra.mxu1 %v2157_v46  ;;  %3446 = vmatpush1.bf16.msra.mxu0 %v2159_v26  ;;  %v2231_v46 = vld [vmem:[#allocation6 + $0x710] sm:$0xff]  ;;  %v2238_v26 = vld [vmem:[#allocation6 + $0x748] sm:$0xff] }
 0x620   :  { %3119 = vmatprep.subr.bf16.mxu1 %v2166_v60  ;;  %3447 = vmatprep.subr.bf16.mxu0 %v2168_v52  ;;  %v2240_v60 = vld [vmem:[#allocation6 + $0x758] sm:$0xff]  ;;  %v2237_v52 = vld [vmem:[#allocation6 + $0x740] sm:$0xff] }
 0x623   :  { %3120 = vmatpush1.bf16.msra.mxu1 %v2165_v42  ;;  %3448 = vmatpush1.bf16.msra.mxu0 %v2167_v49  ;;  %v2239_v42 = vld [vmem:[#allocation6 + $0x750] sm:$0xff]  ;;  %v2246_v49 = vld [vmem:[#allocation6 + $0x788] sm:$0xff] }
 0x624   :  { %3121 = vmatprep.subr.bf16.mxu1 %v2174_v39  ;;  %3449 = vmatprep.subr.bf16.mxu0 %v2176_v34  ;;  %v2248_v39 = vld [vmem:[#allocation6 + $0x798] sm:$0xff]  ;;  %v2245_v34 = vld [vmem:[#allocation6 + $0x780] sm:$0xff] }
 0x627   :  { %3122 = vmatpush1.bf16.msra.mxu1 %v2173_v33  ;;  %3450 = vmatpush1.bf16.msra.mxu0 %v2175_v20  ;;  %v2247_v33 = vld [vmem:[#allocation6 + $0x790] sm:$0xff]  ;;  %v2254_v20 = vld [vmem:[#allocation6 + $0x7c8] sm:$0xff] }
 0x628   :  { %3123 = vmatprep.subr.bf16.mxu1 %v2182_v57  ;;  %3451 = vmatprep.subr.bf16.mxu0 %v2184_v61  ;;  %v2256_v57 = vld [vmem:[#allocation6 + $0x7d8] sm:$0xff]  ;;  %v2253_v61 = vld [vmem:[#allocation6 + $0x7c0] sm:$0xff] }
 0x62b   :  { %3124 = vmatpush1.bf16.msra.mxu1 %v2181_v22  ;;  %3452 = vmatpush1.bf16.msra.mxu0 %v2183_v62  ;;  %v2255_v22 = vld [vmem:[#allocation6 + $0x7d0] sm:$0xff]  ;;  %v2262_v62 = vld [vmem:[#allocation6 + $0x808] sm:$0xff] }
 0x62c   :  { %3125 = vmatprep.subr.bf16.mxu1 %v2190_v45  ;;  %3453 = vmatprep.subr.bf16.mxu0 %v2192_v40  ;;  %v2264_v45 = vld [vmem:[#allocation6 + $0x818] sm:$0xff]  ;;  %v6554_v40 = vmax.f32 %v6138_v31, 0.0  ;;  %v2269_v31 = vld [vmem:[#allocation6 + $0x840] sm:$0xff] }
 0x62f   :  { %3126 = vmatpush1.bf16.msra.mxu1 %v2189_v35  ;;  %3454 = vmatpush1.bf16.msra.mxu0 %v2191_v51  ;;  %v6275_v35 = vpack.c.bf16 %v6554_v40, %v6554_v40  ;;  %v2261_v51 = vld [vmem:[#allocation6 + $0x800] sm:$0xff]  ;;  %v2336_v40 = vld [vmem:[#allocation6 + $0xa58] sm:$0xff] }
 0x630   :  { %3127 = vmatprep.subr.bf16.mxu1 %v2198_v48  ;;  %3455 = vmatprep.subr.bf16.mxu0 %v2200_v23  ;;  %v2263_v48 = vld [vmem:[#allocation6 + $0x810] sm:$0xff]  ;;  %v2270_v23 = vld [vmem:[#allocation6 + $0x848] sm:$0xff] }
 0x633   :  { %3128 = vmatpush1.bf16.msra.mxu1 %v2197_v36  ;;  %3456 = vmatpush1.bf16.msra.mxu0 %v2199_v32  ;;  %v2272_v36 = vld [vmem:[#allocation6 + $0x858] sm:$0xff]  ;;  %v6555_v32 = vmax.f32 %v6130_v63, 0.0  ;;  %v2277_v63 = vld [vmem:[#allocation6 + $0x880] sm:$0xff] }
 0x634   :  { %3129 = vmatprep.subr.bf16.mxu1 %v2206_v0  ;;  %3457 = vmatprep.subr.bf16.mxu0 %v2208_v1  ;;  %v2271_v1 = vld [vmem:[#allocation6 + $0x850] sm:$0xff] }
 0x635   :  { %v6280_v0 = vpack.c.bf16 %v6555_v32, %v6555_v32  ;;  %v2341_v32 = vld [vmem:[#allocation6 + $0xa80] sm:$0xff] }
 0x637   :  { %3130 = vmatpush1.bf16.msra.mxu1 %v2205_v3  ;;  %3458 = vmatpush1.bf16.msra.mxu0 %v2207_v8  ;;  %v2278_v3 = vld [vmem:[#allocation6 + $0x888] sm:$0xff]  ;;  %v2280_v8 = vld [vmem:[#allocation6 + $0x898] sm:$0xff] }
 0x638   :  { %3131 = vmatprep.subr.bf16.mxu1 %v2214_v9  ;;  %3459 = vmatprep.subr.bf16.mxu0 %v2216_v4  ;;  %v2279_v9 = vld [vmem:[#allocation6 + $0x890] sm:$0xff]  ;;  %v2286_v4 = vld [vmem:[#allocation6 + $0x8c8] sm:$0xff] }
 0x63b   :  { %3132 = vmatpush1.bf16.msra.mxu1 %v2213_v10  ;;  %3460 = vmatpush1.bf16.msra.mxu0 %v2215_v53  ;;  %v2288_v10 = vld [vmem:[#allocation6 + $0x8d8] sm:$0xff]  ;;  %v2285_v53 = vld [vmem:[#allocation6 + $0x8c0] sm:$0xff] }
 0x63c   :  { %3133 = vmatprep.subr.bf16.mxu1 %v2222_v7  ;;  %3461 = vmatprep.subr.bf16.mxu0 %v2224_v11  ;;  %v2287_v7 = vld [vmem:[#allocation6 + $0x8d0] sm:$0xff]  ;;  %v2294_v11 = vld [vmem:[#allocation6 + $0x908] sm:$0xff] }
 0x63f   :  { %3134 = vmatpush1.bf16.msra.mxu1 %v2221_v12  ;;  %3462 = vmatpush1.bf16.msra.mxu0 %v2223_v50  ;;  %v2296_v12 = vld [vmem:[#allocation6 + $0x918] sm:$0xff]  ;;  %v2293_v50 = vld [vmem:[#allocation6 + $0x900] sm:$0xff] }
 0x640   :  { %3135 = vmatprep.subr.bf16.mxu1 %v2230_v13  ;;  %3463 = vmatprep.subr.bf16.mxu0 %v2232_v14  ;;  %v2295_v13 = vld [vmem:[#allocation6 + $0x910] sm:$0xff]  ;;  %v2302_v14 = vld [vmem:[#allocation6 + $0x948] sm:$0xff] }
 0x643   :  { %3136 = vmatpush1.bf16.msra.mxu1 %v2229_v15  ;;  %3464 = vmatpush1.bf16.msra.mxu0 %v2231_v46  ;;  %v2304_v15 = vld [vmem:[#allocation6 + $0x958] sm:$0xff]  ;;  %v2301_v46 = vld [vmem:[#allocation6 + $0x940] sm:$0xff] }
 0x644   :  { %3137 = vmatprep.subr.bf16.mxu1 %v2238_v26  ;;  %3465 = vmatprep.subr.bf16.mxu0 %v2240_v60  ;;  %v2303_v26 = vld [vmem:[#allocation6 + $0x950] sm:$0xff]  ;;  %v2310_v60 = vld [vmem:[#allocation6 + $0x988] sm:$0xff] }
 0x647   :  { %3138 = vmatpush1.bf16.msra.mxu1 %v2237_v52  ;;  %3466 = vmatpush1.bf16.msra.mxu0 %v2239_v42  ;;  %v2312_v52 = vld [vmem:[#allocation6 + $0x998] sm:$0xff]  ;;  %v2309_v42 = vld [vmem:[#allocation6 + $0x980] sm:$0xff] }
 0x648   :  { %3139 = vmatprep.subr.bf16.mxu1 %v2246_v49  ;;  %3467 = vmatprep.subr.bf16.mxu0 %v2248_v39  ;;  %v2311_v49 = vld [vmem:[#allocation6 + $0x990] sm:$0xff]  ;;  %v2318_v39 = vld [vmem:[#allocation6 + $0x9c8] sm:$0xff] }
 0x64b   :  { %3140 = vmatpush1.bf16.msra.mxu1 %v2245_v34  ;;  %3468 = vmatpush1.bf16.msra.mxu0 %v2247_v33  ;;  %v2320_v34 = vld [vmem:[#allocation6 + $0x9d8] sm:$0xff]  ;;  %v2317_v33 = vld [vmem:[#allocation6 + $0x9c0] sm:$0xff] }
 0x64c   :  { %3141 = vmatprep.subr.bf16.mxu1 %v2254_v20  ;;  %3469 = vmatprep.subr.bf16.mxu0 %v2256_v57  ;;  %v2319_v20 = vld [vmem:[#allocation6 + $0x9d0] sm:$0xff]  ;;  %v2326_v57 = vld [vmem:[#allocation6 + $0xa08] sm:$0xff] }
 0x64f   :  { %3142 = vmatpush1.bf16.msra.mxu1 %v2253_v61  ;;  %3470 = vmatpush1.bf16.msra.mxu0 %v2255_v22  ;;  %v2328_v61 = vld [vmem:[#allocation6 + $0xa18] sm:$0xff]  ;;  %v2325_v22 = vld [vmem:[#allocation6 + $0xa00] sm:$0xff] }
 0x650   :  { %3152 = vmatprep.subr.bf16.mxu1 %v2262_v62  ;;  %3480 = vmatprep.subr.bf16.mxu0 %v2264_v45  ;;  %v2327_v62 = vld [vmem:[#allocation6 + $0xa10] sm:$0xff]  ;;  %v2334_v45 = vld [vmem:[#allocation6 + $0xa48] sm:$0xff] }
 0x652   :  { %3144 = vmatmul.mubr.bf16.vlgmr.msra.gmra.mrb[36].mxu1 %v6275_v35  ;;  %3472 = vmatmul.mubr.bf16.vlgmr.msra.gmra.mrb[28].mxu0 %v6275_v35 }
 0x653   :  { %3153 = vmatpush1.bf16.msra.mxu1 %v2261_v51  ;;  %3481 = vmatpush1.bf16.msra.mxu0 %v2263_v48  ;;  %v2333_v51 = vld [vmem:[#allocation6 + $0xa40] sm:$0xff]  ;;  %v2335_v48 = vld [vmem:[#allocation6 + $0xa50] sm:$0xff] }
 0x654   :  { %3154 = vmatprep.subr.bf16.mxu1 %v2270_v23  ;;  %3482 = vmatprep.subr.bf16.mxu0 %v2272_v36  ;;  %v2342_v23 = vld [vmem:[#allocation6 + $0xa88] sm:$0xff]  ;;  %v2344_v36 = vld [vmem:[#allocation6 + $0xa98] sm:$0xff] }
 0x655   :  { %3184 = vmatprep.mubr.bf16.mxu1 %v6280_v0  ;;  %3512 = vmatprep.mubr.bf16.mxu0 %v6280_v0 }
 0x657   :  { %3155 = vmatpush1.bf16.msra.mxu1 %v2269_v31  ;;  %3483 = vmatpush1.bf16.msra.mxu0 %v2271_v1  ;;  %v2343_v31 = vld [vmem:[#allocation6 + $0xa90] sm:$0xff]  ;;  %v2350_v1 = vld [vmem:[#allocation6 + $0xac8] sm:$0xff] }
 0x658   :  { %3156 = vmatprep.subr.bf16.mxu1 %v2278_v3  ;;  %3484 = vmatprep.subr.bf16.mxu0 %v2280_v8  ;;  %v2352_v3 = vld [vmem:[#allocation6 + $0xad8] sm:$0xff]  ;;  %v2349_v8 = vld [vmem:[#allocation6 + $0xac0] sm:$0xff] }
 0x65b   :  { %3157 = vmatpush1.bf16.msra.mxu1 %v2277_v63  ;;  %3485 = vmatpush1.bf16.msra.mxu0 %v2279_v9  ;;  %v2351_v63 = vld [vmem:[#allocation6 + $0xad0] sm:$0xff]  ;;  %v2358_v9 = vld [vmem:[#allocation6 + $0xb08] sm:$0xff] }
 0x65c   :  { %3158 = vmatprep.subr.bf16.mxu1 %v2286_v4  ;;  %3486 = vmatprep.subr.bf16.mxu0 %v2288_v10  ;;  %v2360_v4 = vld [vmem:[#allocation6 + $0xb18] sm:$0xff]  ;;  %v2357_v10 = vld [vmem:[#allocation6 + $0xb00] sm:$0xff] }
 0x65f   :  { %3159 = vmatpush1.bf16.msra.mxu1 %v2285_v53  ;;  %3487 = vmatpush1.bf16.msra.mxu0 %v2287_v7  ;;  %v2359_v53 = vld [vmem:[#allocation6 + $0xb10] sm:$0xff]  ;;  %v2366_v7 = vld [vmem:[#allocation6 + $0xb48] sm:$0xff] }
 0x660   :  { %3160 = vmatprep.subr.bf16.mxu1 %v2294_v11  ;;  %3488 = vmatprep.subr.bf16.mxu0 %v2296_v12  ;;  %v2368_v11 = vld [vmem:[#allocation6 + $0xb58] sm:$0xff]  ;;  %v2365_v12 = vld [vmem:[#allocation6 + $0xb40] sm:$0xff] }
 0x663   :  { %3161 = vmatpush1.bf16.msra.mxu1 %v2293_v50  ;;  %3489 = vmatpush1.bf16.msra.mxu0 %v2295_v13  ;;  %v2367_v50 = vld [vmem:[#allocation6 + $0xb50] sm:$0xff]  ;;  %v2374_v13 = vld [vmem:[#allocation6 + $0xb88] sm:$0xff] }
 0x664   :  { %3162 = vmatprep.subr.bf16.mxu1 %v2302_v14  ;;  %3490 = vmatprep.subr.bf16.mxu0 %v2304_v15  ;;  %v2376_v14 = vld [vmem:[#allocation6 + $0xb98] sm:$0xff]  ;;  %v2373_v15 = vld [vmem:[#allocation6 + $0xb80] sm:$0xff] }
 0x667   :  { %3163 = vmatpush1.bf16.msra.mxu1 %v2301_v46  ;;  %3491 = vmatpush1.bf16.msra.mxu0 %v2303_v26  ;;  %v2375_v46 = vld [vmem:[#allocation6 + $0xb90] sm:$0xff]  ;;  %v2382_v26 = vld [vmem:[#allocation6 + $0xbc8] sm:$0xff] }
 0x668   :  { %3164 = vmatprep.subr.bf16.mxu1 %v2310_v60  ;;  %3492 = vmatprep.subr.bf16.mxu0 %v2312_v52  ;;  %v2384_v60 = vld [vmem:[#allocation6 + $0xbd8] sm:$0xff]  ;;  %v2381_v52 = vld [vmem:[#allocation6 + $0xbc0] sm:$0xff] }
 0x66b   :  { %3165 = vmatpush1.bf16.msra.mxu1 %v2309_v42  ;;  %3493 = vmatpush1.bf16.msra.mxu0 %v2311_v49  ;;  %v2383_v42 = vld [vmem:[#allocation6 + $0xbd0] sm:$0xff]  ;;  %v2390_v49 = vld [vmem:[#allocation6 + $0xc08] sm:$0xff] }
 0x66c   :  { %3166 = vmatprep.subr.bf16.mxu1 %v2318_v39  ;;  %3494 = vmatprep.subr.bf16.mxu0 %v2320_v34  ;;  %v2392_v39 = vld [vmem:[#allocation6 + $0xc18] sm:$0xff]  ;;  %v6556_v34 = vmax.f32 %v6128_v55, 0.0  ;;  %v2397_v55 = vld [vmem:[#allocation6 + $0xc40] sm:$0xff] }
 0x66f   :  { %3167 = vmatpush1.bf16.msra.mxu1 %v2317_v33  ;;  %3495 = vmatpush1.bf16.msra.mxu0 %v2319_v20  ;;  %v6289_v33 = vpack.c.bf16 %v6556_v34, %v6556_v34  ;;  %v2389_v20 = vld [vmem:[#allocation6 + $0xc00] sm:$0xff]  ;;  %v2464_v34 = vld [vmem:[#allocation6 + $0xe58] sm:$0xff] }
 0x670   :  { %3168 = vmatprep.subr.bf16.mxu1 %v2326_v57  ;;  %3496 = vmatprep.subr.bf16.mxu0 %v2328_v61  ;;  %v2391_v57 = vld [vmem:[#allocation6 + $0xc10] sm:$0xff]  ;;  %v2398_v61 = vld [vmem:[#allocation6 + $0xc48] sm:$0xff] }
 0x673   :  { %3169 = vmatpush1.bf16.msra.mxu1 %v2325_v22  ;;  %3497 = vmatpush1.bf16.msra.mxu0 %v2327_v62  ;;  %v2400_v22 = vld [vmem:[#allocation6 + $0xc58] sm:$0xff]  ;;  %v6557_v62 = vmax.f32 %v6158_v41, 0.0  ;;  %v2405_v41 = vld [vmem:[#allocation6 + $0xc80] sm:$0xff] }
 0x674   :  { %3170 = vmatprep.subr.bf16.mxu1 %v2334_v45  ;;  %3498 = vmatprep.subr.bf16.mxu0 %v2336_v40  ;;  %v2399_v40 = vld [vmem:[#allocation6 + $0xc50] sm:$0xff] }
 0x675   :  { %v6294_v45 = vpack.c.bf16 %v6557_v62, %v6557_v62  ;;  %v2469_v62 = vld [vmem:[#allocation6 + $0xe80] sm:$0xff] }
 0x677   :  { %3171 = vmatpush1.bf16.msra.mxu1 %v2333_v51  ;;  %3499 = vmatpush1.bf16.msra.mxu0 %v2335_v48  ;;  %v2406_v51 = vld [vmem:[#allocation6 + $0xc88] sm:$0xff]  ;;  %v2408_v48 = vld [vmem:[#allocation6 + $0xc98] sm:$0xff] }
 0x678   :  { %3172 = vmatprep.subr.bf16.mxu1 %v2342_v23  ;;  %3500 = vmatprep.subr.bf16.mxu0 %v2344_v36  ;;  %v2407_v23 = vld [vmem:[#allocation6 + $0xc90] sm:$0xff]  ;;  %v2414_v36 = vld [vmem:[#allocation6 + $0xcc8] sm:$0xff] }
 0x67b   :  { %3173 = vmatpush1.bf16.msra.mxu1 %v2341_v32  ;;  %3501 = vmatpush1.bf16.msra.mxu0 %v2343_v31  ;;  %v2416_v32 = vld [vmem:[#allocation6 + $0xcd8] sm:$0xff]  ;;  %v2413_v31 = vld [vmem:[#allocation6 + $0xcc0] sm:$0xff] }
 0x67c   :  { %3174 = vmatprep.subr.bf16.mxu1 %v2350_v1  ;;  %3502 = vmatprep.subr.bf16.mxu0 %v2352_v3  ;;  %v2415_v1 = vld [vmem:[#allocation6 + $0xcd0] sm:$0xff]  ;;  %v2422_v3 = vld [vmem:[#allocation6 + $0xd08] sm:$0xff] }
 0x67f   :  { %3175 = vmatpush1.bf16.msra.mxu1 %v2349_v8  ;;  %3503 = vmatpush1.bf16.msra.mxu0 %v2351_v63  ;;  %v2424_v8 = vld [vmem:[#allocation6 + $0xd18] sm:$0xff]  ;;  %v2421_v63 = vld [vmem:[#allocation6 + $0xd00] sm:$0xff] }
 0x680   :  { %3176 = vmatprep.subr.bf16.mxu1 %v2358_v9  ;;  %3504 = vmatprep.subr.bf16.mxu0 %v2360_v4  ;;  %v2423_v9 = vld [vmem:[#allocation6 + $0xd10] sm:$0xff]  ;;  %v2430_v4 = vld [vmem:[#allocation6 + $0xd48] sm:$0xff] }
 0x683   :  { %3177 = vmatpush1.bf16.msra.mxu1 %v2357_v10  ;;  %3505 = vmatpush1.bf16.msra.mxu0 %v2359_v53  ;;  %v2432_v10 = vld [vmem:[#allocation6 + $0xd58] sm:$0xff]  ;;  %v2429_v53 = vld [vmem:[#allocation6 + $0xd40] sm:$0xff] }
 0x684   :  { %3178 = vmatprep.subr.bf16.mxu1 %v2366_v7  ;;  %3506 = vmatprep.subr.bf16.mxu0 %v2368_v11  ;;  %v2431_v7 = vld [vmem:[#allocation6 + $0xd50] sm:$0xff]  ;;  %v2438_v11 = vld [vmem:[#allocation6 + $0xd88] sm:$0xff] }
 0x687   :  { %3179 = vmatpush1.bf16.msra.mxu1 %v2365_v12  ;;  %3507 = vmatpush1.bf16.msra.mxu0 %v2367_v50  ;;  %v2440_v12 = vld [vmem:[#allocation6 + $0xd98] sm:$0xff]  ;;  %v2437_v50 = vld [vmem:[#allocation6 + $0xd80] sm:$0xff] }
 0x688   :  { %3180 = vmatprep.subr.bf16.mxu1 %v2374_v13  ;;  %3508 = vmatprep.subr.bf16.mxu0 %v2376_v14  ;;  %v2439_v13 = vld [vmem:[#allocation6 + $0xd90] sm:$0xff]  ;;  %v2446_v14 = vld [vmem:[#allocation6 + $0xdc8] sm:$0xff] }
 0x68b   :  { %3181 = vmatpush1.bf16.msra.mxu1 %v2373_v15  ;;  %3509 = vmatpush1.bf16.msra.mxu0 %v2375_v46  ;;  %v2448_v15 = vld [vmem:[#allocation6 + $0xdd8] sm:$0xff]  ;;  %v2445_v46 = vld [vmem:[#allocation6 + $0xdc0] sm:$0xff] }
 0x68c   :  { %3182 = vmatprep.subr.bf16.mxu1 %v2382_v26  ;;  %3510 = vmatprep.subr.bf16.mxu0 %v2384_v60  ;;  %v2447_v26 = vld [vmem:[#allocation6 + $0xdd0] sm:$0xff]  ;;  %v2454_v60 = vld [vmem:[#allocation6 + $0xe08] sm:$0xff] }
 0x68f   :  { %3183 = vmatpush1.bf16.msra.mxu1 %v2381_v52  ;;  %3511 = vmatpush1.bf16.msra.mxu0 %v2383_v42  ;;  %v2456_v52 = vld [vmem:[#allocation6 + $0xe18] sm:$0xff]  ;;  %v2453_v42 = vld [vmem:[#allocation6 + $0xe00] sm:$0xff] }
 0x690   :  { %3193 = vmatprep.subr.bf16.mxu1 %v2390_v49  ;;  %3521 = vmatprep.subr.bf16.mxu0 %v2392_v39  ;;  %v2455_v49 = vld [vmem:[#allocation6 + $0xe10] sm:$0xff]  ;;  %v2462_v39 = vld [vmem:[#allocation6 + $0xe48] sm:$0xff] }
 0x692   :  { %3185 = vmatmul.mubr.bf16.vlgmr.msra.gmra.mrb[36].mxu1 %v6289_v33  ;;  %3513 = vmatmul.mubr.bf16.vlgmr.msra.gmra.mrb[28].mxu0 %v6289_v33 }
 0x693   :  { %3194 = vmatpush1.bf16.msra.mxu1 %v2389_v20  ;;  %3522 = vmatpush1.bf16.msra.mxu0 %v2391_v57  ;;  %v2461_v20 = vld [vmem:[#allocation6 + $0xe40] sm:$0xff]  ;;  %v2463_v57 = vld [vmem:[#allocation6 + $0xe50] sm:$0xff] }
 0x694   :  { %3195 = vmatprep.subr.bf16.mxu1 %v2398_v61  ;;  %3523 = vmatprep.subr.bf16.mxu0 %v2400_v22  ;;  %v2470_v61 = vld [vmem:[#allocation6 + $0xe88] sm:$0xff]  ;;  %v2472_v22 = vld [vmem:[#allocation6 + $0xe98] sm:$0xff] }
 0x695   :  { %3225 = vmatprep.mubr.bf16.mxu1 %v6294_v45  ;;  %3553 = vmatprep.mubr.bf16.mxu0 %v6294_v45 }
 0x697   :  { %3196 = vmatpush1.bf16.msra.mxu1 %v2397_v55  ;;  %3524 = vmatpush1.bf16.msra.mxu0 %v2399_v40  ;;  %v2471_v55 = vld [vmem:[#allocation6 + $0xe90] sm:$0xff]  ;;  %v2478_v40 = vld [vmem:[#allocation6 + $0xec8] sm:$0xff] }
 0x698   :  { %3197 = vmatprep.subr.bf16.mxu1 %v2406_v51  ;;  %3525 = vmatprep.subr.bf16.mxu0 %v2408_v48  ;;  %v2480_v51 = vld [vmem:[#allocation6 + $0xed8] sm:$0xff]  ;;  %v2477_v48 = vld [vmem:[#allocation6 + $0xec0] sm:$0xff] }
 0x69b   :  { %3198 = vmatpush1.bf16.msra.mxu1 %v2405_v41  ;;  %3526 = vmatpush1.bf16.msra.mxu0 %v2407_v23  ;;  %v2479_v41 = vld [vmem:[#allocation6 + $0xed0] sm:$0xff]  ;;  %v2486_v23 = vld [vmem:[#allocation6 + $0xf08] sm:$0xff] }
 0x69c   :  { %3199 = vmatprep.subr.bf16.mxu1 %v2414_v36  ;;  %3527 = vmatprep.subr.bf16.mxu0 %v2416_v32  ;;  %v2488_v36 = vld [vmem:[#allocation6 + $0xf18] sm:$0xff]  ;;  %v2485_v32 = vld [vmem:[#allocation6 + $0xf00] sm:$0xff] }
 0x69f   :  { %3200 = vmatpush1.bf16.msra.mxu1 %v2413_v31  ;;  %3528 = vmatpush1.bf16.msra.mxu0 %v2415_v1  ;;  %v2487_v31 = vld [vmem:[#allocation6 + $0xf10] sm:$0xff]  ;;  %v2494_v1 = vld [vmem:[#allocation6 + $0xf48] sm:$0xff] }
 0x6a0   :  { %3201 = vmatprep.subr.bf16.mxu1 %v2422_v3  ;;  %3529 = vmatprep.subr.bf16.mxu0 %v2424_v8  ;;  %v2496_v3 = vld [vmem:[#allocation6 + $0xf58] sm:$0xff]  ;;  %v2493_v8 = vld [vmem:[#allocation6 + $0xf40] sm:$0xff] }
 0x6a3   :  { %3202 = vmatpush1.bf16.msra.mxu1 %v2421_v63  ;;  %3530 = vmatpush1.bf16.msra.mxu0 %v2423_v9  ;;  %v2495_v63 = vld [vmem:[#allocation6 + $0xf50] sm:$0xff]  ;;  %v2502_v9 = vld [vmem:[#allocation6 + $0xf88] sm:$0xff] }
 0x6a4   :  { %3203 = vmatprep.subr.bf16.mxu1 %v2430_v4  ;;  %3531 = vmatprep.subr.bf16.mxu0 %v2432_v10  ;;  %v2504_v4 = vld [vmem:[#allocation6 + $0xf98] sm:$0xff]  ;;  %v2501_v10 = vld [vmem:[#allocation6 + $0xf80] sm:$0xff] }
 0x6a7   :  { %3204 = vmatpush1.bf16.msra.mxu1 %v2429_v53  ;;  %3532 = vmatpush1.bf16.msra.mxu0 %v2431_v7  ;;  %v2503_v53 = vld [vmem:[#allocation6 + $0xf90] sm:$0xff]  ;;  %v2510_v7 = vld [vmem:[#allocation6 + $0xfc8] sm:$0xff] }
 0x6a8   :  { %3205 = vmatprep.subr.bf16.mxu1 %v2438_v11  ;;  %3533 = vmatprep.subr.bf16.mxu0 %v2440_v12  ;;  %v2512_v11 = vld [vmem:[#allocation6 + $0xfd8] sm:$0xff]  ;;  %v2509_v12 = vld [vmem:[#allocation6 + $0xfc0] sm:$0xff] }
 0x6ab   :  { %3206 = vmatpush1.bf16.msra.mxu1 %v2437_v50  ;;  %3534 = vmatpush1.bf16.msra.mxu0 %v2439_v13  ;;  %v2511_v50 = vld [vmem:[#allocation6 + $0xfd0] sm:$0xff]  ;;  %v2518_v13 = vld [vmem:[#allocation6 + $0x1008] sm:$0xff] }
 0x6ac   :  { %3207 = vmatprep.subr.bf16.mxu1 %v2446_v14  ;;  %3535 = vmatprep.subr.bf16.mxu0 %v2448_v15  ;;  %v2520_v14 = vld [vmem:[#allocation6 + $0x1018] sm:$0xff]  ;;  %v6558_v15 = vmax.f32 %v6156_v47, 0.0  ;;  %v2525_v47 = vld [vmem:[#allocation6 + $0x1040] sm:$0xff] }
 0x6af   :  { %3208 = vmatpush1.bf16.msra.mxu1 %v2445_v46  ;;  %3536 = vmatpush1.bf16.msra.mxu0 %v2447_v26  ;;  %v6303_v46 = vpack.c.bf16 %v6558_v15, %v6558_v15  ;;  %v2517_v26 = vld [vmem:[#allocation6 + $0x1000] sm:$0xff]  ;;  %v2592_v15 = vld [vmem:[#allocation6 + $0x1258] sm:$0xff] }
 0x6b0   :  { %3209 = vmatprep.subr.bf16.mxu1 %v2454_v60  ;;  %3537 = vmatprep.subr.bf16.mxu0 %v2456_v52  ;;  %v2519_v60 = vld [vmem:[#allocation6 + $0x1010] sm:$0xff]  ;;  %v2526_v52 = vld [vmem:[#allocation6 + $0x1048] sm:$0xff] }
 0x6b3   :  { %3210 = vmatpush1.bf16.msra.mxu1 %v2453_v42  ;;  %3538 = vmatpush1.bf16.msra.mxu0 %v2455_v49  ;;  %v2528_v42 = vld [vmem:[#allocation6 + $0x1058] sm:$0xff]  ;;  %v6559_v49 = vmax.f32 %v6148_v29, 0.0  ;;  %v2533_v29 = vld [vmem:[#allocation6 + $0x1080] sm:$0xff] }
 0x6b4   :  { %3211 = vmatprep.subr.bf16.mxu1 %v2462_v39  ;;  %3539 = vmatprep.subr.bf16.mxu0 %v2464_v34  ;;  %v2527_v34 = vld [vmem:[#allocation6 + $0x1050] sm:$0xff] }
 0x6b5   :  { %v6308_v39 = vpack.c.bf16 %v6559_v49, %v6559_v49  ;;  %v2597_v49 = vld [vmem:[#allocation6 + $0x1280] sm:$0xff] }
 0x6b7   :  { %3212 = vmatpush1.bf16.msra.mxu1 %v2461_v20  ;;  %3540 = vmatpush1.bf16.msra.mxu0 %v2463_v57  ;;  %v2534_v20 = vld [vmem:[#allocation6 + $0x1088] sm:$0xff]  ;;  %v2536_v57 = vld [vmem:[#allocation6 + $0x1098] sm:$0xff] }
 0x6b8   :  { %3213 = vmatprep.subr.bf16.mxu1 %v2470_v61  ;;  %3541 = vmatprep.subr.bf16.mxu0 %v2472_v22  ;;  %v2535_v61 = vld [vmem:[#allocation6 + $0x1090] sm:$0xff]  ;;  %v2542_v22 = vld [vmem:[#allocation6 + $0x10c8] sm:$0xff] }
 0x6bb   :  { %3214 = vmatpush1.bf16.msra.mxu1 %v2469_v62  ;;  %3542 = vmatpush1.bf16.msra.mxu0 %v2471_v55  ;;  %v2544_v62 = vld [vmem:[#allocation6 + $0x10d8] sm:$0xff]  ;;  %v2541_v55 = vld [vmem:[#allocation6 + $0x10c0] sm:$0xff] }
 0x6bc   :  { %3215 = vmatprep.subr.bf16.mxu1 %v2478_v40  ;;  %3543 = vmatprep.subr.bf16.mxu0 %v2480_v51  ;;  %v2543_v40 = vld [vmem:[#allocation6 + $0x10d0] sm:$0xff]  ;;  %v2550_v51 = vld [vmem:[#allocation6 + $0x1108] sm:$0xff] }
 0x6bf   :  { %3216 = vmatpush1.bf16.msra.mxu1 %v2477_v48  ;;  %3544 = vmatpush1.bf16.msra.mxu0 %v2479_v41  ;;  %v2552_v48 = vld [vmem:[#allocation6 + $0x1118] sm:$0xff]  ;;  %v2549_v41 = vld [vmem:[#allocation6 + $0x1100] sm:$0xff] }
 0x6c0   :  { %3217 = vmatprep.subr.bf16.mxu1 %v2486_v23  ;;  %3545 = vmatprep.subr.bf16.mxu0 %v2488_v36  ;;  %v2551_v23 = vld [vmem:[#allocation6 + $0x1110] sm:$0xff]  ;;  %v2558_v36 = vld [vmem:[#allocation6 + $0x1148] sm:$0xff] }
 0x6c3   :  { %3218 = vmatpush1.bf16.msra.mxu1 %v2485_v32  ;;  %3546 = vmatpush1.bf16.msra.mxu0 %v2487_v31  ;;  %v2560_v32 = vld [vmem:[#allocation6 + $0x1158] sm:$0xff]  ;;  %v2557_v31 = vld [vmem:[#allocation6 + $0x1140] sm:$0xff] }
 0x6c4   :  { %3219 = vmatprep.subr.bf16.mxu1 %v2494_v1  ;;  %3547 = vmatprep.subr.bf16.mxu0 %v2496_v3  ;;  %v2559_v1 = vld [vmem:[#allocation6 + $0x1150] sm:$0xff]  ;;  %v2566_v3 = vld [vmem:[#allocation6 + $0x1188] sm:$0xff] }
 0x6c7   :  { %3220 = vmatpush1.bf16.msra.mxu1 %v2493_v8  ;;  %3548 = vmatpush1.bf16.msra.mxu0 %v2495_v63  ;;  %v2568_v8 = vld [vmem:[#allocation6 + $0x1198] sm:$0xff]  ;;  %v2565_v63 = vld [vmem:[#allocation6 + $0x1180] sm:$0xff] }
 0x6c8   :  { %3221 = vmatprep.subr.bf16.mxu1 %v2502_v9  ;;  %3549 = vmatprep.subr.bf16.mxu0 %v2504_v4  ;;  %v2567_v9 = vld [vmem:[#allocation6 + $0x1190] sm:$0xff]  ;;  %v2574_v4 = vld [vmem:[#allocation6 + $0x11c8] sm:$0xff] }
 0x6cb   :  { %3222 = vmatpush1.bf16.msra.mxu1 %v2501_v10  ;;  %3550 = vmatpush1.bf16.msra.mxu0 %v2503_v53  ;;  %v2576_v10 = vld [vmem:[#allocation6 + $0x11d8] sm:$0xff]  ;;  %v2573_v53 = vld [vmem:[#allocation6 + $0x11c0] sm:$0xff] }
 0x6cc   :  { %3223 = vmatprep.subr.bf16.mxu1 %v2510_v7  ;;  %3551 = vmatprep.subr.bf16.mxu0 %v2512_v11  ;;  %v2575_v7 = vld [vmem:[#allocation6 + $0x11d0] sm:$0xff]  ;;  %v2582_v11 = vld [vmem:[#allocation6 + $0x1208] sm:$0xff] }
 0x6cf   :  { %3224 = vmatpush1.bf16.msra.mxu1 %v2509_v12  ;;  %3552 = vmatpush1.bf16.msra.mxu0 %v2511_v50  ;;  %v2584_v12 = vld [vmem:[#allocation6 + $0x1218] sm:$0xff]  ;;  %v2581_v50 = vld [vmem:[#allocation6 + $0x1200] sm:$0xff] }
 0x6d0   :  { %3234 = vmatprep.subr.bf16.mxu1 %v2518_v13  ;;  %3562 = vmatprep.subr.bf16.mxu0 %v2520_v14  ;;  %v2583_v13 = vld [vmem:[#allocation6 + $0x1210] sm:$0xff]  ;;  %v2590_v14 = vld [vmem:[#allocation6 + $0x1248] sm:$0xff] }
 0x6d2   :  { %3226 = vmatmul.mubr.bf16.vlgmr.msra.gmra.mrb[36].mxu1 %v6303_v46  ;;  %3554 = vmatmul.mubr.bf16.vlgmr.msra.gmra.mrb[28].mxu0 %v6303_v46 }
 0x6d3   :  { %3235 = vmatpush1.bf16.msra.mxu1 %v2517_v26  ;;  %3563 = vmatpush1.bf16.msra.mxu0 %v2519_v60  ;;  %v2589_v26 = vld [vmem:[#allocation6 + $0x1240] sm:$0xff]  ;;  %v2591_v60 = vld [vmem:[#allocation6 + $0x1250] sm:$0xff] }
 0x6d4   :  { %3236 = vmatprep.subr.bf16.mxu1 %v2526_v52  ;;  %3564 = vmatprep.subr.bf16.mxu0 %v2528_v42  ;;  %v2598_v52 = vld [vmem:[#allocation6 + $0x1288] sm:$0xff]  ;;  %v2600_v42 = vld [vmem:[#allocation6 + $0x1298] sm:$0xff] }
 0x6d5   :  { %3266 = vmatprep.mubr.bf16.mxu1 %v6308_v39  ;;  %3594 = vmatprep.mubr.bf16.mxu0 %v6308_v39 }
 0x6d7   :  { %3237 = vmatpush1.bf16.msra.mxu1 %v2525_v47  ;;  %3565 = vmatpush1.bf16.msra.mxu0 %v2527_v34  ;;  %v2599_v47 = vld [vmem:[#allocation6 + $0x1290] sm:$0xff]  ;;  %v2606_v34 = vld [vmem:[#allocation6 + $0x12c8] sm:$0xff] }
 0x6d8   :  { %3238 = vmatprep.subr.bf16.mxu1 %v2534_v20  ;;  %3566 = vmatprep.subr.bf16.mxu0 %v2536_v57  ;;  %v2608_v20 = vld [vmem:[#allocation6 + $0x12d8] sm:$0xff]  ;;  %v2605_v57 = vld [vmem:[#allocation6 + $0x12c0] sm:$0xff] }
 0x6db   :  { %3239 = vmatpush1.bf16.msra.mxu1 %v2533_v29  ;;  %3567 = vmatpush1.bf16.msra.mxu0 %v2535_v61  ;;  %v2607_v29 = vld [vmem:[#allocation6 + $0x12d0] sm:$0xff]  ;;  %v2614_v61 = vld [vmem:[#allocation6 + $0x1308] sm:$0xff] }
 0x6dc   :  { %3240 = vmatprep.subr.bf16.mxu1 %v2542_v22  ;;  %3568 = vmatprep.subr.bf16.mxu0 %v2544_v62  ;;  %v2616_v22 = vld [vmem:[#allocation6 + $0x1318] sm:$0xff]  ;;  %v2613_v62 = vld [vmem:[#allocation6 + $0x1300] sm:$0xff] }
 0x6df   :  { %3241 = vmatpush1.bf16.msra.mxu1 %v2541_v55  ;;  %3569 = vmatpush1.bf16.msra.mxu0 %v2543_v40  ;;  %v2615_v55 = vld [vmem:[#allocation6 + $0x1310] sm:$0xff]  ;;  %v2622_v40 = vld [vmem:[#allocation6 + $0x1348] sm:$0xff] }
 0x6e0   :  { %3242 = vmatprep.subr.bf16.mxu1 %v2550_v51  ;;  %3570 = vmatprep.subr.bf16.mxu0 %v2552_v48  ;;  %v2624_v51 = vld [vmem:[#allocation6 + $0x1358] sm:$0xff]  ;;  %v2621_v48 = vld [vmem:[#allocation6 + $0x1340] sm:$0xff] }
 0x6e3   :  { %3243 = vmatpush1.bf16.msra.mxu1 %v2549_v41  ;;  %3571 = vmatpush1.bf16.msra.mxu0 %v2551_v23  ;;  %v2623_v41 = vld [vmem:[#allocation6 + $0x1350] sm:$0xff]  ;;  %v2630_v23 = vld [vmem:[#allocation6 + $0x1388] sm:$0xff] }
 0x6e4   :  { %3244 = vmatprep.subr.bf16.mxu1 %v2558_v36  ;;  %3572 = vmatprep.subr.bf16.mxu0 %v2560_v32  ;;  %v2632_v36 = vld [vmem:[#allocation6 + $0x1398] sm:$0xff]  ;;  %v2629_v32 = vld [vmem:[#allocation6 + $0x1380] sm:$0xff] }
 0x6e7   :  { %3245 = vmatpush1.bf16.msra.mxu1 %v2557_v31  ;;  %3573 = vmatpush1.bf16.msra.mxu0 %v2559_v1  ;;  %v2631_v31 = vld [vmem:[#allocation6 + $0x1390] sm:$0xff]  ;;  %v2638_v1 = vld [vmem:[#allocation6 + $0x13c8] sm:$0xff] }
 0x6e8   :  { %3246 = vmatprep.subr.bf16.mxu1 %v2566_v3  ;;  %3574 = vmatprep.subr.bf16.mxu0 %v2568_v8  ;;  %v2640_v3 = vld [vmem:[#allocation6 + $0x13d8] sm:$0xff]  ;;  %v2637_v8 = vld [vmem:[#allocation6 + $0x13c0] sm:$0xff] }
 0x6eb   :  { %3247 = vmatpush1.bf16.msra.mxu1 %v2565_v63  ;;  %3575 = vmatpush1.bf16.msra.mxu0 %v2567_v9  ;;  %v2639_v63 = vld [vmem:[#allocation6 + $0x13d0] sm:$0xff]  ;;  %v2646_v9 = vld [vmem:[#allocation6 + $0x1408] sm:$0xff] }
 0x6ec   :  { %3248 = vmatprep.subr.bf16.mxu1 %v2574_v4  ;;  %3576 = vmatprep.subr.bf16.mxu0 %v2576_v10  ;;  %v2648_v4 = vld [vmem:[#allocation6 + $0x1418] sm:$0xff]  ;;  %v6560_v10 = vmax.f32 %v6146_v30, 0.0  ;;  %v2653_v30 = vld [vmem:[#allocation6 + $0x1440] sm:$0xff] }
 0x6ef   :  { %3249 = vmatpush1.bf16.msra.mxu1 %v2573_v53  ;;  %3577 = vmatpush1.bf16.msra.mxu0 %v2575_v7  ;;  %v6317_v53 = vpack.c.bf16 %v6560_v10, %v6560_v10  ;;  %v2645_v7 = vld [vmem:[#allocation6 + $0x1400] sm:$0xff]  ;;  %v2720_v10 = vld [vmem:[#allocation6 + $0x1658] sm:$0xff] }
 0x6f0   :  { %3250 = vmatprep.subr.bf16.mxu1 %v2582_v11  ;;  %3578 = vmatprep.subr.bf16.mxu0 %v2584_v12  ;;  %v2647_v11 = vld [vmem:[#allocation6 + $0x1410] sm:$0xff]  ;;  %v2654_v12 = vld [vmem:[#allocation6 + $0x1448] sm:$0xff] }
 0x6f3   :  { %3251 = vmatpush1.bf16.msra.mxu1 %v2581_v50  ;;  %3579 = vmatpush1.bf16.msra.mxu0 %v2583_v13  ;;  %v2656_v50 = vld [vmem:[#allocation6 + $0x1458] sm:$0xff]  ;;  %v6561_v13 = vmax.f32 %v6174_v18, 0.0  ;;  %v2661_v18 = vld [vmem:[#allocation6 + $0x1480] sm:$0xff] }
 0x6f4   :  { %3252 = vmatprep.subr.bf16.mxu1 %v2590_v14  ;;  %3580 = vmatprep.subr.bf16.mxu0 %v2592_v15  ;;  %v2655_v15 = vld [vmem:[#allocation6 + $0x1450] sm:$0xff] }
 0x6f5   :  { %v6322_v14 = vpack.c.bf16 %v6561_v13, %v6561_v13  ;;  %v2725_v13 = vld [vmem:[#allocation6 + $0x1680] sm:$0xff] }
 0x6f7   :  { %3253 = vmatpush1.bf16.msra.mxu1 %v2589_v26  ;;  %3581 = vmatpush1.bf16.msra.mxu0 %v2591_v60  ;;  %v2662_v26 = vld [vmem:[#allocation6 + $0x1488] sm:$0xff]  ;;  %v2664_v60 = vld [vmem:[#allocation6 + $0x1498] sm:$0xff] }
 0x6f8   :  { %3254 = vmatprep.subr.bf16.mxu1 %v2598_v52  ;;  %3582 = vmatprep.subr.bf16.mxu0 %v2600_v42  ;;  %v2663_v52 = vld [vmem:[#allocation6 + $0x1490] sm:$0xff]  ;;  %v2670_v42 = vld [vmem:[#allocation6 + $0x14c8] sm:$0xff] }
 0x6fb   :  { %3255 = vmatpush1.bf16.msra.mxu1 %v2597_v49  ;;  %3583 = vmatpush1.bf16.msra.mxu0 %v2599_v47  ;;  %v2672_v49 = vld [vmem:[#allocation6 + $0x14d8] sm:$0xff]  ;;  %v2669_v47 = vld [vmem:[#allocation6 + $0x14c0] sm:$0xff] }
 0x6fc   :  { %3256 = vmatprep.subr.bf16.mxu1 %v2606_v34  ;;  %3584 = vmatprep.subr.bf16.mxu0 %v2608_v20  ;;  %v2671_v34 = vld [vmem:[#allocation6 + $0x14d0] sm:$0xff]  ;;  %v2678_v20 = vld [vmem:[#allocation6 + $0x1508] sm:$0xff] }
 0x6ff   :  { %3257 = vmatpush1.bf16.msra.mxu1 %v2605_v57  ;;  %3585 = vmatpush1.bf16.msra.mxu0 %v2607_v29  ;;  %v2680_v57 = vld [vmem:[#allocation6 + $0x1518] sm:$0xff]  ;;  %v2677_v29 = vld [vmem:[#allocation6 + $0x1500] sm:$0xff] }
 0x700   :  { %3258 = vmatprep.subr.bf16.mxu1 %v2614_v61  ;;  %3586 = vmatprep.subr.bf16.mxu0 %v2616_v22  ;;  %v2679_v61 = vld [vmem:[#allocation6 + $0x1510] sm:$0xff]  ;;  %v2686_v22 = vld [vmem:[#allocation6 + $0x1548] sm:$0xff] }
 0x703   :  { %3259 = vmatpush1.bf16.msra.mxu1 %v2613_v62  ;;  %3587 = vmatpush1.bf16.msra.mxu0 %v2615_v55  ;;  %v2688_v62 = vld [vmem:[#allocation6 + $0x1558] sm:$0xff]  ;;  %v2685_v55 = vld [vmem:[#allocation6 + $0x1540] sm:$0xff] }
 0x704   :  { %3260 = vmatprep.subr.bf16.mxu1 %v2622_v40  ;;  %3588 = vmatprep.subr.bf16.mxu0 %v2624_v51  ;;  %v2687_v40 = vld [vmem:[#allocation6 + $0x1550] sm:$0xff]  ;;  %v2694_v51 = vld [vmem:[#allocation6 + $0x1588] sm:$0xff] }
 0x707   :  { %3261 = vmatpush1.bf16.msra.mxu1 %v2621_v48  ;;  %3589 = vmatpush1.bf16.msra.mxu0 %v2623_v41  ;;  %v2696_v48 = vld [vmem:[#allocation6 + $0x1598] sm:$0xff]  ;;  %v2693_v41 = vld [vmem:[#allocation6 + $0x1580] sm:$0xff] }
 0x708   :  { %3262 = vmatprep.subr.bf16.mxu1 %v2630_v23  ;;  %3590 = vmatprep.subr.bf16.mxu0 %v2632_v36  ;;  %v2695_v23 = vld [vmem:[#allocation6 + $0x1590] sm:$0xff]  ;;  %v2702_v36 = vld [vmem:[#allocation6 + $0x15c8] sm:$0xff] }
 0x70b   :  { %3263 = vmatpush1.bf16.msra.mxu1 %v2629_v32  ;;  %3591 = vmatpush1.bf16.msra.mxu0 %v2631_v31  ;;  %v2704_v32 = vld [vmem:[#allocation6 + $0x15d8] sm:$0xff]  ;;  %v2701_v31 = vld [vmem:[#allocation6 + $0x15c0] sm:$0xff] }
 0x70c   :  { %3264 = vmatprep.subr.bf16.mxu1 %v2638_v1  ;;  %3592 = vmatprep.subr.bf16.mxu0 %v2640_v3  ;;  %v2703_v1 = vld [vmem:[#allocation6 + $0x15d0] sm:$0xff]  ;;  %v2710_v3 = vld [vmem:[#allocation6 + $0x1608] sm:$0xff] }
 0x70f   :  { %3265 = vmatpush1.bf16.msra.mxu1 %v2637_v8  ;;  %3593 = vmatpush1.bf16.msra.mxu0 %v2639_v63  ;;  %v2712_v8 = vld [vmem:[#allocation6 + $0x1618] sm:$0xff]  ;;  %v2709_v63 = vld [vmem:[#allocation6 + $0x1600] sm:$0xff] }
 0x710   :  { %3275 = vmatprep.subr.bf16.mxu1 %v2646_v9  ;;  %3603 = vmatprep.subr.bf16.mxu0 %v2648_v4  ;;  %v2711_v9 = vld [vmem:[#allocation6 + $0x1610] sm:$0xff]  ;;  %v2718_v4 = vld [vmem:[#allocation6 + $0x1648] sm:$0xff] }
 0x712   :  { %3267 = vmatmul.mubr.bf16.vlgmr.msra.gmra.mrb[36].mxu1 %v6317_v53  ;;  %3595 = vmatmul.mubr.bf16.vlgmr.msra.gmra.mrb[28].mxu0 %v6317_v53 }
 0x713   :  { %3276 = vmatpush1.bf16.msra.mxu1 %v2645_v7  ;;  %3604 = vmatpush1.bf16.msra.mxu0 %v2647_v11  ;;  %v2717_v7 = vld [vmem:[#allocation6 + $0x1640] sm:$0xff]  ;;  %v2719_v11 = vld [vmem:[#allocation6 + $0x1650] sm:$0xff] }
 0x714   :  { %3277 = vmatprep.subr.bf16.mxu1 %v2654_v12  ;;  %3605 = vmatprep.subr.bf16.mxu0 %v2656_v50  ;;  %v2726_v12 = vld [vmem:[#allocation6 + $0x1688] sm:$0xff]  ;;  %v2728_v50 = vld [vmem:[#allocation6 + $0x1698] sm:$0xff] }
 0x715   :  { %3307 = vmatprep.mubr.bf16.mxu1 %v6322_v14  ;;  %3635 = vmatprep.mubr.bf16.mxu0 %v6322_v14 }
 0x717   :  { %3278 = vmatpush1.bf16.msra.mxu1 %v2653_v30  ;;  %3606 = vmatpush1.bf16.msra.mxu0 %v2655_v15  ;;  %v2727_v30 = vld [vmem:[#allocation6 + $0x1690] sm:$0xff]  ;;  %v2734_v15 = vld [vmem:[#allocation6 + $0x16c8] sm:$0xff] }
 0x718   :  { %3279 = vmatprep.subr.bf16.mxu1 %v2662_v26  ;;  %3607 = vmatprep.subr.bf16.mxu0 %v2664_v60  ;;  %v2736_v26 = vld [vmem:[#allocation6 + $0x16d8] sm:$0xff]  ;;  %v2733_v60 = vld [vmem:[#allocation6 + $0x16c0] sm:$0xff] }
 0x71b   :  { %3280 = vmatpush1.bf16.msra.mxu1 %v2661_v18  ;;  %3608 = vmatpush1.bf16.msra.mxu0 %v2663_v52  ;;  %v2735_v18 = vld [vmem:[#allocation6 + $0x16d0] sm:$0xff]  ;;  %v2742_v52 = vld [vmem:[#allocation6 + $0x1708] sm:$0xff] }
 0x71c   :  { %3281 = vmatprep.subr.bf16.mxu1 %v2670_v42  ;;  %3609 = vmatprep.subr.bf16.mxu0 %v2672_v49  ;;  %v2744_v42 = vld [vmem:[#allocation6 + $0x1718] sm:$0xff]  ;;  %v2741_v49 = vld [vmem:[#allocation6 + $0x1700] sm:$0xff] }
 0x71f   :  { %3282 = vmatpush1.bf16.msra.mxu1 %v2669_v47  ;;  %3610 = vmatpush1.bf16.msra.mxu0 %v2671_v34  ;;  %v2743_v47 = vld [vmem:[#allocation6 + $0x1710] sm:$0xff]  ;;  %v2750_v34 = vld [vmem:[#allocation6 + $0x1748] sm:$0xff] }
 0x720   :  { %3283 = vmatprep.subr.bf16.mxu1 %v2678_v20  ;;  %3611 = vmatprep.subr.bf16.mxu0 %v2680_v57  ;;  %v2752_v20 = vld [vmem:[#allocation6 + $0x1758] sm:$0xff]  ;;  %v2749_v57 = vld [vmem:[#allocation6 + $0x1740] sm:$0xff] }
 0x723   :  { %3284 = vmatpush1.bf16.msra.mxu1 %v2677_v29  ;;  %3612 = vmatpush1.bf16.msra.mxu0 %v2679_v61  ;;  %v2751_v29 = vld [vmem:[#allocation6 + $0x1750] sm:$0xff]  ;;  %v2758_v61 = vld [vmem:[#allocation6 + $0x1788] sm:$0xff] }
 0x724   :  { %3285 = vmatprep.subr.bf16.mxu1 %v2686_v22  ;;  %3613 = vmatprep.subr.bf16.mxu0 %v2688_v62  ;;  %v2760_v22 = vld [vmem:[#allocation6 + $0x1798] sm:$0xff]  ;;  %v2757_v62 = vld [vmem:[#allocation6 + $0x1780] sm:$0xff] }
 0x727   :  { %3286 = vmatpush1.bf16.msra.mxu1 %v2685_v55  ;;  %3614 = vmatpush1.bf16.msra.mxu0 %v2687_v40  ;;  %v2759_v55 = vld [vmem:[#allocation6 + $0x1790] sm:$0xff]  ;;  %v2766_v40 = vld [vmem:[#allocation6 + $0x17c8] sm:$0xff] }
 0x728   :  { %3287 = vmatprep.subr.bf16.mxu1 %v2694_v51  ;;  %3615 = vmatprep.subr.bf16.mxu0 %v2696_v48  ;;  %v2768_v51 = vld [vmem:[#allocation6 + $0x17d8] sm:$0xff]  ;;  %v2765_v48 = vld [vmem:[#allocation6 + $0x17c0] sm:$0xff] }
 0x72b   :  { %3288 = vmatpush1.bf16.msra.mxu1 %v2693_v41  ;;  %3616 = vmatpush1.bf16.msra.mxu0 %v2695_v23  ;;  %v2767_v41 = vld [vmem:[#allocation6 + $0x17d0] sm:$0xff]  ;;  %v2774_v23 = vld [vmem:[#allocation6 + $0x1808] sm:$0xff] }
 0x72c   :  { %3289 = vmatprep.subr.bf16.mxu1 %v2702_v36  ;;  %3617 = vmatprep.subr.bf16.mxu0 %v2704_v32  ;;  %v2776_v36 = vld [vmem:[#allocation6 + $0x1818] sm:$0xff]  ;;  %v6562_v32 = vmax.f32 %v6172_v27, 0.0  ;;  %v2781_v27 = vld [vmem:[#allocation6 + $0x1840] sm:$0xff] }
 0x72f   :  { %3290 = vmatpush1.bf16.msra.mxu1 %v2701_v31  ;;  %3618 = vmatpush1.bf16.msra.mxu0 %v2703_v1  ;;  %v6331_v31 = vpack.c.bf16 %v6562_v32, %v6562_v32  ;;  %v2773_v1 = vld [vmem:[#allocation6 + $0x1800] sm:$0xff]  ;;  %v2848_v32 = vld [vmem:[#allocation6 + $0x1a58] sm:$0xff] }
 0x730   :  { %3291 = vmatprep.subr.bf16.mxu1 %v2710_v3  ;;  %3619 = vmatprep.subr.bf16.mxu0 %v2712_v8  ;;  %v2775_v3 = vld [vmem:[#allocation6 + $0x1810] sm:$0xff]  ;;  %v2782_v8 = vld [vmem:[#allocation6 + $0x1848] sm:$0xff] }
 0x733   :  { %3292 = vmatpush1.bf16.msra.mxu1 %v2709_v63  ;;  %3620 = vmatpush1.bf16.msra.mxu0 %v2711_v9  ;;  %v2784_v63 = vld [vmem:[#allocation6 + $0x1858] sm:$0xff]  ;;  %v6563_v9 = vmax.f32 %v6166_v19, 0.0  ;;  %v2789_v19 = vld [vmem:[#allocation6 + $0x1880] sm:$0xff] }
 0x734   :  { %3293 = vmatprep.subr.bf16.mxu1 %v2718_v4  ;;  %3621 = vmatprep.subr.bf16.mxu0 %v2720_v10  ;;  %v2783_v10 = vld [vmem:[#allocation6 + $0x1850] sm:$0xff] }
 0x735   :  { %v6336_v4 = vpack.c.bf16 %v6563_v9, %v6563_v9  ;;  %v2853_v9 = vld [vmem:[#allocation6 + $0x1a80] sm:$0xff] }
 0x737   :  { %3294 = vmatpush1.bf16.msra.mxu1 %v2717_v7  ;;  %3622 = vmatpush1.bf16.msra.mxu0 %v2719_v11  ;;  %v2790_v7 = vld [vmem:[#allocation6 + $0x1888] sm:$0xff]  ;;  %v2792_v11 = vld [vmem:[#allocation6 + $0x1898] sm:$0xff] }
 0x738   :  { %3295 = vmatprep.subr.bf16.mxu1 %v2726_v12  ;;  %3623 = vmatprep.subr.bf16.mxu0 %v2728_v50  ;;  %v2791_v12 = vld [vmem:[#allocation6 + $0x1890] sm:$0xff]  ;;  %v2798_v50 = vld [vmem:[#allocation6 + $0x18c8] sm:$0xff] }
 0x73b   :  { %3296 = vmatpush1.bf16.msra.mxu1 %v2725_v13  ;;  %3624 = vmatpush1.bf16.msra.mxu0 %v2727_v30  ;;  %v2800_v13 = vld [vmem:[#allocation6 + $0x18d8] sm:$0xff]  ;;  %v2797_v30 = vld [vmem:[#allocation6 + $0x18c0] sm:$0xff] }
 0x73c   :  { %3297 = vmatprep.subr.bf16.mxu1 %v2734_v15  ;;  %3625 = vmatprep.subr.bf16.mxu0 %v2736_v26  ;;  %v2799_v15 = vld [vmem:[#allocation6 + $0x18d0] sm:$0xff]  ;;  %v2806_v26 = vld [vmem:[#allocation6 + $0x1908] sm:$0xff] }
 0x73f   :  { %3298 = vmatpush1.bf16.msra.mxu1 %v2733_v60  ;;  %3626 = vmatpush1.bf16.msra.mxu0 %v2735_v18  ;;  %v2808_v60 = vld [vmem:[#allocation6 + $0x1918] sm:$0xff]  ;;  %v2805_v18 = vld [vmem:[#allocation6 + $0x1900] sm:$0xff] }
 0x740   :  { %3299 = vmatprep.subr.bf16.mxu1 %v2742_v52  ;;  %3627 = vmatprep.subr.bf16.mxu0 %v2744_v42  ;;  %v2807_v52 = vld [vmem:[#allocation6 + $0x1910] sm:$0xff]  ;;  %v2814_v42 = vld [vmem:[#allocation6 + $0x1948] sm:$0xff] }
 0x743   :  { %3300 = vmatpush1.bf16.msra.mxu1 %v2741_v49  ;;  %3628 = vmatpush1.bf16.msra.mxu0 %v2743_v47  ;;  %v2816_v49 = vld [vmem:[#allocation6 + $0x1958] sm:$0xff]  ;;  %v2813_v47 = vld [vmem:[#allocation6 + $0x1940] sm:$0xff] }
 0x744   :  { %3301 = vmatprep.subr.bf16.mxu1 %v2750_v34  ;;  %3629 = vmatprep.subr.bf16.mxu0 %v2752_v20  ;;  %v2815_v34 = vld [vmem:[#allocation6 + $0x1950] sm:$0xff]  ;;  %v2822_v20 = vld [vmem:[#allocation6 + $0x1988] sm:$0xff] }
 0x747   :  { %3302 = vmatpush1.bf16.msra.mxu1 %v2749_v57  ;;  %3630 = vmatpush1.bf16.msra.mxu0 %v2751_v29  ;;  %v2824_v57 = vld [vmem:[#allocation6 + $0x1998] sm:$0xff]  ;;  %v2821_v29 = vld [vmem:[#allocation6 + $0x1980] sm:$0xff] }
 0x748   :  { %3303 = vmatprep.subr.bf16.mxu1 %v2758_v61  ;;  %3631 = vmatprep.subr.bf16.mxu0 %v2760_v22  ;;  %v2823_v61 = vld [vmem:[#allocation6 + $0x1990] sm:$0xff]  ;;  %v2830_v22 = vld [vmem:[#allocation6 + $0x19c8] sm:$0xff] }
 0x74b   :  { %3304 = vmatpush1.bf16.msra.mxu1 %v2757_v62  ;;  %3632 = vmatpush1.bf16.msra.mxu0 %v2759_v55  ;;  %v2832_v62 = vld [vmem:[#allocation6 + $0x19d8] sm:$0xff]  ;;  %v2829_v55 = vld [vmem:[#allocation6 + $0x19c0] sm:$0xff] }
 0x74c   :  { %3305 = vmatprep.subr.bf16.mxu1 %v2766_v40  ;;  %3633 = vmatprep.subr.bf16.mxu0 %v2768_v51  ;;  %v2831_v40 = vld [vmem:[#allocation6 + $0x19d0] sm:$0xff]  ;;  %v2838_v51 = vld [vmem:[#allocation6 + $0x1a08] sm:$0xff] }
 0x74f   :  { %3306 = vmatpush1.bf16.msra.mxu1 %v2765_v48  ;;  %3634 = vmatpush1.bf16.msra.mxu0 %v2767_v41  ;;  %v2840_v48 = vld [vmem:[#allocation6 + $0x1a18] sm:$0xff]  ;;  %v2837_v41 = vld [vmem:[#allocation6 + $0x1a00] sm:$0xff] }
 0x750   :  { %3316 = vmatprep.subr.bf16.mxu1 %v2774_v23  ;;  %3644 = vmatprep.subr.bf16.mxu0 %v2776_v36  ;;  %v2839_v23 = vld [vmem:[#allocation6 + $0x1a10] sm:$0xff]  ;;  %v2846_v36 = vld [vmem:[#allocation6 + $0x1a48] sm:$0xff] }
 0x752   :  { %3308 = vmatmul.mubr.bf16.vlgmr.msra.gmra.mrb[36].mxu1 %v6331_v31  ;;  %3636 = vmatmul.mubr.bf16.vlgmr.msra.gmra.mrb[28].mxu0 %v6331_v31 }
 0x753   :  { %3317 = vmatpush1.bf16.msra.mxu1 %v2773_v1  ;;  %3645 = vmatpush1.bf16.msra.mxu0 %v2775_v3  ;;  %v2845_v1 = vld [vmem:[#allocation6 + $0x1a40] sm:$0xff]  ;;  %v2847_v3 = vld [vmem:[#allocation6 + $0x1a50] sm:$0xff] }
 0x754   :  { %3318 = vmatprep.subr.bf16.mxu1 %v2782_v8  ;;  %3646 = vmatprep.subr.bf16.mxu0 %v2784_v63  ;;  %v2854_v8 = vld [vmem:[#allocation6 + $0x1a88] sm:$0xff]  ;;  %v2856_v63 = vld [vmem:[#allocation6 + $0x1a98] sm:$0xff] }
 0x755   :  { %3348 = vmatprep.mubr.bf16.mxu1 %v6336_v4  ;;  %3676 = vmatprep.mubr.bf16.mxu0 %v6336_v4 }
 0x757   :  { %3319 = vmatpush1.bf16.msra.mxu1 %v2781_v27  ;;  %3647 = vmatpush1.bf16.msra.mxu0 %v2783_v10  ;;  %v2855_v27 = vld [vmem:[#allocation6 + $0x1a90] sm:$0xff]  ;;  %v2862_v10 = vld [vmem:[#allocation6 + $0x1ac8] sm:$0xff] }
 0x758   :  { %3320 = vmatprep.subr.bf16.mxu1 %v2790_v7  ;;  %3648 = vmatprep.subr.bf16.mxu0 %v2792_v11  ;;  %v2864_v7 = vld [vmem:[#allocation6 + $0x1ad8] sm:$0xff]  ;;  %v2861_v11 = vld [vmem:[#allocation6 + $0x1ac0] sm:$0xff] }
 0x75b   :  { %3321 = vmatpush1.bf16.msra.mxu1 %v2789_v19  ;;  %3649 = vmatpush1.bf16.msra.mxu0 %v2791_v12  ;;  %v2863_v19 = vld [vmem:[#allocation6 + $0x1ad0] sm:$0xff]  ;;  %v2870_v12 = vld [vmem:[#allocation6 + $0x1b08] sm:$0xff] }
 0x75c   :  { %3322 = vmatprep.subr.bf16.mxu1 %v2798_v50  ;;  %3650 = vmatprep.subr.bf16.mxu0 %v2800_v13  ;;  %v2872_v50 = vld [vmem:[#allocation6 + $0x1b18] sm:$0xff]  ;;  %v2869_v13 = vld [vmem:[#allocation6 + $0x1b00] sm:$0xff] }
 0x75f   :  { %3323 = vmatpush1.bf16.msra.mxu1 %v2797_v30  ;;  %3651 = vmatpush1.bf16.msra.mxu0 %v2799_v15  ;;  %v2871_v30 = vld [vmem:[#allocation6 + $0x1b10] sm:$0xff]  ;;  %v2878_v15 = vld [vmem:[#allocation6 + $0x1b48] sm:$0xff] }
 0x760   :  { %3324 = vmatprep.subr.bf16.mxu1 %v2806_v26  ;;  %3652 = vmatprep.subr.bf16.mxu0 %v2808_v60  ;;  %v2880_v26 = vld [vmem:[#allocation6 + $0x1b58] sm:$0xff]  ;;  %v2877_v60 = vld [vmem:[#allocation6 + $0x1b40] sm:$0xff] }
 0x763   :  { %3325 = vmatpush1.bf16.msra.mxu1 %v2805_v18  ;;  %3653 = vmatpush1.bf16.msra.mxu0 %v2807_v52  ;;  %v2879_v18 = vld [vmem:[#allocation6 + $0x1b50] sm:$0xff]  ;;  %v2886_v52 = vld [vmem:[#allocation6 + $0x1b88] sm:$0xff] }
 0x764   :  { %3326 = vmatprep.subr.bf16.mxu1 %v2814_v42  ;;  %3654 = vmatprep.subr.bf16.mxu0 %v2816_v49  ;;  %v2888_v42 = vld [vmem:[#allocation6 + $0x1b98] sm:$0xff]  ;;  %v2885_v49 = vld [vmem:[#allocation6 + $0x1b80] sm:$0xff] }
 0x767   :  { %3327 = vmatpush1.bf16.msra.mxu1 %v2813_v47  ;;  %3655 = vmatpush1.bf16.msra.mxu0 %v2815_v34  ;;  %v2887_v47 = vld [vmem:[#allocation6 + $0x1b90] sm:$0xff]  ;;  %v2894_v34 = vld [vmem:[#allocation6 + $0x1bc8] sm:$0xff] }
 0x768   :  { %3328 = vmatprep.subr.bf16.mxu1 %v2822_v20  ;;  %3656 = vmatprep.subr.bf16.mxu0 %v2824_v57  ;;  %v2896_v20 = vld [vmem:[#allocation6 + $0x1bd8] sm:$0xff]  ;;  %v2893_v57 = vld [vmem:[#allocation6 + $0x1bc0] sm:$0xff] }
 0x76b   :  { %3329 = vmatpush1.bf16.msra.mxu1 %v2821_v29  ;;  %3657 = vmatpush1.bf16.msra.mxu0 %v2823_v61  ;;  %v2895_v29 = vld [vmem:[#allocation6 + $0x1bd0] sm:$0xff]  ;;  %v2902_v61 = vld [vmem:[#allocation6 + $0x1c08] sm:$0xff] }
 0x76c   :  { %3330 = vmatprep.subr.bf16.mxu1 %v2830_v22  ;;  %3658 = vmatprep.subr.bf16.mxu0 %v2832_v62  ;;  %v2904_v22 = vld [vmem:[#allocation6 + $0x1c18] sm:$0xff]  ;;  %v6564_v62 = vmax.f32 %v6164_v28, 0.0  ;;  %v2909_v28 = vld [vmem:[#allocation6 + $0x1c40] sm:$0xff] }
 0x76f   :  { %3331 = vmatpush1.bf16.msra.mxu1 %v2829_v55  ;;  %3659 = vmatpush1.bf16.msra.mxu0 %v2831_v40  ;;  %v6345_v55 = vpack.c.bf16 %v6564_v62, %v6564_v62  ;;  %v2901_v40 = vld [vmem:[#allocation6 + $0x1c00] sm:$0xff]  ;;  %v2976_v62 = vld [vmem:[#allocation6 + $0x1e58] sm:$0xff] }
 0x770   :  { %3332 = vmatprep.subr.bf16.mxu1 %v2838_v51  ;;  %3660 = vmatprep.subr.bf16.mxu0 %v2840_v48  ;;  %v2903_v51 = vld [vmem:[#allocation6 + $0x1c10] sm:$0xff]  ;;  %v2910_v48 = vld [vmem:[#allocation6 + $0x1c48] sm:$0xff] }
 0x773   :  { %3333 = vmatpush1.bf16.msra.mxu1 %v2837_v41  ;;  %3661 = vmatpush1.bf16.msra.mxu0 %v2839_v23  ;;  %v2912_v41 = vld [vmem:[#allocation6 + $0x1c58] sm:$0xff]  ;;  %v6565_v23 = vmax.f32 %v6182_v17, 0.0  ;;  %v2917_v17 = vld [vmem:[#allocation6 + $0x1c80] sm:$0xff] }
 0x774   :  { %3334 = vmatprep.subr.bf16.mxu1 %v2846_v36  ;;  %3662 = vmatprep.subr.bf16.mxu0 %v2848_v32  ;;  %v2911_v32 = vld [vmem:[#allocation6 + $0x1c50] sm:$0xff] }
 0x775   :  { %v6350_v36 = vpack.c.bf16 %v6565_v23, %v6565_v23  ;;  %v2981_v23 = vld [vmem:[#allocation6 + $0x1e80] sm:$0xff] }
 0x777   :  { %3335 = vmatpush1.bf16.msra.mxu1 %v2845_v1  ;;  %3663 = vmatpush1.bf16.msra.mxu0 %v2847_v3  ;;  %v2918_v1 = vld [vmem:[#allocation6 + $0x1c88] sm:$0xff]  ;;  %v2920_v3 = vld [vmem:[#allocation6 + $0x1c98] sm:$0xff] }
 0x778   :  { %3336 = vmatprep.subr.bf16.mxu1 %v2854_v8  ;;  %3664 = vmatprep.subr.bf16.mxu0 %v2856_v63  ;;  %v2919_v8 = vld [vmem:[#allocation6 + $0x1c90] sm:$0xff]  ;;  %v2926_v63 = vld [vmem:[#allocation6 + $0x1cc8] sm:$0xff] }
 0x77b   :  { %3337 = vmatpush1.bf16.msra.mxu1 %v2853_v9  ;;  %3665 = vmatpush1.bf16.msra.mxu0 %v2855_v27  ;;  %v2928_v9 = vld [vmem:[#allocation6 + $0x1cd8] sm:$0xff]  ;;  %v2925_v27 = vld [vmem:[#allocation6 + $0x1cc0] sm:$0xff] }
 0x77c   :  { %3338 = vmatprep.subr.bf16.mxu1 %v2862_v10  ;;  %3666 = vmatprep.subr.bf16.mxu0 %v2864_v7  ;;  %v2927_v10 = vld [vmem:[#allocation6 + $0x1cd0] sm:$0xff]  ;;  %v2934_v7 = vld [vmem:[#allocation6 + $0x1d08] sm:$0xff] }
 0x77f   :  { %3339 = vmatpush1.bf16.msra.mxu1 %v2861_v11  ;;  %3667 = vmatpush1.bf16.msra.mxu0 %v2863_v19  ;;  %v2936_v11 = vld [vmem:[#allocation6 + $0x1d18] sm:$0xff]  ;;  %v2933_v19 = vld [vmem:[#allocation6 + $0x1d00] sm:$0xff] }
 0x780   :  { %3340 = vmatprep.subr.bf16.mxu1 %v2870_v12  ;;  %3668 = vmatprep.subr.bf16.mxu0 %v2872_v50  ;;  %v2935_v12 = vld [vmem:[#allocation6 + $0x1d10] sm:$0xff]  ;;  %v2942_v50 = vld [vmem:[#allocation6 + $0x1d48] sm:$0xff] }
 0x783   :  { %3341 = vmatpush1.bf16.msra.mxu1 %v2869_v13  ;;  %3669 = vmatpush1.bf16.msra.mxu0 %v2871_v30  ;;  %v2944_v13 = vld [vmem:[#allocation6 + $0x1d58] sm:$0xff]  ;;  %v2941_v30 = vld [vmem:[#allocation6 + $0x1d40] sm:$0xff] }
 0x784   :  { %3342 = vmatprep.subr.bf16.mxu1 %v2878_v15  ;;  %3670 = vmatprep.subr.bf16.mxu0 %v2880_v26  ;;  %v2943_v15 = vld [vmem:[#allocation6 + $0x1d50] sm:$0xff]  ;;  %v2950_v26 = vld [vmem:[#allocation6 + $0x1d88] sm:$0xff] }
 0x787   :  { %3343 = vmatpush1.bf16.msra.mxu1 %v2877_v60  ;;  %3671 = vmatpush1.bf16.msra.mxu0 %v2879_v18  ;;  %v2952_v60 = vld [vmem:[#allocation6 + $0x1d98] sm:$0xff]  ;;  %v2949_v18 = vld [vmem:[#allocation6 + $0x1d80] sm:$0xff] }
 0x788   :  { %3344 = vmatprep.subr.bf16.mxu1 %v2886_v52  ;;  %3672 = vmatprep.subr.bf16.mxu0 %v2888_v42  ;;  %v2951_v52 = vld [vmem:[#allocation6 + $0x1d90] sm:$0xff]  ;;  %v2958_v42 = vld [vmem:[#allocation6 + $0x1dc8] sm:$0xff] }
 0x78b   :  { %3345 = vmatpush1.bf16.msra.mxu1 %v2885_v49  ;;  %3673 = vmatpush1.bf16.msra.mxu0 %v2887_v47  ;;  %v2960_v49 = vld [vmem:[#allocation6 + $0x1dd8] sm:$0xff]  ;;  %v2957_v47 = vld [vmem:[#allocation6 + $0x1dc0] sm:$0xff] }
 0x78c   :  { %3346 = vmatprep.subr.bf16.mxu1 %v2894_v34  ;;  %3674 = vmatprep.subr.bf16.mxu0 %v2896_v20  ;;  %v2959_v34 = vld [vmem:[#allocation6 + $0x1dd0] sm:$0xff]  ;;  %v2966_v20 = vld [vmem:[#allocation6 + $0x1e08] sm:$0xff] }
 0x78f   :  { %3347 = vmatpush1.bf16.msra.mxu1 %v2893_v57  ;;  %3675 = vmatpush1.bf16.msra.mxu0 %v2895_v29  ;;  %v2968_v57 = vld [vmem:[#allocation6 + $0x1e18] sm:$0xff]  ;;  %v2965_v29 = vld [vmem:[#allocation6 + $0x1e00] sm:$0xff] }
 0x790   :  { %3357 = vmatprep.subr.bf16.mxu1 %v2902_v61  ;;  %3685 = vmatprep.subr.bf16.mxu0 %v2904_v22  ;;  %v2967_v61 = vld [vmem:[#allocation6 + $0x1e10] sm:$0xff]  ;;  %v2974_v22 = vld [vmem:[#allocation6 + $0x1e48] sm:$0xff] }
 0x792   :  { %3349 = vmatmul.mubr.bf16.vlgmr.msra.gmra.mrb[36].mxu1 %v6345_v55  ;;  %3677 = vmatmul.mubr.bf16.vlgmr.msra.gmra.mrb[28].mxu0 %v6345_v55 }
 0x793   :  { %3358 = vmatpush1.bf16.msra.mxu1 %v2901_v40  ;;  %3686 = vmatpush1.bf16.msra.mxu0 %v2903_v51  ;;  %v2973_v40 = vld [vmem:[#allocation6 + $0x1e40] sm:$0xff]  ;;  %v2975_v51 = vld [vmem:[#allocation6 + $0x1e50] sm:$0xff] }
 0x794   :  { %3359 = vmatprep.subr.bf16.mxu1 %v2910_v48  ;;  %3687 = vmatprep.subr.bf16.mxu0 %v2912_v41  ;;  %v2982_v48 = vld [vmem:[#allocation6 + $0x1e88] sm:$0xff]  ;;  %v2984_v41 = vld [vmem:[#allocation6 + $0x1e98] sm:$0xff] }
 0x795   :  { %3389 = vmatprep.mubr.bf16.mxu1 %v6350_v36  ;;  %3717 = vmatprep.mubr.bf16.mxu0 %v6350_v36 }
 0x797   :  { %3360 = vmatpush1.bf16.msra.mxu1 %v2909_v28  ;;  %3688 = vmatpush1.bf16.msra.mxu0 %v2911_v32  ;;  %v2983_v28 = vld [vmem:[#allocation6 + $0x1e90] sm:$0xff]  ;;  %v2990_v32 = vld [vmem:[#allocation6 + $0x1ec8] sm:$0xff] }
 0x798   :  { %3361 = vmatprep.subr.bf16.mxu1 %v2918_v1  ;;  %3689 = vmatprep.subr.bf16.mxu0 %v2920_v3  ;;  %v2992_v1 = vld [vmem:[#allocation6 + $0x1ed8] sm:$0xff]  ;;  %v2989_v3 = vld [vmem:[#allocation6 + $0x1ec0] sm:$0xff] }
 0x79b   :  { %3362 = vmatpush1.bf16.msra.mxu1 %v2917_v17  ;;  %3690 = vmatpush1.bf16.msra.mxu0 %v2919_v8  ;;  %v2991_v17 = vld [vmem:[#allocation6 + $0x1ed0] sm:$0xff]  ;;  %v2998_v8 = vld [vmem:[#allocation6 + $0x1f08] sm:$0xff] }
 0x79c   :  { %3363 = vmatprep.subr.bf16.mxu1 %v2926_v63  ;;  %3691 = vmatprep.subr.bf16.mxu0 %v2928_v9  ;;  %v3000_v63 = vld [vmem:[#allocation6 + $0x1f18] sm:$0xff]  ;;  %v2997_v9 = vld [vmem:[#allocation6 + $0x1f00] sm:$0xff] }
 0x79f   :  { %3364 = vmatpush1.bf16.msra.mxu1 %v2925_v27  ;;  %3692 = vmatpush1.bf16.msra.mxu0 %v2927_v10  ;;  %v2999_v27 = vld [vmem:[#allocation6 + $0x1f10] sm:$0xff]  ;;  %v3006_v10 = vld [vmem:[#allocation6 + $0x1f48] sm:$0xff] }
 0x7a0   :  { %3365 = vmatprep.subr.bf16.mxu1 %v2934_v7  ;;  %3693 = vmatprep.subr.bf16.mxu0 %v2936_v11  ;;  %v3008_v7 = vld [vmem:[#allocation6 + $0x1f58] sm:$0xff]  ;;  %v3005_v11 = vld [vmem:[#allocation6 + $0x1f40] sm:$0xff] }
 0x7a3   :  { %3366 = vmatpush1.bf16.msra.mxu1 %v2933_v19  ;;  %3694 = vmatpush1.bf16.msra.mxu0 %v2935_v12  ;;  %v3007_v19 = vld [vmem:[#allocation6 + $0x1f50] sm:$0xff]  ;;  %v3014_v12 = vld [vmem:[#allocation6 + $0x1f88] sm:$0xff] }
 0x7a4   :  { %3367 = vmatprep.subr.bf16.mxu1 %v2942_v50  ;;  %3695 = vmatprep.subr.bf16.mxu0 %v2944_v13  ;;  %v3016_v50 = vld [vmem:[#allocation6 + $0x1f98] sm:$0xff]  ;;  %v3013_v13 = vld [vmem:[#allocation6 + $0x1f80] sm:$0xff] }
 0x7a7   :  { %3368 = vmatpush1.bf16.msra.mxu1 %v2941_v30  ;;  %3696 = vmatpush1.bf16.msra.mxu0 %v2943_v15  ;;  %v3015_v30 = vld [vmem:[#allocation6 + $0x1f90] sm:$0xff]  ;;  %v3022_v15 = vld [vmem:[#allocation6 + $0x1fc8] sm:$0xff] }
 0x7a8   :  { %3369 = vmatprep.subr.bf16.mxu1 %v2950_v26  ;;  %3697 = vmatprep.subr.bf16.mxu0 %v2952_v60  ;;  %v3024_v26 = vld [vmem:[#allocation6 + $0x1fd8] sm:$0xff]  ;;  %v3021_v60 = vld [vmem:[#allocation6 + $0x1fc0] sm:$0xff] }
 0x7ab   :  { %3370 = vmatpush1.bf16.msra.mxu1 %v2949_v18  ;;  %3698 = vmatpush1.bf16.msra.mxu0 %v2951_v52  ;;  %v3023_v18 = vld [vmem:[#allocation6 + $0x1fd0] sm:$0xff]  ;;  %v2010_v52 = vld [vmem:[#allocation6 + $0x28] sm:$0xff] }
 0x7ac   :  { %3371 = vmatprep.subr.bf16.mxu1 %v2958_v42  ;;  %3699 = vmatprep.subr.bf16.mxu0 %v2960_v49  ;;  %v2012_v42 = vld [vmem:[#allocation6 + $0x38] sm:$0xff]  ;;  %v6566_v49 = vmax.f32 %v6180_v21, 0.0  ;;  %v2017_v21 = vld [vmem:[#allocation6 + $0x60] sm:$0xff] }
 0x7af   :  { %3372 = vmatpush1.bf16.msra.mxu1 %v2957_v47  ;;  %3700 = vmatpush1.bf16.msra.mxu0 %v2959_v34  ;;  %v6359_v47 = vpack.c.bf16 %v6566_v49, %v6566_v49  ;;  %v2009_v34 = vld [vmem:[#allocation6 + $0x20] sm:$0xff]  ;;  %v2083_v49 = vld [vmem:[#allocation6 + $0x270] sm:$0xff] }
 0x7b0   :  { %3373 = vmatprep.subr.bf16.mxu1 %v2966_v20  ;;  %3701 = vmatprep.subr.bf16.mxu0 %v2968_v57  ;;  %v2011_v20 = vld [vmem:[#allocation6 + $0x30] sm:$0xff]  ;;  %v2018_v57 = vld [vmem:[#allocation6 + $0x68] sm:$0xff] }
 0x7b3   :  { %3374 = vmatpush1.bf16.msra.mxu1 %v2965_v29  ;;  %3702 = vmatpush1.bf16.msra.mxu0 %v2967_v61  ;;  %v2020_v29 = vld [vmem:[#allocation6 + $0x78] sm:$0xff]  ;;  %v2019_v61 = vld [vmem:[#allocation6 + $0x70] sm:$0xff] }
 0x7b4   :  { %3375 = vmatprep.subr.bf16.mxu1 %v2974_v22  ;;  %3703 = vmatprep.subr.bf16.mxu0 %v2976_v62  ;;  %v2026_v22 = vld [vmem:[#allocation6 + $0xa8] sm:$0xff]  ;;  %v2028_v62 = vld [vmem:[#allocation6 + $0xb8] sm:$0xff] }
 0x7b7   :  { %3376 = vmatpush1.bf16.msra.mxu1 %v2973_v40  ;;  %3704 = vmatpush1.bf16.msra.mxu0 %v2975_v51  ;;  %v2025_v40 = vld [vmem:[#allocation6 + $0xa0] sm:$0xff]  ;;  %v2027_v51 = vld [vmem:[#allocation6 + $0xb0] sm:$0xff] }
 0x7b8   :  { %3377 = vmatprep.subr.bf16.mxu1 %v2982_v48  ;;  %3705 = vmatprep.subr.bf16.mxu0 %v2984_v41  ;;  %v2034_v48 = vld [vmem:[#allocation6 + $0xe8] sm:$0xff]  ;;  %v2036_v41 = vld [vmem:[#allocation6 + $0xf8] sm:$0xff] }
 0x7bb   :  { %3378 = vmatpush1.bf16.msra.mxu1 %v2981_v23  ;;  %3706 = vmatpush1.bf16.msra.mxu0 %v2983_v28  ;;  %v2033_v23 = vld [vmem:[#allocation6 + $0xe0] sm:$0xff]  ;;  %v2035_v28 = vld [vmem:[#allocation6 + $0xf0] sm:$0xff] }
 0x7bc   :  { %3379 = vmatprep.subr.bf16.mxu1 %v2990_v32  ;;  %3707 = vmatprep.subr.bf16.mxu0 %v2992_v1  ;;  %v2042_v32 = vld [vmem:[#allocation6 + $0x128] sm:$0xff]  ;;  %v2044_v1 = vld [vmem:[#allocation6 + $0x138] sm:$0xff] }
 0x7bf   :  { %3380 = vmatpush1.bf16.msra.mxu1 %v2989_v3  ;;  %3708 = vmatpush1.bf16.msra.mxu0 %v2991_v17  ;;  %v2043_v3 = vld [vmem:[#allocation6 + $0x130] sm:$0xff]  ;;  %v2050_v17 = vld [vmem:[#allocation6 + $0x168] sm:$0xff] }
 0x7c0   :  { %3381 = vmatprep.subr.bf16.mxu1 %v2998_v8  ;;  %3709 = vmatprep.subr.bf16.mxu0 %v3000_v63  ;;  %v2052_v8 = vld [vmem:[#allocation6 + $0x178] sm:$0xff]  ;;  %v2049_v63 = vld [vmem:[#allocation6 + $0x160] sm:$0xff] }
 0x7c3   :  { %3382 = vmatpush1.bf16.msra.mxu1 %v2997_v9  ;;  %3710 = vmatpush1.bf16.msra.mxu0 %v2999_v27  ;;  %v2051_v9 = vld [vmem:[#allocation6 + $0x170] sm:$0xff]  ;;  %v2058_v27 = vld [vmem:[#allocation6 + $0x1a8] sm:$0xff] }
 0x7c4   :  { %3383 = vmatprep.subr.bf16.mxu1 %v3006_v10  ;;  %3711 = vmatprep.subr.bf16.mxu0 %v3008_v7  ;;  %v2060_v10 = vld [vmem:[#allocation6 + $0x1b8] sm:$0xff]  ;;  %v2057_v7 = vld [vmem:[#allocation6 + $0x1a0] sm:$0xff] }
 0x7c7   :  { %3384 = vmatpush1.bf16.msra.mxu1 %v3005_v11  ;;  %3712 = vmatpush1.bf16.msra.mxu0 %v3007_v19  ;;  %v2059_v11 = vld [vmem:[#allocation6 + $0x1b0] sm:$0xff]  ;;  %v2066_v19 = vld [vmem:[#allocation6 + $0x1e8] sm:$0xff] }
 0x7c8   :  { %3385 = vmatprep.subr.bf16.mxu1 %v3014_v12  ;;  %3713 = vmatprep.subr.bf16.mxu0 %v3016_v50  ;;  %v2068_v12 = vld [vmem:[#allocation6 + $0x1f8] sm:$0xff]  ;;  %v2065_v50 = vld [vmem:[#allocation6 + $0x1e0] sm:$0xff] }
 0x7cb   :  { %3386 = vmatpush1.bf16.msra.mxu1 %v3013_v13  ;;  %3714 = vmatpush1.bf16.msra.mxu0 %v3015_v30  ;;  %v2067_v13 = vld [vmem:[#allocation6 + $0x1f0] sm:$0xff]  ;;  %v2074_v30 = vld [vmem:[#allocation6 + $0x228] sm:$0xff] }
 0x7cc   :  { %3387 = vmatprep.subr.bf16.mxu1 %v3022_v15  ;;  %3715 = vmatprep.subr.bf16.mxu0 %v3024_v26  ;;  %v2076_v15 = vld [vmem:[#allocation6 + $0x238] sm:$0xff]  ;;  %v2073_v26 = vld [vmem:[#allocation6 + $0x220] sm:$0xff] }
 0x7cf   :  { %3388 = vmatpush1.bf16.msra.mxu1 %v3021_v60  ;;  %3716 = vmatpush1.bf16.msra.mxu0 %v3023_v18  ;;  %v2075_v60 = vld [vmem:[#allocation6 + $0x230] sm:$0xff]  ;;  %v2082_v18 = vld [vmem:[#allocation6 + $0x268] sm:$0xff] }
 0x7d0   :  { %3726 = vmatprep.subr.bf16.mxu1 %v2010_v52  ;;  %4054 = vmatprep.subr.bf16.mxu0 %v2012_v42  ;;  %v2084_v52 = vld [vmem:[#allocation6 + $0x278] sm:$0xff]  ;;  %v2081_v42 = vld [vmem:[#allocation6 + $0x260] sm:$0xff] }
 0x7d2   :  { %3390 = vmatmul.mubr.bf16.vlgmr.msra.gmra.mrb[36].mxu1 %v6359_v47  ;;  %3718 = vmatmul.mubr.bf16.vlgmr.msra.gmra.mrb[28].mxu0 %v6359_v47 }
 0x7d3   :  { %3727 = vmatpush1.bf16.msra.mxu1 %v2009_v34  ;;  %4055 = vmatpush1.bf16.msra.mxu0 %v2011_v20  ;;  %v2090_v34 = vld [vmem:[#allocation6 + $0x2a8] sm:$0xff]  ;;  %v2092_v20 = vld [vmem:[#allocation6 + $0x2b8] sm:$0xff] }
 0x7d4   :  { %3728 = vmatprep.subr.bf16.mxu1 %v2018_v57  ;;  %4056 = vmatprep.subr.bf16.mxu0 %v2020_v29  ;;  %v2089_v57 = vld [vmem:[#allocation6 + $0x2a0] sm:$0xff]  ;;  %v2091_v29 = vld [vmem:[#allocation6 + $0x2b0] sm:$0xff] }
 0x7d5   :  { %3758 = vmatprep.mubr.bf16.mxu1 %v6254_v6  ;;  %4086 = vmatprep.mubr.bf16.mxu0 %v6254_v6  ;;  %v2041_v6 = vld [vmem:[#allocation6 + $0x120] sm:$0xff] }
 0x7d7   :  { %3729 = vmatpush1.bf16.msra.mxu1 %v2017_v21  ;;  %4057 = vmatpush1.bf16.msra.mxu0 %v2019_v61  ;;  %v2098_v21 = vld [vmem:[#allocation6 + $0x2e8] sm:$0xff]  ;;  %v2100_v61 = vld [vmem:[#allocation6 + $0x2f8] sm:$0xff] }
 0x7d8   :  { %3730 = vmatprep.subr.bf16.mxu1 %v2026_v22  ;;  %4058 = vmatprep.subr.bf16.mxu0 %v2028_v62  ;;  %v2097_v22 = vld [vmem:[#allocation6 + $0x2e0] sm:$0xff]  ;;  %v2099_v62 = vld [vmem:[#allocation6 + $0x2f0] sm:$0xff] }
 0x7db   :  { %3731 = vmatpush1.bf16.msra.mxu1 %v2025_v40  ;;  %4059 = vmatpush1.bf16.msra.mxu0 %v2027_v51  ;;  %v2106_v40 = vld [vmem:[#allocation6 + $0x328] sm:$0xff]  ;;  %v2108_v51 = vld [vmem:[#allocation6 + $0x338] sm:$0xff] }
 0x7dc   :  { %3732 = vmatprep.subr.bf16.mxu1 %v2034_v48  ;;  %4060 = vmatprep.subr.bf16.mxu0 %v2036_v41  ;;  %v2105_v48 = vld [vmem:[#allocation6 + $0x320] sm:$0xff]  ;;  %v2107_v41 = vld [vmem:[#allocation6 + $0x330] sm:$0xff] }
 0x7df   :  { %3733 = vmatpush1.bf16.msra.mxu1 %v2033_v23  ;;  %4061 = vmatpush1.bf16.msra.mxu0 %v2035_v28  ;;  %v2114_v23 = vld [vmem:[#allocation6 + $0x368] sm:$0xff]  ;;  %v2116_v28 = vld [vmem:[#allocation6 + $0x378] sm:$0xff] }
 0x7e0   :  { %3734 = vmatprep.subr.bf16.mxu1 %v2042_v32  ;;  %4062 = vmatprep.subr.bf16.mxu0 %v2044_v1  ;;  %v2113_v32 = vld [vmem:[#allocation6 + $0x360] sm:$0xff]  ;;  %v2115_v1 = vld [vmem:[#allocation6 + $0x370] sm:$0xff] }
 0x7e3   :  { %3735 = vmatpush1.bf16.msra.mxu1 %v2041_v6  ;;  %4063 = vmatpush1.bf16.msra.mxu0 %v2043_v3  ;;  %v2122_v6 = vld [vmem:[#allocation6 + $0x3a8] sm:$0xff]  ;;  %v2124_v3 = vld [vmem:[#allocation6 + $0x3b8] sm:$0xff] }
 0x7e4   :  { %3736 = vmatprep.subr.bf16.mxu1 %v2050_v17  ;;  %4064 = vmatprep.subr.bf16.mxu0 %v2052_v8  ;;  %v2121_v17 = vld [vmem:[#allocation6 + $0x3a0] sm:$0xff]  ;;  %v2123_v8 = vld [vmem:[#allocation6 + $0x3b0] sm:$0xff] }
 0x7e7   :  { %3737 = vmatpush1.bf16.msra.mxu1 %v2049_v63  ;;  %4065 = vmatpush1.bf16.msra.mxu0 %v2051_v9  ;;  %v2130_v63 = vld [vmem:[#allocation6 + $0x3e8] sm:$0xff]  ;;  %v2132_v9 = vld [vmem:[#allocation6 + $0x3f8] sm:$0xff] }
 0x7e8   :  { %3738 = vmatprep.subr.bf16.mxu1 %v2058_v27  ;;  %4066 = vmatprep.subr.bf16.mxu0 %v2060_v10  ;;  %v2129_v27 = vld [vmem:[#allocation6 + $0x3e0] sm:$0xff]  ;;  %v2131_v10 = vld [vmem:[#allocation6 + $0x3f0] sm:$0xff] }
 0x7eb   :  { %3739 = vmatpush1.bf16.msra.mxu1 %v2057_v7  ;;  %4067 = vmatpush1.bf16.msra.mxu0 %v2059_v11  ;;  %v2138_v7 = vld [vmem:[#allocation6 + $0x428] sm:$0xff]  ;;  %v2140_v11 = vld [vmem:[#allocation6 + $0x438] sm:$0xff] }
 0x7ec   :  { %3740 = vmatprep.subr.bf16.mxu1 %v2066_v19  ;;  %4068 = vmatprep.subr.bf16.mxu0 %v2068_v12  ;;  %v2137_v19 = vld [vmem:[#allocation6 + $0x420] sm:$0xff]  ;;  %v2139_v12 = vld [vmem:[#allocation6 + $0x430] sm:$0xff] }
 0x7ef   :  { %3741 = vmatpush1.bf16.msra.mxu1 %v2065_v50  ;;  %4069 = vmatpush1.bf16.msra.mxu0 %v2067_v13  ;;  %v2146_v50 = vld [vmem:[#allocation6 + $0x468] sm:$0xff]  ;;  %v2148_v13 = vld [vmem:[#allocation6 + $0x478] sm:$0xff] }
 0x7f0   :  { %3742 = vmatprep.subr.bf16.mxu1 %v2074_v30  ;;  %4070 = vmatprep.subr.bf16.mxu0 %v2076_v15  ;;  %v2145_v30 = vld [vmem:[#allocation6 + $0x460] sm:$0xff]  ;;  %v2147_v15 = vld [vmem:[#allocation6 + $0x470] sm:$0xff] }
 0x7f3   :  { %3743 = vmatpush1.bf16.msra.mxu1 %v2073_v26  ;;  %4071 = vmatpush1.bf16.msra.mxu0 %v2075_v60  ;;  %v2154_v26 = vld [vmem:[#allocation6 + $0x4a8] sm:$0xff]  ;;  %v2156_v60 = vld [vmem:[#allocation6 + $0x4b8] sm:$0xff] }
 0x7f4   :  { %3744 = vmatprep.subr.bf16.mxu1 %v2082_v18  ;;  %4072 = vmatprep.subr.bf16.mxu0 %v2084_v52  ;;  %v2153_v18 = vld [vmem:[#allocation6 + $0x4a0] sm:$0xff]  ;;  %v2155_v52 = vld [vmem:[#allocation6 + $0x4b0] sm:$0xff] }
 0x7f7   :  { %3745 = vmatpush1.bf16.msra.mxu1 %v2081_v42  ;;  %4073 = vmatpush1.bf16.msra.mxu0 %v2083_v49  ;;  %v2162_v42 = vld [vmem:[#allocation6 + $0x4e8] sm:$0xff]  ;;  %v2161_v49 = vld [vmem:[#allocation6 + $0x4e0] sm:$0xff] }
 0x7f8   :  { %3746 = vmatprep.subr.bf16.mxu1 %v2090_v34  ;;  %4074 = vmatprep.subr.bf16.mxu0 %v2092_v20  ;;  %v2163_v34 = vld [vmem:[#allocation6 + $0x4f0] sm:$0xff]  ;;  %v2170_v20 = vld [vmem:[#allocation6 + $0x528] sm:$0xff] }
 0x7fb   :  { %3747 = vmatpush1.bf16.msra.mxu1 %v2089_v57  ;;  %4075 = vmatpush1.bf16.msra.mxu0 %v2091_v29  ;;  %v2172_v57 = vld [vmem:[#allocation6 + $0x538] sm:$0xff]  ;;  %v2171_v29 = vld [vmem:[#allocation6 + $0x530] sm:$0xff] }
 0x7fc   :  { %3748 = vmatprep.subr.bf16.mxu1 %v2098_v21  ;;  %4076 = vmatprep.subr.bf16.mxu0 %v2100_v61  ;;  %v2178_v21 = vld [vmem:[#allocation6 + $0x568] sm:$0xff]  ;;  %v2180_v61 = vld [vmem:[#allocation6 + $0x578] sm:$0xff] }
 0x7ff   :  { %3749 = vmatpush1.bf16.msra.mxu1 %v2097_v22  ;;  %4077 = vmatpush1.bf16.msra.mxu0 %v2099_v62  ;;  %v2177_v22 = vld [vmem:[#allocation6 + $0x560] sm:$0xff]  ;;  %v2179_v62 = vld [vmem:[#allocation6 + $0x570] sm:$0xff] }
 0x800   :  { %3750 = vmatprep.subr.bf16.mxu1 %v2106_v40  ;;  %4078 = vmatprep.subr.bf16.mxu0 %v2108_v51  ;;  %v2186_v40 = vld [vmem:[#allocation6 + $0x5a8] sm:$0xff]  ;;  %v2188_v51 = vld [vmem:[#allocation6 + $0x5b8] sm:$0xff] }
 0x803   :  { %3751 = vmatpush1.bf16.msra.mxu1 %v2105_v48  ;;  %4079 = vmatpush1.bf16.msra.mxu0 %v2107_v41  ;;  %v2185_v48 = vld [vmem:[#allocation6 + $0x5a0] sm:$0xff]  ;;  %v2187_v41 = vld [vmem:[#allocation6 + $0x5b0] sm:$0xff] }
 0x804   :  { %3752 = vmatprep.subr.bf16.mxu1 %v2114_v23  ;;  %4080 = vmatprep.subr.bf16.mxu0 %v2116_v28  ;;  %v2194_v23 = vld [vmem:[#allocation6 + $0x5e8] sm:$0xff]  ;;  %v2196_v28 = vld [vmem:[#allocation6 + $0x5f8] sm:$0xff] }
 0x807   :  { %3753 = vmatpush1.bf16.msra.mxu1 %v2113_v32  ;;  %4081 = vmatpush1.bf16.msra.mxu0 %v2115_v1  ;;  %v2193_v32 = vld [vmem:[#allocation6 + $0x5e0] sm:$0xff]  ;;  %v2195_v1 = vld [vmem:[#allocation6 + $0x5f0] sm:$0xff] }
 0x808   :  { %3754 = vmatprep.subr.bf16.mxu1 %v2122_v6  ;;  %4082 = vmatprep.subr.bf16.mxu0 %v2124_v3  ;;  %v2202_v6 = vld [vmem:[#allocation6 + $0x628] sm:$0xff]  ;;  %v2204_v3 = vld [vmem:[#allocation6 + $0x638] sm:$0xff] }
 0x80b   :  { %3755 = vmatpush1.bf16.msra.mxu1 %v2121_v17  ;;  %4083 = vmatpush1.bf16.msra.mxu0 %v2123_v8  ;;  %v2201_v17 = vld [vmem:[#allocation6 + $0x620] sm:$0xff]  ;;  %v2203_v8 = vld [vmem:[#allocation6 + $0x630] sm:$0xff] }
 0x80c   :  { %3756 = vmatprep.subr.bf16.mxu1 %v2130_v63  ;;  %4084 = vmatprep.subr.bf16.mxu0 %v2132_v9  ;;  %v2210_v63 = vld [vmem:[#allocation6 + $0x668] sm:$0xff]  ;;  %v2212_v9 = vld [vmem:[#allocation6 + $0x678] sm:$0xff] }
 0x80f   :  { %3757 = vmatpush1.bf16.msra.mxu1 %v2129_v27  ;;  %4085 = vmatpush1.bf16.msra.mxu0 %v2131_v10  ;;  %v2209_v27 = vld [vmem:[#allocation6 + $0x660] sm:$0xff]  ;;  %v2211_v10 = vld [vmem:[#allocation6 + $0x670] sm:$0xff] }
 0x810   :  { %3767 = vmatprep.subr.bf16.mxu1 %v2138_v7  ;;  %4095 = vmatprep.subr.bf16.mxu0 %v2140_v11  ;;  %v2218_v7 = vld [vmem:[#allocation6 + $0x6a8] sm:$0xff]  ;;  %v2220_v11 = vld [vmem:[#allocation6 + $0x6b8] sm:$0xff] }
 0x812   :  { %3759 = vmatmul.mubr.bf16.vlgmr.msra.gmra.mrb[40].mxu1 %v6261_v2  ;;  %4087 = vmatmul.mubr.bf16.vlgmr.msra.gmra.mrb[32].mxu0 %v6261_v2  ;;  %v2164_v2 = vld [vmem:[#allocation6 + $0x4f8] sm:$0xff] }
 0x813   :  { %3768 = vmatpush1.bf16.msra.mxu1 %v2137_v19  ;;  %4096 = vmatpush1.bf16.msra.mxu0 %v2139_v12  ;;  %v2217_v19 = vld [vmem:[#allocation6 + $0x6a0] sm:$0xff]  ;;  %v2219_v12 = vld [vmem:[#allocation6 + $0x6b0] sm:$0xff] }
 0x814   :  { %3769 = vmatprep.subr.bf16.mxu1 %v2146_v50  ;;  %4097 = vmatprep.subr.bf16.mxu0 %v2148_v13  ;;  %v2226_v50 = vld [vmem:[#allocation6 + $0x6e8] sm:$0xff]  ;;  %v2228_v13 = vld [vmem:[#allocation6 + $0x6f8] sm:$0xff] }
 0x815   :  { %3799 = vmatprep.mubr.bf16.mxu1 %v6266_v5  ;;  %4127 = vmatprep.mubr.bf16.mxu0 %v6266_v5  ;;  %v2169_v5 = vld [vmem:[#allocation6 + $0x520] sm:$0xff] }
 0x817   :  { %3770 = vmatpush1.bf16.msra.mxu1 %v2145_v30  ;;  %4098 = vmatpush1.bf16.msra.mxu0 %v2147_v15  ;;  %v2225_v30 = vld [vmem:[#allocation6 + $0x6e0] sm:$0xff]  ;;  %v2227_v15 = vld [vmem:[#allocation6 + $0x6f0] sm:$0xff] }
 0x818   :  { %3771 = vmatprep.subr.bf16.mxu1 %v2154_v26  ;;  %4099 = vmatprep.subr.bf16.mxu0 %v2156_v60  ;;  %v2234_v26 = vld [vmem:[#allocation6 + $0x728] sm:$0xff]  ;;  %v2236_v60 = vld [vmem:[#allocation6 + $0x738] sm:$0xff] }
 0x81b   :  { %3772 = vmatpush1.bf16.msra.mxu1 %v2153_v18  ;;  %4100 = vmatpush1.bf16.msra.mxu0 %v2155_v52  ;;  %v2233_v18 = vld [vmem:[#allocation6 + $0x720] sm:$0xff]  ;;  %v2235_v52 = vld [vmem:[#allocation6 + $0x730] sm:$0xff] }
 0x81c   :  { %3773 = vmatprep.subr.bf16.mxu1 %v2162_v42  ;;  %4101 = vmatprep.subr.bf16.mxu0 %v2164_v2  ;;  %v2242_v42 = vld [vmem:[#allocation6 + $0x768] sm:$0xff]  ;;  %v2244_v2 = vld [vmem:[#allocation6 + $0x778] sm:$0xff] }
 0x81f   :  { %3774 = vmatpush1.bf16.msra.mxu1 %v2161_v49  ;;  %4102 = vmatpush1.bf16.msra.mxu0 %v2163_v34  ;;  %v2241_v49 = vld [vmem:[#allocation6 + $0x760] sm:$0xff]  ;;  %v2243_v34 = vld [vmem:[#allocation6 + $0x770] sm:$0xff] }
 0x820   :  { %3775 = vmatprep.subr.bf16.mxu1 %v2170_v20  ;;  %4103 = vmatprep.subr.bf16.mxu0 %v2172_v57  ;;  %v2250_v20 = vld [vmem:[#allocation6 + $0x7a8] sm:$0xff]  ;;  %v2252_v57 = vld [vmem:[#allocation6 + $0x7b8] sm:$0xff] }
 0x823   :  { %3776 = vmatpush1.bf16.msra.mxu1 %v2169_v5  ;;  %4104 = vmatpush1.bf16.msra.mxu0 %v2171_v29  ;;  %v2249_v5 = vld [vmem:[#allocation6 + $0x7a0] sm:$0xff]  ;;  %v2251_v29 = vld [vmem:[#allocation6 + $0x7b0] sm:$0xff] }
 0x824   :  { %3777 = vmatprep.subr.bf16.mxu1 %v2178_v21  ;;  %4105 = vmatprep.subr.bf16.mxu0 %v2180_v61  ;;  %v2258_v21 = vld [vmem:[#allocation6 + $0x7e8] sm:$0xff]  ;;  %v2260_v61 = vld [vmem:[#allocation6 + $0x7f8] sm:$0xff] }
 0x827   :  { %3778 = vmatpush1.bf16.msra.mxu1 %v2177_v22  ;;  %4106 = vmatpush1.bf16.msra.mxu0 %v2179_v62  ;;  %v2257_v22 = vld [vmem:[#allocation6 + $0x7e0] sm:$0xff]  ;;  %v2259_v62 = vld [vmem:[#allocation6 + $0x7f0] sm:$0xff] }
 0x828   :  { %3779 = vmatprep.subr.bf16.mxu1 %v2186_v40  ;;  %4107 = vmatprep.subr.bf16.mxu0 %v2188_v51  ;;  %v2266_v40 = vld [vmem:[#allocation6 + $0x828] sm:$0xff]  ;;  %v2268_v51 = vld [vmem:[#allocation6 + $0x838] sm:$0xff] }
 0x82b   :  { %3780 = vmatpush1.bf16.msra.mxu1 %v2185_v48  ;;  %4108 = vmatpush1.bf16.msra.mxu0 %v2187_v41  ;;  %v2265_v48 = vld [vmem:[#allocation6 + $0x820] sm:$0xff]  ;;  %v2267_v41 = vld [vmem:[#allocation6 + $0x830] sm:$0xff] }
 0x82c   :  { %3781 = vmatprep.subr.bf16.mxu1 %v2194_v23  ;;  %4109 = vmatprep.subr.bf16.mxu0 %v2196_v28  ;;  %v2274_v23 = vld [vmem:[#allocation6 + $0x868] sm:$0xff]  ;;  %v2276_v28 = vld [vmem:[#allocation6 + $0x878] sm:$0xff] }
 0x82f   :  { %3782 = vmatpush1.bf16.msra.mxu1 %v2193_v32  ;;  %4110 = vmatpush1.bf16.msra.mxu0 %v2195_v1  ;;  %v2273_v32 = vld [vmem:[#allocation6 + $0x860] sm:$0xff]  ;;  %v2275_v1 = vld [vmem:[#allocation6 + $0x870] sm:$0xff] }
 0x830   :  { %3783 = vmatprep.subr.bf16.mxu1 %v2202_v6  ;;  %4111 = vmatprep.subr.bf16.mxu0 %v2204_v3  ;;  %v2282_v6 = vld [vmem:[#allocation6 + $0x8a8] sm:$0xff]  ;;  %v2284_v3 = vld [vmem:[#allocation6 + $0x8b8] sm:$0xff] }
 0x833   :  { %3784 = vmatpush1.bf16.msra.mxu1 %v2201_v17  ;;  %4112 = vmatpush1.bf16.msra.mxu0 %v2203_v8  ;;  %v2281_v17 = vld [vmem:[#allocation6 + $0x8a0] sm:$0xff]  ;;  %v2283_v8 = vld [vmem:[#allocation6 + $0x8b0] sm:$0xff] }
 0x834   :  { %3785 = vmatprep.subr.bf16.mxu1 %v2210_v63  ;;  %4113 = vmatprep.subr.bf16.mxu0 %v2212_v9  ;;  %v2290_v63 = vld [vmem:[#allocation6 + $0x8e8] sm:$0xff]  ;;  %v2289_v9 = vld [vmem:[#allocation6 + $0x8e0] sm:$0xff] }
 0x837   :  { %3786 = vmatpush1.bf16.msra.mxu1 %v2209_v27  ;;  %4114 = vmatpush1.bf16.msra.mxu0 %v2211_v10  ;;  %v2291_v27 = vld [vmem:[#allocation6 + $0x8f0] sm:$0xff]  ;;  %v2298_v10 = vld [vmem:[#allocation6 + $0x928] sm:$0xff] }
 0x838   :  { %3787 = vmatprep.subr.bf16.mxu1 %v2218_v7  ;;  %4115 = vmatprep.subr.bf16.mxu0 %v2220_v11  ;;  %v2300_v7 = vld [vmem:[#allocation6 + $0x938] sm:$0xff]  ;;  %v2299_v11 = vld [vmem:[#allocation6 + $0x930] sm:$0xff] }
 0x83b   :  { %3788 = vmatpush1.bf16.msra.mxu1 %v2217_v19  ;;  %4116 = vmatpush1.bf16.msra.mxu0 %v2219_v12  ;;  %v2306_v19 = vld [vmem:[#allocation6 + $0x968] sm:$0xff]  ;;  %v2308_v12 = vld [vmem:[#allocation6 + $0x978] sm:$0xff] }
 0x83c   :  { %3789 = vmatprep.subr.bf16.mxu1 %v2226_v50  ;;  %4117 = vmatprep.subr.bf16.mxu0 %v2228_v13  ;;  %v2305_v50 = vld [vmem:[#allocation6 + $0x960] sm:$0xff]  ;;  %v2307_v13 = vld [vmem:[#allocation6 + $0x970] sm:$0xff] }
 0x83f   :  { %3790 = vmatpush1.bf16.msra.mxu1 %v2225_v30  ;;  %4118 = vmatpush1.bf16.msra.mxu0 %v2227_v15  ;;  %v2314_v30 = vld [vmem:[#allocation6 + $0x9a8] sm:$0xff]  ;;  %v2316_v15 = vld [vmem:[#allocation6 + $0x9b8] sm:$0xff] }
 0x840   :  { %3791 = vmatprep.subr.bf16.mxu1 %v2234_v26  ;;  %4119 = vmatprep.subr.bf16.mxu0 %v2236_v60  ;;  %v2313_v26 = vld [vmem:[#allocation6 + $0x9a0] sm:$0xff]  ;;  %v2315_v60 = vld [vmem:[#allocation6 + $0x9b0] sm:$0xff] }
 0x843   :  { %3792 = vmatpush1.bf16.msra.mxu1 %v2233_v18  ;;  %4120 = vmatpush1.bf16.msra.mxu0 %v2235_v52  ;;  %v2322_v18 = vld [vmem:[#allocation6 + $0x9e8] sm:$0xff]  ;;  %v2324_v52 = vld [vmem:[#allocation6 + $0x9f8] sm:$0xff] }
 0x844   :  { %3793 = vmatprep.subr.bf16.mxu1 %v2242_v42  ;;  %4121 = vmatprep.subr.bf16.mxu0 %v2244_v2  ;;  %v2321_v42 = vld [vmem:[#allocation6 + $0x9e0] sm:$0xff]  ;;  %v2323_v2 = vld [vmem:[#allocation6 + $0x9f0] sm:$0xff] }
 0x847   :  { %3794 = vmatpush1.bf16.msra.mxu1 %v2241_v49  ;;  %4122 = vmatpush1.bf16.msra.mxu0 %v2243_v34  ;;  %v2330_v49 = vld [vmem:[#allocation6 + $0xa28] sm:$0xff]  ;;  %v2332_v34 = vld [vmem:[#allocation6 + $0xa38] sm:$0xff] }
 0x848   :  { %3795 = vmatprep.subr.bf16.mxu1 %v2250_v20  ;;  %4123 = vmatprep.subr.bf16.mxu0 %v2252_v57  ;;  %v2329_v20 = vld [vmem:[#allocation6 + $0xa20] sm:$0xff]  ;;  %v2331_v57 = vld [vmem:[#allocation6 + $0xa30] sm:$0xff] }
 0x84b   :  { %3796 = vmatpush1.bf16.msra.mxu1 %v2249_v5  ;;  %4124 = vmatpush1.bf16.msra.mxu0 %v2251_v29  ;;  %v2338_v5 = vld [vmem:[#allocation6 + $0xa68] sm:$0xff]  ;;  %v2340_v29 = vld [vmem:[#allocation6 + $0xa78] sm:$0xff] }
 0x84c   :  { %3797 = vmatprep.subr.bf16.mxu1 %v2258_v21  ;;  %4125 = vmatprep.subr.bf16.mxu0 %v2260_v61  ;;  %v2337_v21 = vld [vmem:[#allocation6 + $0xa60] sm:$0xff]  ;;  %v2339_v61 = vld [vmem:[#allocation6 + $0xa70] sm:$0xff] }
 0x84f   :  { %3798 = vmatpush1.bf16.msra.mxu1 %v2257_v22  ;;  %4126 = vmatpush1.bf16.msra.mxu0 %v2259_v62  ;;  %v2346_v22 = vld [vmem:[#allocation6 + $0xaa8] sm:$0xff]  ;;  %v2348_v62 = vld [vmem:[#allocation6 + $0xab8] sm:$0xff] }
 0x850   :  { %3808 = vmatprep.subr.bf16.mxu1 %v2266_v40  ;;  %4136 = vmatprep.subr.bf16.mxu0 %v2268_v51  ;;  %v2345_v40 = vld [vmem:[#allocation6 + $0xaa0] sm:$0xff]  ;;  %v2347_v51 = vld [vmem:[#allocation6 + $0xab0] sm:$0xff] }
 0x852   :  { %3800 = vmatmul.mubr.bf16.vlgmr.msra.gmra.mrb[40].mxu1 %v6275_v35  ;;  %4128 = vmatmul.mubr.bf16.vlgmr.msra.gmra.mrb[32].mxu0 %v6275_v35  ;;  %v2292_v35 = vld [vmem:[#allocation6 + $0x8f8] sm:$0xff] }
 0x853   :  { %3809 = vmatpush1.bf16.msra.mxu1 %v2265_v48  ;;  %4137 = vmatpush1.bf16.msra.mxu0 %v2267_v41  ;;  %v2354_v48 = vld [vmem:[#allocation6 + $0xae8] sm:$0xff]  ;;  %v2356_v41 = vld [vmem:[#allocation6 + $0xaf8] sm:$0xff] }
 0x854   :  { %3810 = vmatprep.subr.bf16.mxu1 %v2274_v23  ;;  %4138 = vmatprep.subr.bf16.mxu0 %v2276_v28  ;;  %v2353_v23 = vld [vmem:[#allocation6 + $0xae0] sm:$0xff]  ;;  %v2355_v28 = vld [vmem:[#allocation6 + $0xaf0] sm:$0xff] }
 0x855   :  { %3840 = vmatprep.mubr.bf16.mxu1 %v6280_v0  ;;  %4168 = vmatprep.mubr.bf16.mxu0 %v6280_v0  ;;  %v2297_v0 = vld [vmem:[#allocation6 + $0x920] sm:$0xff] }
 0x857   :  { %3811 = vmatpush1.bf16.msra.mxu1 %v2273_v32  ;;  %4139 = vmatpush1.bf16.msra.mxu0 %v2275_v1  ;;  %v2362_v32 = vld [vmem:[#allocation6 + $0xb28] sm:$0xff]  ;;  %v2364_v1 = vld [vmem:[#allocation6 + $0xb38] sm:$0xff] }
 0x858   :  { %3812 = vmatprep.subr.bf16.mxu1 %v2282_v6  ;;  %4140 = vmatprep.subr.bf16.mxu0 %v2284_v3  ;;  %v2361_v6 = vld [vmem:[#allocation6 + $0xb20] sm:$0xff]  ;;  %v2363_v3 = vld [vmem:[#allocation6 + $0xb30] sm:$0xff] }
 0x85b   :  { %3813 = vmatpush1.bf16.msra.mxu1 %v2281_v17  ;;  %4141 = vmatpush1.bf16.msra.mxu0 %v2283_v8  ;;  %v2370_v17 = vld [vmem:[#allocation6 + $0xb68] sm:$0xff]  ;;  %v2372_v8 = vld [vmem:[#allocation6 + $0xb78] sm:$0xff] }
 0x85c   :  { %3814 = vmatprep.subr.bf16.mxu1 %v2290_v63  ;;  %4142 = vmatprep.subr.bf16.mxu0 %v2292_v35  ;;  %v2369_v63 = vld [vmem:[#allocation6 + $0xb60] sm:$0xff]  ;;  %v2371_v35 = vld [vmem:[#allocation6 + $0xb70] sm:$0xff] }
 0x85f   :  { %3815 = vmatpush1.bf16.msra.mxu1 %v2289_v9  ;;  %4143 = vmatpush1.bf16.msra.mxu0 %v2291_v27  ;;  %v2378_v9 = vld [vmem:[#allocation6 + $0xba8] sm:$0xff]  ;;  %v2380_v27 = vld [vmem:[#allocation6 + $0xbb8] sm:$0xff] }
 0x860   :  { %3816 = vmatprep.subr.bf16.mxu1 %v2298_v10  ;;  %4144 = vmatprep.subr.bf16.mxu0 %v2300_v7  ;;  %v2377_v10 = vld [vmem:[#allocation6 + $0xba0] sm:$0xff]  ;;  %v2379_v7 = vld [vmem:[#allocation6 + $0xbb0] sm:$0xff] }
 0x863   :  { %3817 = vmatpush1.bf16.msra.mxu1 %v2297_v0  ;;  %4145 = vmatpush1.bf16.msra.mxu0 %v2299_v11  ;;  %v2386_v0 = vld [vmem:[#allocation6 + $0xbe8] sm:$0xff]  ;;  %v2388_v11 = vld [vmem:[#allocation6 + $0xbf8] sm:$0xff] }
 0x864   :  { %3818 = vmatprep.subr.bf16.mxu1 %v2306_v19  ;;  %4146 = vmatprep.subr.bf16.mxu0 %v2308_v12  ;;  %v2385_v19 = vld [vmem:[#allocation6 + $0xbe0] sm:$0xff]  ;;  %v2387_v12 = vld [vmem:[#allocation6 + $0xbf0] sm:$0xff] }
 0x867   :  { %3819 = vmatpush1.bf16.msra.mxu1 %v2305_v50  ;;  %4147 = vmatpush1.bf16.msra.mxu0 %v2307_v13  ;;  %v2394_v50 = vld [vmem:[#allocation6 + $0xc28] sm:$0xff]  ;;  %v2396_v13 = vld [vmem:[#allocation6 + $0xc38] sm:$0xff] }
 0x868   :  { %3820 = vmatprep.subr.bf16.mxu1 %v2314_v30  ;;  %4148 = vmatprep.subr.bf16.mxu0 %v2316_v15  ;;  %v2393_v30 = vld [vmem:[#allocation6 + $0xc20] sm:$0xff]  ;;  %v2395_v15 = vld [vmem:[#allocation6 + $0xc30] sm:$0xff] }
 0x86b   :  { %3821 = vmatpush1.bf16.msra.mxu1 %v2313_v26  ;;  %4149 = vmatpush1.bf16.msra.mxu0 %v2315_v60  ;;  %v2402_v26 = vld [vmem:[#allocation6 + $0xc68] sm:$0xff]  ;;  %v2404_v60 = vld [vmem:[#allocation6 + $0xc78] sm:$0xff] }
 0x86c   :  { %3822 = vmatprep.subr.bf16.mxu1 %v2322_v18  ;;  %4150 = vmatprep.subr.bf16.mxu0 %v2324_v52  ;;  %v2401_v18 = vld [vmem:[#allocation6 + $0xc60] sm:$0xff]  ;;  %v2403_v52 = vld [vmem:[#allocation6 + $0xc70] sm:$0xff] }
 0x86f   :  { %3823 = vmatpush1.bf16.msra.mxu1 %v2321_v42  ;;  %4151 = vmatpush1.bf16.msra.mxu0 %v2323_v2  ;;  %v2410_v42 = vld [vmem:[#allocation6 + $0xca8] sm:$0xff]  ;;  %v2412_v2 = vld [vmem:[#allocation6 + $0xcb8] sm:$0xff] }
 0x870   :  { %3824 = vmatprep.subr.bf16.mxu1 %v2330_v49  ;;  %4152 = vmatprep.subr.bf16.mxu0 %v2332_v34  ;;  %v2409_v49 = vld [vmem:[#allocation6 + $0xca0] sm:$0xff]  ;;  %v2411_v34 = vld [vmem:[#allocation6 + $0xcb0] sm:$0xff] }
 0x873   :  { %3825 = vmatpush1.bf16.msra.mxu1 %v2329_v20  ;;  %4153 = vmatpush1.bf16.msra.mxu0 %v2331_v57  ;;  %v2418_v20 = vld [vmem:[#allocation6 + $0xce8] sm:$0xff]  ;;  %v2417_v57 = vld [vmem:[#allocation6 + $0xce0] sm:$0xff] }
 0x874   :  { %3826 = vmatprep.subr.bf16.mxu1 %v2338_v5  ;;  %4154 = vmatprep.subr.bf16.mxu0 %v2340_v29  ;;  %v2419_v5 = vld [vmem:[#allocation6 + $0xcf0] sm:$0xff]  ;;  %v2426_v29 = vld [vmem:[#allocation6 + $0xd28] sm:$0xff] }
 0x877   :  { %3827 = vmatpush1.bf16.msra.mxu1 %v2337_v21  ;;  %4155 = vmatpush1.bf16.msra.mxu0 %v2339_v61  ;;  %v2428_v21 = vld [vmem:[#allocation6 + $0xd38] sm:$0xff]  ;;  %v1988_v61 = vld [vmem:[#allocation13 + $0x1f] sm:$0xff] }
 0x878   :  { %3828 = vmatprep.subr.bf16.mxu1 %v2346_v22  ;;  %4156 = vmatprep.subr.bf16.mxu0 %v2348_v62  ;;  %v2427_v22 = vld [vmem:[#allocation6 + $0xd30] sm:$0xff]  ;;  %v2434_v62 = vld [vmem:[#allocation6 + $0xd68] sm:$0xff] }
 0x87b   :  { %3829 = vmatpush1.bf16.msra.mxu1 %v2345_v40  ;;  %4157 = vmatpush1.bf16.msra.mxu0 %v2347_v51  ;;  %v2436_v40 = vld [vmem:[#allocation6 + $0xd78] sm:$0xff]  ;;  %v3033_v51 = vrot.slane %v1988_v61, %v6064_v54 }
 0x87c   :  { %3830 = vmatprep.subr.bf16.mxu1 %v2354_v48  ;;  %4158 = vmatprep.subr.bf16.mxu0 %v2356_v41  ;;  %v3041_v48 = vrot.slane %v1988_v61, %v6082_v38  ;;  %v3037_v41 = vrot.slane %v1988_v61, %v6066_v56 }
 0x87f   :  { %3831 = vmatpush1.bf16.msra.mxu1 %v2353_v23  ;;  %4159 = vmatpush1.bf16.msra.mxu0 %v2355_v28  ;;  %v3045_v23 = vrot.slane %v1988_v61, %v6084_v37  ;;  %v2433_v28 = vld [vmem:[#allocation6 + $0xd60] sm:$0xff]  ;;  %v2476_v61 = vld [vmem:[#allocation6 + $0xeb8] sm:$0xff] }
 0x880   :  { %3832 = vmatprep.subr.bf16.mxu1 %v2362_v32  ;;  %4160 = vmatprep.subr.bf16.mxu0 %v2364_v1  ;;  %v2435_v32 = vld [vmem:[#allocation6 + $0xd70] sm:$0xff] }
 0x883   :  { %3833 = vmatpush1.bf16.msra.mxu1 %v2361_v6  ;;  %4161 = vmatpush1.bf16.msra.mxu0 %v2363_v3  ;;  %v2442_v3 = vld [vmem:[#allocation6 + $0xda8] sm:$0xff] }
 0x884   :  { %3834 = vmatprep.subr.bf16.mxu1 %v2370_v17  ;;  %4162 = vmatprep.subr.bf16.mxu0 %v2372_v8  ;;  %v2444_v17 = vld [vmem:[#allocation6 + $0xdb8] sm:$0xff] }
 0x887   :  { %3835 = vmatpush1.bf16.msra.mxu1 %v2369_v63  ;;  %4163 = vmatpush1.bf16.msra.mxu0 %v2371_v35 }
 0x888   :  { %3836 = vmatprep.subr.bf16.mxu1 %v2378_v9  ;;  %4164 = vmatprep.subr.bf16.mxu0 %v2380_v27 }
 0x88b   :  { %3837 = vmatpush1.bf16.msra.mxu1 %v2377_v10  ;;  %4165 = vmatpush1.bf16.msra.mxu0 %v2379_v7 }
 0x88c   :  { %3838 = vmatprep.subr.bf16.mxu1 %v2386_v0  ;;  %4166 = vmatprep.subr.bf16.mxu0 %v2388_v11 }
 0x88f   :  { %3839 = vmatpush1.bf16.msra.mxu1 %v2385_v19  ;;  %4167 = vmatpush1.bf16.msra.mxu0 %v2387_v12 }
 0x890   :  { %3849 = vmatprep.subr.bf16.mxu1 %v2394_v50  ;;  %4177 = vmatprep.subr.bf16.mxu0 %v2396_v13  ;;  %v2441_v13 = vld [vmem:[#allocation6 + $0xda0] sm:$0xff] }
 0x892   :  { %3841 = vmatmul.mubr.bf16.vlgmr.msra.gmra.mrb[40].mxu1 %v6289_v33  ;;  %4169 = vmatmul.mubr.bf16.vlgmr.msra.gmra.mrb[32].mxu0 %v6289_v33  ;;  %v2420_v33 = vld [vmem:[#allocation6 + $0xcf8] sm:$0xff] }
 0x893   :  { %3850 = vmatpush1.bf16.msra.mxu1 %v2393_v30  ;;  %4178 = vmatpush1.bf16.msra.mxu0 %v2395_v15  ;;  %v2443_v30 = vld [vmem:[#allocation6 + $0xdb0] sm:$0xff] }
 0x894   :  { %3851 = vmatprep.subr.bf16.mxu1 %v2402_v26  ;;  %4179 = vmatprep.subr.bf16.mxu0 %v2404_v60  ;;  %v2450_v60 = vld [vmem:[#allocation6 + $0xde8] sm:$0xff] }
 0x895   :  { %3881 = vmatprep.mubr.bf16.mxu1 %v6294_v45  ;;  %4209 = vmatprep.mubr.bf16.mxu0 %v6294_v45  ;;  %v2425_v45 = vld [vmem:[#allocation6 + $0xd20] sm:$0xff] }
 0x897   :  { %3852 = vmatpush1.bf16.msra.mxu1 %v2401_v18  ;;  %4180 = vmatpush1.bf16.msra.mxu0 %v2403_v52  ;;  %v2452_v18 = vld [vmem:[#allocation6 + $0xdf8] sm:$0xff]  ;;  %v2449_v52 = vld [vmem:[#allocation6 + $0xde0] sm:$0xff] }
 0x898   :  { %3853 = vmatprep.subr.bf16.mxu1 %v2410_v42  ;;  %4181 = vmatprep.subr.bf16.mxu0 %v2412_v2  ;;  %v2451_v42 = vld [vmem:[#allocation6 + $0xdf0] sm:$0xff]  ;;  %v2458_v2 = vld [vmem:[#allocation6 + $0xe28] sm:$0xff] }
 0x89b   :  { %3854 = vmatpush1.bf16.msra.mxu1 %v2409_v49  ;;  %4182 = vmatpush1.bf16.msra.mxu0 %v2411_v34  ;;  %v2460_v49 = vld [vmem:[#allocation6 + $0xe38] sm:$0xff]  ;;  %v2457_v34 = vld [vmem:[#allocation6 + $0xe20] sm:$0xff] }
 0x89c   :  { %3855 = vmatprep.subr.bf16.mxu1 %v2418_v20  ;;  %4183 = vmatprep.subr.bf16.mxu0 %v2420_v33  ;;  %v2459_v20 = vld [vmem:[#allocation6 + $0xe30] sm:$0xff]  ;;  %v2466_v33 = vld [vmem:[#allocation6 + $0xe68] sm:$0xff] }
 0x89f   :  { %3856 = vmatpush1.bf16.msra.mxu1 %v2417_v57  ;;  %4184 = vmatpush1.bf16.msra.mxu0 %v2419_v5  ;;  %v2468_v57 = vld [vmem:[#allocation6 + $0xe78] sm:$0xff]  ;;  %v2465_v5 = vld [vmem:[#allocation6 + $0xe60] sm:$0xff] }
 0x8a0   :  { %3857 = vmatprep.subr.bf16.mxu1 %v2426_v29  ;;  %4185 = vmatprep.subr.bf16.mxu0 %v2428_v21  ;;  %v2467_v29 = vld [vmem:[#allocation6 + $0xe70] sm:$0xff]  ;;  %v2474_v21 = vld [vmem:[#allocation6 + $0xea8] sm:$0xff] }
 0x8a3   :  { %3858 = vmatpush1.bf16.msra.mxu1 %v2425_v45  ;;  %4186 = vmatpush1.bf16.msra.mxu0 %v2427_v22  ;;  %v2473_v45 = vld [vmem:[#allocation6 + $0xea0] sm:$0xff]  ;;  %v2475_v22 = vld [vmem:[#allocation6 + $0xeb0] sm:$0xff] }
 0x8a4   :  { %3859 = vmatprep.subr.bf16.mxu1 %v2434_v62  ;;  %4187 = vmatprep.subr.bf16.mxu0 %v2436_v40  ;;  %v2482_v62 = vld [vmem:[#allocation6 + $0xee8] sm:$0xff]  ;;  %v2484_v40 = vld [vmem:[#allocation6 + $0xef8] sm:$0xff] }
 0x8a5   :  { %v3391_v1 = vpop.f32.mrb[36].mxu1  ;;  %v3719_v6 = vpop.f32.mrb[28].mxu0 }
 0x8a6   :  { %v6381_v8 = vadd.f32 %v3391_v1, %v3033_v51  ;;  %v6383_v63 = vadd.f32 %v3719_v6, %v3041_v48  ;;  %v3393_v35 = vpop.f32.mrb[37].mxu1  ;;  %v3721_v9 = vpop.f32.mrb[29].mxu0  ;;  %v2481_v51 = vld [vmem:[#allocation6 + $0xee0] sm:$0xff]  ;;  %v2483_v48 = vld [vmem:[#allocation6 + $0xef0] sm:$0xff]  ;;  %v2498_v1 = vld [vmem:[#allocation6 + $0xf68] sm:$0xff] }
 0x8a7   :  { %v6385_v27 = vadd.f32 %v3393_v35, %v3037_v41  ;;  %v6387_v10 = vadd.f32 %v3721_v9, %v3045_v23  ;;  %v3395_v7 = vpop.f32.mrb[38].mxu1  ;;  %v3723_v0 = vpop.f32.mrb[30].mxu0  ;;  %3860 = vmatpush1.bf16.msra.mxu1 %v2433_v28  ;;  %4188 = vmatpush1.bf16.msra.mxu0 %v2435_v32  ;;  %v2490_v41 = vld [vmem:[#allocation6 + $0xf28] sm:$0xff]  ;;  %v2492_v23 = vld [vmem:[#allocation6 + $0xf38] sm:$0xff]  ;;  %v2489_v28 = vld [vmem:[#allocation6 + $0xf20] sm:$0xff] }
 0x8a8   :  { %v4382_v11 = vmax.f32 %v6381_v8, 0.0  ;;  %v4384_v19 = vmax.f32 %v6383_v63, 0.0  ;;  %v3396_v12 = vpop.f32.mrb[39].mxu1  ;;  %v3724_v50 = vpop.f32.mrb[31].mxu0  ;;  %3861 = vmatprep.subr.bf16.mxu1 %v2442_v3  ;;  %4189 = vmatprep.subr.bf16.mxu0 %v2444_v17  ;;  %v2491_v32 = vld [vmem:[#allocation6 + $0xf30] sm:$0xff]  ;;  %v2500_v6 = vld [vmem:[#allocation6 + $0xf78] sm:$0xff] }
 0x8a9   :  { %v4383_v15 = vmax.f32 %v6385_v27, 0.0  ;;  %v4385_v26 = vmax.f32 %v6387_v10, 0.0  ;;  %v2497_v3 = vld [vmem:[#allocation6 + $0xf60] sm:$0xff]  ;;  %v2499_v17 = vld [vmem:[#allocation6 + $0xf70] sm:$0xff]  ;;  %v2506_v35 = vld [vmem:[#allocation6 + $0xfa8] sm:$0xff] }
 0x8aa   :  { %v2508_v9 = vld [vmem:[#allocation6 + $0xfb8] sm:$0xff]  ;;  %v2505_v7 = vld [vmem:[#allocation6 + $0xfa0] sm:$0xff]  ;;  %v2507_v0 = vld [vmem:[#allocation6 + $0xfb0] sm:$0xff] }
 0x8ab   :  { %3862 = vmatpush1.bf16.msra.mxu1 %v2441_v13  ;;  %4190 = vmatpush1.bf16.msra.mxu0 %v2443_v30  ;;  %v2514_v12 = vld [vmem:[#allocation6 + $0xfe8] sm:$0xff]  ;;  %v2516_v50 = vld [vmem:[#allocation6 + $0xff8] sm:$0xff]  ;;  %v2513_v13 = vld [vmem:[#allocation6 + $0xfe0] sm:$0xff] }
 0x8ac   :  { %3863 = vmatprep.subr.bf16.mxu1 %v2450_v60  ;;  %4191 = vmatprep.subr.bf16.mxu0 %v2452_v18  ;;  %v2515_v30 = vld [vmem:[#allocation6 + $0xff0] sm:$0xff]  ;;  %v2522_v60 = vld [vmem:[#allocation6 + $0x1028] sm:$0xff]  ;;  %v2524_v18 = vld [vmem:[#allocation6 + $0x1038] sm:$0xff] }
 0x8af   :  { %3864 = vmatpush1.bf16.msra.mxu1 %v2449_v52  ;;  %4192 = vmatpush1.bf16.msra.mxu0 %v2451_v42  ;;  %v2521_v52 = vld [vmem:[#allocation6 + $0x1020] sm:$0xff]  ;;  %v2523_v42 = vld [vmem:[#allocation6 + $0x1030] sm:$0xff] }
 0x8b0   :  { %3865 = vmatprep.subr.bf16.mxu1 %v2458_v2  ;;  %4193 = vmatprep.subr.bf16.mxu0 %v2460_v49  ;;  %v2530_v2 = vld [vmem:[#allocation6 + $0x1068] sm:$0xff]  ;;  %v2532_v49 = vld [vmem:[#allocation6 + $0x1078] sm:$0xff] }
 0x8b3   :  { %3866 = vmatpush1.bf16.msra.mxu1 %v2457_v34  ;;  %4194 = vmatpush1.bf16.msra.mxu0 %v2459_v20  ;;  %v2529_v34 = vld [vmem:[#allocation6 + $0x1060] sm:$0xff]  ;;  %v2531_v20 = vld [vmem:[#allocation6 + $0x1070] sm:$0xff] }
 0x8b4   :  { %3867 = vmatprep.subr.bf16.mxu1 %v2466_v33  ;;  %4195 = vmatprep.subr.bf16.mxu0 %v2468_v57  ;;  %v2538_v33 = vld [vmem:[#allocation6 + $0x10a8] sm:$0xff]  ;;  %v2540_v57 = vld [vmem:[#allocation6 + $0x10b8] sm:$0xff] }
 0x8b7   :  { %3868 = vmatpush1.bf16.msra.mxu1 %v2465_v5  ;;  %4196 = vmatpush1.bf16.msra.mxu0 %v2467_v29  ;;  %v2537_v5 = vld [vmem:[#allocation6 + $0x10a0] sm:$0xff]  ;;  %v2539_v29 = vld [vmem:[#allocation6 + $0x10b0] sm:$0xff] }
 0x8b8   :  { %3869 = vmatprep.subr.bf16.mxu1 %v2474_v21  ;;  %4197 = vmatprep.subr.bf16.mxu0 %v2476_v61  ;;  %v2546_v21 = vld [vmem:[#allocation6 + $0x10e8] sm:$0xff]  ;;  %v2545_v61 = vld [vmem:[#allocation6 + $0x10e0] sm:$0xff] }
 0x8bb   :  { %3870 = vmatpush1.bf16.msra.mxu1 %v2473_v45  ;;  %4198 = vmatpush1.bf16.msra.mxu0 %v2475_v22  ;;  %v2547_v45 = vld [vmem:[#allocation6 + $0x10f0] sm:$0xff]  ;;  %v2554_v22 = vld [vmem:[#allocation6 + $0x1128] sm:$0xff] }
 0x8bc   :  { %3871 = vmatprep.subr.bf16.mxu1 %v2482_v62  ;;  %4199 = vmatprep.subr.bf16.mxu0 %v2484_v40  ;;  %v2556_v62 = vld [vmem:[#allocation6 + $0x1138] sm:$0xff]  ;;  %v2555_v40 = vld [vmem:[#allocation6 + $0x1130] sm:$0xff] }
 0x8bf   :  { %3872 = vmatpush1.bf16.msra.mxu1 %v2481_v51  ;;  %4200 = vmatpush1.bf16.msra.mxu0 %v2483_v48  ;;  %v2562_v51 = vld [vmem:[#allocation6 + $0x1168] sm:$0xff]  ;;  %v2564_v48 = vld [vmem:[#allocation6 + $0x1178] sm:$0xff] }
 0x8c0   :  { %3873 = vmatprep.subr.bf16.mxu1 %v2490_v41  ;;  %4201 = vmatprep.subr.bf16.mxu0 %v2492_v23  ;;  %v2561_v41 = vld [vmem:[#allocation6 + $0x1160] sm:$0xff]  ;;  %v2563_v23 = vld [vmem:[#allocation6 + $0x1170] sm:$0xff] }
 0x8c3   :  { %3874 = vmatpush1.bf16.msra.mxu1 %v2489_v28  ;;  %4202 = vmatpush1.bf16.msra.mxu0 %v2491_v32  ;;  %v2570_v28 = vld [vmem:[#allocation6 + $0x11a8] sm:$0xff]  ;;  %v2572_v32 = vld [vmem:[#allocation6 + $0x11b8] sm:$0xff] }
 0x8c4   :  { %3875 = vmatprep.subr.bf16.mxu1 %v2498_v1  ;;  %4203 = vmatprep.subr.bf16.mxu0 %v2500_v6  ;;  %v2569_v1 = vld [vmem:[#allocation6 + $0x11a0] sm:$0xff]  ;;  %v2571_v6 = vld [vmem:[#allocation6 + $0x11b0] sm:$0xff] }
 0x8c7   :  { %3876 = vmatpush1.bf16.msra.mxu1 %v2497_v3  ;;  %4204 = vmatpush1.bf16.msra.mxu0 %v2499_v17  ;;  %v2578_v3 = vld [vmem:[#allocation6 + $0x11e8] sm:$0xff]  ;;  %v2580_v17 = vld [vmem:[#allocation6 + $0x11f8] sm:$0xff] }
 0x8c8   :  { %3877 = vmatprep.subr.bf16.mxu1 %v2506_v35  ;;  %4205 = vmatprep.subr.bf16.mxu0 %v2508_v9  ;;  %v2577_v35 = vld [vmem:[#allocation6 + $0x11e0] sm:$0xff]  ;;  %v2579_v9 = vld [vmem:[#allocation6 + $0x11f0] sm:$0xff] }
 0x8cb   :  { %3878 = vmatpush1.bf16.msra.mxu1 %v2505_v7  ;;  %4206 = vmatpush1.bf16.msra.mxu0 %v2507_v0  ;;  %v2586_v7 = vld [vmem:[#allocation6 + $0x1228] sm:$0xff]  ;;  %v2588_v0 = vld [vmem:[#allocation6 + $0x1238] sm:$0xff] }
 0x8cc   :  { %3879 = vmatprep.subr.bf16.mxu1 %v2514_v12  ;;  %4207 = vmatprep.subr.bf16.mxu0 %v2516_v50  ;;  %v2585_v12 = vld [vmem:[#allocation6 + $0x1220] sm:$0xff]  ;;  %v2587_v50 = vld [vmem:[#allocation6 + $0x1230] sm:$0xff] }
 0x8cf   :  { %3880 = vmatpush1.bf16.msra.mxu1 %v2513_v13  ;;  %4208 = vmatpush1.bf16.msra.mxu0 %v2515_v30  ;;  %v2594_v13 = vld [vmem:[#allocation6 + $0x1268] sm:$0xff]  ;;  %v2596_v30 = vld [vmem:[#allocation6 + $0x1278] sm:$0xff] }
 0x8d0   :  { %3890 = vmatprep.subr.bf16.mxu1 %v2522_v60  ;;  %4218 = vmatprep.subr.bf16.mxu0 %v2524_v18  ;;  %v2593_v60 = vld [vmem:[#allocation6 + $0x1260] sm:$0xff]  ;;  %v2595_v18 = vld [vmem:[#allocation6 + $0x1270] sm:$0xff] }
 0x8d2   :  { %3882 = vmatmul.mubr.bf16.vlgmr.msra.gmra.mrb[40].mxu1 %v6303_v46  ;;  %4210 = vmatmul.mubr.bf16.vlgmr.msra.gmra.mrb[32].mxu0 %v6303_v46  ;;  %v2548_v46 = vld [vmem:[#allocation6 + $0x10f8] sm:$0xff] }
 0x8d3   :  { %3891 = vmatpush1.bf16.msra.mxu1 %v2521_v52  ;;  %4219 = vmatpush1.bf16.msra.mxu0 %v2523_v42  ;;  %v2602_v52 = vld [vmem:[#allocation6 + $0x12a8] sm:$0xff]  ;;  %v2604_v42 = vld [vmem:[#allocation6 + $0x12b8] sm:$0xff] }
 0x8d4   :  { %3892 = vmatprep.subr.bf16.mxu1 %v2530_v2  ;;  %4220 = vmatprep.subr.bf16.mxu0 %v2532_v49  ;;  %v2601_v2 = vld [vmem:[#allocation6 + $0x12a0] sm:$0xff]  ;;  %v2603_v49 = vld [vmem:[#allocation6 + $0x12b0] sm:$0xff] }
 0x8d5   :  { %3922 = vmatprep.mubr.bf16.mxu1 %v6308_v39  ;;  %4250 = vmatprep.mubr.bf16.mxu0 %v6308_v39  ;;  %v2553_v39 = vld [vmem:[#allocation6 + $0x1120] sm:$0xff] }
 0x8d7   :  { %3893 = vmatpush1.bf16.msra.mxu1 %v2529_v34  ;;  %4221 = vmatpush1.bf16.msra.mxu0 %v2531_v20  ;;  %v2610_v34 = vld [vmem:[#allocation6 + $0x12e8] sm:$0xff]  ;;  %v2612_v20 = vld [vmem:[#allocation6 + $0x12f8] sm:$0xff] }
 0x8d8   :  { %3894 = vmatprep.subr.bf16.mxu1 %v2538_v33  ;;  %4222 = vmatprep.subr.bf16.mxu0 %v2540_v57  ;;  %v2609_v33 = vld [vmem:[#allocation6 + $0x12e0] sm:$0xff]  ;;  %v2611_v57 = vld [vmem:[#allocation6 + $0x12f0] sm:$0xff] }
 0x8db   :  { %3895 = vmatpush1.bf16.msra.mxu1 %v2537_v5  ;;  %4223 = vmatpush1.bf16.msra.mxu0 %v2539_v29  ;;  %v2618_v5 = vld [vmem:[#allocation6 + $0x1328] sm:$0xff]  ;;  %v2620_v29 = vld [vmem:[#allocation6 + $0x1338] sm:$0xff] }
 0x8dc   :  { %3896 = vmatprep.subr.bf16.mxu1 %v2546_v21  ;;  %4224 = vmatprep.subr.bf16.mxu0 %v2548_v46  ;;  %v2617_v21 = vld [vmem:[#allocation6 + $0x1320] sm:$0xff]  ;;  %v2619_v46 = vld [vmem:[#allocation6 + $0x1330] sm:$0xff] }
 0x8df   :  { %3897 = vmatpush1.bf16.msra.mxu1 %v2545_v61  ;;  %4225 = vmatpush1.bf16.msra.mxu0 %v2547_v45  ;;  %v2626_v61 = vld [vmem:[#allocation6 + $0x1368] sm:$0xff]  ;;  %v2628_v45 = vld [vmem:[#allocation6 + $0x1378] sm:$0xff] }
 0x8e0   :  { %3898 = vmatprep.subr.bf16.mxu1 %v2554_v22  ;;  %4226 = vmatprep.subr.bf16.mxu0 %v2556_v62  ;;  %v2625_v22 = vld [vmem:[#allocation6 + $0x1360] sm:$0xff]  ;;  %v2627_v62 = vld [vmem:[#allocation6 + $0x1370] sm:$0xff] }
 0x8e3   :  { %3899 = vmatpush1.bf16.msra.mxu1 %v2553_v39  ;;  %4227 = vmatpush1.bf16.msra.mxu0 %v2555_v40  ;;  %v2634_v39 = vld [vmem:[#allocation6 + $0x13a8] sm:$0xff]  ;;  %v2636_v40 = vld [vmem:[#allocation6 + $0x13b8] sm:$0xff] }
 0x8e4   :  { %3900 = vmatprep.subr.bf16.mxu1 %v2562_v51  ;;  %4228 = vmatprep.subr.bf16.mxu0 %v2564_v48  ;;  %v2633_v51 = vld [vmem:[#allocation6 + $0x13a0] sm:$0xff]  ;;  %v2635_v48 = vld [vmem:[#allocation6 + $0x13b0] sm:$0xff] }
 0x8e7   :  { %3901 = vmatpush1.bf16.msra.mxu1 %v2561_v41  ;;  %4229 = vmatpush1.bf16.msra.mxu0 %v2563_v23  ;;  %v2642_v41 = vld [vmem:[#allocation6 + $0x13e8] sm:$0xff]  ;;  %v2644_v23 = vld [vmem:[#allocation6 + $0x13f8] sm:$0xff] }
 0x8e8   :  { %3902 = vmatprep.subr.bf16.mxu1 %v2570_v28  ;;  %4230 = vmatprep.subr.bf16.mxu0 %v2572_v32  ;;  %v2641_v28 = vld [vmem:[#allocation6 + $0x13e0] sm:$0xff]  ;;  %v2643_v32 = vld [vmem:[#allocation6 + $0x13f0] sm:$0xff] }
 0x8eb   :  { %3903 = vmatpush1.bf16.msra.mxu1 %v2569_v1  ;;  %4231 = vmatpush1.bf16.msra.mxu0 %v2571_v6  ;;  %v2650_v1 = vld [vmem:[#allocation6 + $0x1428] sm:$0xff]  ;;  %v2652_v6 = vld [vmem:[#allocation6 + $0x1438] sm:$0xff] }
 0x8ec   :  { %3904 = vmatprep.subr.bf16.mxu1 %v2578_v3  ;;  %4232 = vmatprep.subr.bf16.mxu0 %v2580_v17  ;;  %v2649_v3 = vld [vmem:[#allocation6 + $0x1420] sm:$0xff]  ;;  %v2651_v17 = vld [vmem:[#allocation6 + $0x1430] sm:$0xff] }
 0x8ef   :  { %3905 = vmatpush1.bf16.msra.mxu1 %v2577_v35  ;;  %4233 = vmatpush1.bf16.msra.mxu0 %v2579_v9  ;;  %v2658_v35 = vld [vmem:[#allocation6 + $0x1468] sm:$0xff]  ;;  %v2660_v9 = vld [vmem:[#allocation6 + $0x1478] sm:$0xff] }
 0x8f0   :  { %3906 = vmatprep.subr.bf16.mxu1 %v2586_v7  ;;  %4234 = vmatprep.subr.bf16.mxu0 %v2588_v0  ;;  %v2657_v7 = vld [vmem:[#allocation6 + $0x1460] sm:$0xff]  ;;  %v2659_v0 = vld [vmem:[#allocation6 + $0x1470] sm:$0xff] }
 0x8f3   :  { %3907 = vmatpush1.bf16.msra.mxu1 %v2585_v12  ;;  %4235 = vmatpush1.bf16.msra.mxu0 %v2587_v50  ;;  %v2666_v12 = vld [vmem:[#allocation6 + $0x14a8] sm:$0xff]  ;;  %v2668_v50 = vld [vmem:[#allocation6 + $0x14b8] sm:$0xff] }
 0x8f4   :  { %3908 = vmatprep.subr.bf16.mxu1 %v2594_v13  ;;  %4236 = vmatprep.subr.bf16.mxu0 %v2596_v30  ;;  %v2665_v13 = vld [vmem:[#allocation6 + $0x14a0] sm:$0xff]  ;;  %v2667_v30 = vld [vmem:[#allocation6 + $0x14b0] sm:$0xff] }
 0x8f7   :  { %3909 = vmatpush1.bf16.msra.mxu1 %v2593_v60  ;;  %4237 = vmatpush1.bf16.msra.mxu0 %v2595_v18  ;;  %v2674_v60 = vld [vmem:[#allocation6 + $0x14e8] sm:$0xff]  ;;  %v2673_v18 = vld [vmem:[#allocation6 + $0x14e0] sm:$0xff] }
 0x8f8   :  { %3910 = vmatprep.subr.bf16.mxu1 %v2602_v52  ;;  %4238 = vmatprep.subr.bf16.mxu0 %v2604_v42  ;;  %v2675_v52 = vld [vmem:[#allocation6 + $0x14f0] sm:$0xff]  ;;  %v2682_v42 = vld [vmem:[#allocation6 + $0x1528] sm:$0xff] }
 0x8fb   :  { %3911 = vmatpush1.bf16.msra.mxu1 %v2601_v2  ;;  %4239 = vmatpush1.bf16.msra.mxu0 %v2603_v49  ;;  %v2684_v2 = vld [vmem:[#allocation6 + $0x1538] sm:$0xff]  ;;  %v2683_v49 = vld [vmem:[#allocation6 + $0x1530] sm:$0xff] }
 0x8fc   :  { %3912 = vmatprep.subr.bf16.mxu1 %v2610_v34  ;;  %4240 = vmatprep.subr.bf16.mxu0 %v2612_v20  ;;  %v2690_v34 = vld [vmem:[#allocation6 + $0x1568] sm:$0xff]  ;;  %v2692_v20 = vld [vmem:[#allocation6 + $0x1578] sm:$0xff] }
 0x8ff   :  { %3913 = vmatpush1.bf16.msra.mxu1 %v2609_v33  ;;  %4241 = vmatpush1.bf16.msra.mxu0 %v2611_v57  ;;  %v2689_v33 = vld [vmem:[#allocation6 + $0x1560] sm:$0xff]  ;;  %v2691_v57 = vld [vmem:[#allocation6 + $0x1570] sm:$0xff] }
 0x900   :  { %3914 = vmatprep.subr.bf16.mxu1 %v2618_v5  ;;  %4242 = vmatprep.subr.bf16.mxu0 %v2620_v29  ;;  %v2698_v5 = vld [vmem:[#allocation6 + $0x15a8] sm:$0xff]  ;;  %v2700_v29 = vld [vmem:[#allocation6 + $0x15b8] sm:$0xff] }
 0x903   :  { %3915 = vmatpush1.bf16.msra.mxu1 %v2617_v21  ;;  %4243 = vmatpush1.bf16.msra.mxu0 %v2619_v46  ;;  %v2697_v21 = vld [vmem:[#allocation6 + $0x15a0] sm:$0xff]  ;;  %v2699_v46 = vld [vmem:[#allocation6 + $0x15b0] sm:$0xff] }
 0x904   :  { %3916 = vmatprep.subr.bf16.mxu1 %v2626_v61  ;;  %4244 = vmatprep.subr.bf16.mxu0 %v2628_v45  ;;  %v2706_v61 = vld [vmem:[#allocation6 + $0x15e8] sm:$0xff]  ;;  %v2708_v45 = vld [vmem:[#allocation6 + $0x15f8] sm:$0xff] }
 0x907   :  { %3917 = vmatpush1.bf16.msra.mxu1 %v2625_v22  ;;  %4245 = vmatpush1.bf16.msra.mxu0 %v2627_v62  ;;  %v2705_v22 = vld [vmem:[#allocation6 + $0x15e0] sm:$0xff]  ;;  %v2707_v62 = vld [vmem:[#allocation6 + $0x15f0] sm:$0xff] }
 0x908   :  { %3918 = vmatprep.subr.bf16.mxu1 %v2634_v39  ;;  %4246 = vmatprep.subr.bf16.mxu0 %v2636_v40  ;;  %v2714_v39 = vld [vmem:[#allocation6 + $0x1628] sm:$0xff]  ;;  %v2716_v40 = vld [vmem:[#allocation6 + $0x1638] sm:$0xff] }
 0x90b   :  { %3919 = vmatpush1.bf16.msra.mxu1 %v2633_v51  ;;  %4247 = vmatpush1.bf16.msra.mxu0 %v2635_v48  ;;  %v2713_v51 = vld [vmem:[#allocation6 + $0x1620] sm:$0xff]  ;;  %v2715_v48 = vld [vmem:[#allocation6 + $0x1630] sm:$0xff] }
 0x90c   :  { %3920 = vmatprep.subr.bf16.mxu1 %v2642_v41  ;;  %4248 = vmatprep.subr.bf16.mxu0 %v2644_v23  ;;  %v2722_v41 = vld [vmem:[#allocation6 + $0x1668] sm:$0xff]  ;;  %v2724_v23 = vld [vmem:[#allocation6 + $0x1678] sm:$0xff] }
 0x90f   :  { %3921 = vmatpush1.bf16.msra.mxu1 %v2641_v28  ;;  %4249 = vmatpush1.bf16.msra.mxu0 %v2643_v32  ;;  %v2721_v28 = vld [vmem:[#allocation6 + $0x1660] sm:$0xff]  ;;  %v2723_v32 = vld [vmem:[#allocation6 + $0x1670] sm:$0xff] }
 0x910   :  { %3931 = vmatprep.subr.bf16.mxu1 %v2650_v1  ;;  %4259 = vmatprep.subr.bf16.mxu0 %v2652_v6  ;;  %v2730_v1 = vld [vmem:[#allocation6 + $0x16a8] sm:$0xff]  ;;  %v2732_v6 = vld [vmem:[#allocation6 + $0x16b8] sm:$0xff] }
 0x912   :  { %3923 = vmatmul.mubr.bf16.vlgmr.msra.gmra.mrb[40].mxu1 %v6317_v53  ;;  %4251 = vmatmul.mubr.bf16.vlgmr.msra.gmra.mrb[32].mxu0 %v6317_v53  ;;  %v2676_v53 = vld [vmem:[#allocation6 + $0x14f8] sm:$0xff] }
 0x913   :  { %3932 = vmatpush1.bf16.msra.mxu1 %v2649_v3  ;;  %4260 = vmatpush1.bf16.msra.mxu0 %v2651_v17  ;;  %v2729_v3 = vld [vmem:[#allocation6 + $0x16a0] sm:$0xff]  ;;  %v2731_v17 = vld [vmem:[#allocation6 + $0x16b0] sm:$0xff] }
 0x914   :  { %3933 = vmatprep.subr.bf16.mxu1 %v2658_v35  ;;  %4261 = vmatprep.subr.bf16.mxu0 %v2660_v9  ;;  %v2738_v35 = vld [vmem:[#allocation6 + $0x16e8] sm:$0xff]  ;;  %v2740_v9 = vld [vmem:[#allocation6 + $0x16f8] sm:$0xff] }
 0x915   :  { %3963 = vmatprep.mubr.bf16.mxu1 %v6322_v14  ;;  %4291 = vmatprep.mubr.bf16.mxu0 %v6322_v14  ;;  %v2681_v14 = vld [vmem:[#allocation6 + $0x1520] sm:$0xff] }
 0x917   :  { %3934 = vmatpush1.bf16.msra.mxu1 %v2657_v7  ;;  %4262 = vmatpush1.bf16.msra.mxu0 %v2659_v0  ;;  %v2737_v7 = vld [vmem:[#allocation6 + $0x16e0] sm:$0xff]  ;;  %v2739_v0 = vld [vmem:[#allocation6 + $0x16f0] sm:$0xff] }
 0x918   :  { %3935 = vmatprep.subr.bf16.mxu1 %v2666_v12  ;;  %4263 = vmatprep.subr.bf16.mxu0 %v2668_v50  ;;  %v2746_v12 = vld [vmem:[#allocation6 + $0x1728] sm:$0xff]  ;;  %v2748_v50 = vld [vmem:[#allocation6 + $0x1738] sm:$0xff] }
 0x91b   :  { %3936 = vmatpush1.bf16.msra.mxu1 %v2665_v13  ;;  %4264 = vmatpush1.bf16.msra.mxu0 %v2667_v30  ;;  %v2745_v13 = vld [vmem:[#allocation6 + $0x1720] sm:$0xff]  ;;  %v2747_v30 = vld [vmem:[#allocation6 + $0x1730] sm:$0xff] }
 0x91c   :  { %3937 = vmatprep.subr.bf16.mxu1 %v2674_v60  ;;  %4265 = vmatprep.subr.bf16.mxu0 %v2676_v53  ;;  %v2754_v60 = vld [vmem:[#allocation6 + $0x1768] sm:$0xff]  ;;  %v2756_v53 = vld [vmem:[#allocation6 + $0x1778] sm:$0xff] }
 0x91f   :  { %3938 = vmatpush1.bf16.msra.mxu1 %v2673_v18  ;;  %4266 = vmatpush1.bf16.msra.mxu0 %v2675_v52  ;;  %v2753_v18 = vld [vmem:[#allocation6 + $0x1760] sm:$0xff]  ;;  %v2755_v52 = vld [vmem:[#allocation6 + $0x1770] sm:$0xff] }
 0x920   :  { %3939 = vmatprep.subr.bf16.mxu1 %v2682_v42  ;;  %4267 = vmatprep.subr.bf16.mxu0 %v2684_v2  ;;  %v2762_v42 = vld [vmem:[#allocation6 + $0x17a8] sm:$0xff]  ;;  %v2764_v2 = vld [vmem:[#allocation6 + $0x17b8] sm:$0xff] }
 0x923   :  { %3940 = vmatpush1.bf16.msra.mxu1 %v2681_v14  ;;  %4268 = vmatpush1.bf16.msra.mxu0 %v2683_v49  ;;  %v2761_v14 = vld [vmem:[#allocation6 + $0x17a0] sm:$0xff]  ;;  %v2763_v49 = vld [vmem:[#allocation6 + $0x17b0] sm:$0xff] }
 0x924   :  { %3941 = vmatprep.subr.bf16.mxu1 %v2690_v34  ;;  %4269 = vmatprep.subr.bf16.mxu0 %v2692_v20  ;;  %v2770_v34 = vld [vmem:[#allocation6 + $0x17e8] sm:$0xff]  ;;  %v2772_v20 = vld [vmem:[#allocation6 + $0x17f8] sm:$0xff] }
 0x927   :  { %3942 = vmatpush1.bf16.msra.mxu1 %v2689_v33  ;;  %4270 = vmatpush1.bf16.msra.mxu0 %v2691_v57  ;;  %v2769_v33 = vld [vmem:[#allocation6 + $0x17e0] sm:$0xff]  ;;  %v2771_v57 = vld [vmem:[#allocation6 + $0x17f0] sm:$0xff] }
 0x928   :  { %3943 = vmatprep.subr.bf16.mxu1 %v2698_v5  ;;  %4271 = vmatprep.subr.bf16.mxu0 %v2700_v29  ;;  %v2778_v5 = vld [vmem:[#allocation6 + $0x1828] sm:$0xff]  ;;  %v2780_v29 = vld [vmem:[#allocation6 + $0x1838] sm:$0xff] }
 0x92b   :  { %3944 = vmatpush1.bf16.msra.mxu1 %v2697_v21  ;;  %4272 = vmatpush1.bf16.msra.mxu0 %v2699_v46  ;;  %v2777_v21 = vld [vmem:[#allocation6 + $0x1820] sm:$0xff]  ;;  %v2779_v46 = vld [vmem:[#allocation6 + $0x1830] sm:$0xff] }
 0x92c   :  { %3945 = vmatprep.subr.bf16.mxu1 %v2706_v61  ;;  %4273 = vmatprep.subr.bf16.mxu0 %v2708_v45  ;;  %v2786_v61 = vld [vmem:[#allocation6 + $0x1868] sm:$0xff]  ;;  %v2788_v45 = vld [vmem:[#allocation6 + $0x1878] sm:$0xff] }
 0x92f   :  { %3946 = vmatpush1.bf16.msra.mxu1 %v2705_v22  ;;  %4274 = vmatpush1.bf16.msra.mxu0 %v2707_v62  ;;  %v2785_v22 = vld [vmem:[#allocation6 + $0x1860] sm:$0xff]  ;;  %v2787_v62 = vld [vmem:[#allocation6 + $0x1870] sm:$0xff] }
 0x930   :  { %3947 = vmatprep.subr.bf16.mxu1 %v2714_v39  ;;  %4275 = vmatprep.subr.bf16.mxu0 %v2716_v40  ;;  %v2794_v39 = vld [vmem:[#allocation6 + $0x18a8] sm:$0xff]  ;;  %v2796_v40 = vld [vmem:[#allocation6 + $0x18b8] sm:$0xff] }
 0x933   :  { %3948 = vmatpush1.bf16.msra.mxu1 %v2713_v51  ;;  %4276 = vmatpush1.bf16.msra.mxu0 %v2715_v48  ;;  %v2793_v51 = vld [vmem:[#allocation6 + $0x18a0] sm:$0xff]  ;;  %v2795_v48 = vld [vmem:[#allocation6 + $0x18b0] sm:$0xff] }
 0x934   :  { %3949 = vmatprep.subr.bf16.mxu1 %v2722_v41  ;;  %4277 = vmatprep.subr.bf16.mxu0 %v2724_v23  ;;  %v2802_v41 = vld [vmem:[#allocation6 + $0x18e8] sm:$0xff]  ;;  %v2801_v23 = vld [vmem:[#allocation6 + $0x18e0] sm:$0xff] }
 0x937   :  { %3950 = vmatpush1.bf16.msra.mxu1 %v2721_v28  ;;  %4278 = vmatpush1.bf16.msra.mxu0 %v2723_v32  ;;  %v2803_v28 = vld [vmem:[#allocation6 + $0x18f0] sm:$0xff]  ;;  %v2810_v32 = vld [vmem:[#allocation6 + $0x1928] sm:$0xff] }
 0x938   :  { %3951 = vmatprep.subr.bf16.mxu1 %v2730_v1  ;;  %4279 = vmatprep.subr.bf16.mxu0 %v2732_v6  ;;  %v2812_v1 = vld [vmem:[#allocation6 + $0x1938] sm:$0xff]  ;;  %v2811_v6 = vld [vmem:[#allocation6 + $0x1930] sm:$0xff] }
 0x93b   :  { %3952 = vmatpush1.bf16.msra.mxu1 %v2729_v3  ;;  %4280 = vmatpush1.bf16.msra.mxu0 %v2731_v17  ;;  %v2818_v3 = vld [vmem:[#allocation6 + $0x1968] sm:$0xff]  ;;  %v2820_v17 = vld [vmem:[#allocation6 + $0x1978] sm:$0xff] }
 0x93c   :  { %3953 = vmatprep.subr.bf16.mxu1 %v2738_v35  ;;  %4281 = vmatprep.subr.bf16.mxu0 %v2740_v9  ;;  %v2817_v35 = vld [vmem:[#allocation6 + $0x1960] sm:$0xff]  ;;  %v2819_v9 = vld [vmem:[#allocation6 + $0x1970] sm:$0xff] }
 0x93f   :  { %3954 = vmatpush1.bf16.msra.mxu1 %v2737_v7  ;;  %4282 = vmatpush1.bf16.msra.mxu0 %v2739_v0  ;;  %v2826_v7 = vld [vmem:[#allocation6 + $0x19a8] sm:$0xff]  ;;  %v2828_v0 = vld [vmem:[#allocation6 + $0x19b8] sm:$0xff] }
 0x940   :  { %3955 = vmatprep.subr.bf16.mxu1 %v2746_v12  ;;  %4283 = vmatprep.subr.bf16.mxu0 %v2748_v50  ;;  %v2825_v12 = vld [vmem:[#allocation6 + $0x19a0] sm:$0xff]  ;;  %v2827_v50 = vld [vmem:[#allocation6 + $0x19b0] sm:$0xff] }
 0x943   :  { %3956 = vmatpush1.bf16.msra.mxu1 %v2745_v13  ;;  %4284 = vmatpush1.bf16.msra.mxu0 %v2747_v30  ;;  %v2834_v13 = vld [vmem:[#allocation6 + $0x19e8] sm:$0xff]  ;;  %v2836_v30 = vld [vmem:[#allocation6 + $0x19f8] sm:$0xff] }
 0x944   :  { %3957 = vmatprep.subr.bf16.mxu1 %v2754_v60  ;;  %4285 = vmatprep.subr.bf16.mxu0 %v2756_v53  ;;  %v2833_v60 = vld [vmem:[#allocation6 + $0x19e0] sm:$0xff]  ;;  %v2835_v53 = vld [vmem:[#allocation6 + $0x19f0] sm:$0xff] }
 0x947   :  { %3958 = vmatpush1.bf16.msra.mxu1 %v2753_v18  ;;  %4286 = vmatpush1.bf16.msra.mxu0 %v2755_v52  ;;  %v2842_v18 = vld [vmem:[#allocation6 + $0x1a28] sm:$0xff]  ;;  %v2844_v52 = vld [vmem:[#allocation6 + $0x1a38] sm:$0xff] }
 0x948   :  { %3959 = vmatprep.subr.bf16.mxu1 %v2762_v42  ;;  %4287 = vmatprep.subr.bf16.mxu0 %v2764_v2  ;;  %v2841_v42 = vld [vmem:[#allocation6 + $0x1a20] sm:$0xff]  ;;  %v2843_v2 = vld [vmem:[#allocation6 + $0x1a30] sm:$0xff] }
 0x94b   :  { %3960 = vmatpush1.bf16.msra.mxu1 %v2761_v14  ;;  %4288 = vmatpush1.bf16.msra.mxu0 %v2763_v49  ;;  %v2850_v14 = vld [vmem:[#allocation6 + $0x1a68] sm:$0xff]  ;;  %v2852_v49 = vld [vmem:[#allocation6 + $0x1a78] sm:$0xff] }
 0x94c   :  { %3961 = vmatprep.subr.bf16.mxu1 %v2770_v34  ;;  %4289 = vmatprep.subr.bf16.mxu0 %v2772_v20  ;;  %v2849_v34 = vld [vmem:[#allocation6 + $0x1a60] sm:$0xff]  ;;  %v2851_v20 = vld [vmem:[#allocation6 + $0x1a70] sm:$0xff] }
 0x94f   :  { %3962 = vmatpush1.bf16.msra.mxu1 %v2769_v33  ;;  %4290 = vmatpush1.bf16.msra.mxu0 %v2771_v57  ;;  %v2858_v33 = vld [vmem:[#allocation6 + $0x1aa8] sm:$0xff]  ;;  %v2860_v57 = vld [vmem:[#allocation6 + $0x1ab8] sm:$0xff] }
 0x950   :  { %3972 = vmatprep.subr.bf16.mxu1 %v2778_v5  ;;  %4300 = vmatprep.subr.bf16.mxu0 %v2780_v29  ;;  %v2857_v5 = vld [vmem:[#allocation6 + $0x1aa0] sm:$0xff]  ;;  %v2859_v29 = vld [vmem:[#allocation6 + $0x1ab0] sm:$0xff] }
 0x952   :  { %3964 = vmatmul.mubr.bf16.vlgmr.msra.gmra.mrb[40].mxu1 %v6331_v31  ;;  %4292 = vmatmul.mubr.bf16.vlgmr.msra.gmra.mrb[32].mxu0 %v6331_v31  ;;  %v2804_v31 = vld [vmem:[#allocation6 + $0x18f8] sm:$0xff] }
 0x953   :  { %3973 = vmatpush1.bf16.msra.mxu1 %v2777_v21  ;;  %4301 = vmatpush1.bf16.msra.mxu0 %v2779_v46  ;;  %v2866_v21 = vld [vmem:[#allocation6 + $0x1ae8] sm:$0xff]  ;;  %v2868_v46 = vld [vmem:[#allocation6 + $0x1af8] sm:$0xff] }
 0x954   :  { %3974 = vmatprep.subr.bf16.mxu1 %v2786_v61  ;;  %4302 = vmatprep.subr.bf16.mxu0 %v2788_v45  ;;  %v2865_v61 = vld [vmem:[#allocation6 + $0x1ae0] sm:$0xff]  ;;  %v2867_v45 = vld [vmem:[#allocation6 + $0x1af0] sm:$0xff] }
 0x955   :  { %4004 = vmatprep.mubr.bf16.mxu1 %v6336_v4  ;;  %4332 = vmatprep.mubr.bf16.mxu0 %v6336_v4  ;;  %v2809_v4 = vld [vmem:[#allocation6 + $0x1920] sm:$0xff] }
 0x957   :  { %3975 = vmatpush1.bf16.msra.mxu1 %v2785_v22  ;;  %4303 = vmatpush1.bf16.msra.mxu0 %v2787_v62  ;;  %v2874_v22 = vld [vmem:[#allocation6 + $0x1b28] sm:$0xff]  ;;  %v2876_v62 = vld [vmem:[#allocation6 + $0x1b38] sm:$0xff] }
 0x958   :  { %3976 = vmatprep.subr.bf16.mxu1 %v2794_v39  ;;  %4304 = vmatprep.subr.bf16.mxu0 %v2796_v40  ;;  %v2873_v39 = vld [vmem:[#allocation6 + $0x1b20] sm:$0xff]  ;;  %v2875_v40 = vld [vmem:[#allocation6 + $0x1b30] sm:$0xff] }
 0x95b   :  { %3977 = vmatpush1.bf16.msra.mxu1 %v2793_v51  ;;  %4305 = vmatpush1.bf16.msra.mxu0 %v2795_v48  ;;  %v2882_v51 = vld [vmem:[#allocation6 + $0x1b68] sm:$0xff]  ;;  %v2884_v48 = vld [vmem:[#allocation6 + $0x1b78] sm:$0xff] }
 0x95c   :  { %3978 = vmatprep.subr.bf16.mxu1 %v2802_v41  ;;  %4306 = vmatprep.subr.bf16.mxu0 %v2804_v31  ;;  %v2881_v41 = vld [vmem:[#allocation6 + $0x1b60] sm:$0xff]  ;;  %v2883_v31 = vld [vmem:[#allocation6 + $0x1b70] sm:$0xff] }
 0x95f   :  { %3979 = vmatpush1.bf16.msra.mxu1 %v2801_v23  ;;  %4307 = vmatpush1.bf16.msra.mxu0 %v2803_v28  ;;  %v2890_v23 = vld [vmem:[#allocation6 + $0x1ba8] sm:$0xff]  ;;  %v2892_v28 = vld [vmem:[#allocation6 + $0x1bb8] sm:$0xff] }
 0x960   :  { %3980 = vmatprep.subr.bf16.mxu1 %v2810_v32  ;;  %4308 = vmatprep.subr.bf16.mxu0 %v2812_v1  ;;  %v2889_v32 = vld [vmem:[#allocation6 + $0x1ba0] sm:$0xff]  ;;  %v2891_v1 = vld [vmem:[#allocation6 + $0x1bb0] sm:$0xff] }
 0x963   :  { %3981 = vmatpush1.bf16.msra.mxu1 %v2809_v4  ;;  %4309 = vmatpush1.bf16.msra.mxu0 %v2811_v6  ;;  %v2898_v4 = vld [vmem:[#allocation6 + $0x1be8] sm:$0xff]  ;;  %v2900_v6 = vld [vmem:[#allocation6 + $0x1bf8] sm:$0xff] }
 0x964   :  { %3982 = vmatprep.subr.bf16.mxu1 %v2818_v3  ;;  %4310 = vmatprep.subr.bf16.mxu0 %v2820_v17  ;;  %v2897_v3 = vld [vmem:[#allocation6 + $0x1be0] sm:$0xff]  ;;  %v2899_v17 = vld [vmem:[#allocation6 + $0x1bf0] sm:$0xff] }
 0x967   :  { %3983 = vmatpush1.bf16.msra.mxu1 %v2817_v35  ;;  %4311 = vmatpush1.bf16.msra.mxu0 %v2819_v9  ;;  %v2906_v35 = vld [vmem:[#allocation6 + $0x1c28] sm:$0xff]  ;;  %v2908_v9 = vld [vmem:[#allocation6 + $0x1c38] sm:$0xff] }
 0x968   :  { %3984 = vmatprep.subr.bf16.mxu1 %v2826_v7  ;;  %4312 = vmatprep.subr.bf16.mxu0 %v2828_v0  ;;  %v2905_v7 = vld [vmem:[#allocation6 + $0x1c20] sm:$0xff]  ;;  %v2907_v0 = vld [vmem:[#allocation6 + $0x1c30] sm:$0xff] }
 0x96b   :  { %3985 = vmatpush1.bf16.msra.mxu1 %v2825_v12  ;;  %4313 = vmatpush1.bf16.msra.mxu0 %v2827_v50  ;;  %v2914_v12 = vld [vmem:[#allocation6 + $0x1c68] sm:$0xff]  ;;  %v2916_v50 = vld [vmem:[#allocation6 + $0x1c78] sm:$0xff] }
 0x96c   :  { %3986 = vmatprep.subr.bf16.mxu1 %v2834_v13  ;;  %4314 = vmatprep.subr.bf16.mxu0 %v2836_v30  ;;  %v2913_v13 = vld [vmem:[#allocation6 + $0x1c60] sm:$0xff]  ;;  %v2915_v30 = vld [vmem:[#allocation6 + $0x1c70] sm:$0xff] }
 0x96f   :  { %3987 = vmatpush1.bf16.msra.mxu1 %v2833_v60  ;;  %4315 = vmatpush1.bf16.msra.mxu0 %v2835_v53  ;;  %v2922_v60 = vld [vmem:[#allocation6 + $0x1ca8] sm:$0xff]  ;;  %v2924_v53 = vld [vmem:[#allocation6 + $0x1cb8] sm:$0xff] }
 0x970   :  { %3988 = vmatprep.subr.bf16.mxu1 %v2842_v18  ;;  %4316 = vmatprep.subr.bf16.mxu0 %v2844_v52  ;;  %v2921_v18 = vld [vmem:[#allocation6 + $0x1ca0] sm:$0xff]  ;;  %v2923_v52 = vld [vmem:[#allocation6 + $0x1cb0] sm:$0xff] }
 0x973   :  { %3989 = vmatpush1.bf16.msra.mxu1 %v2841_v42  ;;  %4317 = vmatpush1.bf16.msra.mxu0 %v2843_v2  ;;  %v2930_v42 = vld [vmem:[#allocation6 + $0x1ce8] sm:$0xff]  ;;  %v2929_v2 = vld [vmem:[#allocation6 + $0x1ce0] sm:$0xff] }
 0x974   :  { %3990 = vmatprep.subr.bf16.mxu1 %v2850_v14  ;;  %4318 = vmatprep.subr.bf16.mxu0 %v2852_v49  ;;  %v2931_v14 = vld [vmem:[#allocation6 + $0x1cf0] sm:$0xff]  ;;  %v2938_v49 = vld [vmem:[#allocation6 + $0x1d28] sm:$0xff] }
 0x977   :  { %3991 = vmatpush1.bf16.msra.mxu1 %v2849_v34  ;;  %4319 = vmatpush1.bf16.msra.mxu0 %v2851_v20  ;;  %v2940_v34 = vld [vmem:[#allocation6 + $0x1d38] sm:$0xff]  ;;  %v2939_v20 = vld [vmem:[#allocation6 + $0x1d30] sm:$0xff] }
 0x978   :  { %3992 = vmatprep.subr.bf16.mxu1 %v2858_v33  ;;  %4320 = vmatprep.subr.bf16.mxu0 %v2860_v57  ;;  %v2946_v33 = vld [vmem:[#allocation6 + $0x1d68] sm:$0xff]  ;;  %v2948_v57 = vld [vmem:[#allocation6 + $0x1d78] sm:$0xff] }
 0x97b   :  { %3993 = vmatpush1.bf16.msra.mxu1 %v2857_v5  ;;  %4321 = vmatpush1.bf16.msra.mxu0 %v2859_v29  ;;  %v2945_v5 = vld [vmem:[#allocation6 + $0x1d60] sm:$0xff]  ;;  %v2947_v29 = vld [vmem:[#allocation6 + $0x1d70] sm:$0xff] }
 0x97c   :  { %3994 = vmatprep.subr.bf16.mxu1 %v2866_v21  ;;  %4322 = vmatprep.subr.bf16.mxu0 %v2868_v46  ;;  %v2954_v21 = vld [vmem:[#allocation6 + $0x1da8] sm:$0xff]  ;;  %v2956_v46 = vld [vmem:[#allocation6 + $0x1db8] sm:$0xff] }
 0x97f   :  { %3995 = vmatpush1.bf16.msra.mxu1 %v2865_v61  ;;  %4323 = vmatpush1.bf16.msra.mxu0 %v2867_v45  ;;  %v2953_v61 = vld [vmem:[#allocation6 + $0x1da0] sm:$0xff]  ;;  %v2955_v45 = vld [vmem:[#allocation6 + $0x1db0] sm:$0xff] }
 0x980   :  { %3996 = vmatprep.subr.bf16.mxu1 %v2874_v22  ;;  %4324 = vmatprep.subr.bf16.mxu0 %v2876_v62  ;;  %v2962_v22 = vld [vmem:[#allocation6 + $0x1de8] sm:$0xff]  ;;  %v2964_v62 = vld [vmem:[#allocation6 + $0x1df8] sm:$0xff] }
 0x983   :  { %3997 = vmatpush1.bf16.msra.mxu1 %v2873_v39  ;;  %4325 = vmatpush1.bf16.msra.mxu0 %v2875_v40  ;;  %v2961_v39 = vld [vmem:[#allocation6 + $0x1de0] sm:$0xff]  ;;  %v2963_v40 = vld [vmem:[#allocation6 + $0x1df0] sm:$0xff] }
 0x984   :  { %3998 = vmatprep.subr.bf16.mxu1 %v2882_v51  ;;  %4326 = vmatprep.subr.bf16.mxu0 %v2884_v48  ;;  %v2970_v51 = vld [vmem:[#allocation6 + $0x1e28] sm:$0xff]  ;;  %v2972_v48 = vld [vmem:[#allocation6 + $0x1e38] sm:$0xff] }
 0x987   :  { %3999 = vmatpush1.bf16.msra.mxu1 %v2881_v41  ;;  %4327 = vmatpush1.bf16.msra.mxu0 %v2883_v31  ;;  %v2969_v41 = vld [vmem:[#allocation6 + $0x1e20] sm:$0xff]  ;;  %v2971_v31 = vld [vmem:[#allocation6 + $0x1e30] sm:$0xff] }
 0x988   :  { %4000 = vmatprep.subr.bf16.mxu1 %v2890_v23  ;;  %4328 = vmatprep.subr.bf16.mxu0 %v2892_v28  ;;  %v2978_v23 = vld [vmem:[#allocation6 + $0x1e68] sm:$0xff]  ;;  %v2980_v28 = vld [vmem:[#allocation6 + $0x1e78] sm:$0xff] }
 0x98b   :  { %4001 = vmatpush1.bf16.msra.mxu1 %v2889_v32  ;;  %4329 = vmatpush1.bf16.msra.mxu0 %v2891_v1  ;;  %v2977_v32 = vld [vmem:[#allocation6 + $0x1e60] sm:$0xff]  ;;  %v2979_v1 = vld [vmem:[#allocation6 + $0x1e70] sm:$0xff] }
 0x98c   :  { %4002 = vmatprep.subr.bf16.mxu1 %v2898_v4  ;;  %4330 = vmatprep.subr.bf16.mxu0 %v2900_v6  ;;  %v2986_v4 = vld [vmem:[#allocation6 + $0x1ea8] sm:$0xff]  ;;  %v2988_v6 = vld [vmem:[#allocation6 + $0x1eb8] sm:$0xff] }
 0x98f   :  { %4003 = vmatpush1.bf16.msra.mxu1 %v2897_v3  ;;  %4331 = vmatpush1.bf16.msra.mxu0 %v2899_v17  ;;  %v2985_v3 = vld [vmem:[#allocation6 + $0x1ea0] sm:$0xff]  ;;  %v2987_v17 = vld [vmem:[#allocation6 + $0x1eb0] sm:$0xff] }
 0x990   :  { %4013 = vmatprep.subr.bf16.mxu1 %v2906_v35  ;;  %4341 = vmatprep.subr.bf16.mxu0 %v2908_v9  ;;  %v2994_v35 = vld [vmem:[#allocation6 + $0x1ee8] sm:$0xff]  ;;  %v2996_v9 = vld [vmem:[#allocation6 + $0x1ef8] sm:$0xff] }
 0x992   :  { %4005 = vmatmul.mubr.bf16.vlgmr.msra.gmra.mrb[40].mxu1 %v6345_v55  ;;  %4333 = vmatmul.mubr.bf16.vlgmr.msra.gmra.mrb[32].mxu0 %v6345_v55  ;;  %v2932_v55 = vld [vmem:[#allocation6 + $0x1cf8] sm:$0xff] }
 0x993   :  { %4014 = vmatpush1.bf16.msra.mxu1 %v2905_v7  ;;  %4342 = vmatpush1.bf16.msra.mxu0 %v2907_v0  ;;  %v2993_v7 = vld [vmem:[#allocation6 + $0x1ee0] sm:$0xff]  ;;  %v2995_v0 = vld [vmem:[#allocation6 + $0x1ef0] sm:$0xff] }
 0x994   :  { %4015 = vmatprep.subr.bf16.mxu1 %v2914_v12  ;;  %4343 = vmatprep.subr.bf16.mxu0 %v2916_v50  ;;  %v3002_v12 = vld [vmem:[#allocation6 + $0x1f28] sm:$0xff]  ;;  %v3004_v50 = vld [vmem:[#allocation6 + $0x1f38] sm:$0xff] }
 0x995   :  { %4045 = vmatprep.mubr.bf16.mxu1 %v6350_v36  ;;  %4373 = vmatprep.mubr.bf16.mxu0 %v6350_v36  ;;  %v2937_v36 = vld [vmem:[#allocation6 + $0x1d20] sm:$0xff] }
 0x997   :  { %4016 = vmatpush1.bf16.msra.mxu1 %v2913_v13  ;;  %4344 = vmatpush1.bf16.msra.mxu0 %v2915_v30  ;;  %v3001_v13 = vld [vmem:[#allocation6 + $0x1f20] sm:$0xff]  ;;  %v3003_v30 = vld [vmem:[#allocation6 + $0x1f30] sm:$0xff] }
 0x998   :  { %4017 = vmatprep.subr.bf16.mxu1 %v2922_v60  ;;  %4345 = vmatprep.subr.bf16.mxu0 %v2924_v53  ;;  %v3010_v60 = vld [vmem:[#allocation6 + $0x1f68] sm:$0xff]  ;;  %v3012_v53 = vld [vmem:[#allocation6 + $0x1f78] sm:$0xff] }
 0x99b   :  { %4018 = vmatpush1.bf16.msra.mxu1 %v2921_v18  ;;  %4346 = vmatpush1.bf16.msra.mxu0 %v2923_v52  ;;  %v3009_v18 = vld [vmem:[#allocation6 + $0x1f60] sm:$0xff]  ;;  %v3011_v52 = vld [vmem:[#allocation6 + $0x1f70] sm:$0xff] }
 0x99c   :  { %4019 = vmatprep.subr.bf16.mxu1 %v2930_v42  ;;  %4347 = vmatprep.subr.bf16.mxu0 %v2932_v55  ;;  %v3018_v42 = vld [vmem:[#allocation6 + $0x1fa8] sm:$0xff]  ;;  %v3020_v55 = vld [vmem:[#allocation6 + $0x1fb8] sm:$0xff] }
 0x99f   :  { %4020 = vmatpush1.bf16.msra.mxu1 %v2929_v2  ;;  %4348 = vmatpush1.bf16.msra.mxu0 %v2931_v14  ;;  %v3017_v2 = vld [vmem:[#allocation6 + $0x1fa0] sm:$0xff]  ;;  %v3019_v14 = vld [vmem:[#allocation6 + $0x1fb0] sm:$0xff] }
 0x9a0   :  { %4021 = vmatprep.subr.bf16.mxu1 %v2938_v49  ;;  %4349 = vmatprep.subr.bf16.mxu0 %v2940_v34  ;;  %v3026_v49 = vld [vmem:[#allocation6 + $0x1fe8] sm:$0xff]  ;;  %v3028_v34 = vld [vmem:[#allocation6 + $0x1ff8] sm:$0xff] }
 0x9a3   :  { %4022 = vmatpush1.bf16.msra.mxu1 %v2937_v36  ;;  %4350 = vmatpush1.bf16.msra.mxu0 %v2939_v20  ;;  %v3025_v36 = vld [vmem:[#allocation6 + $0x1fe0] sm:$0xff]  ;;  %v3027_v20 = vld [vmem:[#allocation6 + $0x1ff0] sm:$0xff] }
 0x9a4   :  { %4023 = vmatprep.subr.bf16.mxu1 %v2946_v33  ;;  %4351 = vmatprep.subr.bf16.mxu0 %v2948_v57  ;;  %v5530_v33 = vld [vmem:[#allocation13 + $0x1f] sm:$0xff] }
 0x9a5   :  { %v3049_v57 = vrot.slane %v5530_v33, %v6070_v58 }
 0x9a7   :  { %4024 = vmatpush1.bf16.msra.mxu1 %v2945_v5  ;;  %4352 = vmatpush1.bf16.msra.mxu0 %v2947_v29  ;;  %v3057_v5 = vrot.slane %v5530_v33, %v6106_v43  ;;  %v3053_v29 = vrot.slane %v5530_v33, %v6072_v59 }
 0x9a8   :  { %4025 = vmatprep.subr.bf16.mxu1 %v2954_v21  ;;  %4353 = vmatprep.subr.bf16.mxu0 %v2956_v46  ;;  %v3061_v21 = vrot.slane %v5530_v33, %v6108_v44 }
 0x9ab   :  { %4026 = vmatpush1.bf16.msra.mxu1 %v2953_v61  ;;  %4354 = vmatpush1.bf16.msra.mxu0 %v2955_v45 }
 0x9ac   :  { %4027 = vmatprep.subr.bf16.mxu1 %v2962_v22  ;;  %4355 = vmatprep.subr.bf16.mxu0 %v2964_v62 }
 0x9af   :  { %4028 = vmatpush1.bf16.msra.mxu1 %v2961_v39  ;;  %4356 = vmatpush1.bf16.msra.mxu0 %v2963_v40 }
 0x9b0   :  { %4029 = vmatprep.subr.bf16.mxu1 %v2970_v51  ;;  %4357 = vmatprep.subr.bf16.mxu0 %v2972_v48 }
 0x9b3   :  { %4030 = vmatpush1.bf16.msra.mxu1 %v2969_v41  ;;  %4358 = vmatpush1.bf16.msra.mxu0 %v2971_v31 }
 0x9b4   :  { %4031 = vmatprep.subr.bf16.mxu1 %v2978_v23  ;;  %4359 = vmatprep.subr.bf16.mxu0 %v2980_v28 }
 0x9b7   :  { %4032 = vmatpush1.bf16.msra.mxu1 %v2977_v32  ;;  %4360 = vmatpush1.bf16.msra.mxu0 %v2979_v1 }
 0x9b8   :  { %4033 = vmatprep.subr.bf16.mxu1 %v2986_v4  ;;  %4361 = vmatprep.subr.bf16.mxu0 %v2988_v6 }
 0x9bb   :  { %4034 = vmatpush1.bf16.msra.mxu1 %v2985_v3  ;;  %4362 = vmatpush1.bf16.msra.mxu0 %v2987_v17 }
 0x9bc   :  { %4035 = vmatprep.subr.bf16.mxu1 %v2994_v35  ;;  %4363 = vmatprep.subr.bf16.mxu0 %v2996_v9 }
 0x9bf   :  { %4036 = vmatpush1.bf16.msra.mxu1 %v2993_v7  ;;  %4364 = vmatpush1.bf16.msra.mxu0 %v2995_v0 }
 0x9c0   :  { %4037 = vmatprep.subr.bf16.mxu1 %v3002_v12  ;;  %4365 = vmatprep.subr.bf16.mxu0 %v3004_v50 }
 0x9c3   :  { %4038 = vmatpush1.bf16.msra.mxu1 %v3001_v13  ;;  %4366 = vmatpush1.bf16.msra.mxu0 %v3003_v30 }
 0x9c4   :  { %4039 = vmatprep.subr.bf16.mxu1 %v3010_v60  ;;  %4367 = vmatprep.subr.bf16.mxu0 %v3012_v53 }
 0x9c7   :  { %4040 = vmatpush1.bf16.msra.mxu1 %v3009_v18  ;;  %4368 = vmatpush1.bf16.msra.mxu0 %v3011_v52 }
 0x9c8   :  { %4041 = vmatprep.subr.bf16.mxu1 %v3018_v42  ;;  %4369 = vmatprep.subr.bf16.mxu0 %v3020_v55 }
 0x9cb   :  { %4042 = vmatpush1.bf16.msra.mxu1 %v3017_v2  ;;  %4370 = vmatpush1.bf16.msra.mxu0 %v3019_v14 }
 0x9cc   :  { %4043 = vmatprep.subr.bf16.mxu1 %v3026_v49  ;;  %4371 = vmatprep.subr.bf16.mxu0 %v3028_v34 }
 0x9cf   :  { %4044 = vmatpush1.bf16.msra.mxu1 %v3025_v36  ;;  %4372 = vmatpush1.bf16.msra.mxu0 %v3027_v20 }
 0x9d2   :  { %4046 = vmatmul.mubr.bf16.vlgmr.msra.gmra.mrb[40].mxu1 %v6359_v47  ;;  %4374 = vmatmul.mubr.bf16.vlgmr.msra.gmra.mrb[32].mxu0 %v6359_v47 }
 0xaa5   :  { %v4047_v46 = vpop.f32.mrb[40].mxu1  ;;  %v4375_v61 = vpop.f32.mrb[32].mxu0 }
 0xaa6   :  { %v6415_v45 = vadd.f32 %v4047_v46, %v3049_v57  ;;  %v6417_v22 = vadd.f32 %v4375_v61, %v3057_v5  ;;  %v4049_v62 = vpop.f32.mrb[41].mxu1  ;;  %v4377_v39 = vpop.f32.mrb[33].mxu0 }
 0xaa7   :  { %v6419_v40 = vadd.f32 %v4049_v62, %v3053_v29  ;;  %v6421_v47 = vadd.f32 %v4377_v39, %v3061_v21  ;;  %v4051_v51 = vpop.f32.mrb[42].mxu1  ;;  %v4379_v58 = vpop.f32.mrb[34].mxu0 }
 0xaa8   :  { %v4386_v43 = vmax.f32 %v6415_v45, 0.0  ;;  %v4388_v59 = vmax.f32 %v6417_v22, 0.0  ;;  %v4052_v48 = vpop.f32.mrb[43].mxu1  ;;  %v4380_v44 = vpop.f32.mrb[35].mxu0 }
 0xaa9   :  { %v4387_v41 = vmax.f32 %v6419_v40, 0.0  ;;  %v4389_v31 = vmax.f32 %v6421_v47, 0.0 }
 0xaaa   :  { %5611 = dma.done.wait [#allocation9 + $0x5], 32768 }
 0xaab   :  { %5612 = vsyncadd [#allocation9 + $0x5], 4294934528  ;;  %v4394_v23 = vpack.c.bf16 %v4383_v15, %v4383_v15  ;;  %v4402_v28 = vld [vmem:[#allocation7 + $0x8] sm:$0xff]  ;;  %v4404_v32 = vld [vmem:[#allocation7 + $0x18] sm:$0xff] }
 0xaac   :  { %v4401_v1 = vld [vmem:[#allocation7] sm:$0xff]  ;;  %4678 = vmatprep.subr.bf16.mxu1 %v4402_v28  ;;  %4842 = vmatprep.subr.bf16.mxu0 %v4404_v32  ;;  %v4403_v4 = vld [vmem:[#allocation7 + $0x10] sm:$0xff]  ;;  %v4406_v6 = vld [vmem:[#allocation7 + $0x28] sm:$0xff] }
 0xaad   :  { %4710 = vmatprep.mubr.bf16.mxu1 %v4394_v23  ;;  %4874 = vmatprep.mubr.bf16.mxu0 %v4394_v23  ;;  %v4408_v3 = vld [vmem:[#allocation7 + $0x38] sm:$0xff]  ;;  %v4405_v17 = vld [vmem:[#allocation7 + $0x20] sm:$0xff]  ;;  %v4407_v35 = vld [vmem:[#allocation7 + $0x30] sm:$0xff] }
 0xaae   :  { %4679 = vmatpush1.bf16.msra.mxu1 %v4401_v1  ;;  %4843 = vmatpush1.bf16.msra.mxu0 %v4403_v4  ;;  %v4410_v9 = vld [vmem:[#allocation7 + $0x48] sm:$0xff]  ;;  %v4412_v27 = vld [vmem:[#allocation7 + $0x58] sm:$0xff]  ;;  %v4409_v15 = vld [vmem:[#allocation7 + $0x40] sm:$0xff] }
 0xaaf   :  { %4680 = vmatprep.subr.bf16.mxu1 %v4406_v6  ;;  %4844 = vmatprep.subr.bf16.mxu0 %v4408_v3  ;;  %v4411_v7 = vld [vmem:[#allocation7 + $0x50] sm:$0xff]  ;;  %v4414_v0 = vld [vmem:[#allocation7 + $0x68] sm:$0xff]  ;;  %v4416_v12 = vld [vmem:[#allocation7 + $0x78] sm:$0xff] }
 0xab0   :  { %v4413_v50 = vld [vmem:[#allocation7 + $0x60] sm:$0xff]  ;;  %v4415_v13 = vld [vmem:[#allocation7 + $0x70] sm:$0xff]  ;;  %v4418_v30 = vld [vmem:[#allocation7 + $0x88] sm:$0xff] }
 0xab1   :  { %v4420_v60 = vld [vmem:[#allocation7 + $0x98] sm:$0xff]  ;;  %v4417_v53 = vld [vmem:[#allocation7 + $0x80] sm:$0xff]  ;;  %v4419_v18 = vld [vmem:[#allocation7 + $0x90] sm:$0xff] }
 0xab2   :  { %4681 = vmatpush1.bf16.msra.mxu1 %v4405_v17  ;;  %4845 = vmatpush1.bf16.msra.mxu0 %v4407_v35  ;;  %v4422_v52 = vld [vmem:[#allocation7 + $0xa8] sm:$0xff]  ;;  %v4424_v42 = vld [vmem:[#allocation7 + $0xb8] sm:$0xff]  ;;  %v4421_v55 = vld [vmem:[#allocation7 + $0xa0] sm:$0xff] }
 0xab3   :  { %4682 = vmatprep.subr.bf16.mxu1 %v4410_v9  ;;  %4846 = vmatprep.subr.bf16.mxu0 %v4412_v27  ;;  %v4423_v2 = vld [vmem:[#allocation7 + $0xb0] sm:$0xff]  ;;  %v4426_v14 = vld [vmem:[#allocation7 + $0xc8] sm:$0xff]  ;;  %v4428_v49 = vld [vmem:[#allocation7 + $0xd8] sm:$0xff] }
 0xab4   :  { %v4425_v34 = vld [vmem:[#allocation7 + $0xc0] sm:$0xff]  ;;  %v4427_v36 = vld [vmem:[#allocation7 + $0xd0] sm:$0xff]  ;;  %v4430_v20 = vld [vmem:[#allocation7 + $0xe8] sm:$0xff] }
 0xab5   :  { %v4432_v33 = vld [vmem:[#allocation7 + $0xf8] sm:$0xff]  ;;  %v4429_v57 = vld [vmem:[#allocation7 + $0xe0] sm:$0xff]  ;;  %v4431_v5 = vld [vmem:[#allocation7 + $0xf0] sm:$0xff] }
 0xab6   :  { %4683 = vmatpush1.bf16.msra.mxu1 %v4409_v15  ;;  %4847 = vmatpush1.bf16.msra.mxu0 %v4411_v7  ;;  %v4434_v29 = vld [vmem:[#allocation7 + $0x108] sm:$0xff]  ;;  %v4436_v21 = vld [vmem:[#allocation7 + $0x118] sm:$0xff]  ;;  %v4433_v46 = vld [vmem:[#allocation7 + $0x100] sm:$0xff] }
 0xab7   :  { %4684 = vmatprep.subr.bf16.mxu1 %v4414_v0  ;;  %4848 = vmatprep.subr.bf16.mxu0 %v4416_v12  ;;  %v4435_v61 = vld [vmem:[#allocation7 + $0x110] sm:$0xff]  ;;  %v4438_v62 = vld [vmem:[#allocation7 + $0x128] sm:$0xff]  ;;  %v4440_v39 = vld [vmem:[#allocation7 + $0x138] sm:$0xff] }
 0xab8   :  { %v4437_v51 = vld [vmem:[#allocation7 + $0x120] sm:$0xff]  ;;  %v4439_v58 = vld [vmem:[#allocation7 + $0x130] sm:$0xff]  ;;  %v4442_v48 = vld [vmem:[#allocation7 + $0x148] sm:$0xff] }
 0xab9   :  { %v4444_v44 = vld [vmem:[#allocation7 + $0x158] sm:$0xff]  ;;  %v4441_v23 = vld [vmem:[#allocation7 + $0x140] sm:$0xff]  ;;  %v4443_v28 = vld [vmem:[#allocation7 + $0x150] sm:$0xff] }
 0xaba   :  { %4685 = vmatpush1.bf16.msra.mxu1 %v4413_v50  ;;  %4849 = vmatpush1.bf16.msra.mxu0 %v4415_v13  ;;  %v4446_v32 = vld [vmem:[#allocation7 + $0x168] sm:$0xff]  ;;  %v4448_v1 = vld [vmem:[#allocation7 + $0x178] sm:$0xff]  ;;  %v4445_v4 = vld [vmem:[#allocation7 + $0x160] sm:$0xff] }
 0xabb   :  { %4686 = vmatprep.subr.bf16.mxu1 %v4418_v30  ;;  %4850 = vmatprep.subr.bf16.mxu0 %v4420_v60  ;;  %v4447_v6 = vld [vmem:[#allocation7 + $0x170] sm:$0xff]  ;;  %v4450_v3 = vld [vmem:[#allocation7 + $0x188] sm:$0xff]  ;;  %v4452_v17 = vld [vmem:[#allocation7 + $0x198] sm:$0xff] }
 0xabc   :  { %v4449_v35 = vld [vmem:[#allocation7 + $0x180] sm:$0xff]  ;;  %v4451_v9 = vld [vmem:[#allocation7 + $0x190] sm:$0xff]  ;;  %v4454_v27 = vld [vmem:[#allocation7 + $0x1a8] sm:$0xff] }
 0xabd   :  { %v4456_v15 = vld [vmem:[#allocation7 + $0x1b8] sm:$0xff]  ;;  %v4453_v7 = vld [vmem:[#allocation7 + $0x1a0] sm:$0xff]  ;;  %v4455_v0 = vld [vmem:[#allocation7 + $0x1b0] sm:$0xff] }
 0xabe   :  { %4687 = vmatpush1.bf16.msra.mxu1 %v4417_v53  ;;  %4851 = vmatpush1.bf16.msra.mxu0 %v4419_v18  ;;  %v4458_v12 = vld [vmem:[#allocation7 + $0x1c8] sm:$0xff]  ;;  %v4460_v50 = vld [vmem:[#allocation7 + $0x1d8] sm:$0xff]  ;;  %v4457_v13 = vld [vmem:[#allocation7 + $0x1c0] sm:$0xff] }
 0xabf   :  { %4688 = vmatprep.subr.bf16.mxu1 %v4422_v52  ;;  %4852 = vmatprep.subr.bf16.mxu0 %v4424_v42  ;;  %v4459_v30 = vld [vmem:[#allocation7 + $0x1d0] sm:$0xff]  ;;  %v4462_v60 = vld [vmem:[#allocation7 + $0x1e8] sm:$0xff]  ;;  %v4464_v53 = vld [vmem:[#allocation7 + $0x1f8] sm:$0xff] }
 0xac0   :  { %v4461_v18 = vld [vmem:[#allocation7 + $0x1e0] sm:$0xff]  ;;  %v4463_v52 = vld [vmem:[#allocation7 + $0x1f0] sm:$0xff]  ;;  %v4466_v42 = vld [vmem:[#allocation7 + $0x208] sm:$0xff] }
 0xac1   :  { %v4469_v8 = vld [vmem:[#allocation7 + $0x220] sm:$0xff]  ;;  %v4475_v10 = vld [vmem:[#allocation7 + $0x250] sm:$0xff] }
 0xac2   :  { %4689 = vmatpush1.bf16.msra.mxu1 %v4421_v55  ;;  %4853 = vmatpush1.bf16.msra.mxu0 %v4423_v2  ;;  %v4468_v55 = vld [vmem:[#allocation7 + $0x218] sm:$0xff]  ;;  %v4393_v2 = vpack.c.bf16 %v4382_v11, %v4382_v11  ;;  %v4471_v11 = vld [vmem:[#allocation7 + $0x230] sm:$0xff]  ;;  %v4533_v63 = vld [vmem:[#allocation7 + $0x420] sm:$0xff] }
 0xac3   :  { %4690 = vmatprep.subr.bf16.mxu1 %v4426_v14  ;;  %4854 = vmatprep.subr.bf16.mxu0 %v4428_v49  ;;  %v4465_v14 = vld [vmem:[#allocation7 + $0x200] sm:$0xff]  ;;  %v4467_v49 = vld [vmem:[#allocation7 + $0x210] sm:$0xff] }
 0xac4   :  { %v4539_v40 = vld [vmem:[#allocation7 + $0x450] sm:$0xff]  ;;  %v4597_v45 = vld [vmem:[#allocation7 + $0x620] sm:$0xff] }
 0xac5   :  { %v4603_v47 = vld [vmem:[#allocation7 + $0x650] sm:$0xff] }
 0xac6   :  { %4691 = vmatpush1.bf16.msra.mxu1 %v4425_v34  ;;  %4855 = vmatpush1.bf16.msra.mxu0 %v4427_v36  ;;  %v4470_v34 = vld [vmem:[#allocation7 + $0x228] sm:$0xff]  ;;  %v4472_v36 = vld [vmem:[#allocation7 + $0x238] sm:$0xff] }
 0xac7   :  { %4692 = vmatprep.subr.bf16.mxu1 %v4430_v20  ;;  %4856 = vmatprep.subr.bf16.mxu0 %v4432_v33  ;;  %v4396_v20 = vpack.c.bf16 %v4385_v26, %v4385_v26  ;;  %v4474_v33 = vld [vmem:[#allocation7 + $0x248] sm:$0xff]  ;;  %v4480_v26 = vld [vmem:[#allocation7 + $0x278] sm:$0xff] }
 0xaca   :  { %4693 = vmatpush1.bf16.msra.mxu1 %v4429_v57  ;;  %4857 = vmatpush1.bf16.msra.mxu0 %v4431_v5  ;;  %v4476_v57 = vld [vmem:[#allocation7 + $0x258] sm:$0xff]  ;;  %v4473_v5 = vld [vmem:[#allocation7 + $0x240] sm:$0xff] }
 0xacb   :  { %4694 = vmatprep.subr.bf16.mxu1 %v4434_v29  ;;  %4858 = vmatprep.subr.bf16.mxu0 %v4436_v21  ;;  %v4478_v29 = vld [vmem:[#allocation7 + $0x268] sm:$0xff]  ;;  %v4477_v21 = vld [vmem:[#allocation7 + $0x260] sm:$0xff] }
 0xace   :  { %4695 = vmatpush1.bf16.msra.mxu1 %v4433_v46  ;;  %4859 = vmatpush1.bf16.msra.mxu0 %v4435_v61  ;;  %v4479_v46 = vld [vmem:[#allocation7 + $0x270] sm:$0xff]  ;;  %v4482_v61 = vld [vmem:[#allocation7 + $0x288] sm:$0xff] }
 0xacf   :  { %4696 = vmatprep.subr.bf16.mxu1 %v4438_v62  ;;  %4860 = vmatprep.subr.bf16.mxu0 %v4440_v39  ;;  %v4484_v62 = vld [vmem:[#allocation7 + $0x298] sm:$0xff]  ;;  %v4481_v39 = vld [vmem:[#allocation7 + $0x280] sm:$0xff] }
 0xad2   :  { %4697 = vmatpush1.bf16.msra.mxu1 %v4437_v51  ;;  %4861 = vmatpush1.bf16.msra.mxu0 %v4439_v58  ;;  %v4483_v51 = vld [vmem:[#allocation7 + $0x290] sm:$0xff]  ;;  %v4486_v58 = vld [vmem:[#allocation7 + $0x2a8] sm:$0xff] }
 0xad3   :  { %4698 = vmatprep.subr.bf16.mxu1 %v4442_v48  ;;  %4862 = vmatprep.subr.bf16.mxu0 %v4444_v44  ;;  %v4488_v48 = vld [vmem:[#allocation7 + $0x2b8] sm:$0xff]  ;;  %v4485_v44 = vld [vmem:[#allocation7 + $0x2a0] sm:$0xff] }
 0xad6   :  { %4699 = vmatpush1.bf16.msra.mxu1 %v4441_v23  ;;  %4863 = vmatpush1.bf16.msra.mxu0 %v4443_v28  ;;  %v4487_v23 = vld [vmem:[#allocation7 + $0x2b0] sm:$0xff]  ;;  %v4490_v28 = vld [vmem:[#allocation7 + $0x2c8] sm:$0xff] }
 0xad7   :  { %4700 = vmatprep.subr.bf16.mxu1 %v4446_v32  ;;  %4864 = vmatprep.subr.bf16.mxu0 %v4448_v1  ;;  %v4492_v32 = vld [vmem:[#allocation7 + $0x2d8] sm:$0xff]  ;;  %v4489_v1 = vld [vmem:[#allocation7 + $0x2c0] sm:$0xff] }
 0xada   :  { %4701 = vmatpush1.bf16.msra.mxu1 %v4445_v4  ;;  %4865 = vmatpush1.bf16.msra.mxu0 %v4447_v6  ;;  %v4491_v4 = vld [vmem:[#allocation7 + $0x2d0] sm:$0xff]  ;;  %v4494_v6 = vld [vmem:[#allocation7 + $0x2e8] sm:$0xff] }
 0xadb   :  { %4702 = vmatprep.subr.bf16.mxu1 %v4450_v3  ;;  %4866 = vmatprep.subr.bf16.mxu0 %v4452_v17  ;;  %v4496_v3 = vld [vmem:[#allocation7 + $0x2f8] sm:$0xff]  ;;  %v4493_v17 = vld [vmem:[#allocation7 + $0x2e0] sm:$0xff] }
 0xade   :  { %4703 = vmatpush1.bf16.msra.mxu1 %v4449_v35  ;;  %4867 = vmatpush1.bf16.msra.mxu0 %v4451_v9  ;;  %v4495_v35 = vld [vmem:[#allocation7 + $0x2f0] sm:$0xff]  ;;  %v4498_v9 = vld [vmem:[#allocation7 + $0x308] sm:$0xff] }
 0xadf   :  { %4704 = vmatprep.subr.bf16.mxu1 %v4454_v27  ;;  %4868 = vmatprep.subr.bf16.mxu0 %v4456_v15  ;;  %v4500_v27 = vld [vmem:[#allocation7 + $0x318] sm:$0xff]  ;;  %v4497_v15 = vld [vmem:[#allocation7 + $0x300] sm:$0xff] }
 0xae2   :  { %4705 = vmatpush1.bf16.msra.mxu1 %v4453_v7  ;;  %4869 = vmatpush1.bf16.msra.mxu0 %v4455_v0  ;;  %v4499_v7 = vld [vmem:[#allocation7 + $0x310] sm:$0xff]  ;;  %v4502_v0 = vld [vmem:[#allocation7 + $0x328] sm:$0xff] }
 0xae3   :  { %4706 = vmatprep.subr.bf16.mxu1 %v4458_v12  ;;  %4870 = vmatprep.subr.bf16.mxu0 %v4460_v50  ;;  %v4504_v12 = vld [vmem:[#allocation7 + $0x338] sm:$0xff]  ;;  %v4501_v50 = vld [vmem:[#allocation7 + $0x320] sm:$0xff] }
 0xae6   :  { %4707 = vmatpush1.bf16.msra.mxu1 %v4457_v13  ;;  %4871 = vmatpush1.bf16.msra.mxu0 %v4459_v30  ;;  %v4503_v13 = vld [vmem:[#allocation7 + $0x330] sm:$0xff]  ;;  %v4506_v30 = vld [vmem:[#allocation7 + $0x348] sm:$0xff] }
 0xae7   :  { %4708 = vmatprep.subr.bf16.mxu1 %v4462_v60  ;;  %4872 = vmatprep.subr.bf16.mxu0 %v4464_v53  ;;  %v4508_v60 = vld [vmem:[#allocation7 + $0x358] sm:$0xff]  ;;  %v4505_v53 = vld [vmem:[#allocation7 + $0x340] sm:$0xff] }
 0xaea   :  { %4709 = vmatpush1.bf16.msra.mxu1 %v4461_v18  ;;  %4873 = vmatpush1.bf16.msra.mxu0 %v4463_v52  ;;  %v4507_v18 = vld [vmem:[#allocation7 + $0x350] sm:$0xff]  ;;  %v4510_v52 = vld [vmem:[#allocation7 + $0x368] sm:$0xff] }
 0xaeb   :  { %4719 = vmatprep.subr.bf16.mxu1 %v4466_v42  ;;  %4883 = vmatprep.subr.bf16.mxu0 %v4468_v55  ;;  %v4512_v42 = vld [vmem:[#allocation7 + $0x378] sm:$0xff]  ;;  %v4509_v55 = vld [vmem:[#allocation7 + $0x360] sm:$0xff] }
 0xaed   :  { %4711 = vmatmul.mubr.bf16.vlgmr.msra.gmra.mrb[44].mxu1 %v4393_v2  ;;  %4875 = vmatmul.mubr.bf16.vlgmr.msra.gmra.mrb[36].mxu0 %v4393_v2  ;;  %v4511_v2 = vld [vmem:[#allocation7 + $0x370] sm:$0xff] }
 0xaee   :  { %4720 = vmatpush1.bf16.msra.mxu1 %v4465_v14  ;;  %4884 = vmatpush1.bf16.msra.mxu0 %v4467_v49  ;;  %v4514_v14 = vld [vmem:[#allocation7 + $0x388] sm:$0xff]  ;;  %v4516_v49 = vld [vmem:[#allocation7 + $0x398] sm:$0xff] }
 0xaef   :  { %4721 = vmatprep.subr.bf16.mxu1 %v4470_v34  ;;  %4885 = vmatprep.subr.bf16.mxu0 %v4472_v36  ;;  %v4513_v34 = vld [vmem:[#allocation7 + $0x380] sm:$0xff]  ;;  %v4515_v36 = vld [vmem:[#allocation7 + $0x390] sm:$0xff] }
 0xaf0   :  { %4751 = vmatprep.mubr.bf16.mxu1 %v4396_v20  ;;  %4915 = vmatprep.mubr.bf16.mxu0 %v4396_v20  ;;  %v4518_v20 = vld [vmem:[#allocation7 + $0x3a8] sm:$0xff] }
 0xaf2   :  { %4722 = vmatpush1.bf16.msra.mxu1 %v4469_v8  ;;  %4886 = vmatpush1.bf16.msra.mxu0 %v4471_v11  ;;  %v4520_v8 = vld [vmem:[#allocation7 + $0x3b8] sm:$0xff]  ;;  %v4517_v11 = vld [vmem:[#allocation7 + $0x3a0] sm:$0xff] }
 0xaf3   :  { %4723 = vmatprep.subr.bf16.mxu1 %v4474_v33  ;;  %4887 = vmatprep.subr.bf16.mxu0 %v4476_v57  ;;  %v4519_v33 = vld [vmem:[#allocation7 + $0x3b0] sm:$0xff]  ;;  %v4522_v57 = vld [vmem:[#allocation7 + $0x3c8] sm:$0xff] }
 0xaf6   :  { %4724 = vmatpush1.bf16.msra.mxu1 %v4473_v5  ;;  %4888 = vmatpush1.bf16.msra.mxu0 %v4475_v10  ;;  %v4524_v5 = vld [vmem:[#allocation7 + $0x3d8] sm:$0xff]  ;;  %v4521_v10 = vld [vmem:[#allocation7 + $0x3c0] sm:$0xff] }
 0xaf7   :  { %4725 = vmatprep.subr.bf16.mxu1 %v4478_v29  ;;  %4889 = vmatprep.subr.bf16.mxu0 %v4480_v26  ;;  %v4523_v29 = vld [vmem:[#allocation7 + $0x3d0] sm:$0xff]  ;;  %v4526_v26 = vld [vmem:[#allocation7 + $0x3e8] sm:$0xff] }
 0xafa   :  { %4726 = vmatpush1.bf16.msra.mxu1 %v4477_v21  ;;  %4890 = vmatpush1.bf16.msra.mxu0 %v4479_v46  ;;  %v4528_v21 = vld [vmem:[#allocation7 + $0x3f8] sm:$0xff]  ;;  %v4525_v46 = vld [vmem:[#allocation7 + $0x3e0] sm:$0xff] }
 0xafb   :  { %4727 = vmatprep.subr.bf16.mxu1 %v4482_v61  ;;  %4891 = vmatprep.subr.bf16.mxu0 %v4484_v62  ;;  %v4527_v61 = vld [vmem:[#allocation7 + $0x3f0] sm:$0xff]  ;;  %v4530_v62 = vld [vmem:[#allocation7 + $0x408] sm:$0xff] }
 0xafe   :  { %4728 = vmatpush1.bf16.msra.mxu1 %v4481_v39  ;;  %4892 = vmatpush1.bf16.msra.mxu0 %v4483_v51  ;;  %v4532_v39 = vld [vmem:[#allocation7 + $0x418] sm:$0xff]  ;;  %v4395_v51 = vpack.c.bf16 %v4384_v19, %v4384_v19  ;;  %v4535_v19 = vld [vmem:[#allocation7 + $0x430] sm:$0xff] }
 0xaff   :  { %4729 = vmatprep.subr.bf16.mxu1 %v4486_v58  ;;  %4893 = vmatprep.subr.bf16.mxu0 %v4488_v48  ;;  %v4529_v58 = vld [vmem:[#allocation7 + $0x400] sm:$0xff]  ;;  %v4531_v48 = vld [vmem:[#allocation7 + $0x410] sm:$0xff] }
 0xb02   :  { %4730 = vmatpush1.bf16.msra.mxu1 %v4485_v44  ;;  %4894 = vmatpush1.bf16.msra.mxu0 %v4487_v23  ;;  %v4534_v44 = vld [vmem:[#allocation7 + $0x428] sm:$0xff]  ;;  %v4536_v23 = vld [vmem:[#allocation7 + $0x438] sm:$0xff] }
 0xb03   :  { %4731 = vmatprep.subr.bf16.mxu1 %v4490_v28  ;;  %4895 = vmatprep.subr.bf16.mxu0 %v4492_v32  ;;  %v4398_v28 = vpack.c.bf16 %v4387_v41, %v4387_v41  ;;  %v4538_v32 = vld [vmem:[#allocation7 + $0x448] sm:$0xff]  ;;  %v4544_v41 = vld [vmem:[#allocation7 + $0x478] sm:$0xff] }
 0xb06   :  { %4732 = vmatpush1.bf16.msra.mxu1 %v4489_v1  ;;  %4896 = vmatpush1.bf16.msra.mxu0 %v4491_v4  ;;  %v4540_v1 = vld [vmem:[#allocation7 + $0x458] sm:$0xff]  ;;  %v4537_v4 = vld [vmem:[#allocation7 + $0x440] sm:$0xff] }
 0xb07   :  { %4733 = vmatprep.subr.bf16.mxu1 %v4494_v6  ;;  %4897 = vmatprep.subr.bf16.mxu0 %v4496_v3  ;;  %v4542_v6 = vld [vmem:[#allocation7 + $0x468] sm:$0xff]  ;;  %v4541_v3 = vld [vmem:[#allocation7 + $0x460] sm:$0xff] }
 0xb0a   :  { %4734 = vmatpush1.bf16.msra.mxu1 %v4493_v17  ;;  %4898 = vmatpush1.bf16.msra.mxu0 %v4495_v35  ;;  %v4543_v17 = vld [vmem:[#allocation7 + $0x470] sm:$0xff]  ;;  %v4546_v35 = vld [vmem:[#allocation7 + $0x488] sm:$0xff] }
 0xb0b   :  { %4735 = vmatprep.subr.bf16.mxu1 %v4498_v9  ;;  %4899 = vmatprep.subr.bf16.mxu0 %v4500_v27  ;;  %v4548_v9 = vld [vmem:[#allocation7 + $0x498] sm:$0xff]  ;;  %v4545_v27 = vld [vmem:[#allocation7 + $0x480] sm:$0xff] }
 0xb0e   :  { %4736 = vmatpush1.bf16.msra.mxu1 %v4497_v15  ;;  %4900 = vmatpush1.bf16.msra.mxu0 %v4499_v7  ;;  %v4547_v15 = vld [vmem:[#allocation7 + $0x490] sm:$0xff]  ;;  %v4550_v7 = vld [vmem:[#allocation7 + $0x4a8] sm:$0xff] }
 0xb0f   :  { %4737 = vmatprep.subr.bf16.mxu1 %v4502_v0  ;;  %4901 = vmatprep.subr.bf16.mxu0 %v4504_v12  ;;  %v4552_v0 = vld [vmem:[#allocation7 + $0x4b8] sm:$0xff]  ;;  %v4549_v12 = vld [vmem:[#allocation7 + $0x4a0] sm:$0xff] }
 0xb12   :  { %4738 = vmatpush1.bf16.msra.mxu1 %v4501_v50  ;;  %4902 = vmatpush1.bf16.msra.mxu0 %v4503_v13  ;;  %v4551_v50 = vld [vmem:[#allocation7 + $0x4b0] sm:$0xff]  ;;  %v4554_v13 = vld [vmem:[#allocation7 + $0x4c8] sm:$0xff] }
 0xb13   :  { %4739 = vmatprep.subr.bf16.mxu1 %v4506_v30  ;;  %4903 = vmatprep.subr.bf16.mxu0 %v4508_v60  ;;  %v4556_v30 = vld [vmem:[#allocation7 + $0x4d8] sm:$0xff]  ;;  %v4553_v60 = vld [vmem:[#allocation7 + $0x4c0] sm:$0xff] }
 0xb16   :  { %4740 = vmatpush1.bf16.msra.mxu1 %v4505_v53  ;;  %4904 = vmatpush1.bf16.msra.mxu0 %v4507_v18  ;;  %v4555_v53 = vld [vmem:[#allocation7 + $0x4d0] sm:$0xff]  ;;  %v4558_v18 = vld [vmem:[#allocation7 + $0x4e8] sm:$0xff] }
 0xb17   :  { %4741 = vmatprep.subr.bf16.mxu1 %v4510_v52  ;;  %4905 = vmatprep.subr.bf16.mxu0 %v4512_v42  ;;  %v4560_v52 = vld [vmem:[#allocation7 + $0x4f8] sm:$0xff]  ;;  %v4557_v42 = vld [vmem:[#allocation7 + $0x4e0] sm:$0xff] }
 0xb1a   :  { %4742 = vmatpush1.bf16.msra.mxu1 %v4509_v55  ;;  %4906 = vmatpush1.bf16.msra.mxu0 %v4511_v2  ;;  %v4559_v55 = vld [vmem:[#allocation7 + $0x4f0] sm:$0xff]  ;;  %v4562_v2 = vld [vmem:[#allocation7 + $0x508] sm:$0xff] }
 0xb1b   :  { %4743 = vmatprep.subr.bf16.mxu1 %v4514_v14  ;;  %4907 = vmatprep.subr.bf16.mxu0 %v4516_v49  ;;  %v4564_v14 = vld [vmem:[#allocation7 + $0x518] sm:$0xff]  ;;  %v4561_v49 = vld [vmem:[#allocation7 + $0x500] sm:$0xff] }
 0xb1e   :  { %4744 = vmatpush1.bf16.msra.mxu1 %v4513_v34  ;;  %4908 = vmatpush1.bf16.msra.mxu0 %v4515_v36  ;;  %v4563_v34 = vld [vmem:[#allocation7 + $0x510] sm:$0xff]  ;;  %v4566_v36 = vld [vmem:[#allocation7 + $0x528] sm:$0xff] }
 0xb1f   :  { %4745 = vmatprep.subr.bf16.mxu1 %v4518_v20  ;;  %4909 = vmatprep.subr.bf16.mxu0 %v4520_v8  ;;  %v4568_v20 = vld [vmem:[#allocation7 + $0x538] sm:$0xff]  ;;  %v4565_v8 = vld [vmem:[#allocation7 + $0x520] sm:$0xff] }
 0xb22   :  { %4746 = vmatpush1.bf16.msra.mxu1 %v4517_v11  ;;  %4910 = vmatpush1.bf16.msra.mxu0 %v4519_v33  ;;  %v4567_v11 = vld [vmem:[#allocation7 + $0x530] sm:$0xff]  ;;  %v4570_v33 = vld [vmem:[#allocation7 + $0x548] sm:$0xff] }
 0xb23   :  { %4747 = vmatprep.subr.bf16.mxu1 %v4522_v57  ;;  %4911 = vmatprep.subr.bf16.mxu0 %v4524_v5  ;;  %v4572_v57 = vld [vmem:[#allocation7 + $0x558] sm:$0xff]  ;;  %v4569_v5 = vld [vmem:[#allocation7 + $0x540] sm:$0xff] }
 0xb26   :  { %4748 = vmatpush1.bf16.msra.mxu1 %v4521_v10  ;;  %4912 = vmatpush1.bf16.msra.mxu0 %v4523_v29  ;;  %v4571_v10 = vld [vmem:[#allocation7 + $0x550] sm:$0xff]  ;;  %v4574_v29 = vld [vmem:[#allocation7 + $0x568] sm:$0xff] }
 0xb27   :  { %4749 = vmatprep.subr.bf16.mxu1 %v4526_v26  ;;  %4913 = vmatprep.subr.bf16.mxu0 %v4528_v21  ;;  %v4576_v26 = vld [vmem:[#allocation7 + $0x578] sm:$0xff]  ;;  %v4573_v21 = vld [vmem:[#allocation7 + $0x560] sm:$0xff] }
 0xb2a   :  { %4750 = vmatpush1.bf16.msra.mxu1 %v4525_v46  ;;  %4914 = vmatpush1.bf16.msra.mxu0 %v4527_v61  ;;  %v4575_v46 = vld [vmem:[#allocation7 + $0x570] sm:$0xff]  ;;  %v4578_v61 = vld [vmem:[#allocation7 + $0x588] sm:$0xff] }
 0xb2b   :  { %4760 = vmatprep.subr.bf16.mxu1 %v4530_v62  ;;  %4924 = vmatprep.subr.bf16.mxu0 %v4532_v39  ;;  %v4580_v62 = vld [vmem:[#allocation7 + $0x598] sm:$0xff]  ;;  %v4577_v39 = vld [vmem:[#allocation7 + $0x580] sm:$0xff] }
 0xb2d   :  { %4752 = vmatmul.mubr.bf16.vlgmr.msra.gmra.mrb[44].mxu1 %v4395_v51  ;;  %4916 = vmatmul.mubr.bf16.vlgmr.msra.gmra.mrb[36].mxu0 %v4395_v51  ;;  %v4579_v51 = vld [vmem:[#allocation7 + $0x590] sm:$0xff] }
 0xb2e   :  { %4761 = vmatpush1.bf16.msra.mxu1 %v4529_v58  ;;  %4925 = vmatpush1.bf16.msra.mxu0 %v4531_v48  ;;  %v4582_v58 = vld [vmem:[#allocation7 + $0x5a8] sm:$0xff]  ;;  %v4584_v48 = vld [vmem:[#allocation7 + $0x5b8] sm:$0xff] }
 0xb2f   :  { %4762 = vmatprep.subr.bf16.mxu1 %v4534_v44  ;;  %4926 = vmatprep.subr.bf16.mxu0 %v4536_v23  ;;  %v4581_v44 = vld [vmem:[#allocation7 + $0x5a0] sm:$0xff]  ;;  %v4583_v23 = vld [vmem:[#allocation7 + $0x5b0] sm:$0xff] }
 0xb30   :  { %4792 = vmatprep.mubr.bf16.mxu1 %v4398_v28  ;;  %4956 = vmatprep.mubr.bf16.mxu0 %v4398_v28  ;;  %v4586_v28 = vld [vmem:[#allocation7 + $0x5c8] sm:$0xff] }
 0xb32   :  { %4763 = vmatpush1.bf16.msra.mxu1 %v4533_v63  ;;  %4927 = vmatpush1.bf16.msra.mxu0 %v4535_v19  ;;  %v4588_v63 = vld [vmem:[#allocation7 + $0x5d8] sm:$0xff]  ;;  %v4585_v19 = vld [vmem:[#allocation7 + $0x5c0] sm:$0xff] }
 0xb33   :  { %4764 = vmatprep.subr.bf16.mxu1 %v4538_v32  ;;  %4928 = vmatprep.subr.bf16.mxu0 %v4540_v1  ;;  %v4587_v32 = vld [vmem:[#allocation7 + $0x5d0] sm:$0xff]  ;;  %v4590_v1 = vld [vmem:[#allocation7 + $0x5e8] sm:$0xff] }
 0xb36   :  { %4765 = vmatpush1.bf16.msra.mxu1 %v4537_v4  ;;  %4929 = vmatpush1.bf16.msra.mxu0 %v4539_v40  ;;  %v4592_v4 = vld [vmem:[#allocation7 + $0x5f8] sm:$0xff]  ;;  %v4589_v40 = vld [vmem:[#allocation7 + $0x5e0] sm:$0xff] }
 0xb37   :  { %4766 = vmatprep.subr.bf16.mxu1 %v4542_v6  ;;  %4930 = vmatprep.subr.bf16.mxu0 %v4544_v41  ;;  %v4591_v6 = vld [vmem:[#allocation7 + $0x5f0] sm:$0xff]  ;;  %v4594_v41 = vld [vmem:[#allocation7 + $0x608] sm:$0xff] }
 0xb3a   :  { %4767 = vmatpush1.bf16.msra.mxu1 %v4541_v3  ;;  %4931 = vmatpush1.bf16.msra.mxu0 %v4543_v17  ;;  %v4596_v3 = vld [vmem:[#allocation7 + $0x618] sm:$0xff]  ;;  %v4397_v17 = vpack.c.bf16 %v4386_v43, %v4386_v43  ;;  %v4599_v43 = vld [vmem:[#allocation7 + $0x630] sm:$0xff] }
 0xb3b   :  { %4768 = vmatprep.subr.bf16.mxu1 %v4546_v35  ;;  %4932 = vmatprep.subr.bf16.mxu0 %v4548_v9  ;;  %v4593_v35 = vld [vmem:[#allocation7 + $0x600] sm:$0xff]  ;;  %v4595_v9 = vld [vmem:[#allocation7 + $0x610] sm:$0xff] }
 0xb3e   :  { %4769 = vmatpush1.bf16.msra.mxu1 %v4545_v27  ;;  %4933 = vmatpush1.bf16.msra.mxu0 %v4547_v15  ;;  %v4598_v27 = vld [vmem:[#allocation7 + $0x628] sm:$0xff]  ;;  %v4600_v15 = vld [vmem:[#allocation7 + $0x638] sm:$0xff] }
 0xb3f   :  { %4770 = vmatprep.subr.bf16.mxu1 %v4550_v7  ;;  %4934 = vmatprep.subr.bf16.mxu0 %v4552_v0  ;;  %v4400_v7 = vpack.c.bf16 %v4389_v31, %v4389_v31  ;;  %v4602_v0 = vld [vmem:[#allocation7 + $0x648] sm:$0xff]  ;;  %v4608_v31 = vld [vmem:[#allocation7 + $0x678] sm:$0xff] }
 0xb42   :  { %4771 = vmatpush1.bf16.msra.mxu1 %v4549_v12  ;;  %4935 = vmatpush1.bf16.msra.mxu0 %v4551_v50  ;;  %v4604_v12 = vld [vmem:[#allocation7 + $0x658] sm:$0xff]  ;;  %v4601_v50 = vld [vmem:[#allocation7 + $0x640] sm:$0xff] }
 0xb43   :  { %4772 = vmatprep.subr.bf16.mxu1 %v4554_v13  ;;  %4936 = vmatprep.subr.bf16.mxu0 %v4556_v30  ;;  %v4606_v13 = vld [vmem:[#allocation7 + $0x668] sm:$0xff]  ;;  %v4605_v30 = vld [vmem:[#allocation7 + $0x660] sm:$0xff] }
 0xb46   :  { %4773 = vmatpush1.bf16.msra.mxu1 %v4553_v60  ;;  %4937 = vmatpush1.bf16.msra.mxu0 %v4555_v53  ;;  %v4607_v60 = vld [vmem:[#allocation7 + $0x670] sm:$0xff]  ;;  %v4610_v53 = vld [vmem:[#allocation7 + $0x688] sm:$0xff] }
 0xb47   :  { %4774 = vmatprep.subr.bf16.mxu1 %v4558_v18  ;;  %4938 = vmatprep.subr.bf16.mxu0 %v4560_v52  ;;  %v4612_v18 = vld [vmem:[#allocation7 + $0x698] sm:$0xff]  ;;  %v4609_v52 = vld [vmem:[#allocation7 + $0x680] sm:$0xff] }
 0xb4a   :  { %4775 = vmatpush1.bf16.msra.mxu1 %v4557_v42  ;;  %4939 = vmatpush1.bf16.msra.mxu0 %v4559_v55  ;;  %v4611_v42 = vld [vmem:[#allocation7 + $0x690] sm:$0xff]  ;;  %v4614_v55 = vld [vmem:[#allocation7 + $0x6a8] sm:$0xff] }
 0xb4b   :  { %4776 = vmatprep.subr.bf16.mxu1 %v4562_v2  ;;  %4940 = vmatprep.subr.bf16.mxu0 %v4564_v14  ;;  %v4616_v2 = vld [vmem:[#allocation7 + $0x6b8] sm:$0xff]  ;;  %v4613_v14 = vld [vmem:[#allocation7 + $0x6a0] sm:$0xff] }
 0xb4e   :  { %4777 = vmatpush1.bf16.msra.mxu1 %v4561_v49  ;;  %4941 = vmatpush1.bf16.msra.mxu0 %v4563_v34  ;;  %v4615_v49 = vld [vmem:[#allocation7 + $0x6b0] sm:$0xff]  ;;  %v4618_v34 = vld [vmem:[#allocation7 + $0x6c8] sm:$0xff] }
 0xb4f   :  { %4778 = vmatprep.subr.bf16.mxu1 %v4566_v36  ;;  %4942 = vmatprep.subr.bf16.mxu0 %v4568_v20  ;;  %v4620_v36 = vld [vmem:[#allocation7 + $0x6d8] sm:$0xff]  ;;  %v4617_v20 = vld [vmem:[#allocation7 + $0x6c0] sm:$0xff] }
 0xb52   :  { %4779 = vmatpush1.bf16.msra.mxu1 %v4565_v8  ;;  %4943 = vmatpush1.bf16.msra.mxu0 %v4567_v11  ;;  %v4619_v8 = vld [vmem:[#allocation7 + $0x6d0] sm:$0xff]  ;;  %v4622_v11 = vld [vmem:[#allocation7 + $0x6e8] sm:$0xff] }
 0xb53   :  { %4780 = vmatprep.subr.bf16.mxu1 %v4570_v33  ;;  %4944 = vmatprep.subr.bf16.mxu0 %v4572_v57  ;;  %v4624_v33 = vld [vmem:[#allocation7 + $0x6f8] sm:$0xff]  ;;  %v4621_v57 = vld [vmem:[#allocation7 + $0x6e0] sm:$0xff] }
 0xb56   :  { %4781 = vmatpush1.bf16.msra.mxu1 %v4569_v5  ;;  %4945 = vmatpush1.bf16.msra.mxu0 %v4571_v10  ;;  %v4623_v5 = vld [vmem:[#allocation7 + $0x6f0] sm:$0xff]  ;;  %v4626_v10 = vld [vmem:[#allocation7 + $0x708] sm:$0xff] }
 0xb57   :  { %4782 = vmatprep.subr.bf16.mxu1 %v4574_v29  ;;  %4946 = vmatprep.subr.bf16.mxu0 %v4576_v26  ;;  %v4628_v29 = vld [vmem:[#allocation7 + $0x718] sm:$0xff]  ;;  %v4625_v26 = vld [vmem:[#allocation7 + $0x700] sm:$0xff] }
 0xb5a   :  { %4783 = vmatpush1.bf16.msra.mxu1 %v4573_v21  ;;  %4947 = vmatpush1.bf16.msra.mxu0 %v4575_v46  ;;  %v4627_v21 = vld [vmem:[#allocation7 + $0x710] sm:$0xff]  ;;  %v4630_v46 = vld [vmem:[#allocation7 + $0x728] sm:$0xff] }
 0xb5b   :  { %4784 = vmatprep.subr.bf16.mxu1 %v4578_v61  ;;  %4948 = vmatprep.subr.bf16.mxu0 %v4580_v62  ;;  %v4632_v61 = vld [vmem:[#allocation7 + $0x738] sm:$0xff]  ;;  %v4629_v62 = vld [vmem:[#allocation7 + $0x720] sm:$0xff] }
 0xb5e   :  { %4785 = vmatpush1.bf16.msra.mxu1 %v4577_v39  ;;  %4949 = vmatpush1.bf16.msra.mxu0 %v4579_v51  ;;  %v4631_v39 = vld [vmem:[#allocation7 + $0x730] sm:$0xff]  ;;  %v4634_v51 = vld [vmem:[#allocation7 + $0x748] sm:$0xff] }
 0xb5f   :  { %4786 = vmatprep.subr.bf16.mxu1 %v4582_v58  ;;  %4950 = vmatprep.subr.bf16.mxu0 %v4584_v48  ;;  %v4636_v58 = vld [vmem:[#allocation7 + $0x758] sm:$0xff]  ;;  %v4633_v48 = vld [vmem:[#allocation7 + $0x740] sm:$0xff] }
 0xb62   :  { %4787 = vmatpush1.bf16.msra.mxu1 %v4581_v44  ;;  %4951 = vmatpush1.bf16.msra.mxu0 %v4583_v23  ;;  %v4635_v44 = vld [vmem:[#allocation7 + $0x750] sm:$0xff]  ;;  %v4638_v23 = vld [vmem:[#allocation7 + $0x768] sm:$0xff] }
 0xb63   :  { %4788 = vmatprep.subr.bf16.mxu1 %v4586_v28  ;;  %4952 = vmatprep.subr.bf16.mxu0 %v4588_v63  ;;  %v4640_v28 = vld [vmem:[#allocation7 + $0x778] sm:$0xff]  ;;  %v4637_v63 = vld [vmem:[#allocation7 + $0x760] sm:$0xff] }
 0xb66   :  { %4789 = vmatpush1.bf16.msra.mxu1 %v4585_v19  ;;  %4953 = vmatpush1.bf16.msra.mxu0 %v4587_v32  ;;  %v4639_v19 = vld [vmem:[#allocation7 + $0x770] sm:$0xff]  ;;  %v4642_v32 = vld [vmem:[#allocation7 + $0x788] sm:$0xff] }
 0xb67   :  { %4790 = vmatprep.subr.bf16.mxu1 %v4590_v1  ;;  %4954 = vmatprep.subr.bf16.mxu0 %v4592_v4  ;;  %v4644_v1 = vld [vmem:[#allocation7 + $0x798] sm:$0xff]  ;;  %v4641_v4 = vld [vmem:[#allocation7 + $0x780] sm:$0xff] }
 0xb6a   :  { %4791 = vmatpush1.bf16.msra.mxu1 %v4589_v40  ;;  %4955 = vmatpush1.bf16.msra.mxu0 %v4591_v6  ;;  %v4643_v40 = vld [vmem:[#allocation7 + $0x790] sm:$0xff]  ;;  %v4646_v6 = vld [vmem:[#allocation7 + $0x7a8] sm:$0xff] }
 0xb6b   :  { %4801 = vmatprep.subr.bf16.mxu1 %v4594_v41  ;;  %4965 = vmatprep.subr.bf16.mxu0 %v4596_v3  ;;  %v4648_v41 = vld [vmem:[#allocation7 + $0x7b8] sm:$0xff]  ;;  %v4645_v3 = vld [vmem:[#allocation7 + $0x7a0] sm:$0xff] }
 0xb6d   :  { %4793 = vmatmul.mubr.bf16.vlgmr.msra.gmra.mrb[44].mxu1 %v4397_v17  ;;  %4957 = vmatmul.mubr.bf16.vlgmr.msra.gmra.mrb[36].mxu0 %v4397_v17  ;;  %v4647_v17 = vld [vmem:[#allocation7 + $0x7b0] sm:$0xff] }
 0xb6e   :  { %4802 = vmatpush1.bf16.msra.mxu1 %v4593_v35  ;;  %4966 = vmatpush1.bf16.msra.mxu0 %v4595_v9  ;;  %v4650_v35 = vld [vmem:[#allocation7 + $0x7c8] sm:$0xff]  ;;  %v4652_v9 = vld [vmem:[#allocation7 + $0x7d8] sm:$0xff] }
 0xb6f   :  { %4803 = vmatprep.subr.bf16.mxu1 %v4598_v27  ;;  %4967 = vmatprep.subr.bf16.mxu0 %v4600_v15  ;;  %v4649_v27 = vld [vmem:[#allocation7 + $0x7c0] sm:$0xff]  ;;  %v4651_v15 = vld [vmem:[#allocation7 + $0x7d0] sm:$0xff] }
 0xb70   :  { %4833 = vmatprep.mubr.bf16.mxu1 %v4400_v7  ;;  %4997 = vmatprep.mubr.bf16.mxu0 %v4400_v7  ;;  %v4654_v7 = vld [vmem:[#allocation7 + $0x7e8] sm:$0xff] }
 0xb72   :  { %4804 = vmatpush1.bf16.msra.mxu1 %v4597_v45  ;;  %4968 = vmatpush1.bf16.msra.mxu0 %v4599_v43  ;;  %v4656_v45 = vld [vmem:[#allocation7 + $0x7f8] sm:$0xff]  ;;  %v4653_v43 = vld [vmem:[#allocation7 + $0x7e0] sm:$0xff] }
 0xb73   :  { %4805 = vmatprep.subr.bf16.mxu1 %v4602_v0  ;;  %4969 = vmatprep.subr.bf16.mxu0 %v4604_v12  ;;  %v4655_v0 = vld [vmem:[#allocation7 + $0x7f0] sm:$0xff]  ;;  %v4399_v12 = vpack.c.bf16 %v4388_v59, %v4388_v59 }
 0xb76   :  { %4806 = vmatpush1.bf16.msra.mxu1 %v4601_v50  ;;  %4970 = vmatpush1.bf16.msra.mxu0 %v4603_v47  ;;  %v4392_v50 = vld [vmem:[#allocation13 + $0x27] sm:$0xf] }
 0xb77   :  { %4807 = vmatprep.subr.bf16.mxu1 %v4606_v13  ;;  %4971 = vmatprep.subr.bf16.mxu0 %v4608_v31  ;;  %v4661_v47 = vrot.slane %v4392_v50, %v6064_v54  ;;  %v4669_v13 = vrot.slane %v4392_v50, %v6082_v38  ;;  %v4665_v31 = vrot.slane %v4392_v50, %v6066_v56 }
 0xb7a   :  { %4808 = vmatpush1.bf16.msra.mxu1 %v4605_v30  ;;  %4972 = vmatpush1.bf16.msra.mxu0 %v4607_v60  ;;  %v4673_v30 = vrot.slane %v4392_v50, %v6084_v37 }
 0xb7b   :  { %4809 = vmatprep.subr.bf16.mxu1 %v4610_v53  ;;  %4973 = vmatprep.subr.bf16.mxu0 %v4612_v18 }
 0xb7e   :  { %4810 = vmatpush1.bf16.msra.mxu1 %v4609_v52  ;;  %4974 = vmatpush1.bf16.msra.mxu0 %v4611_v42 }
 0xb7f   :  { %4811 = vmatprep.subr.bf16.mxu1 %v4614_v55  ;;  %4975 = vmatprep.subr.bf16.mxu0 %v4616_v2 }
 0xb82   :  { %4812 = vmatpush1.bf16.msra.mxu1 %v4613_v14  ;;  %4976 = vmatpush1.bf16.msra.mxu0 %v4615_v49 }
 0xb83   :  { %4813 = vmatprep.subr.bf16.mxu1 %v4618_v34  ;;  %4977 = vmatprep.subr.bf16.mxu0 %v4620_v36 }
 0xb86   :  { %4814 = vmatpush1.bf16.msra.mxu1 %v4617_v20  ;;  %4978 = vmatpush1.bf16.msra.mxu0 %v4619_v8 }
 0xb87   :  { %4815 = vmatprep.subr.bf16.mxu1 %v4622_v11  ;;  %4979 = vmatprep.subr.bf16.mxu0 %v4624_v33 }
 0xb8a   :  { %4816 = vmatpush1.bf16.msra.mxu1 %v4621_v57  ;;  %4980 = vmatpush1.bf16.msra.mxu0 %v4623_v5 }
 0xb8b   :  { %4817 = vmatprep.subr.bf16.mxu1 %v4626_v10  ;;  %4981 = vmatprep.subr.bf16.mxu0 %v4628_v29 }
 0xb8e   :  { %4818 = vmatpush1.bf16.msra.mxu1 %v4625_v26  ;;  %4982 = vmatpush1.bf16.msra.mxu0 %v4627_v21 }
 0xb8f   :  { %4819 = vmatprep.subr.bf16.mxu1 %v4630_v46  ;;  %4983 = vmatprep.subr.bf16.mxu0 %v4632_v61 }
 0xb92   :  { %4820 = vmatpush1.bf16.msra.mxu1 %v4629_v62  ;;  %4984 = vmatpush1.bf16.msra.mxu0 %v4631_v39 }
 0xb93   :  { %4821 = vmatprep.subr.bf16.mxu1 %v4634_v51  ;;  %4985 = vmatprep.subr.bf16.mxu0 %v4636_v58 }
 0xb96   :  { %4822 = vmatpush1.bf16.msra.mxu1 %v4633_v48  ;;  %4986 = vmatpush1.bf16.msra.mxu0 %v4635_v44 }
 0xb97   :  { %4823 = vmatprep.subr.bf16.mxu1 %v4638_v23  ;;  %4987 = vmatprep.subr.bf16.mxu0 %v4640_v28 }
 0xb9a   :  { %4824 = vmatpush1.bf16.msra.mxu1 %v4637_v63  ;;  %4988 = vmatpush1.bf16.msra.mxu0 %v4639_v19 }
 0xb9b   :  { %4825 = vmatprep.subr.bf16.mxu1 %v4642_v32  ;;  %4989 = vmatprep.subr.bf16.mxu0 %v4644_v1 }
 0xb9e   :  { %4826 = vmatpush1.bf16.msra.mxu1 %v4641_v4  ;;  %4990 = vmatpush1.bf16.msra.mxu0 %v4643_v40 }
 0xb9f   :  { %4827 = vmatprep.subr.bf16.mxu1 %v4646_v6  ;;  %4991 = vmatprep.subr.bf16.mxu0 %v4648_v41 }
 0xba2   :  { %4828 = vmatpush1.bf16.msra.mxu1 %v4645_v3  ;;  %4992 = vmatpush1.bf16.msra.mxu0 %v4647_v17 }
 0xba3   :  { %4829 = vmatprep.subr.bf16.mxu1 %v4650_v35  ;;  %4993 = vmatprep.subr.bf16.mxu0 %v4652_v9 }
 0xba6   :  { %4830 = vmatpush1.bf16.msra.mxu1 %v4649_v27  ;;  %4994 = vmatpush1.bf16.msra.mxu0 %v4651_v15 }
 0xba7   :  { %4831 = vmatprep.subr.bf16.mxu1 %v4654_v7  ;;  %4995 = vmatprep.subr.bf16.mxu0 %v4656_v45 }
 0xbaa   :  { %4832 = vmatpush1.bf16.msra.mxu1 %v4653_v43  ;;  %4996 = vmatpush1.bf16.msra.mxu0 %v4655_v0 }
 0xbab   :  { %5274 = vmatprep.subr.bf16.mxu1 %v5909_v24 }
 0xbad   :  { %4834 = vmatmul.mubr.bf16.vlgmr.msra.gmra.mrb[44].mxu1 %v4399_v12  ;;  %4998 = vmatmul.mubr.bf16.vlgmr.msra.gmra.mrb[36].mxu0 %v4399_v12 }
 0xc80   :  { %v4835_v60 = vpop.f32.mrb[44].mxu1  ;;  %v4999_v53 = vpop.f32.mrb[36].mxu0 }
 0xc81   :  { %v5332_v18 = vadd.f32 %v4835_v60, %v4661_v47  ;;  %v5334_v52 = vadd.f32 %v4999_v53, %v4669_v13  ;;  %v4837_v22 = vpop.f32.mrb[45].mxu1  ;;  %v5001_v42 = vpop.f32.mrb[37].mxu0 }
 0xc82   :  { %v5333_v59 = vadd.f32 %v4837_v22, %v4665_v31  ;;  %v5335_v55 = vadd.f32 %v5001_v42, %v4673_v30  ;;  %v4839_v2 = vpop.f32.mrb[46].mxu1  ;;  %v5003_v14 = vpop.f32.mrb[38].mxu0 }
 0xc83   :  { %v5006_v49 = vmax.f32 %v5332_v18, 0.0  ;;  %v5008_v34 = vmax.f32 %v5334_v52, 0.0  ;;  %v4840_v36 = vpop.f32.mrb[47].mxu1  ;;  %v5004_v54 = vpop.f32.mrb[39].mxu0 }
 0xc84   :  { %v5007_v20 = vmax.f32 %v5333_v59, 0.0  ;;  %v5009_v38 = vmax.f32 %v5335_v55, 0.0 }
 0xc86   :  { %v5015_v56 = vpack.c.bf16 %v5007_v20, %v5007_v20 }
 0xc87   :  { %5613 = dma.done.wait [#allocation9 + $0x6], 4096 }
 0xc88   :  { %5614 = vsyncadd [#allocation9 + $0x6], 4294963200  ;;  %5275 = vmatpush3.bf16.msra.mxu1 %v5869_v16  ;;  %5088 = vmatprep.mubr.bf16.mxu1 %v5015_v56  ;;  %v6567_v37 = vld [vmem:[#allocation38_spill] sm:$0xff]  ;;  %v6568_v8 = vld [vmem:[#allocation45_spill] sm:$0xff]  ;;  %v5014_v21 = vpack.c.bf16 %v5006_v49, %v5006_v49  ;;  %v5017_v61 = vpack.c.bf16 %v5009_v38, %v5009_v38  ;;  %v5016_v41 = vpack.c.bf16 %v5008_v34, %v5008_v34  ;;  %s5646_s8 = smov [#allocation15]  }
 0xc89   :  { %5276 = vmatprep.subr.bf16.mxu1 %v5914_v25  ;;  %v6569_v11 = vld [vmem:[#allocation39_spill] sm:$0xff]  ;;  %v6570_v33 = vld [vmem:[#allocation46_spill] sm:$0xff]  ;;  %v6571_v57 = vld [vmem:[#allocation40_spill] sm:$0xff]  ;;  %s5143_s7 = sshll.u32 %s5646_s8, 4  ;;  %s5144_s7 = int_to_ptr.vmem [resolvable:$true] %s5143_s7 }
 0xc8a   :  { %v6572_v5 = vld [vmem:[#allocation47_spill] sm:$0xff]  ;;  %v6573_v24 = vld [vmem:[#allocation41_spill] sm:$0xff]  ;;  %v6574_v10 = vld [vmem:[#allocation48_spill] sm:$0xff]  ;;  %s5575_s16 = scalar_lea.vmem %s5144_s7, 32  ;;  %p5580_p3 = scmp.lt.s32.totalorder %s5144_s7, %s5144_s7 }
 0xc8b   :  { %v6575_v16 = vld [vmem:[#allocation42_spill] sm:$0xff]  ;;  %v6576_v25 = vld [vmem:[#allocation49_spill] sm:$0xff]  ;;  %v6577_v29 = vld [vmem:[#allocation43_spill] sm:$0xff]  ;;  %p5576_p2 = scmp.ne.s32.totalorder %s5144_s7, %s5575_s16  ;;  %p5581_p4 = scmp.lt.s32.totalorder %s5575_s16, %s5575_s16 }
 0xc8c   :  { %5277 = vmatpush3.bf16.msra.mxu1 %v6567_v37  ;;  %v6578_v26 = vld [vmem:[#allocation50_spill] sm:$0xff]  ;;  %v6579_v46 = vld [vmem:[#allocation44_spill] sm:$0xff]  ;;  %v6580_v62 = vld [vmem:[#allocation59_spill] sm:$0xff] }
 0xc8d   :  { %5278 = vmatprep.subr.bf16.mxu1 %v6568_v8  ;;  %v6581_v39 = vld [vmem:[#allocation51_spill] sm:$0xff]  ;;  %v6582_v51 = vld [vmem:[#allocation60_spill] sm:$0xff]  ;;  %v6584_v48 = vld [vmem:[#allocation61_spill] sm:$0xff]  ;;  %p5582_p5 = por %p5581_p4, %p5580_p3 }
 0xc8e   :  { %v6583_v58 = vld [vmem:[#allocation52_spill] sm:$0xff]  ;;  %v6585_v44 = vld [vmem:[#allocation53_spill] sm:$0xff]  ;;  %v6586_v23 = vld [vmem:[#allocation62_spill] sm:$0xff] }
 0xc8f   :  { %v6587_v28 = vld [vmem:[#allocation54_spill] sm:$0xff]  ;;  %v6588_v63 = vld [vmem:[#allocation63_spill] sm:$0xff]  ;;  %v6590_v32 = vld [vmem:[#allocation64_spill] sm:$0xff]  ;;  %p5583_p6 = pnand %p5582_p5, %p5576_p2 }
 0xc90   :  { %5279 = vmatpush3.bf16.msra.mxu1 %v6569_v11  ;;  %v6589_v19 = vld [vmem:[#allocation55_spill] sm:$0xff]  ;;  %v6591_v1 = vld [vmem:[#allocation56_spill] sm:$0xff]  ;;  %v6592_v4 = vld [vmem:[#allocation65_spill] sm:$0xff] }
 0xc91   :  { %5280 = vmatprep.subr.bf16.mxu1 %v6570_v33  ;;  %v6593_v40 = vld [vmem:[#allocation57_spill] sm:$0xff]  ;;  %v6594_v6 = vld [vmem:[#allocation66_spill] sm:$0xff] }
 0xc92   :  { %v6595_v3 = vld [vmem:[#allocation58_spill] sm:$0xff] }
 0xc94   :  { %5281 = vmatpush3.bf16.msra.mxu1 %v6571_v57 }
 0xc95   :  { %5282 = vmatprep.subr.bf16.mxu1 %v6572_v5 }
 0xc98   :  { %5283 = vmatpush3.bf16.msra.mxu1 %v6573_v24 }
 0xc99   :  { %5284 = vmatprep.subr.bf16.mxu1 %v6574_v10 }
 0xc9c   :  { %5285 = vmatpush3.bf16.msra.mxu1 %v6575_v16 }
 0xc9d   :  { %5286 = vmatprep.subr.bf16.mxu1 %v6576_v25 }
 0xca0   :  { %5287 = vmatpush3.bf16.msra.mxu1 %v6577_v29 }
 0xca1   :  { %5288 = vmatprep.subr.bf16.mxu1 %v6578_v26 }
 0xca4   :  { %5289 = vmatpush3.bf16.msra.mxu1 %v6579_v46 }
 0xca5   :  { %5296 = vmatprep.subr.bf16.mxu1 %v6580_v62 }
 0xca7   :  { %5089 = vmatmul.mubr.bf16.vlgmr.msra.gmra.mrb[48].mxu1 %v5014_v21 }
 0xca8   :  { %5297 = vmatpush3.bf16.msra.mxu1 %v6581_v39  ;;  %5128 = vmatprep.mubr.bf16.mxu1 %v5017_v61 }
 0xca9   :  { %5298 = vmatprep.subr.bf16.mxu1 %v6582_v51 }
 0xcac   :  { %5299 = vmatpush3.bf16.msra.mxu1 %v6583_v58 }
 0xcad   :  { %5300 = vmatprep.subr.bf16.mxu1 %v6584_v48 }
 0xcb0   :  { %5301 = vmatpush3.bf16.msra.mxu1 %v6585_v44 }
 0xcb1   :  { %5302 = vmatprep.subr.bf16.mxu1 %v6586_v23 }
 0xcb4   :  { %5303 = vmatpush3.bf16.msra.mxu1 %v6587_v28 }
 0xcb5   :  { %5304 = vmatprep.subr.bf16.mxu1 %v6588_v63 }
 0xcb8   :  { %5305 = vmatpush3.bf16.msra.mxu1 %v6589_v19 }
 0xcb9   :  { %5306 = vmatprep.subr.bf16.mxu1 %v6590_v32 }
 0xcbc   :  { %5307 = vmatpush3.bf16.msra.mxu1 %v6591_v1 }
 0xcbd   :  { %5308 = vmatprep.subr.bf16.mxu1 %v6592_v4 }
 0xcc0   :  { %5309 = vmatpush3.bf16.msra.mxu1 %v6593_v40 }
 0xcc1   :  { %5310 = vmatprep.subr.bf16.mxu1 %v6594_v6 }
 0xcc4   :  { %5311 = vmatpush3.bf16.msra.mxu1 %v6595_v3 }
 0xcc7   :  { %5129 = vmatmul.mubr.bf16.vlgmr.msra.gmra.mrb[52].mxu1 %v5016_v41 }
 0xcc8   :  { %5586 = shalt.err (!%p5583_p6)
}
 0xcc9   :  { %s5587_s18 = scalar_lea.hbm %s6512_s9, 32 }
 0xcca   :  { %p5588_p7 = scmp.ne.s32.totalorder %s6512_s9, %s5587_s18  ;;  %p5591_p8 = scmp.lt.u32.totalorder %s5587_s18, %s6512_s9 }
 0xccc   :  { %p5593_p9 = pnand %p5591_p8, %p5588_p7 }
 0xcce   :  { %5596 = shalt.err (!%p5593_p9)
}
 0xccf   :  { %5146 = dma.vmem_to_hbm [thread:$0]  %s5144_s7, 32, %s6512_s9, [#allocation12]   ;;  %v5244_v7 = vld [vmem:[#allocation13 + $0x2b] ss:$0 sm:$0xff] }
 0xd7a   :  { %v5290_v17 = vpop.f32.mrb[48].mxu1 }
 0xd7b   :  { %v5291_v35 = vpop.f32.mrb[49].mxu1 }
 0xd7c   :  { %v5292_v9 = vadd.f32 %v5291_v35, %v5290_v17  ;;  %v5293_v27 = vpop.f32.mrb[50].mxu1 }
 0xd7d   :  { %v5294_v15 = vpop.f32.mrb[51].mxu1 }
 0xd7e   :  { %v5091_v0 = vadd.f32 %v5292_v9, %v5244_v7 }
 0xd9a   :  { %v5312_v45 = vpop.f32.mrb[52].mxu1 }
 0xd9b   :  { %v5313_v43 = vpop.f32.mrb[53].mxu1 }
 0xd9c   :  { %v5314_v12 = vadd.f32 %v5313_v43, %v5312_v45  ;;  %v5315_v50 = vpop.f32.mrb[54].mxu1 }
 0xd9d   :  { %v5316_v47 = vpop.f32.mrb[55].mxu1 }
 0xd9e   :  { %v5131_v13 = vadd.f32 %v5314_v12, %v5091_v0 }
 0xda0   :  { %5136 = vst.msk [vmem:[%s6513_s10] sm:$0x3] %vm1982_vm1, %v5131_v13 }
 0xda1   :  { %5615 = dma.done.wait [#allocation12], 32  }
 0xda2   :  { %5616 = vsyncadd [#allocation12], 4294967264 }
 0xda3   :  { %5154 = vsyncpa [#allocation11], 1 }
 0xda4   :  { %5155 = vsyncpa [#allocation14], 1 }
 0xda5   :  { %5156 = vsyncpa [#allocation12], 1 }
 0xda6   :  { %5157 = vsyncmov [#allocation9] }
 0xda9   :  { %s5158_s9 = vpop.sfrf %5157 }
 0xdaa   :  { %p5245_p10 = scmp.ne.s32.totalorder %s5158_s9, 0 }
 0xdac   :  { %5162 = shalt.err (%p5245_p10)  }
 0xdad   :  { %5164 = vsyncmov [#allocation9 + $0x1] }
 0xdb0   :  { %s5165_s28 = vpop.sfrf %5164 }
 0xdb1   :  { %p5246_p11 = scmp.ne.s32.totalorder %s5165_s28, 0 }
 0xdb3   :  { %5169 = shalt.err (%p5246_p11)  }
 0xdb4   :  { %5171 = vsyncmov [#allocation9 + $0x2] }
 0xdb7   :  { %s5172_s29 = vpop.sfrf %5171 }
 0xdb8   :  { %p5247_p12 = scmp.ne.s32.totalorder %s5172_s29, 0 }
 0xdba   :  { %5176 = shalt.err (%p5247_p12)  }
 0xdbb   :  { %5178 = vsyncmov [#allocation9 + $0x3] }
 0xdbe   :  { %s5179_s30 = vpop.sfrf %5178 }
 0xdbf   :  { %p5248_p13 = scmp.ne.s32.totalorder %s5179_s30, 0 }
 0xdc1   :  { %5183 = shalt.err (%p5248_p13)  }
 0xdc2   :  { %5185 = vsyncmov [#allocation9 + $0x4] }
 0xdc5   :  { %s5186_s10 = vpop.sfrf %5185 }
 0xdc6   :  { %p5249_p0 = scmp.ne.s32.totalorder %s5186_s10, 0 }
 0xdc8   :  { %5190 = shalt.err (%p5249_p0)  }
 0xdc9   :  { %5192 = vsyncmov [#allocation9 + $0x5] }
 0xdcc   :  { %s5193_s6 = vpop.sfrf %5192 }
 0xdcd   :  { %p5250_p1 = scmp.ne.s32.totalorder %s5193_s6, 0 }
 0xdcf   :  { %5197 = shalt.err (%p5250_p1)  }
 0xdd0   :  { %5199 = vsyncmov [#allocation9 + $0x6] }
 0xdd3   :  { %s5200_s12 = vpop.sfrf %5199 }
 0xdd4   :  { %p5251_p2 = scmp.ne.s32.totalorder %s5200_s12, 0 }
 0xdd6   :  { %5204 = shalt.err (%p5251_p2)  }

</bundles_post_ra>
